<compile_context>
chip_gen: v7x
topology: tpu7x:2x2x1
jax: 0.10.0
libtpu: 0.0.40
codegen_flags: <defaults>
</compile_context>

<pallas_src>
import functools

import jax
import jax.numpy as jnp
from jax import lax
from jax.experimental import pallas as pl
from jax.experimental.pallas import tpu as pltpu

_SLOPE = 0.2  # LeakyReLU negative slope used by TT-GAN's Conv2dLayer


def _lrelu(x):
    return jnp.where(x > 0.0, x, _SLOPE * x)


# ---------------------------------------------------------------------------
# Model configuration / synthetic parameters
# ---------------------------------------------------------------------------
def layer_configs(in_channel=4, latent_channel=16):
    # (cin, cout, kernel, stride, padding) — mirrors PatchDiscriminator2.__init__
    lc = latent_channel
    return (
        (in_channel, lc, 7, 1, 3),
        (lc, lc * 2, 4, 2, 1),
        (lc * 2, lc * 4, 4, 2, 1),
        (lc * 4, lc * 4, 4, 2, 1),
        (lc * 4, lc * 4, 4, 2, 1),
        (lc * 4, lc * 4, 4, 2, 1),
    )


def init_params(key, configs):
    """Synthetic PyTorch-layout weights, pre-packed once for the kernel.

    Per layer: w_packed (kh, kw*cin, cout) bf16 — feature order (kw major,
    cin minor) matching the in-kernel kw-folded patch buffers — and a bias
    (1, cout) f32.
    """
    params = []
    for cin, cout, k, _, _ in configs:
        key, wk, bk = jax.random.split(key, 3)
        w = jax.random.normal(wk, (cout, cin, k, k), jnp.float32) * 0.05
        b = jax.random.normal(bk, (cout,), jnp.float32) * 0.01
        wp = jnp.transpose(w, (2, 3, 1, 0)).reshape(k, k * cin, cout)
        params.append((wp.astype(jnp.bfloat16), b.reshape(1, cout)))
    return params


def _build_dims(configs, H, W):
    cin1, cout1, k1, s1, p1 = configs[0]
    assert s1 == 1 and p1 == (k1 - 1) // 2, "block1 must be stride-1 'same' pad"
    dims1 = dict(k=k1, cin=cin1, cout=cout1, Ho=H, Wo=W)
    dims_tail = []
    h, w, c = H, W, cout1
    for cin, cout, k, s, p in configs[1:]:
        assert (k, s, p) == (4, 2, 1) and cin == c
        assert h % 2 == 0 and w % 2 == 0 and w >= 4
        dims_tail.append(dict(cin=cin, cout=cout, Hin=h, Win=w,
                              Hp=h + 2, W1=w - 1, Ho=h // 2, Wo=w // 2))
        h, w, c = h // 2, w // 2, cout
    return dims1, dims_tail


# ---------------------------------------------------------------------------
# Fused whole-network Pallas kernel
# ---------------------------------------------------------------------------
def _make_kernel(dims1, dims_tail, r1):
    k1, cin1, cout1 = dims1["k"], dims1["cin"], dims1["cout"]
    Ho1, Wo1 = dims1["Ho"], dims1["Wo"]
    n_tail = len(dims_tail)
    n_layers = 1 + n_tail

    def _store_row_into_fold(f_ref, row, y, w_prev, c_prev):
        # Write one produced activation row (w_prev, c_prev), kw-folded for a
        # following k=4 / pad=1 conv, into the next layer's VMEM patch buffer:
        #   fold[row, w1, dj*C + c] = zero_pad_cols(y)[w1 + dj, c]
        # All slice bounds are static; `row` may be a traced index.
        w1 = w_prev - 1
        zcol = jnp.zeros((1, c_prev), y.dtype)
        for dj in range(4):
            lo = max(0, 1 - dj)
            hi = min(w1, w_prev + 1 - dj)
            band = slice(dj * c_prev, (dj + 1) * c_prev)
            f_ref[row, lo:hi, band] = y[lo + dj - 1:hi + dj - 1, :]
            if lo > 0:                       # left zero-pad column (dj == 0)
                f_ref[row, 0:lo, band] = zcol
            if hi < w1:                      # right zero-pad column (dj == 3)
                f_ref[row, hi:w1, band] = zcol

    def kernel(x_ref, *args):
        wb = args[:2 * n_layers]
        o_ref = args[2 * n_layers]
        folds = args[2 * n_layers + 1:]
        w_refs = wb[0::2]
        b_refs = wb[1::2]

        # Zero the top / bottom padding rows of every patch buffer (left/right
        # padding columns are refreshed by every row store above).
        for f_ref, d in zip(folds, dims_tail):
            zrow = jnp.zeros((d["W1"], 4 * d["cin"]), jnp.bfloat16)
            f_ref[0] = zrow
            f_ref[d["Hp"] - 1] = zrow

        # ---- layer 1: 7x7 stride-1 conv from the kw-folded input ----------
        # x_ref: (1, (Ho1 + k1 - 1) * Wo1, k1*cin1).  Row tap `di` is a
        # contiguous slice of Wo1-wide row groups, so each tap is one MXU dot.
        w1_ref, b1_ref = w_refs[0], b_refs[0]
        f2_ref = folds[0]

        def l1_block(blk, carry):
            r0 = blk * r1
            acc = None
            for di in range(k1):
                start = pl.multiple_of((r0 + di) * Wo1, Wo1)
                xv = x_ref[0, pl.ds(start, r1 * Wo1), :]
                part = jnp.dot(xv, w1_ref[di],
                               preferred_element_type=jnp.float32)
                acc = part if acc is None else acc + part
            y = _lrelu(acc + b1_ref[...]).astype(jnp.bfloat16)
            for j in range(r1):
                _store_row_into_fold(f2_ref, r0 + j + 1,
                                     y[j * Wo1:(j + 1) * Wo1, :], Wo1, cout1)
            return carry

        lax.fori_loop(0, Ho1 // r1, l1_block, 0)

        # ---- layers 2..6: 4x4 stride-2 convs, fully VMEM-resident ---------
        for li, d in enumerate(dims_tail):
            w_ref, b_ref = w_refs[li + 1], b_refs[li + 1]
            f_in = folds[li]
            is_last = (li + 1 == n_tail)
            f_out = None if is_last else folds[li + 1]
            Wo, W1, cout = d["Wo"], d["W1"], d["cout"]

            # Constant 0/1 matrix selecting even patch columns (the stride-2
            # column decimation) -- a tiny MXU dot instead of strided loads.
            wo_i = lax.broadcasted_iota(jnp.int32, (Wo, W1), 0)
            w1_i = lax.broadcasted_iota(jnp.int32, (Wo, W1), 1)
            dmat = (w1_i == 2 * wo_i).astype(jnp.float32)

            def row_body(ho, carry, *, w_ref=w_ref, b_ref=b_ref, f_in=f_in,
                         f_out=f_out, dmat=dmat, Wo=Wo, W1=W1, cout=cout,
                         is_last=is_last):
                z = None
                for di in range(4):
                    frow = f_in[2 * ho + di]               # (W1, 4*cin) bf16
                    part = jnp.dot(frow, w_ref[di],
                                   preferred_element_type=jnp.float32)
                    z = part if z is None else z + part    # (W1, cout) f32
                zd = jnp.dot(dmat, z, preferred_element_type=jnp.float32)
                y = _lrelu(zd + b_ref[...])                # (Wo, cout) f32
                if is_last:
                    o_ref[0, ho * Wo:(ho + 1) * Wo, :] = y
                else:
                    _store_row_into_fold(f_out, ho + 1,
                                         y.astype(jnp.bfloat16), Wo, cout)
                return carry

            if is_last:
                for ho in range(d["Ho"]):                  # tiny; keep static
                    row_body(ho, 0)
            else:
                lax.fori_loop(0, d["Ho"], row_body, 0)

    return kernel


# ---------------------------------------------------------------------------
# Forward pass
# ---------------------------------------------------------------------------
@functools.partial(jax.jit, static_argnums=(3,))
def patch_discriminator2_forward(params, img, large_mask, configs):
    # img: (N, 3, H, W), large_mask: (N, 1, H, W) — PyTorch NCHW convention.
    N, _, H, W = img.shape
    assert H % 32 == 0 and W % 32 == 0 and min(H, W) >= 64
    dims1, dims_tail = _build_dims(configs, H, W)
    k1, cin1 = dims1["k"], dims1["cin"]
    p1 = (k1 - 1) // 2
    r1 = 4 if dims1["Ho"] % 4 == 0 else 1

    # x_masked = img * large_mask ; x = cat((x_masked, large_mask), dim=1)
    x = jnp.concatenate([img * large_mask, large_mask], axis=1)   # (N, 4, H, W)
    x = jnp.transpose(x, (0, 2, 3, 1))                            # NHWC
    xp = jnp.pad(x, ((0, 0), (p1, p1), (p1, p1), (0, 0)))
    # kw-fold for layer 1: (N, H + 2p, W, k1*cin1) — the only im2col-ish HBM
    # tensor left (~7x the raw input vs 49x for the old full im2col).
    xw = jnp.concatenate([xp[:, :, dj:dj + W, :] for dj in range(k1)], axis=-1)
    xw = xw.reshape(N, (H + 2 * p1) * W, k1 * cin1).astype(jnp.bfloat16)

    d_last = dims_tail[-1]
    out_rows = d_last["Ho"] * d_last["Wo"]
    c_last = d_last["cout"]

    in_specs = [pl.BlockSpec((1, (H + 2 * p1) * W, k1 * cin1),
                             lambda n: (n, 0, 0))]
    operands = [xw]
    for wp, b in params:
        in_specs.append(pl.BlockSpec(wp.shape, lambda n: (0, 0, 0)))
        in_specs.append(pl.BlockSpec(b.shape, lambda n: (0, 0)))
        operands.append(wp)
        operands.append(b)

    out = pl.pallas_call(
        _make_kernel(dims1, dims_tail, r1),
        out_shape=jax.ShapeDtypeStruct((N, out_rows, c_last), jnp.float32),
        grid_spec=pltpu.PrefetchScalarGridSpec(
            num_scalar_prefetch=0,
            grid=(N,),
            in_specs=in_specs,
            out_specs=pl.BlockSpec((1, out_rows, c_last), lambda n: (n, 0, 0)),
            scratch_shapes=[
                pltpu.VMEM((d["Hp"], d["W1"], 4 * d["cin"]), jnp.bfloat16)
                for d in dims_tail
            ],
        ),
        compiler_params=pltpu.CompilerParams(
            dimension_semantics=("parallel",),
        ),
    )(*operands)

    # Kernel emits (n, h*Wo + w, c); nn.Flatten() on NCHW wants (c, h, w) order.
    out = jnp.transpose(out, (0, 2, 1)).reshape(N, -1)
    return out


if __name__ == "__main__":
    key = jax.random.PRNGKey(0)
    k_img, k_mask, k_param = jax.random.split(key, 3)

    N, H, W = 2, 64, 64          # 5 stride-2 convs -> 2x2 spatial output
    latent_channel = 16
    img = jax.random.normal(k_img, (N, 3, H, W), jnp.float32)
    large_mask = (jax.random.uniform(k_mask, (N, 1, H, W)) > 0.5).astype(
        jnp.float32)

    configs = layer_configs(in_channel=4, latent_channel=latent_channel)
    params = init_params(k_param, configs)

    out = patch_discriminator2_forward(params, img, large_mask, configs)
    jax.block_until_ready(out)

    expected = latent_channel * 4 * (H // 32) * (W // 32)
    assert out.shape == (N, expected), out.shape
    assert bool(jnp.all(jnp.isfinite(out)))
    print("KERNEL_OK")
</pallas_src>

<mosaic_0001>
module attributes {stable_mosaic.version = 11 : i64} {
  func.func @kernel(%arg0: i32, %arg1: memref<1x4480x28xbf16, #tpu.memory_space<vmem>>, %arg2: memref<7x28x16xbf16, #tpu.memory_space<vmem>>, %arg3: memref<1x16xf32, #tpu.memory_space<vmem>>, %arg4: memref<4x64x32xbf16, #tpu.memory_space<vmem>>, %arg5: memref<1x32xf32, #tpu.memory_space<vmem>>, %arg6: memref<4x128x64xbf16, #tpu.memory_space<vmem>>, %arg7: memref<1x64xf32, #tpu.memory_space<vmem>>, %arg8: memref<4x256x64xbf16, #tpu.memory_space<vmem>>, %arg9: memref<1x64xf32, #tpu.memory_space<vmem>>, %arg10: memref<4x256x64xbf16, #tpu.memory_space<vmem>>, %arg11: memref<1x64xf32, #tpu.memory_space<vmem>>, %arg12: memref<4x256x64xbf16, #tpu.memory_space<vmem>>, %arg13: memref<1x64xf32, #tpu.memory_space<vmem>>, %arg14: memref<1x4x64xf32, #tpu.memory_space<vmem>>, %arg15: memref<66x63x64xbf16, #tpu.memory_space<vmem>>, %arg16: memref<34x31x128xbf16, #tpu.memory_space<vmem>>, %arg17: memref<18x15x256xbf16, #tpu.memory_space<vmem>>, %arg18: memref<10x7x256xbf16, #tpu.memory_space<vmem>>, %arg19: memref<6x3x256xbf16, #tpu.memory_space<vmem>>) attributes {dimension_semantics = [#tpu.dimension_semantics<parallel>], iteration_bounds = array<i64: 2>, scalar_prefetch = 0 : i64, scratch_operands = 5 : i64, tpu.core_type = #tpu.core_type<tc>, window_params = [{transform_indices = @transform_0, window_bounds = array<i64: 1, 4480, 28>}, {pipeline_mode = #tpu.pipeline_mode<synchronous>, transform_indices = @transform_1, window_bounds = array<i64: 7, 28, 16>}, {pipeline_mode = #tpu.pipeline_mode<synchronous>, transform_indices = @transform_2, window_bounds = array<i64: 1, 16>}, {pipeline_mode = #tpu.pipeline_mode<synchronous>, transform_indices = @transform_3, window_bounds = array<i64: 4, 64, 32>}, {pipeline_mode = #tpu.pipeline_mode<synchronous>, transform_indices = @transform_4, window_bounds = array<i64: 1, 32>}, {pipeline_mode = #tpu.pipeline_mode<synchronous>, transform_indices = @transform_5, window_bounds = array<i64: 4, 128, 64>}, {pipeline_mode = #tpu.pipeline_mode<synchronous>, transform_indices = @transform_6, window_bounds = array<i64: 1, 64>}, {pipeline_mode = #tpu.pipeline_mode<synchronous>, transform_indices = @transform_7, window_bounds = array<i64: 4, 256, 64>}, {pipeline_mode = #tpu.pipeline_mode<synchronous>, transform_indices = @transform_8, window_bounds = array<i64: 1, 64>}, {pipeline_mode = #tpu.pipeline_mode<synchronous>, transform_indices = @transform_9, window_bounds = array<i64: 4, 256, 64>}, {pipeline_mode = #tpu.pipeline_mode<synchronous>, transform_indices = @transform_10, window_bounds = array<i64: 1, 64>}, {pipeline_mode = #tpu.pipeline_mode<synchronous>, transform_indices = @transform_11, window_bounds = array<i64: 4, 256, 64>}, {pipeline_mode = #tpu.pipeline_mode<synchronous>, transform_indices = @transform_12, window_bounds = array<i64: 1, 64>}, {transform_indices = @transform_13, window_bounds = array<i64: 1, 4, 64>}]} {
    %cst = arith.constant 0.000000e+00 : bf16
    %0 = vector.broadcast %cst : bf16 to vector<63x64xbf16>
    %c0 = arith.constant 0 : index
    %c0_0 = arith.constant 0 : index
    %c0_1 = arith.constant 0 : index
    %1 = vector.load %arg15[%c0, %c0_0, %c0_1] : memref<66x63x64xbf16, #tpu.memory_space<vmem>>, vector<1x63x64xbf16>
    %2 = vector.shape_cast %1 : vector<1x63x64xbf16> to vector<63x64xbf16>
    %3 = vector.shape_cast %0 : vector<63x64xbf16> to vector<1x63x64xbf16>
    tpu.vector_store %arg15[%c0, %c0_0, %c0_1], %3 {strides = array<i32>} : memref<66x63x64xbf16, #tpu.memory_space<vmem>>, vector<1x63x64xbf16>,
    %c65 = arith.constant 65 : index
    %c0_2 = arith.constant 0 : index
    %c0_3 = arith.constant 0 : index
    %4 = vector.load %arg15[%c65, %c0_2, %c0_3] : memref<66x63x64xbf16, #tpu.memory_space<vmem>>, vector<1x63x64xbf16>
    %5 = vector.shape_cast %4 : vector<1x63x64xbf16> to vector<63x64xbf16>
    %6 = vector.shape_cast %0 : vector<63x64xbf16> to vector<1x63x64xbf16>
    tpu.vector_store %arg15[%c65, %c0_2, %c0_3], %6 {strides = array<i32>} : memref<66x63x64xbf16, #tpu.memory_space<vmem>>, vector<1x63x64xbf16>,
    %cst_4 = arith.constant 0.000000e+00 : bf16
    %7 = vector.broadcast %cst_4 : bf16 to vector<31x128xbf16>
    %c0_5 = arith.constant 0 : index
    %c0_6 = arith.constant 0 : index
    %c0_7 = arith.constant 0 : index
    %8 = vector.load %arg16[%c0_5, %c0_6, %c0_7] : memref<34x31x128xbf16, #tpu.memory_space<vmem>>, vector<1x31x128xbf16>
    %9 = vector.shape_cast %8 : vector<1x31x128xbf16> to vector<31x128xbf16>
    %10 = vector.shape_cast %7 : vector<31x128xbf16> to vector<1x31x128xbf16>
    tpu.vector_store %arg16[%c0_5, %c0_6, %c0_7], %10 {strides = array<i32>} : memref<34x31x128xbf16, #tpu.memory_space<vmem>>, vector<1x31x128xbf16>,
    %c33 = arith.constant 33 : index
    %c0_8 = arith.constant 0 : index
    %c0_9 = arith.constant 0 : index
    %11 = vector.load %arg16[%c33, %c0_8, %c0_9] : memref<34x31x128xbf16, #tpu.memory_space<vmem>>, vector<1x31x128xbf16>
    %12 = vector.shape_cast %11 : vector<1x31x128xbf16> to vector<31x128xbf16>
    %13 = vector.shape_cast %7 : vector<31x128xbf16> to vector<1x31x128xbf16>
    tpu.vector_store %arg16[%c33, %c0_8, %c0_9], %13 {strides = array<i32>} : memref<34x31x128xbf16, #tpu.memory_space<vmem>>, vector<1x31x128xbf16>,
    %cst_10 = arith.constant 0.000000e+00 : bf16
    %14 = vector.broadcast %cst_10 : bf16 to vector<15x256xbf16>
    %c0_11 = arith.constant 0 : index
    %c0_12 = arith.constant 0 : index
    %c0_13 = arith.constant 0 : index
    %15 = vector.load %arg17[%c0_11, %c0_12, %c0_13] : memref<18x15x256xbf16, #tpu.memory_space<vmem>>, vector<1x15x256xbf16>
    %16 = vector.shape_cast %15 : vector<1x15x256xbf16> to vector<15x256xbf16>
    %17 = vector.shape_cast %14 : vector<15x256xbf16> to vector<1x15x256xbf16>
    tpu.vector_store %arg17[%c0_11, %c0_12, %c0_13], %17 {strides = array<i32>} : memref<18x15x256xbf16, #tpu.memory_space<vmem>>, vector<1x15x256xbf16>,
    %c17 = arith.constant 17 : index
    %c0_14 = arith.constant 0 : index
    %c0_15 = arith.constant 0 : index
    %18 = vector.load %arg17[%c17, %c0_14, %c0_15] : memref<18x15x256xbf16, #tpu.memory_space<vmem>>, vector<1x15x256xbf16>
    %19 = vector.shape_cast %18 : vector<1x15x256xbf16> to vector<15x256xbf16>
    %20 = vector.shape_cast %14 : vector<15x256xbf16> to vector<1x15x256xbf16>
    tpu.vector_store %arg17[%c17, %c0_14, %c0_15], %20 {strides = array<i32>} : memref<18x15x256xbf16, #tpu.memory_space<vmem>>, vector<1x15x256xbf16>,
    %cst_16 = arith.constant 0.000000e+00 : bf16
    %21 = vector.broadcast %cst_16 : bf16 to vector<7x256xbf16>
    %c0_17 = arith.constant 0 : index
    %c0_18 = arith.constant 0 : index
    %c0_19 = arith.constant 0 : index
    %22 = vector.load %arg18[%c0_17, %c0_18, %c0_19] : memref<10x7x256xbf16, #tpu.memory_space<vmem>>, vector<1x7x256xbf16>
    %23 = vector.shape_cast %22 : vector<1x7x256xbf16> to vector<7x256xbf16>
    %24 = vector.shape_cast %21 : vector<7x256xbf16> to vector<1x7x256xbf16>
    tpu.vector_store %arg18[%c0_17, %c0_18, %c0_19], %24 {strides = array<i32>} : memref<10x7x256xbf16, #tpu.memory_space<vmem>>, vector<1x7x256xbf16>,
    %c9 = arith.constant 9 : index
    %c0_20 = arith.constant 0 : index
    %c0_21 = arith.constant 0 : index
    %25 = vector.load %arg18[%c9, %c0_20, %c0_21] : memref<10x7x256xbf16, #tpu.memory_space<vmem>>, vector<1x7x256xbf16>
    %26 = vector.shape_cast %25 : vector<1x7x256xbf16> to vector<7x256xbf16>
    %27 = vector.shape_cast %21 : vector<7x256xbf16> to vector<1x7x256xbf16>
    tpu.vector_store %arg18[%c9, %c0_20, %c0_21], %27 {strides = array<i32>} : memref<10x7x256xbf16, #tpu.memory_space<vmem>>, vector<1x7x256xbf16>,
    %cst_22 = arith.constant 0.000000e+00 : bf16
    %28 = vector.broadcast %cst_22 : bf16 to vector<3x256xbf16>
    %c0_23 = arith.constant 0 : index
    %c0_24 = arith.constant 0 : index
    %c0_25 = arith.constant 0 : index
    %29 = vector.load %arg19[%c0_23, %c0_24, %c0_25] : memref<6x3x256xbf16, #tpu.memory_space<vmem>>, vector<1x3x256xbf16>
    %30 = vector.shape_cast %29 : vector<1x3x256xbf16> to vector<3x256xbf16>
    %31 = vector.shape_cast %28 : vector<3x256xbf16> to vector<1x3x256xbf16>
    tpu.vector_store %arg19[%c0_23, %c0_24, %c0_25], %31 {strides = array<i32>} : memref<6x3x256xbf16, #tpu.memory_space<vmem>>, vector<1x3x256xbf16>,
    %c5 = arith.constant 5 : index
    %c0_26 = arith.constant 0 : index
    %c0_27 = arith.constant 0 : index
    %32 = vector.load %arg19[%c5, %c0_26, %c0_27] : memref<6x3x256xbf16, #tpu.memory_space<vmem>>, vector<1x3x256xbf16>
    %33 = vector.shape_cast %32 : vector<1x3x256xbf16> to vector<3x256xbf16>
    %34 = vector.shape_cast %28 : vector<3x256xbf16> to vector<1x3x256xbf16>
    tpu.vector_store %arg19[%c5, %c0_26, %c0_27], %34 {strides = array<i32>} : memref<6x3x256xbf16, #tpu.memory_space<vmem>>, vector<1x3x256xbf16>,
    %c0_i32 = arith.constant 0 : i32
    %c16_i32 = arith.constant 16 : i32
    %35 = arith.addi %c0_i32, %c16_i32 : i32
    %c1_i32 = arith.constant 1 : i32
    scf.for %arg20 = %c0_i32 to %35 step %c1_i32  : i32 {
      %c4_i32_114 = arith.constant 4 : i32
      %145 = arith.muli %arg20, %c4_i32_114 : i32
      %c0_i32_115 = arith.constant 0 : i32
      %146 = arith.addi %145, %c0_i32_115 : i32
      %c64_i32 = arith.constant 64 : i32
      %147 = arith.muli %146, %c64_i32 : i32
      %148 = tpu.assume_multiple %147, 64 : i32
      %c0_116 = arith.constant 0 : index
      %149 = arith.index_cast %148 : i32 to index
      %c0_117 = arith.constant 0 : index
      %150 = vector.load %arg1[%c0_116, %149, %c0_117] : memref<1x4480x28xbf16, #tpu.memory_space<vmem>>, vector<1x256x28xbf16>
      %151 = vector.shape_cast %150 : vector<1x256x28xbf16> to vector<256x28xbf16>
      %c0_118 = arith.constant 0 : index
      %c0_119 = arith.constant 0 : index
      %c0_120 = arith.constant 0 : index
      %152 = vector.load %arg2[%c0_118, %c0_119, %c0_120] : memref<7x28x16xbf16, #tpu.memory_space<vmem>>, vector<1x28x16xbf16>
      %153 = vector.shape_cast %152 : vector<1x28x16xbf16> to vector<28x16xbf16>
      %cst_121 = arith.constant dense<0.000000e+00> : vector<256x16xf32>
      %154 = tpu.matmul %151, %153, %cst_121 {dimension_numbers = #tpu.dot_dimension_numbers<[1], [0], [0], [1], [0, 0, 1, 1], [], []>} : vector<256x28xbf16>, vector<28x16xbf16>, vector<256x16xf32> -> vector<256x16xf32>
      %c1_i32_122 = arith.constant 1 : i32
      %155 = arith.addi %145, %c1_i32_122 : i32
      %c64_i32_123 = arith.constant 64 : i32
      %156 = arith.muli %155, %c64_i32_123 : i32
      %157 = tpu.assume_multiple %156, 64 : i32
      %c0_124 = arith.constant 0 : index
      %158 = arith.index_cast %157 : i32 to index
      %c0_125 = arith.constant 0 : index
      %159 = vector.load %arg1[%c0_124, %158, %c0_125] : memref<1x4480x28xbf16, #tpu.memory_space<vmem>>, vector<1x256x28xbf16>
      %160 = vector.shape_cast %159 : vector<1x256x28xbf16> to vector<256x28xbf16>
      %c1_126 = arith.constant 1 : index
      %c0_127 = arith.constant 0 : index
      %c0_128 = arith.constant 0 : index
      %161 = vector.load %arg2[%c1_126, %c0_127, %c0_128] : memref<7x28x16xbf16, #tpu.memory_space<vmem>>, vector<1x28x16xbf16>
      %162 = vector.shape_cast %161 : vector<1x28x16xbf16> to vector<28x16xbf16>
      %cst_129 = arith.constant dense<0.000000e+00> : vector<256x16xf32>
      %163 = tpu.matmul %160, %162, %cst_129 {dimension_numbers = #tpu.dot_dimension_numbers<[1], [0], [0], [1], [0, 0, 1, 1], [], []>} : vector<256x28xbf16>, vector<28x16xbf16>, vector<256x16xf32> -> vector<256x16xf32>
      %164 = arith.addf %154, %163 : vector<256x16xf32>
      %c2_i32_130 = arith.constant 2 : i32
      %165 = arith.addi %145, %c2_i32_130 : i32
      %c64_i32_131 = arith.constant 64 : i32
      %166 = arith.muli %165, %c64_i32_131 : i32
      %167 = tpu.assume_multiple %166, 64 : i32
      %c0_132 = arith.constant 0 : index
      %168 = arith.index_cast %167 : i32 to index
      %c0_133 = arith.constant 0 : index
      %169 = vector.load %arg1[%c0_132, %168, %c0_133] : memref<1x4480x28xbf16, #tpu.memory_space<vmem>>, vector<1x256x28xbf16>
      %170 = vector.shape_cast %169 : vector<1x256x28xbf16> to vector<256x28xbf16>
      %c2_134 = arith.constant 2 : index
      %c0_135 = arith.constant 0 : index
      %c0_136 = arith.constant 0 : index
      %171 = vector.load %arg2[%c2_134, %c0_135, %c0_136] : memref<7x28x16xbf16, #tpu.memory_space<vmem>>, vector<1x28x16xbf16>
      %172 = vector.shape_cast %171 : vector<1x28x16xbf16> to vector<28x16xbf16>
      %cst_137 = arith.constant dense<0.000000e+00> : vector<256x16xf32>
      %173 = tpu.matmul %170, %172, %cst_137 {dimension_numbers = #tpu.dot_dimension_numbers<[1], [0], [0], [1], [0, 0, 1, 1], [], []>} : vector<256x28xbf16>, vector<28x16xbf16>, vector<256x16xf32> -> vector<256x16xf32>
      %174 = arith.addf %164, %173 : vector<256x16xf32>
      %c3_i32 = arith.constant 3 : i32
      %175 = arith.addi %145, %c3_i32 : i32
      %c64_i32_138 = arith.constant 64 : i32
      %176 = arith.muli %175, %c64_i32_138 : i32
      %177 = tpu.assume_multiple %176, 64 : i32
      %c0_139 = arith.constant 0 : index
      %178 = arith.index_cast %177 : i32 to index
      %c0_140 = arith.constant 0 : index
      %179 = vector.load %arg1[%c0_139, %178, %c0_140] : memref<1x4480x28xbf16, #tpu.memory_space<vmem>>, vector<1x256x28xbf16>
      %180 = vector.shape_cast %179 : vector<1x256x28xbf16> to vector<256x28xbf16>
      %c3_141 = arith.constant 3 : index
      %c0_142 = arith.constant 0 : index
      %c0_143 = arith.constant 0 : index
      %181 = vector.load %arg2[%c3_141, %c0_142, %c0_143] : memref<7x28x16xbf16, #tpu.memory_space<vmem>>, vector<1x28x16xbf16>
      %182 = vector.shape_cast %181 : vector<1x28x16xbf16> to vector<28x16xbf16>
      %cst_144 = arith.constant dense<0.000000e+00> : vector<256x16xf32>
      %183 = tpu.matmul %180, %182, %cst_144 {dimension_numbers = #tpu.dot_dimension_numbers<[1], [0], [0], [1], [0, 0, 1, 1], [], []>} : vector<256x28xbf16>, vector<28x16xbf16>, vector<256x16xf32> -> vector<256x16xf32>
      %184 = arith.addf %174, %183 : vector<256x16xf32>
      %c4_i32_145 = arith.constant 4 : i32
      %185 = arith.addi %145, %c4_i32_145 : i32
      %c64_i32_146 = arith.constant 64 : i32
      %186 = arith.muli %185, %c64_i32_146 : i32
      %187 = tpu.assume_multiple %186, 64 : i32
      %c0_147 = arith.constant 0 : index
      %188 = arith.index_cast %187 : i32 to index
      %c0_148 = arith.constant 0 : index
      %189 = vector.load %arg1[%c0_147, %188, %c0_148] : memref<1x4480x28xbf16, #tpu.memory_space<vmem>>, vector<1x256x28xbf16>
      %190 = vector.shape_cast %189 : vector<1x256x28xbf16> to vector<256x28xbf16>
      %c4_149 = arith.constant 4 : index
      %c0_150 = arith.constant 0 : index
      %c0_151 = arith.constant 0 : index
      %191 = vector.load %arg2[%c4_149, %c0_150, %c0_151] : memref<7x28x16xbf16, #tpu.memory_space<vmem>>, vector<1x28x16xbf16>
      %192 = vector.shape_cast %191 : vector<1x28x16xbf16> to vector<28x16xbf16>
      %cst_152 = arith.constant dense<0.000000e+00> : vector<256x16xf32>
      %193 = tpu.matmul %190, %192, %cst_152 {dimension_numbers = #tpu.dot_dimension_numbers<[1], [0], [0], [1], [0, 0, 1, 1], [], []>} : vector<256x28xbf16>, vector<28x16xbf16>, vector<256x16xf32> -> vector<256x16xf32>
      %194 = arith.addf %184, %193 : vector<256x16xf32>
      %c5_i32 = arith.constant 5 : i32
      %195 = arith.addi %145, %c5_i32 : i32
      %c64_i32_153 = arith.constant 64 : i32
      %196 = arith.muli %195, %c64_i32_153 : i32
      %197 = tpu.assume_multiple %196, 64 : i32
      %c0_154 = arith.constant 0 : index
      %198 = arith.index_cast %197 : i32 to index
      %c0_155 = arith.constant 0 : index
      %199 = vector.load %arg1[%c0_154, %198, %c0_155] : memref<1x4480x28xbf16, #tpu.memory_space<vmem>>, vector<1x256x28xbf16>
      %200 = vector.shape_cast %199 : vector<1x256x28xbf16> to vector<256x28xbf16>
      %c5_156 = arith.constant 5 : index
      %c0_157 = arith.constant 0 : index
      %c0_158 = arith.constant 0 : index
      %201 = vector.load %arg2[%c5_156, %c0_157, %c0_158] : memref<7x28x16xbf16, #tpu.memory_space<vmem>>, vector<1x28x16xbf16>
      %202 = vector.shape_cast %201 : vector<1x28x16xbf16> to vector<28x16xbf16>
      %cst_159 = arith.constant dense<0.000000e+00> : vector<256x16xf32>
      %203 = tpu.matmul %200, %202, %cst_159 {dimension_numbers = #tpu.dot_dimension_numbers<[1], [0], [0], [1], [0, 0, 1, 1], [], []>} : vector<256x28xbf16>, vector<28x16xbf16>, vector<256x16xf32> -> vector<256x16xf32>
      %204 = arith.addf %194, %203 : vector<256x16xf32>
      %c6_i32 = arith.constant 6 : i32
      %205 = arith.addi %145, %c6_i32 : i32
      %c64_i32_160 = arith.constant 64 : i32
      %206 = arith.muli %205, %c64_i32_160 : i32
      %207 = tpu.assume_multiple %206, 64 : i32
      %c0_161 = arith.constant 0 : index
      %208 = arith.index_cast %207 : i32 to index
      %c0_162 = arith.constant 0 : index
      %209 = vector.load %arg1[%c0_161, %208, %c0_162] : memref<1x4480x28xbf16, #tpu.memory_space<vmem>>, vector<1x256x28xbf16>
      %210 = vector.shape_cast %209 : vector<1x256x28xbf16> to vector<256x28xbf16>
      %c6 = arith.constant 6 : index
      %c0_163 = arith.constant 0 : index
      %c0_164 = arith.constant 0 : index
      %211 = vector.load %arg2[%c6, %c0_163, %c0_164] : memref<7x28x16xbf16, #tpu.memory_space<vmem>>, vector<1x28x16xbf16>
      %212 = vector.shape_cast %211 : vector<1x28x16xbf16> to vector<28x16xbf16>
      %cst_165 = arith.constant dense<0.000000e+00> : vector<256x16xf32>
      %213 = tpu.matmul %210, %212, %cst_165 {dimension_numbers = #tpu.dot_dimension_numbers<[1], [0], [0], [1], [0, 0, 1, 1], [], []>} : vector<256x28xbf16>, vector<28x16xbf16>, vector<256x16xf32> -> vector<256x16xf32>
      %214 = arith.addf %204, %213 : vector<256x16xf32>
      %c0_166 = arith.constant 0 : index
      %c0_167 = arith.constant 0 : index
      %215 = vector.load %arg3[%c0_166, %c0_167] : memref<1x16xf32, #tpu.memory_space<vmem>>, vector<1x16xf32>
      %216 = vector.broadcast %215 : vector<1x16xf32> to vector<256x16xf32>
      %217 = arith.addf %214, %216 : vector<256x16xf32>
      %cst_168 = arith.constant 0.000000e+00 : f32
      %218 = vector.broadcast %cst_168 : f32 to vector<256x16xf32>
      %219 = arith.cmpf ogt, %217, %218 : vector<256x16xf32>
      %cst_169 = arith.constant 2.000000e-01 : f32
      %220 = vector.broadcast %cst_169 : f32 to vector<256x16xf32>
      %221 = arith.mulf %220, %217 : vector<256x16xf32>
      %222 = arith.select %219, %217, %221 : vector<256x16xi1>, vector<256x16xf32>
      %223 = arith.truncf %222 : vector<256x16xf32> to vector<256x16xbf16>
      %c0_i32_170 = arith.constant 0 : i32
      %224 = arith.addi %145, %c0_i32_170 : i32
      %c1_i32_171 = arith.constant 1 : i32
      %225 = arith.addi %224, %c1_i32_171 : i32
      %226 = vector.extract_strided_slice %223 {offsets = [0, 0], sizes = [64, 16], strides = [1, 1]} : vector<256x16xbf16> to vector<64x16xbf16>
      %cst_172 = arith.constant 0.000000e+00 : bf16
      %227 = vector.broadcast %cst_172 : bf16 to vector<1x16xbf16>
      %228 = vector.extract_strided_slice %226 {offsets = [0, 0], sizes = [62, 16], strides = [1, 1]} : vector<64x16xbf16> to vector<62x16xbf16>
      %229 = arith.index_cast %225 : i32 to index
      %c1_173 = arith.constant 1 : index
      %c0_174 = arith.constant 0 : index
      %230 = vector.load %arg15[%229, %c1_173, %c0_174] : memref<66x63x64xbf16, #tpu.memory_space<vmem>>, vector<1x62x16xbf16>
      %231 = vector.shape_cast %230 : vector<1x62x16xbf16> to vector<62x16xbf16>
      %232 = vector.shape_cast %228 : vector<62x16xbf16> to vector<1x62x16xbf16>
      tpu.vector_store %arg15[%229, %c1_173, %c0_174], %232 {strides = array<i32>} : memref<66x63x64xbf16, #tpu.memory_space<vmem>>, vector<1x62x16xbf16>,
      %233 = arith.index_cast %225 : i32 to index
      %c0_175 = arith.constant 0 : index
      %c0_176 = arith.constant 0 : index
      %234 = vector.load %arg15[%233, %c0_175, %c0_176] : memref<66x63x64xbf16, #tpu.memory_space<vmem>>, vector<1x1x16xbf16>
      %235 = vector.shape_cast %234 : vector<1x1x16xbf16> to vector<1x16xbf16>
      %236 = vector.shape_cast %227 : vector<1x16xbf16> to vector<1x1x16xbf16>
      tpu.vector_store %arg15[%233, %c0_175, %c0_176], %236 {strides = array<i32>} : memref<66x63x64xbf16, #tpu.memory_space<vmem>>, vector<1x1x16xbf16>,
      %237 = vector.extract_strided_slice %226 {offsets = [0, 0], sizes = [63, 16], strides = [1, 1]} : vector<64x16xbf16> to vector<63x16xbf16>
      %238 = arith.index_cast %225 : i32 to index
      %c0_177 = arith.constant 0 : index
      %c16 = arith.constant 16 : index
      %239 = vector.load %arg15[%238, %c0_177, %c16] : memref<66x63x64xbf16, #tpu.memory_space<vmem>>, vector<1x63x16xbf16>
      %240 = vector.shape_cast %239 : vector<1x63x16xbf16> to vector<63x16xbf16>
      %241 = vector.shape_cast %237 : vector<63x16xbf16> to vector<1x63x16xbf16>
      tpu.vector_store %arg15[%238, %c0_177, %c16], %241 {strides = array<i32>} : memref<66x63x64xbf16, #tpu.memory_space<vmem>>, vector<1x63x16xbf16>,
      %242 = vector.extract_strided_slice %226 {offsets = [1, 0], sizes = [63, 16], strides = [1, 1]} : vector<64x16xbf16> to vector<63x16xbf16>
      %243 = arith.index_cast %225 : i32 to index
      %c0_178 = arith.constant 0 : index
      %c32 = arith.constant 32 : index
      %244 = vector.load %arg15[%243, %c0_178, %c32] : memref<66x63x64xbf16, #tpu.memory_space<vmem>>, vector<1x63x16xbf16>
      %245 = vector.shape_cast %244 : vector<1x63x16xbf16> to vector<63x16xbf16>
      %246 = vector.shape_cast %242 : vector<63x16xbf16> to vector<1x63x16xbf16>
      tpu.vector_store %arg15[%243, %c0_178, %c32], %246 {strides = array<i32>} : memref<66x63x64xbf16, #tpu.memory_space<vmem>>, vector<1x63x16xbf16>,
      %247 = vector.extract_strided_slice %226 {offsets = [2, 0], sizes = [62, 16], strides = [1, 1]} : vector<64x16xbf16> to vector<62x16xbf16>
      %248 = arith.index_cast %225 : i32 to index
      %c0_179 = arith.constant 0 : index
      %c48 = arith.constant 48 : index
      %249 = vector.load %arg15[%248, %c0_179, %c48] : memref<66x63x64xbf16, #tpu.memory_space<vmem>>, vector<1x62x16xbf16>
      %250 = vector.shape_cast %249 : vector<1x62x16xbf16> to vector<62x16xbf16>
      %251 = vector.shape_cast %247 : vector<62x16xbf16> to vector<1x62x16xbf16>
      tpu.vector_store %arg15[%248, %c0_179, %c48], %251 {strides = array<i32>} : memref<66x63x64xbf16, #tpu.memory_space<vmem>>, vector<1x62x16xbf16>,
      %252 = arith.index_cast %225 : i32 to index
      %c62 = arith.constant 62 : index
      %c48_180 = arith.constant 48 : index
      %253 = vector.load %arg15[%252, %c62, %c48_180] : memref<66x63x64xbf16, #tpu.memory_space<vmem>>, vector<1x1x16xbf16>
      %254 = vector.shape_cast %253 : vector<1x1x16xbf16> to vector<1x16xbf16>
      %255 = vector.shape_cast %227 : vector<1x16xbf16> to vector<1x1x16xbf16>
      tpu.vector_store %arg15[%252, %c62, %c48_180], %255 {strides = array<i32>} : memref<66x63x64xbf16, #tpu.memory_space<vmem>>, vector<1x1x16xbf16>,
      %c1_i32_181 = arith.constant 1 : i32
      %256 = arith.addi %145, %c1_i32_181 : i32
      %c1_i32_182 = arith.constant 1 : i32
      %257 = arith.addi %256, %c1_i32_182 : i32
      %258 = vector.extract_strided_slice %223 {offsets = [64, 0], sizes = [64, 16], strides = [1, 1]} : vector<256x16xbf16> to vector<64x16xbf16>
      %cst_183 = arith.constant 0.000000e+00 : bf16
      %259 = vector.broadcast %cst_183 : bf16 to vector<1x16xbf16>
      %260 = vector.extract_strided_slice %258 {offsets = [0, 0], sizes = [62, 16], strides = [1, 1]} : vector<64x16xbf16> to vector<62x16xbf16>
      %261 = arith.index_cast %257 : i32 to index
      %c1_184 = arith.constant 1 : index
      %c0_185 = arith.constant 0 : index
      %262 = vector.load %arg15[%261, %c1_184, %c0_185] : memref<66x63x64xbf16, #tpu.memory_space<vmem>>, vector<1x62x16xbf16>
      %263 = vector.shape_cast %262 : vector<1x62x16xbf16> to vector<62x16xbf16>
      %264 = vector.shape_cast %260 : vector<62x16xbf16> to vector<1x62x16xbf16>
      tpu.vector_store %arg15[%261, %c1_184, %c0_185], %264 {strides = array<i32>} : memref<66x63x64xbf16, #tpu.memory_space<vmem>>, vector<1x62x16xbf16>,
      %265 = arith.index_cast %257 : i32 to index
      %c0_186 = arith.constant 0 : index
      %c0_187 = arith.constant 0 : index
      %266 = vector.load %arg15[%265, %c0_186, %c0_187] : memref<66x63x64xbf16, #tpu.memory_space<vmem>>, vector<1x1x16xbf16>
      %267 = vector.shape_cast %266 : vector<1x1x16xbf16> to vector<1x16xbf16>
      %268 = vector.shape_cast %259 : vector<1x16xbf16> to vector<1x1x16xbf16>
      tpu.vector_store %arg15[%265, %c0_186, %c0_187], %268 {strides = array<i32>} : memref<66x63x64xbf16, #tpu.memory_space<vmem>>, vector<1x1x16xbf16>,
      %269 = vector.extract_strided_slice %258 {offsets = [0, 0], sizes = [63, 16], strides = [1, 1]} : vector<64x16xbf16> to vector<63x16xbf16>
      %270 = arith.index_cast %257 : i32 to index
      %c0_188 = arith.constant 0 : index
      %c16_189 = arith.constant 16 : index
      %271 = vector.load %arg15[%270, %c0_188, %c16_189] : memref<66x63x64xbf16, #tpu.memory_space<vmem>>, vector<1x63x16xbf16>
      %272 = vector.shape_cast %271 : vector<1x63x16xbf16> to vector<63x16xbf16>
      %273 = vector.shape_cast %269 : vector<63x16xbf16> to vector<1x63x16xbf16>
      tpu.vector_store %arg15[%270, %c0_188, %c16_189], %273 {strides = array<i32>} : memref<66x63x64xbf16, #tpu.memory_space<vmem>>, vector<1x63x16xbf16>,
      %274 = vector.extract_strided_slice %258 {offsets = [1, 0], sizes = [63, 16], strides = [1, 1]} : vector<64x16xbf16> to vector<63x16xbf16>
      %275 = arith.index_cast %257 : i32 to index
      %c0_190 = arith.constant 0 : index
      %c32_191 = arith.constant 32 : index
      %276 = vector.load %arg15[%275, %c0_190, %c32_191] : memref<66x63x64xbf16, #tpu.memory_space<vmem>>, vector<1x63x16xbf16>
      %277 = vector.shape_cast %276 : vector<1x63x16xbf16> to vector<63x16xbf16>
      %278 = vector.shape_cast %274 : vector<63x16xbf16> to vector<1x63x16xbf16>
      tpu.vector_store %arg15[%275, %c0_190, %c32_191], %278 {strides = array<i32>} : memref<66x63x64xbf16, #tpu.memory_space<vmem>>, vector<1x63x16xbf16>,
      %279 = vector.extract_strided_slice %258 {offsets = [2, 0], sizes = [62, 16], strides = [1, 1]} : vector<64x16xbf16> to vector<62x16xbf16>
      %280 = arith.index_cast %257 : i32 to index
      %c0_192 = arith.constant 0 : index
      %c48_193 = arith.constant 48 : index
      %281 = vector.load %arg15[%280, %c0_192, %c48_193] : memref<66x63x64xbf16, #tpu.memory_space<vmem>>, vector<1x62x16xbf16>
      %282 = vector.shape_cast %281 : vector<1x62x16xbf16> to vector<62x16xbf16>
      %283 = vector.shape_cast %279 : vector<62x16xbf16> to vector<1x62x16xbf16>
      tpu.vector_store %arg15[%280, %c0_192, %c48_193], %283 {strides = array<i32>} : memref<66x63x64xbf16, #tpu.memory_space<vmem>>, vector<1x62x16xbf16>,
      %284 = arith.index_cast %257 : i32 to index
      %c62_194 = arith.constant 62 : index
      %c48_195 = arith.constant 48 : index
      %285 = vector.load %arg15[%284, %c62_194, %c48_195] : memref<66x63x64xbf16, #tpu.memory_space<vmem>>, vector<1x1x16xbf16>
      %286 = vector.shape_cast %285 : vector<1x1x16xbf16> to vector<1x16xbf16>
      %287 = vector.shape_cast %259 : vector<1x16xbf16> to vector<1x1x16xbf16>
      tpu.vector_store %arg15[%284, %c62_194, %c48_195], %287 {strides = array<i32>} : memref<66x63x64xbf16, #tpu.memory_space<vmem>>, vector<1x1x16xbf16>,
      %c2_i32_196 = arith.constant 2 : i32
      %288 = arith.addi %145, %c2_i32_196 : i32
      %c1_i32_197 = arith.constant 1 : i32
      %289 = arith.addi %288, %c1_i32_197 : i32
      %290 = vector.extract_strided_slice %223 {offsets = [128, 0], sizes = [64, 16], strides = [1, 1]} : vector<256x16xbf16> to vector<64x16xbf16>
      %cst_198 = arith.constant 0.000000e+00 : bf16
      %291 = vector.broadcast %cst_198 : bf16 to vector<1x16xbf16>
      %292 = vector.extract_strided_slice %290 {offsets = [0, 0], sizes = [62, 16], strides = [1, 1]} : vector<64x16xbf16> to vector<62x16xbf16>
      %293 = arith.index_cast %289 : i32 to index
      %c1_199 = arith.constant 1 : index
      %c0_200 = arith.constant 0 : index
      %294 = vector.load %arg15[%293, %c1_199, %c0_200] : memref<66x63x64xbf16, #tpu.memory_space<vmem>>, vector<1x62x16xbf16>
      %295 = vector.shape_cast %294 : vector<1x62x16xbf16> to vector<62x16xbf16>
      %296 = vector.shape_cast %292 : vector<62x16xbf16> to vector<1x62x16xbf16>
      tpu.vector_store %arg15[%293, %c1_199, %c0_200], %296 {strides = array<i32>} : memref<66x63x64xbf16, #tpu.memory_space<vmem>>, vector<1x62x16xbf16>,
      %297 = arith.index_cast %289 : i32 to index
      %c0_201 = arith.constant 0 : index
      %c0_202 = arith.constant 0 : index
      %298 = vector.load %arg15[%297, %c0_201, %c0_202] : memref<66x63x64xbf16, #tpu.memory_space<vmem>>, vector<1x1x16xbf16>
      %299 = vector.shape_cast %298 : vector<1x1x16xbf16> to vector<1x16xbf16>
      %300 = vector.shape_cast %291 : vector<1x16xbf16> to vector<1x1x16xbf16>
      tpu.vector_store %arg15[%297, %c0_201, %c0_202], %300 {strides = array<i32>} : memref<66x63x64xbf16, #tpu.memory_space<vmem>>, vector<1x1x16xbf16>,
      %301 = vector.extract_strided_slice %290 {offsets = [0, 0], sizes = [63, 16], strides = [1, 1]} : vector<64x16xbf16> to vector<63x16xbf16>
      %302 = arith.index_cast %289 : i32 to index
      %c0_203 = arith.constant 0 : index
      %c16_204 = arith.constant 16 : index
      %303 = vector.load %arg15[%302, %c0_203, %c16_204] : memref<66x63x64xbf16, #tpu.memory_space<vmem>>, vector<1x63x16xbf16>
      %304 = vector.shape_cast %303 : vector<1x63x16xbf16> to vector<63x16xbf16>
      %305 = vector.shape_cast %301 : vector<63x16xbf16> to vector<1x63x16xbf16>
      tpu.vector_store %arg15[%302, %c0_203, %c16_204], %305 {strides = array<i32>} : memref<66x63x64xbf16, #tpu.memory_space<vmem>>, vector<1x63x16xbf16>,
      %306 = vector.extract_strided_slice %290 {offsets = [1, 0], sizes = [63, 16], strides = [1, 1]} : vector<64x16xbf16> to vector<63x16xbf16>
      %307 = arith.index_cast %289 : i32 to index
      %c0_205 = arith.constant 0 : index
      %c32_206 = arith.constant 32 : index
      %308 = vector.load %arg15[%307, %c0_205, %c32_206] : memref<66x63x64xbf16, #tpu.memory_space<vmem>>, vector<1x63x16xbf16>
      %309 = vector.shape_cast %308 : vector<1x63x16xbf16> to vector<63x16xbf16>
      %310 = vector.shape_cast %306 : vector<63x16xbf16> to vector<1x63x16xbf16>
      tpu.vector_store %arg15[%307, %c0_205, %c32_206], %310 {strides = array<i32>} : memref<66x63x64xbf16, #tpu.memory_space<vmem>>, vector<1x63x16xbf16>,
      %311 = vector.extract_strided_slice %290 {offsets = [2, 0], sizes = [62, 16], strides = [1, 1]} : vector<64x16xbf16> to vector<62x16xbf16>
      %312 = arith.index_cast %289 : i32 to index
      %c0_207 = arith.constant 0 : index
      %c48_208 = arith.constant 48 : index
      %313 = vector.load %arg15[%312, %c0_207, %c48_208] : memref<66x63x64xbf16, #tpu.memory_space<vmem>>, vector<1x62x16xbf16>
      %314 = vector.shape_cast %313 : vector<1x62x16xbf16> to vector<62x16xbf16>
      %315 = vector.shape_cast %311 : vector<62x16xbf16> to vector<1x62x16xbf16>
      tpu.vector_store %arg15[%312, %c0_207, %c48_208], %315 {strides = array<i32>} : memref<66x63x64xbf16, #tpu.memory_space<vmem>>, vector<1x62x16xbf16>,
      %316 = arith.index_cast %289 : i32 to index
      %c62_209 = arith.constant 62 : index
      %c48_210 = arith.constant 48 : index
      %317 = vector.load %arg15[%316, %c62_209, %c48_210] : memref<66x63x64xbf16, #tpu.memory_space<vmem>>, vector<1x1x16xbf16>
      %318 = vector.shape_cast %317 : vector<1x1x16xbf16> to vector<1x16xbf16>
      %319 = vector.shape_cast %291 : vector<1x16xbf16> to vector<1x1x16xbf16>
      tpu.vector_store %arg15[%316, %c62_209, %c48_210], %319 {strides = array<i32>} : memref<66x63x64xbf16, #tpu.memory_space<vmem>>, vector<1x1x16xbf16>,
      %c3_i32_211 = arith.constant 3 : i32
      %320 = arith.addi %145, %c3_i32_211 : i32
      %c1_i32_212 = arith.constant 1 : i32
      %321 = arith.addi %320, %c1_i32_212 : i32
      %322 = vector.extract_strided_slice %223 {offsets = [192, 0], sizes = [64, 16], strides = [1, 1]} : vector<256x16xbf16> to vector<64x16xbf16>
      %cst_213 = arith.constant 0.000000e+00 : bf16
      %323 = vector.broadcast %cst_213 : bf16 to vector<1x16xbf16>
      %324 = vector.extract_strided_slice %322 {offsets = [0, 0], sizes = [62, 16], strides = [1, 1]} : vector<64x16xbf16> to vector<62x16xbf16>
      %325 = arith.index_cast %321 : i32 to index
      %c1_214 = arith.constant 1 : index
      %c0_215 = arith.constant 0 : index
      %326 = vector.load %arg15[%325, %c1_214, %c0_215] : memref<66x63x64xbf16, #tpu.memory_space<vmem>>, vector<1x62x16xbf16>
      %327 = vector.shape_cast %326 : vector<1x62x16xbf16> to vector<62x16xbf16>
      %328 = vector.shape_cast %324 : vector<62x16xbf16> to vector<1x62x16xbf16>
      tpu.vector_store %arg15[%325, %c1_214, %c0_215], %328 {strides = array<i32>} : memref<66x63x64xbf16, #tpu.memory_space<vmem>>, vector<1x62x16xbf16>,
      %329 = arith.index_cast %321 : i32 to index
      %c0_216 = arith.constant 0 : index
      %c0_217 = arith.constant 0 : index
      %330 = vector.load %arg15[%329, %c0_216, %c0_217] : memref<66x63x64xbf16, #tpu.memory_space<vmem>>, vector<1x1x16xbf16>
      %331 = vector.shape_cast %330 : vector<1x1x16xbf16> to vector<1x16xbf16>
      %332 = vector.shape_cast %323 : vector<1x16xbf16> to vector<1x1x16xbf16>
      tpu.vector_store %arg15[%329, %c0_216, %c0_217], %332 {strides = array<i32>} : memref<66x63x64xbf16, #tpu.memory_space<vmem>>, vector<1x1x16xbf16>,
      %333 = vector.extract_strided_slice %322 {offsets = [0, 0], sizes = [63, 16], strides = [1, 1]} : vector<64x16xbf16> to vector<63x16xbf16>
      %334 = arith.index_cast %321 : i32 to index
      %c0_218 = arith.constant 0 : index
      %c16_219 = arith.constant 16 : index
      %335 = vector.load %arg15[%334, %c0_218, %c16_219] : memref<66x63x64xbf16, #tpu.memory_space<vmem>>, vector<1x63x16xbf16>
      %336 = vector.shape_cast %335 : vector<1x63x16xbf16> to vector<63x16xbf16>
      %337 = vector.shape_cast %333 : vector<63x16xbf16> to vector<1x63x16xbf16>
      tpu.vector_store %arg15[%334, %c0_218, %c16_219], %337 {strides = array<i32>} : memref<66x63x64xbf16, #tpu.memory_space<vmem>>, vector<1x63x16xbf16>,
      %338 = vector.extract_strided_slice %322 {offsets = [1, 0], sizes = [63, 16], strides = [1, 1]} : vector<64x16xbf16> to vector<63x16xbf16>
      %339 = arith.index_cast %321 : i32 to index
      %c0_220 = arith.constant 0 : index
      %c32_221 = arith.constant 32 : index
      %340 = vector.load %arg15[%339, %c0_220, %c32_221] : memref<66x63x64xbf16, #tpu.memory_space<vmem>>, vector<1x63x16xbf16>
      %341 = vector.shape_cast %340 : vector<1x63x16xbf16> to vector<63x16xbf16>
      %342 = vector.shape_cast %338 : vector<63x16xbf16> to vector<1x63x16xbf16>
      tpu.vector_store %arg15[%339, %c0_220, %c32_221], %342 {strides = array<i32>} : memref<66x63x64xbf16, #tpu.memory_space<vmem>>, vector<1x63x16xbf16>,
      %343 = vector.extract_strided_slice %322 {offsets = [2, 0], sizes = [62, 16], strides = [1, 1]} : vector<64x16xbf16> to vector<62x16xbf16>
      %344 = arith.index_cast %321 : i32 to index
      %c0_222 = arith.constant 0 : index
      %c48_223 = arith.constant 48 : index
      %345 = vector.load %arg15[%344, %c0_222, %c48_223] : memref<66x63x64xbf16, #tpu.memory_space<vmem>>, vector<1x62x16xbf16>
      %346 = vector.shape_cast %345 : vector<1x62x16xbf16> to vector<62x16xbf16>
      %347 = vector.shape_cast %343 : vector<62x16xbf16> to vector<1x62x16xbf16>
      tpu.vector_store %arg15[%344, %c0_222, %c48_223], %347 {strides = array<i32>} : memref<66x63x64xbf16, #tpu.memory_space<vmem>>, vector<1x62x16xbf16>,
      %348 = arith.index_cast %321 : i32 to index
      %c62_224 = arith.constant 62 : index
      %c48_225 = arith.constant 48 : index
      %349 = vector.load %arg15[%348, %c62_224, %c48_225] : memref<66x63x64xbf16, #tpu.memory_space<vmem>>, vector<1x1x16xbf16>
      %350 = vector.shape_cast %349 : vector<1x1x16xbf16> to vector<1x16xbf16>
      %351 = vector.shape_cast %323 : vector<1x16xbf16> to vector<1x1x16xbf16>
      tpu.vector_store %arg15[%348, %c62_224, %c48_225], %351 {strides = array<i32>} : memref<66x63x64xbf16, #tpu.memory_space<vmem>>, vector<1x1x16xbf16>,
    }
    %c16_i32_28 = arith.constant 16 : i32
    %36 = tpu.iota {dimensions = array<i32: 0>} : vector<32x63xi32>
    %37 = tpu.iota {dimensions = array<i32: 1>} : vector<32x63xi32>
    %c2_i32 = arith.constant 2 : i32
    %38 = vector.broadcast %c2_i32 : i32 to vector<32x63xi32>
    %39 = arith.muli %38, %36 : vector<32x63xi32>
    %40 = arith.cmpi eq, %37, %39 : vector<32x63xi32>
    %41 = arith.extui %40 : vector<32x63xi1> to vector<32x63xi32>
    %42 = arith.sitofp %41 : vector<32x63xi32> to vector<32x63xf32>
    %c0_i32_29 = arith.constant 0 : i32
    %c32_i32 = arith.constant 32 : i32
    %43 = arith.addi %c0_i32_29, %c32_i32 : i32
    %c1_i32_30 = arith.constant 1 : i32
    scf.for %arg20 = %c0_i32_29 to %43 step %c1_i32_30  : i32 {
      %c2_i32_114 = arith.constant 2 : i32
      %145 = arith.muli %c2_i32_114, %arg20 : i32
      %c0_i32_115 = arith.constant 0 : i32
      %146 = arith.addi %145, %c0_i32_115 : i32
      %147 = arith.index_cast %146 : i32 to index
      %c0_116 = arith.constant 0 : index
      %c0_117 = arith.constant 0 : index
      %148 = vector.load %arg15[%147, %c0_116, %c0_117] : memref<66x63x64xbf16, #tpu.memory_space<vmem>>, vector<1x63x64xbf16>
      %149 = vector.shape_cast %148 : vector<1x63x64xbf16> to vector<63x64xbf16>
      %c0_118 = arith.constant 0 : index
      %c0_119 = arith.constant 0 : index
      %c0_120 = arith.constant 0 : index
      %150 = vector.load %arg4[%c0_118, %c0_119, %c0_120] : memref<4x64x32xbf16, #tpu.memory_space<vmem>>, vector<1x64x32xbf16>
      %151 = vector.shape_cast %150 : vector<1x64x32xbf16> to vector<64x32xbf16>
      %cst_121 = arith.constant dense<0.000000e+00> : vector<63x32xf32>
      %152 = tpu.matmul %149, %151, %cst_121 {dimension_numbers = #tpu.dot_dimension_numbers<[1], [0], [0], [1], [0, 0, 1, 1], [], []>} : vector<63x64xbf16>, vector<64x32xbf16>, vector<63x32xf32> -> vector<63x32xf32>
      %c2_i32_122 = arith.constant 2 : i32
      %153 = arith.muli %c2_i32_122, %arg20 : i32
      %c1_i32_123 = arith.constant 1 : i32
      %154 = arith.addi %153, %c1_i32_123 : i32
      %155 = arith.index_cast %154 : i32 to index
      %c0_124 = arith.constant 0 : index
      %c0_125 = arith.constant 0 : index
      %156 = vector.load %arg15[%155, %c0_124, %c0_125] : memref<66x63x64xbf16, #tpu.memory_space<vmem>>, vector<1x63x64xbf16>
      %157 = vector.shape_cast %156 : vector<1x63x64xbf16> to vector<63x64xbf16>
      %c1_126 = arith.constant 1 : index
      %c0_127 = arith.constant 0 : index
      %c0_128 = arith.constant 0 : index
      %158 = vector.load %arg4[%c1_126, %c0_127, %c0_128] : memref<4x64x32xbf16, #tpu.memory_space<vmem>>, vector<1x64x32xbf16>
      %159 = vector.shape_cast %158 : vector<1x64x32xbf16> to vector<64x32xbf16>
      %cst_129 = arith.constant dense<0.000000e+00> : vector<63x32xf32>
      %160 = tpu.matmul %157, %159, %cst_129 {dimension_numbers = #tpu.dot_dimension_numbers<[1], [0], [0], [1], [0, 0, 1, 1], [], []>} : vector<63x64xbf16>, vector<64x32xbf16>, vector<63x32xf32> -> vector<63x32xf32>
      %161 = arith.addf %152, %160 : vector<63x32xf32>
      %c2_i32_130 = arith.constant 2 : i32
      %162 = arith.muli %c2_i32_130, %arg20 : i32
      %c2_i32_131 = arith.constant 2 : i32
      %163 = arith.addi %162, %c2_i32_131 : i32
      %164 = arith.index_cast %163 : i32 to index
      %c0_132 = arith.constant 0 : index
      %c0_133 = arith.constant 0 : index
      %165 = vector.load %arg15[%164, %c0_132, %c0_133] : memref<66x63x64xbf16, #tpu.memory_space<vmem>>, vector<1x63x64xbf16>
      %166 = vector.shape_cast %165 : vector<1x63x64xbf16> to vector<63x64xbf16>
      %c2_134 = arith.constant 2 : index
      %c0_135 = arith.constant 0 : index
      %c0_136 = arith.constant 0 : index
      %167 = vector.load %arg4[%c2_134, %c0_135, %c0_136] : memref<4x64x32xbf16, #tpu.memory_space<vmem>>, vector<1x64x32xbf16>
      %168 = vector.shape_cast %167 : vector<1x64x32xbf16> to vector<64x32xbf16>
      %cst_137 = arith.constant dense<0.000000e+00> : vector<63x32xf32>
      %169 = tpu.matmul %166, %168, %cst_137 {dimension_numbers = #tpu.dot_dimension_numbers<[1], [0], [0], [1], [0, 0, 1, 1], [], []>} : vector<63x64xbf16>, vector<64x32xbf16>, vector<63x32xf32> -> vector<63x32xf32>
      %170 = arith.addf %161, %169 : vector<63x32xf32>
      %c2_i32_138 = arith.constant 2 : i32
      %171 = arith.muli %c2_i32_138, %arg20 : i32
      %c3_i32 = arith.constant 3 : i32
      %172 = arith.addi %171, %c3_i32 : i32
      %173 = arith.index_cast %172 : i32 to index
      %c0_139 = arith.constant 0 : index
      %c0_140 = arith.constant 0 : index
      %174 = vector.load %arg15[%173, %c0_139, %c0_140] : memref<66x63x64xbf16, #tpu.memory_space<vmem>>, vector<1x63x64xbf16>
      %175 = vector.shape_cast %174 : vector<1x63x64xbf16> to vector<63x64xbf16>
      %c3_141 = arith.constant 3 : index
      %c0_142 = arith.constant 0 : index
      %c0_143 = arith.constant 0 : index
      %176 = vector.load %arg4[%c3_141, %c0_142, %c0_143] : memref<4x64x32xbf16, #tpu.memory_space<vmem>>, vector<1x64x32xbf16>
      %177 = vector.shape_cast %176 : vector<1x64x32xbf16> to vector<64x32xbf16>
      %cst_144 = arith.constant dense<0.000000e+00> : vector<63x32xf32>
      %178 = tpu.matmul %175, %177, %cst_144 {dimension_numbers = #tpu.dot_dimension_numbers<[1], [0], [0], [1], [0, 0, 1, 1], [], []>} : vector<63x64xbf16>, vector<64x32xbf16>, vector<63x32xf32> -> vector<63x32xf32>
      %179 = arith.addf %170, %178 : vector<63x32xf32>
      %cst_145 = arith.constant dense<0.000000e+00> : vector<32x32xf32>
      %180 = tpu.matmul %42, %179, %cst_145 {dimension_numbers = #tpu.dot_dimension_numbers<[1], [0], [0], [1], [0, 0, 1, 1], [], []>} : vector<32x63xf32>, vector<63x32xf32>, vector<32x32xf32> -> vector<32x32xf32>
      %c0_146 = arith.constant 0 : index
      %c0_147 = arith.constant 0 : index
      %181 = vector.load %arg5[%c0_146, %c0_147] : memref<1x32xf32, #tpu.memory_space<vmem>>, vector<1x32xf32>
      %182 = vector.broadcast %181 : vector<1x32xf32> to vector<32x32xf32>
      %183 = arith.addf %180, %182 : vector<32x32xf32>
      %cst_148 = arith.constant 0.000000e+00 : f32
      %184 = vector.broadcast %cst_148 : f32 to vector<32x32xf32>
      %185 = arith.cmpf ogt, %183, %184 : vector<32x32xf32>
      %cst_149 = arith.constant 2.000000e-01 : f32
      %186 = vector.broadcast %cst_149 : f32 to vector<32x32xf32>
      %187 = arith.mulf %186, %183 : vector<32x32xf32>
      %188 = arith.select %185, %183, %187 : vector<32x32xi1>, vector<32x32xf32>
      %c1_i32_150 = arith.constant 1 : i32
      %189 = arith.addi %arg20, %c1_i32_150 : i32
      %190 = arith.truncf %188 : vector<32x32xf32> to vector<32x32xbf16>
      %cst_151 = arith.constant 0.000000e+00 : bf16
      %191 = vector.broadcast %cst_151 : bf16 to vector<1x32xbf16>
      %192 = vector.extract_strided_slice %190 {offsets = [0, 0], sizes = [30, 32], strides = [1, 1]} : vector<32x32xbf16> to vector<30x32xbf16>
      %193 = arith.index_cast %189 : i32 to index
      %c1_152 = arith.constant 1 : index
      %c0_153 = arith.constant 0 : index
      %194 = vector.load %arg16[%193, %c1_152, %c0_153] : memref<34x31x128xbf16, #tpu.memory_space<vmem>>, vector<1x30x32xbf16>
      %195 = vector.shape_cast %194 : vector<1x30x32xbf16> to vector<30x32xbf16>
      %196 = vector.shape_cast %192 : vector<30x32xbf16> to vector<1x30x32xbf16>
      tpu.vector_store %arg16[%193, %c1_152, %c0_153], %196 {strides = array<i32>} : memref<34x31x128xbf16, #tpu.memory_space<vmem>>, vector<1x30x32xbf16>,
      %197 = arith.index_cast %189 : i32 to index
      %c0_154 = arith.constant 0 : index
      %c0_155 = arith.constant 0 : index
      %198 = vector.load %arg16[%197, %c0_154, %c0_155] : memref<34x31x128xbf16, #tpu.memory_space<vmem>>, vector<1x1x32xbf16>
      %199 = vector.shape_cast %198 : vector<1x1x32xbf16> to vector<1x32xbf16>
      %200 = vector.shape_cast %191 : vector<1x32xbf16> to vector<1x1x32xbf16>
      tpu.vector_store %arg16[%197, %c0_154, %c0_155], %200 {strides = array<i32>} : memref<34x31x128xbf16, #tpu.memory_space<vmem>>, vector<1x1x32xbf16>,
      %201 = vector.extract_strided_slice %190 {offsets = [0, 0], sizes = [31, 32], strides = [1, 1]} : vector<32x32xbf16> to vector<31x32xbf16>
      %202 = arith.index_cast %189 : i32 to index
      %c0_156 = arith.constant 0 : index
      %c32 = arith.constant 32 : index
      %203 = vector.load %arg16[%202, %c0_156, %c32] : memref<34x31x128xbf16, #tpu.memory_space<vmem>>, vector<1x31x32xbf16>
      %204 = vector.shape_cast %203 : vector<1x31x32xbf16> to vector<31x32xbf16>
      %205 = vector.shape_cast %201 : vector<31x32xbf16> to vector<1x31x32xbf16>
      tpu.vector_store %arg16[%202, %c0_156, %c32], %205 {strides = array<i32>} : memref<34x31x128xbf16, #tpu.memory_space<vmem>>, vector<1x31x32xbf16>,
      %206 = vector.extract_strided_slice %190 {offsets = [1, 0], sizes = [31, 32], strides = [1, 1]} : vector<32x32xbf16> to vector<31x32xbf16>
      %207 = arith.index_cast %189 : i32 to index
      %c0_157 = arith.constant 0 : index
      %c64 = arith.constant 64 : index
      %208 = vector.load %arg16[%207, %c0_157, %c64] : memref<34x31x128xbf16, #tpu.memory_space<vmem>>, vector<1x31x32xbf16>
      %209 = vector.shape_cast %208 : vector<1x31x32xbf16> to vector<31x32xbf16>
      %210 = vector.shape_cast %206 : vector<31x32xbf16> to vector<1x31x32xbf16>
      tpu.vector_store %arg16[%207, %c0_157, %c64], %210 {strides = array<i32>} : memref<34x31x128xbf16, #tpu.memory_space<vmem>>, vector<1x31x32xbf16>,
      %211 = vector.extract_strided_slice %190 {offsets = [2, 0], sizes = [30, 32], strides = [1, 1]} : vector<32x32xbf16> to vector<30x32xbf16>
      %212 = arith.index_cast %189 : i32 to index
      %c0_158 = arith.constant 0 : index
      %c96 = arith.constant 96 : index
      %213 = vector.load %arg16[%212, %c0_158, %c96] : memref<34x31x128xbf16, #tpu.memory_space<vmem>>, vector<1x30x32xbf16>
      %214 = vector.shape_cast %213 : vector<1x30x32xbf16> to vector<30x32xbf16>
      %215 = vector.shape_cast %211 : vector<30x32xbf16> to vector<1x30x32xbf16>
      tpu.vector_store %arg16[%212, %c0_158, %c96], %215 {strides = array<i32>} : memref<34x31x128xbf16, #tpu.memory_space<vmem>>, vector<1x30x32xbf16>,
      %216 = arith.index_cast %189 : i32 to index
      %c30 = arith.constant 30 : index
      %c96_159 = arith.constant 96 : index
      %217 = vector.load %arg16[%216, %c30, %c96_159] : memref<34x31x128xbf16, #tpu.memory_space<vmem>>, vector<1x1x32xbf16>
      %218 = vector.shape_cast %217 : vector<1x1x32xbf16> to vector<1x32xbf16>
      %219 = vector.shape_cast %191 : vector<1x32xbf16> to vector<1x1x32xbf16>
      tpu.vector_store %arg16[%216, %c30, %c96_159], %219 {strides = array<i32>} : memref<34x31x128xbf16, #tpu.memory_space<vmem>>, vector<1x1x32xbf16>,
    }
    %c32_i32_31 = arith.constant 32 : i32
    %44 = tpu.iota {dimensions = array<i32: 0>} : vector<16x31xi32>
    %45 = tpu.iota {dimensions = array<i32: 1>} : vector<16x31xi32>
    %c2_i32_32 = arith.constant 2 : i32
    %46 = vector.broadcast %c2_i32_32 : i32 to vector<16x31xi32>
    %47 = arith.muli %46, %44 : vector<16x31xi32>
    %48 = arith.cmpi eq, %45, %47 : vector<16x31xi32>
    %49 = arith.extui %48 : vector<16x31xi1> to vector<16x31xi32>
    %50 = arith.sitofp %49 : vector<16x31xi32> to vector<16x31xf32>
    %c0_i32_33 = arith.constant 0 : i32
    %c16_i32_34 = arith.constant 16 : i32
    %51 = arith.addi %c0_i32_33, %c16_i32_34 : i32
    %c1_i32_35 = arith.constant 1 : i32
    scf.for %arg20 = %c0_i32_33 to %51 step %c1_i32_35  : i32 {
      %c2_i32_114 = arith.constant 2 : i32
      %145 = arith.muli %c2_i32_114, %arg20 : i32
      %c0_i32_115 = arith.constant 0 : i32
      %146 = arith.addi %145, %c0_i32_115 : i32
      %147 = arith.index_cast %146 : i32 to index
      %c0_116 = arith.constant 0 : index
      %c0_117 = arith.constant 0 : index
      %148 = vector.load %arg16[%147, %c0_116, %c0_117] : memref<34x31x128xbf16, #tpu.memory_space<vmem>>, vector<1x31x128xbf16>
      %149 = vector.shape_cast %148 : vector<1x31x128xbf16> to vector<31x128xbf16>
      %c0_118 = arith.constant 0 : index
      %c0_119 = arith.constant 0 : index
      %c0_120 = arith.constant 0 : index
      %150 = vector.load %arg6[%c0_118, %c0_119, %c0_120] : memref<4x128x64xbf16, #tpu.memory_space<vmem>>, vector<1x128x64xbf16>
      %151 = vector.shape_cast %150 : vector<1x128x64xbf16> to vector<128x64xbf16>
      %cst_121 = arith.constant dense<0.000000e+00> : vector<31x64xf32>
      %152 = tpu.matmul %149, %151, %cst_121 {dimension_numbers = #tpu.dot_dimension_numbers<[1], [0], [0], [1], [0, 0, 1, 1], [], []>} : vector<31x128xbf16>, vector<128x64xbf16>, vector<31x64xf32> -> vector<31x64xf32>
      %c2_i32_122 = arith.constant 2 : i32
      %153 = arith.muli %c2_i32_122, %arg20 : i32
      %c1_i32_123 = arith.constant 1 : i32
      %154 = arith.addi %153, %c1_i32_123 : i32
      %155 = arith.index_cast %154 : i32 to index
      %c0_124 = arith.constant 0 : index
      %c0_125 = arith.constant 0 : index
      %156 = vector.load %arg16[%155, %c0_124, %c0_125] : memref<34x31x128xbf16, #tpu.memory_space<vmem>>, vector<1x31x128xbf16>
      %157 = vector.shape_cast %156 : vector<1x31x128xbf16> to vector<31x128xbf16>
      %c1_126 = arith.constant 1 : index
      %c0_127 = arith.constant 0 : index
      %c0_128 = arith.constant 0 : index
      %158 = vector.load %arg6[%c1_126, %c0_127, %c0_128] : memref<4x128x64xbf16, #tpu.memory_space<vmem>>, vector<1x128x64xbf16>
      %159 = vector.shape_cast %158 : vector<1x128x64xbf16> to vector<128x64xbf16>
      %cst_129 = arith.constant dense<0.000000e+00> : vector<31x64xf32>
      %160 = tpu.matmul %157, %159, %cst_129 {dimension_numbers = #tpu.dot_dimension_numbers<[1], [0], [0], [1], [0, 0, 1, 1], [], []>} : vector<31x128xbf16>, vector<128x64xbf16>, vector<31x64xf32> -> vector<31x64xf32>
      %161 = arith.addf %152, %160 : vector<31x64xf32>
      %c2_i32_130 = arith.constant 2 : i32
      %162 = arith.muli %c2_i32_130, %arg20 : i32
      %c2_i32_131 = arith.constant 2 : i32
      %163 = arith.addi %162, %c2_i32_131 : i32
      %164 = arith.index_cast %163 : i32 to index
      %c0_132 = arith.constant 0 : index
      %c0_133 = arith.constant 0 : index
      %165 = vector.load %arg16[%164, %c0_132, %c0_133] : memref<34x31x128xbf16, #tpu.memory_space<vmem>>, vector<1x31x128xbf16>
      %166 = vector.shape_cast %165 : vector<1x31x128xbf16> to vector<31x128xbf16>
      %c2_134 = arith.constant 2 : index
      %c0_135 = arith.constant 0 : index
      %c0_136 = arith.constant 0 : index
      %167 = vector.load %arg6[%c2_134, %c0_135, %c0_136] : memref<4x128x64xbf16, #tpu.memory_space<vmem>>, vector<1x128x64xbf16>
      %168 = vector.shape_cast %167 : vector<1x128x64xbf16> to vector<128x64xbf16>
      %cst_137 = arith.constant dense<0.000000e+00> : vector<31x64xf32>
      %169 = tpu.matmul %166, %168, %cst_137 {dimension_numbers = #tpu.dot_dimension_numbers<[1], [0], [0], [1], [0, 0, 1, 1], [], []>} : vector<31x128xbf16>, vector<128x64xbf16>, vector<31x64xf32> -> vector<31x64xf32>
      %170 = arith.addf %161, %169 : vector<31x64xf32>
      %c2_i32_138 = arith.constant 2 : i32
      %171 = arith.muli %c2_i32_138, %arg20 : i32
      %c3_i32 = arith.constant 3 : i32
      %172 = arith.addi %171, %c3_i32 : i32
      %173 = arith.index_cast %172 : i32 to index
      %c0_139 = arith.constant 0 : index
      %c0_140 = arith.constant 0 : index
      %174 = vector.load %arg16[%173, %c0_139, %c0_140] : memref<34x31x128xbf16, #tpu.memory_space<vmem>>, vector<1x31x128xbf16>
      %175 = vector.shape_cast %174 : vector<1x31x128xbf16> to vector<31x128xbf16>
      %c3_141 = arith.constant 3 : index
      %c0_142 = arith.constant 0 : index
      %c0_143 = arith.constant 0 : index
      %176 = vector.load %arg6[%c3_141, %c0_142, %c0_143] : memref<4x128x64xbf16, #tpu.memory_space<vmem>>, vector<1x128x64xbf16>
      %177 = vector.shape_cast %176 : vector<1x128x64xbf16> to vector<128x64xbf16>
      %cst_144 = arith.constant dense<0.000000e+00> : vector<31x64xf32>
      %178 = tpu.matmul %175, %177, %cst_144 {dimension_numbers = #tpu.dot_dimension_numbers<[1], [0], [0], [1], [0, 0, 1, 1], [], []>} : vector<31x128xbf16>, vector<128x64xbf16>, vector<31x64xf32> -> vector<31x64xf32>
      %179 = arith.addf %170, %178 : vector<31x64xf32>
      %cst_145 = arith.constant dense<0.000000e+00> : vector<16x64xf32>
      %180 = tpu.matmul %50, %179, %cst_145 {dimension_numbers = #tpu.dot_dimension_numbers<[1], [0], [0], [1], [0, 0, 1, 1], [], []>} : vector<16x31xf32>, vector<31x64xf32>, vector<16x64xf32> -> vector<16x64xf32>
      %c0_146 = arith.constant 0 : index
      %c0_147 = arith.constant 0 : index
      %181 = vector.load %arg7[%c0_146, %c0_147] : memref<1x64xf32, #tpu.memory_space<vmem>>, vector<1x64xf32>
      %182 = vector.broadcast %181 : vector<1x64xf32> to vector<16x64xf32>
      %183 = arith.addf %180, %182 : vector<16x64xf32>
      %cst_148 = arith.constant 0.000000e+00 : f32
      %184 = vector.broadcast %cst_148 : f32 to vector<16x64xf32>
      %185 = arith.cmpf ogt, %183, %184 : vector<16x64xf32>
      %cst_149 = arith.constant 2.000000e-01 : f32
      %186 = vector.broadcast %cst_149 : f32 to vector<16x64xf32>
      %187 = arith.mulf %186, %183 : vector<16x64xf32>
      %188 = arith.select %185, %183, %187 : vector<16x64xi1>, vector<16x64xf32>
      %c1_i32_150 = arith.constant 1 : i32
      %189 = arith.addi %arg20, %c1_i32_150 : i32
      %190 = arith.truncf %188 : vector<16x64xf32> to vector<16x64xbf16>
      %cst_151 = arith.constant 0.000000e+00 : bf16
      %191 = vector.broadcast %cst_151 : bf16 to vector<1x64xbf16>
      %192 = vector.extract_strided_slice %190 {offsets = [0, 0], sizes = [14, 64], strides = [1, 1]} : vector<16x64xbf16> to vector<14x64xbf16>
      %193 = arith.index_cast %189 : i32 to index
      %c1_152 = arith.constant 1 : index
      %c0_153 = arith.constant 0 : index
      %194 = vector.load %arg17[%193, %c1_152, %c0_153] : memref<18x15x256xbf16, #tpu.memory_space<vmem>>, vector<1x14x64xbf16>
      %195 = vector.shape_cast %194 : vector<1x14x64xbf16> to vector<14x64xbf16>
      %196 = vector.shape_cast %192 : vector<14x64xbf16> to vector<1x14x64xbf16>
      tpu.vector_store %arg17[%193, %c1_152, %c0_153], %196 {strides = array<i32>} : memref<18x15x256xbf16, #tpu.memory_space<vmem>>, vector<1x14x64xbf16>,
      %197 = arith.index_cast %189 : i32 to index
      %c0_154 = arith.constant 0 : index
      %c0_155 = arith.constant 0 : index
      %198 = vector.load %arg17[%197, %c0_154, %c0_155] : memref<18x15x256xbf16, #tpu.memory_space<vmem>>, vector<1x1x64xbf16>
      %199 = vector.shape_cast %198 : vector<1x1x64xbf16> to vector<1x64xbf16>
      %200 = vector.shape_cast %191 : vector<1x64xbf16> to vector<1x1x64xbf16>
      tpu.vector_store %arg17[%197, %c0_154, %c0_155], %200 {strides = array<i32>} : memref<18x15x256xbf16, #tpu.memory_space<vmem>>, vector<1x1x64xbf16>,
      %201 = vector.extract_strided_slice %190 {offsets = [0, 0], sizes = [15, 64], strides = [1, 1]} : vector<16x64xbf16> to vector<15x64xbf16>
      %202 = arith.index_cast %189 : i32 to index
      %c0_156 = arith.constant 0 : index
      %c64 = arith.constant 64 : index
      %203 = vector.load %arg17[%202, %c0_156, %c64] : memref<18x15x256xbf16, #tpu.memory_space<vmem>>, vector<1x15x64xbf16>
      %204 = vector.shape_cast %203 : vector<1x15x64xbf16> to vector<15x64xbf16>
      %205 = vector.shape_cast %201 : vector<15x64xbf16> to vector<1x15x64xbf16>
      tpu.vector_store %arg17[%202, %c0_156, %c64], %205 {strides = array<i32>} : memref<18x15x256xbf16, #tpu.memory_space<vmem>>, vector<1x15x64xbf16>,
      %206 = vector.extract_strided_slice %190 {offsets = [1, 0], sizes = [15, 64], strides = [1, 1]} : vector<16x64xbf16> to vector<15x64xbf16>
      %207 = arith.index_cast %189 : i32 to index
      %c0_157 = arith.constant 0 : index
      %c128 = arith.constant 128 : index
      %208 = vector.load %arg17[%207, %c0_157, %c128] : memref<18x15x256xbf16, #tpu.memory_space<vmem>>, vector<1x15x64xbf16>
      %209 = vector.shape_cast %208 : vector<1x15x64xbf16> to vector<15x64xbf16>
      %210 = vector.shape_cast %206 : vector<15x64xbf16> to vector<1x15x64xbf16>
      tpu.vector_store %arg17[%207, %c0_157, %c128], %210 {strides = array<i32>} : memref<18x15x256xbf16, #tpu.memory_space<vmem>>, vector<1x15x64xbf16>,
      %211 = vector.extract_strided_slice %190 {offsets = [2, 0], sizes = [14, 64], strides = [1, 1]} : vector<16x64xbf16> to vector<14x64xbf16>
      %212 = arith.index_cast %189 : i32 to index
      %c0_158 = arith.constant 0 : index
      %c192 = arith.constant 192 : index
      %213 = vector.load %arg17[%212, %c0_158, %c192] : memref<18x15x256xbf16, #tpu.memory_space<vmem>>, vector<1x14x64xbf16>
      %214 = vector.shape_cast %213 : vector<1x14x64xbf16> to vector<14x64xbf16>
      %215 = vector.shape_cast %211 : vector<14x64xbf16> to vector<1x14x64xbf16>
      tpu.vector_store %arg17[%212, %c0_158, %c192], %215 {strides = array<i32>} : memref<18x15x256xbf16, #tpu.memory_space<vmem>>, vector<1x14x64xbf16>,
      %216 = arith.index_cast %189 : i32 to index
      %c14 = arith.constant 14 : index
      %c192_159 = arith.constant 192 : index
      %217 = vector.load %arg17[%216, %c14, %c192_159] : memref<18x15x256xbf16, #tpu.memory_space<vmem>>, vector<1x1x64xbf16>
      %218 = vector.shape_cast %217 : vector<1x1x64xbf16> to vector<1x64xbf16>
      %219 = vector.shape_cast %191 : vector<1x64xbf16> to vector<1x1x64xbf16>
      tpu.vector_store %arg17[%216, %c14, %c192_159], %219 {strides = array<i32>} : memref<18x15x256xbf16, #tpu.memory_space<vmem>>, vector<1x1x64xbf16>,
    }
    %c16_i32_36 = arith.constant 16 : i32
    %52 = tpu.iota {dimensions = array<i32: 0>} : vector<8x15xi32>
    %53 = tpu.iota {dimensions = array<i32: 1>} : vector<8x15xi32>
    %c2_i32_37 = arith.constant 2 : i32
    %54 = vector.broadcast %c2_i32_37 : i32 to vector<8x15xi32>
    %55 = arith.muli %54, %52 : vector<8x15xi32>
    %56 = arith.cmpi eq, %53, %55 : vector<8x15xi32>
    %57 = arith.extui %56 : vector<8x15xi1> to vector<8x15xi32>
    %58 = arith.sitofp %57 : vector<8x15xi32> to vector<8x15xf32>
    %c0_i32_38 = arith.constant 0 : i32
    %c8_i32 = arith.constant 8 : i32
    %59 = arith.addi %c0_i32_38, %c8_i32 : i32
    %c1_i32_39 = arith.constant 1 : i32
    scf.for %arg20 = %c0_i32_38 to %59 step %c1_i32_39  : i32 {
      %c2_i32_114 = arith.constant 2 : i32
      %145 = arith.muli %c2_i32_114, %arg20 : i32
      %c0_i32_115 = arith.constant 0 : i32
      %146 = arith.addi %145, %c0_i32_115 : i32
      %147 = arith.index_cast %146 : i32 to index
      %c0_116 = arith.constant 0 : index
      %c0_117 = arith.constant 0 : index
      %148 = vector.load %arg17[%147, %c0_116, %c0_117] : memref<18x15x256xbf16, #tpu.memory_space<vmem>>, vector<1x15x256xbf16>
      %149 = vector.shape_cast %148 : vector<1x15x256xbf16> to vector<15x256xbf16>
      %c0_118 = arith.constant 0 : index
      %c0_119 = arith.constant 0 : index
      %c0_120 = arith.constant 0 : index
      %150 = vector.load %arg8[%c0_118, %c0_119, %c0_120] : memref<4x256x64xbf16, #tpu.memory_space<vmem>>, vector<1x256x64xbf16>
      %151 = vector.shape_cast %150 : vector<1x256x64xbf16> to vector<256x64xbf16>
      %cst_121 = arith.constant dense<0.000000e+00> : vector<15x64xf32>
      %152 = tpu.matmul %149, %151, %cst_121 {dimension_numbers = #tpu.dot_dimension_numbers<[1], [0], [0], [1], [0, 0, 1, 1], [], []>} : vector<15x256xbf16>, vector<256x64xbf16>, vector<15x64xf32> -> vector<15x64xf32>
      %c2_i32_122 = arith.constant 2 : i32
      %153 = arith.muli %c2_i32_122, %arg20 : i32
      %c1_i32_123 = arith.constant 1 : i32
      %154 = arith.addi %153, %c1_i32_123 : i32
      %155 = arith.index_cast %154 : i32 to index
      %c0_124 = arith.constant 0 : index
      %c0_125 = arith.constant 0 : index
      %156 = vector.load %arg17[%155, %c0_124, %c0_125] : memref<18x15x256xbf16, #tpu.memory_space<vmem>>, vector<1x15x256xbf16>
      %157 = vector.shape_cast %156 : vector<1x15x256xbf16> to vector<15x256xbf16>
      %c1_126 = arith.constant 1 : index
      %c0_127 = arith.constant 0 : index
      %c0_128 = arith.constant 0 : index
      %158 = vector.load %arg8[%c1_126, %c0_127, %c0_128] : memref<4x256x64xbf16, #tpu.memory_space<vmem>>, vector<1x256x64xbf16>
      %159 = vector.shape_cast %158 : vector<1x256x64xbf16> to vector<256x64xbf16>
      %cst_129 = arith.constant dense<0.000000e+00> : vector<15x64xf32>
      %160 = tpu.matmul %157, %159, %cst_129 {dimension_numbers = #tpu.dot_dimension_numbers<[1], [0], [0], [1], [0, 0, 1, 1], [], []>} : vector<15x256xbf16>, vector<256x64xbf16>, vector<15x64xf32> -> vector<15x64xf32>
      %161 = arith.addf %152, %160 : vector<15x64xf32>
      %c2_i32_130 = arith.constant 2 : i32
      %162 = arith.muli %c2_i32_130, %arg20 : i32
      %c2_i32_131 = arith.constant 2 : i32
      %163 = arith.addi %162, %c2_i32_131 : i32
      %164 = arith.index_cast %163 : i32 to index
      %c0_132 = arith.constant 0 : index
      %c0_133 = arith.constant 0 : index
      %165 = vector.load %arg17[%164, %c0_132, %c0_133] : memref<18x15x256xbf16, #tpu.memory_space<vmem>>, vector<1x15x256xbf16>
      %166 = vector.shape_cast %165 : vector<1x15x256xbf16> to vector<15x256xbf16>
      %c2_134 = arith.constant 2 : index
      %c0_135 = arith.constant 0 : index
      %c0_136 = arith.constant 0 : index
      %167 = vector.load %arg8[%c2_134, %c0_135, %c0_136] : memref<4x256x64xbf16, #tpu.memory_space<vmem>>, vector<1x256x64xbf16>
      %168 = vector.shape_cast %167 : vector<1x256x64xbf16> to vector<256x64xbf16>
      %cst_137 = arith.constant dense<0.000000e+00> : vector<15x64xf32>
      %169 = tpu.matmul %166, %168, %cst_137 {dimension_numbers = #tpu.dot_dimension_numbers<[1], [0], [0], [1], [0, 0, 1, 1], [], []>} : vector<15x256xbf16>, vector<256x64xbf16>, vector<15x64xf32> -> vector<15x64xf32>
      %170 = arith.addf %161, %169 : vector<15x64xf32>
      %c2_i32_138 = arith.constant 2 : i32
      %171 = arith.muli %c2_i32_138, %arg20 : i32
      %c3_i32 = arith.constant 3 : i32
      %172 = arith.addi %171, %c3_i32 : i32
      %173 = arith.index_cast %172 : i32 to index
      %c0_139 = arith.constant 0 : index
      %c0_140 = arith.constant 0 : index
      %174 = vector.load %arg17[%173, %c0_139, %c0_140] : memref<18x15x256xbf16, #tpu.memory_space<vmem>>, vector<1x15x256xbf16>
      %175 = vector.shape_cast %174 : vector<1x15x256xbf16> to vector<15x256xbf16>
      %c3_141 = arith.constant 3 : index
      %c0_142 = arith.constant 0 : index
      %c0_143 = arith.constant 0 : index
      %176 = vector.load %arg8[%c3_141, %c0_142, %c0_143] : memref<4x256x64xbf16, #tpu.memory_space<vmem>>, vector<1x256x64xbf16>
      %177 = vector.shape_cast %176 : vector<1x256x64xbf16> to vector<256x64xbf16>
      %cst_144 = arith.constant dense<0.000000e+00> : vector<15x64xf32>
      %178 = tpu.matmul %175, %177, %cst_144 {dimension_numbers = #tpu.dot_dimension_numbers<[1], [0], [0], [1], [0, 0, 1, 1], [], []>} : vector<15x256xbf16>, vector<256x64xbf16>, vector<15x64xf32> -> vector<15x64xf32>
      %179 = arith.addf %170, %178 : vector<15x64xf32>
      %cst_145 = arith.constant dense<0.000000e+00> : vector<8x64xf32>
      %180 = tpu.matmul %58, %179, %cst_145 {dimension_numbers = #tpu.dot_dimension_numbers<[1], [0], [0], [1], [0, 0, 1, 1], [], []>} : vector<8x15xf32>, vector<15x64xf32>, vector<8x64xf32> -> vector<8x64xf32>
      %c0_146 = arith.constant 0 : index
      %c0_147 = arith.constant 0 : index
      %181 = vector.load %arg9[%c0_146, %c0_147] : memref<1x64xf32, #tpu.memory_space<vmem>>, vector<1x64xf32>
      %182 = vector.broadcast %181 : vector<1x64xf32> to vector<8x64xf32>
      %183 = arith.addf %180, %182 : vector<8x64xf32>
      %cst_148 = arith.constant 0.000000e+00 : f32
      %184 = vector.broadcast %cst_148 : f32 to vector<8x64xf32>
      %185 = arith.cmpf ogt, %183, %184 : vector<8x64xf32>
      %cst_149 = arith.constant 2.000000e-01 : f32
      %186 = vector.broadcast %cst_149 : f32 to vector<8x64xf32>
      %187 = arith.mulf %186, %183 : vector<8x64xf32>
      %188 = arith.select %185, %183, %187 : vector<8x64xi1>, vector<8x64xf32>
      %c1_i32_150 = arith.constant 1 : i32
      %189 = arith.addi %arg20, %c1_i32_150 : i32
      %190 = arith.truncf %188 : vector<8x64xf32> to vector<8x64xbf16>
      %cst_151 = arith.constant 0.000000e+00 : bf16
      %191 = vector.broadcast %cst_151 : bf16 to vector<1x64xbf16>
      %192 = vector.extract_strided_slice %190 {offsets = [0, 0], sizes = [6, 64], strides = [1, 1]} : vector<8x64xbf16> to vector<6x64xbf16>
      %193 = arith.index_cast %189 : i32 to index
      %c1_152 = arith.constant 1 : index
      %c0_153 = arith.constant 0 : index
      %194 = vector.load %arg18[%193, %c1_152, %c0_153] : memref<10x7x256xbf16, #tpu.memory_space<vmem>>, vector<1x6x64xbf16>
      %195 = vector.shape_cast %194 : vector<1x6x64xbf16> to vector<6x64xbf16>
      %196 = vector.shape_cast %192 : vector<6x64xbf16> to vector<1x6x64xbf16>
      tpu.vector_store %arg18[%193, %c1_152, %c0_153], %196 {strides = array<i32>} : memref<10x7x256xbf16, #tpu.memory_space<vmem>>, vector<1x6x64xbf16>,
      %197 = arith.index_cast %189 : i32 to index
      %c0_154 = arith.constant 0 : index
      %c0_155 = arith.constant 0 : index
      %198 = vector.load %arg18[%197, %c0_154, %c0_155] : memref<10x7x256xbf16, #tpu.memory_space<vmem>>, vector<1x1x64xbf16>
      %199 = vector.shape_cast %198 : vector<1x1x64xbf16> to vector<1x64xbf16>
      %200 = vector.shape_cast %191 : vector<1x64xbf16> to vector<1x1x64xbf16>
      tpu.vector_store %arg18[%197, %c0_154, %c0_155], %200 {strides = array<i32>} : memref<10x7x256xbf16, #tpu.memory_space<vmem>>, vector<1x1x64xbf16>,
      %201 = vector.extract_strided_slice %190 {offsets = [0, 0], sizes = [7, 64], strides = [1, 1]} : vector<8x64xbf16> to vector<7x64xbf16>
      %202 = arith.index_cast %189 : i32 to index
      %c0_156 = arith.constant 0 : index
      %c64 = arith.constant 64 : index
      %203 = vector.load %arg18[%202, %c0_156, %c64] : memref<10x7x256xbf16, #tpu.memory_space<vmem>>, vector<1x7x64xbf16>
      %204 = vector.shape_cast %203 : vector<1x7x64xbf16> to vector<7x64xbf16>
      %205 = vector.shape_cast %201 : vector<7x64xbf16> to vector<1x7x64xbf16>
      tpu.vector_store %arg18[%202, %c0_156, %c64], %205 {strides = array<i32>} : memref<10x7x256xbf16, #tpu.memory_space<vmem>>, vector<1x7x64xbf16>,
      %206 = vector.extract_strided_slice %190 {offsets = [1, 0], sizes = [7, 64], strides = [1, 1]} : vector<8x64xbf16> to vector<7x64xbf16>
      %207 = arith.index_cast %189 : i32 to index
      %c0_157 = arith.constant 0 : index
      %c128 = arith.constant 128 : index
      %208 = vector.load %arg18[%207, %c0_157, %c128] : memref<10x7x256xbf16, #tpu.memory_space<vmem>>, vector<1x7x64xbf16>
      %209 = vector.shape_cast %208 : vector<1x7x64xbf16> to vector<7x64xbf16>
      %210 = vector.shape_cast %206 : vector<7x64xbf16> to vector<1x7x64xbf16>
      tpu.vector_store %arg18[%207, %c0_157, %c128], %210 {strides = array<i32>} : memref<10x7x256xbf16, #tpu.memory_space<vmem>>, vector<1x7x64xbf16>,
      %211 = vector.extract_strided_slice %190 {offsets = [2, 0], sizes = [6, 64], strides = [1, 1]} : vector<8x64xbf16> to vector<6x64xbf16>
      %212 = arith.index_cast %189 : i32 to index
      %c0_158 = arith.constant 0 : index
      %c192 = arith.constant 192 : index
      %213 = vector.load %arg18[%212, %c0_158, %c192] : memref<10x7x256xbf16, #tpu.memory_space<vmem>>, vector<1x6x64xbf16>
      %214 = vector.shape_cast %213 : vector<1x6x64xbf16> to vector<6x64xbf16>
      %215 = vector.shape_cast %211 : vector<6x64xbf16> to vector<1x6x64xbf16>
      tpu.vector_store %arg18[%212, %c0_158, %c192], %215 {strides = array<i32>} : memref<10x7x256xbf16, #tpu.memory_space<vmem>>, vector<1x6x64xbf16>,
      %216 = arith.index_cast %189 : i32 to index
      %c6 = arith.constant 6 : index
      %c192_159 = arith.constant 192 : index
      %217 = vector.load %arg18[%216, %c6, %c192_159] : memref<10x7x256xbf16, #tpu.memory_space<vmem>>, vector<1x1x64xbf16>
      %218 = vector.shape_cast %217 : vector<1x1x64xbf16> to vector<1x64xbf16>
      %219 = vector.shape_cast %191 : vector<1x64xbf16> to vector<1x1x64xbf16>
      tpu.vector_store %arg18[%216, %c6, %c192_159], %219 {strides = array<i32>} : memref<10x7x256xbf16, #tpu.memory_space<vmem>>, vector<1x1x64xbf16>,
    }
    %c8_i32_40 = arith.constant 8 : i32
    %60 = tpu.iota {dimensions = array<i32: 0>} : vector<4x7xi32>
    %61 = tpu.iota {dimensions = array<i32: 1>} : vector<4x7xi32>
    %c2_i32_41 = arith.constant 2 : i32
    %62 = vector.broadcast %c2_i32_41 : i32 to vector<4x7xi32>
    %63 = arith.muli %62, %60 : vector<4x7xi32>
    %64 = arith.cmpi eq, %61, %63 : vector<4x7xi32>
    %65 = arith.extui %64 : vector<4x7xi1> to vector<4x7xi32>
    %66 = arith.sitofp %65 : vector<4x7xi32> to vector<4x7xf32>
    %c0_i32_42 = arith.constant 0 : i32
    %c4_i32 = arith.constant 4 : i32
    %67 = arith.addi %c0_i32_42, %c4_i32 : i32
    %c1_i32_43 = arith.constant 1 : i32
    scf.for %arg20 = %c0_i32_42 to %67 step %c1_i32_43  : i32 {
      %c2_i32_114 = arith.constant 2 : i32
      %145 = arith.muli %c2_i32_114, %arg20 : i32
      %c0_i32_115 = arith.constant 0 : i32
      %146 = arith.addi %145, %c0_i32_115 : i32
      %147 = arith.index_cast %146 : i32 to index
      %c0_116 = arith.constant 0 : index
      %c0_117 = arith.constant 0 : index
      %148 = vector.load %arg18[%147, %c0_116, %c0_117] : memref<10x7x256xbf16, #tpu.memory_space<vmem>>, vector<1x7x256xbf16>
      %149 = vector.shape_cast %148 : vector<1x7x256xbf16> to vector<7x256xbf16>
      %c0_118 = arith.constant 0 : index
      %c0_119 = arith.constant 0 : index
      %c0_120 = arith.constant 0 : index
      %150 = vector.load %arg10[%c0_118, %c0_119, %c0_120] : memref<4x256x64xbf16, #tpu.memory_space<vmem>>, vector<1x256x64xbf16>
      %151 = vector.shape_cast %150 : vector<1x256x64xbf16> to vector<256x64xbf16>
      %cst_121 = arith.constant dense<0.000000e+00> : vector<7x64xf32>
      %152 = tpu.matmul %149, %151, %cst_121 {dimension_numbers = #tpu.dot_dimension_numbers<[1], [0], [0], [1], [0, 0, 1, 1], [], []>} : vector<7x256xbf16>, vector<256x64xbf16>, vector<7x64xf32> -> vector<7x64xf32>
      %c2_i32_122 = arith.constant 2 : i32
      %153 = arith.muli %c2_i32_122, %arg20 : i32
      %c1_i32_123 = arith.constant 1 : i32
      %154 = arith.addi %153, %c1_i32_123 : i32
      %155 = arith.index_cast %154 : i32 to index
      %c0_124 = arith.constant 0 : index
      %c0_125 = arith.constant 0 : index
      %156 = vector.load %arg18[%155, %c0_124, %c0_125] : memref<10x7x256xbf16, #tpu.memory_space<vmem>>, vector<1x7x256xbf16>
      %157 = vector.shape_cast %156 : vector<1x7x256xbf16> to vector<7x256xbf16>
      %c1_126 = arith.constant 1 : index
      %c0_127 = arith.constant 0 : index
      %c0_128 = arith.constant 0 : index
      %158 = vector.load %arg10[%c1_126, %c0_127, %c0_128] : memref<4x256x64xbf16, #tpu.memory_space<vmem>>, vector<1x256x64xbf16>
      %159 = vector.shape_cast %158 : vector<1x256x64xbf16> to vector<256x64xbf16>
      %cst_129 = arith.constant dense<0.000000e+00> : vector<7x64xf32>
      %160 = tpu.matmul %157, %159, %cst_129 {dimension_numbers = #tpu.dot_dimension_numbers<[1], [0], [0], [1], [0, 0, 1, 1], [], []>} : vector<7x256xbf16>, vector<256x64xbf16>, vector<7x64xf32> -> vector<7x64xf32>
      %161 = arith.addf %152, %160 : vector<7x64xf32>
      %c2_i32_130 = arith.constant 2 : i32
      %162 = arith.muli %c2_i32_130, %arg20 : i32
      %c2_i32_131 = arith.constant 2 : i32
      %163 = arith.addi %162, %c2_i32_131 : i32
      %164 = arith.index_cast %163 : i32 to index
      %c0_132 = arith.constant 0 : index
      %c0_133 = arith.constant 0 : index
      %165 = vector.load %arg18[%164, %c0_132, %c0_133] : memref<10x7x256xbf16, #tpu.memory_space<vmem>>, vector<1x7x256xbf16>
      %166 = vector.shape_cast %165 : vector<1x7x256xbf16> to vector<7x256xbf16>
      %c2_134 = arith.constant 2 : index
      %c0_135 = arith.constant 0 : index
      %c0_136 = arith.constant 0 : index
      %167 = vector.load %arg10[%c2_134, %c0_135, %c0_136] : memref<4x256x64xbf16, #tpu.memory_space<vmem>>, vector<1x256x64xbf16>
      %168 = vector.shape_cast %167 : vector<1x256x64xbf16> to vector<256x64xbf16>
      %cst_137 = arith.constant dense<0.000000e+00> : vector<7x64xf32>
      %169 = tpu.matmul %166, %168, %cst_137 {dimension_numbers = #tpu.dot_dimension_numbers<[1], [0], [0], [1], [0, 0, 1, 1], [], []>} : vector<7x256xbf16>, vector<256x64xbf16>, vector<7x64xf32> -> vector<7x64xf32>
      %170 = arith.addf %161, %169 : vector<7x64xf32>
      %c2_i32_138 = arith.constant 2 : i32
      %171 = arith.muli %c2_i32_138, %arg20 : i32
      %c3_i32 = arith.constant 3 : i32
      %172 = arith.addi %171, %c3_i32 : i32
      %173 = arith.index_cast %172 : i32 to index
      %c0_139 = arith.constant 0 : index
      %c0_140 = arith.constant 0 : index
      %174 = vector.load %arg18[%173, %c0_139, %c0_140] : memref<10x7x256xbf16, #tpu.memory_space<vmem>>, vector<1x7x256xbf16>
      %175 = vector.shape_cast %174 : vector<1x7x256xbf16> to vector<7x256xbf16>
      %c3_141 = arith.constant 3 : index
      %c0_142 = arith.constant 0 : index
      %c0_143 = arith.constant 0 : index
      %176 = vector.load %arg10[%c3_141, %c0_142, %c0_143] : memref<4x256x64xbf16, #tpu.memory_space<vmem>>, vector<1x256x64xbf16>
      %177 = vector.shape_cast %176 : vector<1x256x64xbf16> to vector<256x64xbf16>
      %cst_144 = arith.constant dense<0.000000e+00> : vector<7x64xf32>
      %178 = tpu.matmul %175, %177, %cst_144 {dimension_numbers = #tpu.dot_dimension_numbers<[1], [0], [0], [1], [0, 0, 1, 1], [], []>} : vector<7x256xbf16>, vector<256x64xbf16>, vector<7x64xf32> -> vector<7x64xf32>
      %179 = arith.addf %170, %178 : vector<7x64xf32>
      %cst_145 = arith.constant dense<0.000000e+00> : vector<4x64xf32>
      %180 = tpu.matmul %66, %179, %cst_145 {dimension_numbers = #tpu.dot_dimension_numbers<[1], [0], [0], [1], [0, 0, 1, 1], [], []>} : vector<4x7xf32>, vector<7x64xf32>, vector<4x64xf32> -> vector<4x64xf32>
      %c0_146 = arith.constant 0 : index
      %c0_147 = arith.constant 0 : index
      %181 = vector.load %arg11[%c0_146, %c0_147] : memref<1x64xf32, #tpu.memory_space<vmem>>, vector<1x64xf32>
      %182 = vector.broadcast %181 : vector<1x64xf32> to vector<4x64xf32>
      %183 = arith.addf %180, %182 : vector<4x64xf32>
      %cst_148 = arith.constant 0.000000e+00 : f32
      %184 = vector.broadcast %cst_148 : f32 to vector<4x64xf32>
      %185 = arith.cmpf ogt, %183, %184 : vector<4x64xf32>
      %cst_149 = arith.constant 2.000000e-01 : f32
      %186 = vector.broadcast %cst_149 : f32 to vector<4x64xf32>
      %187 = arith.mulf %186, %183 : vector<4x64xf32>
      %188 = arith.select %185, %183, %187 : vector<4x64xi1>, vector<4x64xf32>
      %c1_i32_150 = arith.constant 1 : i32
      %189 = arith.addi %arg20, %c1_i32_150 : i32
      %190 = arith.truncf %188 : vector<4x64xf32> to vector<4x64xbf16>
      %cst_151 = arith.constant 0.000000e+00 : bf16
      %191 = vector.broadcast %cst_151 : bf16 to vector<1x64xbf16>
      %192 = vector.extract_strided_slice %190 {offsets = [0, 0], sizes = [2, 64], strides = [1, 1]} : vector<4x64xbf16> to vector<2x64xbf16>
      %193 = arith.index_cast %189 : i32 to index
      %c1_152 = arith.constant 1 : index
      %c0_153 = arith.constant 0 : index
      %194 = vector.load %arg19[%193, %c1_152, %c0_153] : memref<6x3x256xbf16, #tpu.memory_space<vmem>>, vector<1x2x64xbf16>
      %195 = vector.shape_cast %194 : vector<1x2x64xbf16> to vector<2x64xbf16>
      %196 = vector.shape_cast %192 : vector<2x64xbf16> to vector<1x2x64xbf16>
      tpu.vector_store %arg19[%193, %c1_152, %c0_153], %196 {strides = array<i32>} : memref<6x3x256xbf16, #tpu.memory_space<vmem>>, vector<1x2x64xbf16>,
      %197 = arith.index_cast %189 : i32 to index
      %c0_154 = arith.constant 0 : index
      %c0_155 = arith.constant 0 : index
      %198 = vector.load %arg19[%197, %c0_154, %c0_155] : memref<6x3x256xbf16, #tpu.memory_space<vmem>>, vector<1x1x64xbf16>
      %199 = vector.shape_cast %198 : vector<1x1x64xbf16> to vector<1x64xbf16>
      %200 = vector.shape_cast %191 : vector<1x64xbf16> to vector<1x1x64xbf16>
      tpu.vector_store %arg19[%197, %c0_154, %c0_155], %200 {strides = array<i32>} : memref<6x3x256xbf16, #tpu.memory_space<vmem>>, vector<1x1x64xbf16>,
      %201 = vector.extract_strided_slice %190 {offsets = [0, 0], sizes = [3, 64], strides = [1, 1]} : vector<4x64xbf16> to vector<3x64xbf16>
      %202 = arith.index_cast %189 : i32 to index
      %c0_156 = arith.constant 0 : index
      %c64 = arith.constant 64 : index
      %203 = vector.load %arg19[%202, %c0_156, %c64] : memref<6x3x256xbf16, #tpu.memory_space<vmem>>, vector<1x3x64xbf16>
      %204 = vector.shape_cast %203 : vector<1x3x64xbf16> to vector<3x64xbf16>
      %205 = vector.shape_cast %201 : vector<3x64xbf16> to vector<1x3x64xbf16>
      tpu.vector_store %arg19[%202, %c0_156, %c64], %205 {strides = array<i32>} : memref<6x3x256xbf16, #tpu.memory_space<vmem>>, vector<1x3x64xbf16>,
      %206 = vector.extract_strided_slice %190 {offsets = [1, 0], sizes = [3, 64], strides = [1, 1]} : vector<4x64xbf16> to vector<3x64xbf16>
      %207 = arith.index_cast %189 : i32 to index
      %c0_157 = arith.constant 0 : index
      %c128 = arith.constant 128 : index
      %208 = vector.load %arg19[%207, %c0_157, %c128] : memref<6x3x256xbf16, #tpu.memory_space<vmem>>, vector<1x3x64xbf16>
      %209 = vector.shape_cast %208 : vector<1x3x64xbf16> to vector<3x64xbf16>
      %210 = vector.shape_cast %206 : vector<3x64xbf16> to vector<1x3x64xbf16>
      tpu.vector_store %arg19[%207, %c0_157, %c128], %210 {strides = array<i32>} : memref<6x3x256xbf16, #tpu.memory_space<vmem>>, vector<1x3x64xbf16>,
      %211 = vector.extract_strided_slice %190 {offsets = [2, 0], sizes = [2, 64], strides = [1, 1]} : vector<4x64xbf16> to vector<2x64xbf16>
      %212 = arith.index_cast %189 : i32 to index
      %c0_158 = arith.constant 0 : index
      %c192 = arith.constant 192 : index
      %213 = vector.load %arg19[%212, %c0_158, %c192] : memref<6x3x256xbf16, #tpu.memory_space<vmem>>, vector<1x2x64xbf16>
      %214 = vector.shape_cast %213 : vector<1x2x64xbf16> to vector<2x64xbf16>
      %215 = vector.shape_cast %211 : vector<2x64xbf16> to vector<1x2x64xbf16>
      tpu.vector_store %arg19[%212, %c0_158, %c192], %215 {strides = array<i32>} : memref<6x3x256xbf16, #tpu.memory_space<vmem>>, vector<1x2x64xbf16>,
      %216 = arith.index_cast %189 : i32 to index
      %c2_159 = arith.constant 2 : index
      %c192_160 = arith.constant 192 : index
      %217 = vector.load %arg19[%216, %c2_159, %c192_160] : memref<6x3x256xbf16, #tpu.memory_space<vmem>>, vector<1x1x64xbf16>
      %218 = vector.shape_cast %217 : vector<1x1x64xbf16> to vector<1x64xbf16>
      %219 = vector.shape_cast %191 : vector<1x64xbf16> to vector<1x1x64xbf16>
      tpu.vector_store %arg19[%216, %c2_159, %c192_160], %219 {strides = array<i32>} : memref<6x3x256xbf16, #tpu.memory_space<vmem>>, vector<1x1x64xbf16>,
    }
    %c4_i32_44 = arith.constant 4 : i32
    %68 = tpu.iota {dimensions = array<i32: 0>} : vector<2x3xi32>
    %69 = tpu.iota {dimensions = array<i32: 1>} : vector<2x3xi32>
    %c2_i32_45 = arith.constant 2 : i32
    %70 = vector.broadcast %c2_i32_45 : i32 to vector<2x3xi32>
    %71 = arith.muli %70, %68 : vector<2x3xi32>
    %72 = arith.cmpi eq, %69, %71 : vector<2x3xi32>
    %73 = arith.extui %72 : vector<2x3xi1> to vector<2x3xi32>
    %74 = arith.sitofp %73 : vector<2x3xi32> to vector<2x3xf32>
    %c0_46 = arith.constant 0 : index
    %c0_47 = arith.constant 0 : index
    %c0_48 = arith.constant 0 : index
    %75 = vector.load %arg19[%c0_46, %c0_47, %c0_48] : memref<6x3x256xbf16, #tpu.memory_space<vmem>>, vector<1x3x256xbf16>
    %76 = vector.shape_cast %75 : vector<1x3x256xbf16> to vector<3x256xbf16>
    %c0_49 = arith.constant 0 : index
    %c0_50 = arith.constant 0 : index
    %c0_51 = arith.constant 0 : index
    %77 = vector.load %arg12[%c0_49, %c0_50, %c0_51] : memref<4x256x64xbf16, #tpu.memory_space<vmem>>, vector<1x256x64xbf16>
    %78 = vector.shape_cast %77 : vector<1x256x64xbf16> to vector<256x64xbf16>
    %cst_52 = arith.constant dense<0.000000e+00> : vector<3x64xf32>
    %79 = tpu.matmul %76, %78, %cst_52 {dimension_numbers = #tpu.dot_dimension_numbers<[1], [0], [0], [1], [0, 0, 1, 1], [], []>} : vector<3x256xbf16>, vector<256x64xbf16>, vector<3x64xf32> -> vector<3x64xf32>
    %c1 = arith.constant 1 : index
    %c0_53 = arith.constant 0 : index
    %c0_54 = arith.constant 0 : index
    %80 = vector.load %arg19[%c1, %c0_53, %c0_54] : memref<6x3x256xbf16, #tpu.memory_space<vmem>>, vector<1x3x256xbf16>
    %81 = vector.shape_cast %80 : vector<1x3x256xbf16> to vector<3x256xbf16>
    %c1_55 = arith.constant 1 : index
    %c0_56 = arith.constant 0 : index
    %c0_57 = arith.constant 0 : index
    %82 = vector.load %arg12[%c1_55, %c0_56, %c0_57] : memref<4x256x64xbf16, #tpu.memory_space<vmem>>, vector<1x256x64xbf16>
    %83 = vector.shape_cast %82 : vector<1x256x64xbf16> to vector<256x64xbf16>
    %cst_58 = arith.constant dense<0.000000e+00> : vector<3x64xf32>
    %84 = tpu.matmul %81, %83, %cst_58 {dimension_numbers = #tpu.dot_dimension_numbers<[1], [0], [0], [1], [0, 0, 1, 1], [], []>} : vector<3x256xbf16>, vector<256x64xbf16>, vector<3x64xf32> -> vector<3x64xf32>
    %85 = arith.addf %79, %84 : vector<3x64xf32>
    %c2 = arith.constant 2 : index
    %c0_59 = arith.constant 0 : index
    %c0_60 = arith.constant 0 : index
    %86 = vector.load %arg19[%c2, %c0_59, %c0_60] : memref<6x3x256xbf16, #tpu.memory_space<vmem>>, vector<1x3x256xbf16>
    %87 = vector.shape_cast %86 : vector<1x3x256xbf16> to vector<3x256xbf16>
    %c2_61 = arith.constant 2 : index
    %c0_62 = arith.constant 0 : index
    %c0_63 = arith.constant 0 : index
    %88 = vector.load %arg12[%c2_61, %c0_62, %c0_63] : memref<4x256x64xbf16, #tpu.memory_space<vmem>>, vector<1x256x64xbf16>
    %89 = vector.shape_cast %88 : vector<1x256x64xbf16> to vector<256x64xbf16>
    %cst_64 = arith.constant dense<0.000000e+00> : vector<3x64xf32>
    %90 = tpu.matmul %87, %89, %cst_64 {dimension_numbers = #tpu.dot_dimension_numbers<[1], [0], [0], [1], [0, 0, 1, 1], [], []>} : vector<3x256xbf16>, vector<256x64xbf16>, vector<3x64xf32> -> vector<3x64xf32>
    %91 = arith.addf %85, %90 : vector<3x64xf32>
    %c3 = arith.constant 3 : index
    %c0_65 = arith.constant 0 : index
    %c0_66 = arith.constant 0 : index
    %92 = vector.load %arg19[%c3, %c0_65, %c0_66] : memref<6x3x256xbf16, #tpu.memory_space<vmem>>, vector<1x3x256xbf16>
    %93 = vector.shape_cast %92 : vector<1x3x256xbf16> to vector<3x256xbf16>
    %c3_67 = arith.constant 3 : index
    %c0_68 = arith.constant 0 : index
    %c0_69 = arith.constant 0 : index
    %94 = vector.load %arg12[%c3_67, %c0_68, %c0_69] : memref<4x256x64xbf16, #tpu.memory_space<vmem>>, vector<1x256x64xbf16>
    %95 = vector.shape_cast %94 : vector<1x256x64xbf16> to vector<256x64xbf16>
    %cst_70 = arith.constant dense<0.000000e+00> : vector<3x64xf32>
    %96 = tpu.matmul %93, %95, %cst_70 {dimension_numbers = #tpu.dot_dimension_numbers<[1], [0], [0], [1], [0, 0, 1, 1], [], []>} : vector<3x256xbf16>, vector<256x64xbf16>, vector<3x64xf32> -> vector<3x64xf32>
    %97 = arith.addf %91, %96 : vector<3x64xf32>
    %cst_71 = arith.constant dense<0.000000e+00> : vector<2x64xf32>
    %98 = tpu.matmul %74, %97, %cst_71 {dimension_numbers = #tpu.dot_dimension_numbers<[1], [0], [0], [1], [0, 0, 1, 1], [], []>} : vector<2x3xf32>, vector<3x64xf32>, vector<2x64xf32> -> vector<2x64xf32>
    %c0_72 = arith.constant 0 : index
    %c0_73 = arith.constant 0 : index
    %99 = vector.load %arg13[%c0_72, %c0_73] : memref<1x64xf32, #tpu.memory_space<vmem>>, vector<1x64xf32>
    %100 = vector.broadcast %99 : vector<1x64xf32> to vector<2x64xf32>
    %101 = arith.addf %98, %100 : vector<2x64xf32>
    %cst_74 = arith.constant 0.000000e+00 : f32
    %102 = vector.broadcast %cst_74 : f32 to vector<2x64xf32>
    %103 = arith.cmpf ogt, %101, %102 : vector<2x64xf32>
    %cst_75 = arith.constant 2.000000e-01 : f32
    %104 = vector.broadcast %cst_75 : f32 to vector<2x64xf32>
    %105 = arith.mulf %104, %101 : vector<2x64xf32>
    %106 = arith.select %103, %101, %105 : vector<2x64xi1>, vector<2x64xf32>
    %c0_76 = arith.constant 0 : index
    %c0_77 = arith.constant 0 : index
    %c0_78 = arith.constant 0 : index
    %107 = vector.load %arg14[%c0_76, %c0_77, %c0_78] : memref<1x4x64xf32, #tpu.memory_space<vmem>>, vector<1x2x64xf32>
    %108 = vector.shape_cast %107 : vector<1x2x64xf32> to vector<2x64xf32>
    %109 = vector.shape_cast %106 : vector<2x64xf32> to vector<1x2x64xf32>
    tpu.vector_store %arg14[%c0_76, %c0_77, %c0_78], %109 {strides = array<i32>} : memref<1x4x64xf32, #tpu.memory_space<vmem>>, vector<1x2x64xf32>,
    %c2_79 = arith.constant 2 : index
    %c0_80 = arith.constant 0 : index
    %c0_81 = arith.constant 0 : index
    %110 = vector.load %arg19[%c2_79, %c0_80, %c0_81] : memref<6x3x256xbf16, #tpu.memory_space<vmem>>, vector<1x3x256xbf16>
    %111 = vector.shape_cast %110 : vector<1x3x256xbf16> to vector<3x256xbf16>
    %c0_82 = arith.constant 0 : index
    %c0_83 = arith.constant 0 : index
    %c0_84 = arith.constant 0 : index
    %112 = vector.load %arg12[%c0_82, %c0_83, %c0_84] : memref<4x256x64xbf16, #tpu.memory_space<vmem>>, vector<1x256x64xbf16>
    %113 = vector.shape_cast %112 : vector<1x256x64xbf16> to vector<256x64xbf16>
    %cst_85 = arith.constant dense<0.000000e+00> : vector<3x64xf32>
    %114 = tpu.matmul %111, %113, %cst_85 {dimension_numbers = #tpu.dot_dimension_numbers<[1], [0], [0], [1], [0, 0, 1, 1], [], []>} : vector<3x256xbf16>, vector<256x64xbf16>, vector<3x64xf32> -> vector<3x64xf32>
    %c3_86 = arith.constant 3 : index
    %c0_87 = arith.constant 0 : index
    %c0_88 = arith.constant 0 : index
    %115 = vector.load %arg19[%c3_86, %c0_87, %c0_88] : memref<6x3x256xbf16, #tpu.memory_space<vmem>>, vector<1x3x256xbf16>
    %116 = vector.shape_cast %115 : vector<1x3x256xbf16> to vector<3x256xbf16>
    %c1_89 = arith.constant 1 : index
    %c0_90 = arith.constant 0 : index
    %c0_91 = arith.constant 0 : index
    %117 = vector.load %arg12[%c1_89, %c0_90, %c0_91] : memref<4x256x64xbf16, #tpu.memory_space<vmem>>, vector<1x256x64xbf16>
    %118 = vector.shape_cast %117 : vector<1x256x64xbf16> to vector<256x64xbf16>
    %cst_92 = arith.constant dense<0.000000e+00> : vector<3x64xf32>
    %119 = tpu.matmul %116, %118, %cst_92 {dimension_numbers = #tpu.dot_dimension_numbers<[1], [0], [0], [1], [0, 0, 1, 1], [], []>} : vector<3x256xbf16>, vector<256x64xbf16>, vector<3x64xf32> -> vector<3x64xf32>
    %120 = arith.addf %114, %119 : vector<3x64xf32>
    %c4 = arith.constant 4 : index
    %c0_93 = arith.constant 0 : index
    %c0_94 = arith.constant 0 : index
    %121 = vector.load %arg19[%c4, %c0_93, %c0_94] : memref<6x3x256xbf16, #tpu.memory_space<vmem>>, vector<1x3x256xbf16>
    %122 = vector.shape_cast %121 : vector<1x3x256xbf16> to vector<3x256xbf16>
    %c2_95 = arith.constant 2 : index
    %c0_96 = arith.constant 0 : index
    %c0_97 = arith.constant 0 : index
    %123 = vector.load %arg12[%c2_95, %c0_96, %c0_97] : memref<4x256x64xbf16, #tpu.memory_space<vmem>>, vector<1x256x64xbf16>
    %124 = vector.shape_cast %123 : vector<1x256x64xbf16> to vector<256x64xbf16>
    %cst_98 = arith.constant dense<0.000000e+00> : vector<3x64xf32>
    %125 = tpu.matmul %122, %124, %cst_98 {dimension_numbers = #tpu.dot_dimension_numbers<[1], [0], [0], [1], [0, 0, 1, 1], [], []>} : vector<3x256xbf16>, vector<256x64xbf16>, vector<3x64xf32> -> vector<3x64xf32>
    %126 = arith.addf %120, %125 : vector<3x64xf32>
    %c5_99 = arith.constant 5 : index
    %c0_100 = arith.constant 0 : index
    %c0_101 = arith.constant 0 : index
    %127 = vector.load %arg19[%c5_99, %c0_100, %c0_101] : memref<6x3x256xbf16, #tpu.memory_space<vmem>>, vector<1x3x256xbf16>
    %128 = vector.shape_cast %127 : vector<1x3x256xbf16> to vector<3x256xbf16>
    %c3_102 = arith.constant 3 : index
    %c0_103 = arith.constant 0 : index
    %c0_104 = arith.constant 0 : index
    %129 = vector.load %arg12[%c3_102, %c0_103, %c0_104] : memref<4x256x64xbf16, #tpu.memory_space<vmem>>, vector<1x256x64xbf16>
    %130 = vector.shape_cast %129 : vector<1x256x64xbf16> to vector<256x64xbf16>
    %cst_105 = arith.constant dense<0.000000e+00> : vector<3x64xf32>
    %131 = tpu.matmul %128, %130, %cst_105 {dimension_numbers = #tpu.dot_dimension_numbers<[1], [0], [0], [1], [0, 0, 1, 1], [], []>} : vector<3x256xbf16>, vector<256x64xbf16>, vector<3x64xf32> -> vector<3x64xf32>
    %132 = arith.addf %126, %131 : vector<3x64xf32>
    %cst_106 = arith.constant dense<0.000000e+00> : vector<2x64xf32>
    %133 = tpu.matmul %74, %132, %cst_106 {dimension_numbers = #tpu.dot_dimension_numbers<[1], [0], [0], [1], [0, 0, 1, 1], [], []>} : vector<2x3xf32>, vector<3x64xf32>, vector<2x64xf32> -> vector<2x64xf32>
    %c0_107 = arith.constant 0 : index
    %c0_108 = arith.constant 0 : index
    %134 = vector.load %arg13[%c0_107, %c0_108] : memref<1x64xf32, #tpu.memory_space<vmem>>, vector<1x64xf32>
    %135 = vector.broadcast %134 : vector<1x64xf32> to vector<2x64xf32>
    %136 = arith.addf %133, %135 : vector<2x64xf32>
    %cst_109 = arith.constant 0.000000e+00 : f32
    %137 = vector.broadcast %cst_109 : f32 to vector<2x64xf32>
    %138 = arith.cmpf ogt, %136, %137 : vector<2x64xf32>
    %cst_110 = arith.constant 2.000000e-01 : f32
    %139 = vector.broadcast %cst_110 : f32 to vector<2x64xf32>
    %140 = arith.mulf %139, %136 : vector<2x64xf32>
    %141 = arith.select %138, %136, %140 : vector<2x64xi1>, vector<2x64xf32>
    %c0_111 = arith.constant 0 : index
    %c2_112 = arith.constant 2 : index
    %c0_113 = arith.constant 0 : index
    %142 = vector.load %arg14[%c0_111, %c2_112, %c0_113] : memref<1x4x64xf32, #tpu.memory_space<vmem>>, vector<1x2x64xf32>
    %143 = vector.shape_cast %142 : vector<1x2x64xf32> to vector<2x64xf32>
    %144 = vector.shape_cast %141 : vector<2x64xf32> to vector<1x2x64xf32>
    tpu.vector_store %arg14[%c0_111, %c2_112, %c0_113], %144 {strides = array<i32>} : memref<1x4x64xf32, #tpu.memory_space<vmem>>, vector<1x2x64xf32>,
    return
  }
  func.func @transform_0(%arg0: i32) -> (i32, i32, i32) {
    %c0_i32 = arith.constant 0 : i32
    %c0_i32_0 = arith.constant 0 : i32
    %c0_i32_1 = arith.constant 0 : i32
    return %arg0, %c0_i32, %c0_i32_0 : i32, i32, i32
  }
  func.func @transform_1(%arg0: i32) -> (i32, i32, i32) {
    %c0_i32 = arith.constant 0 : i32
    %c0_i32_0 = arith.constant 0 : i32
    %c0_i32_1 = arith.constant 0 : i32
    %c0_i32_2 = arith.constant 0 : i32
    return %c0_i32, %c0_i32_0, %c0_i32_1 : i32, i32, i32
  }
  func.func @transform_2(%arg0: i32) -> (i32, i32) {
    %c0_i32 = arith.constant 0 : i32
    %c0_i32_0 = arith.constant 0 : i32
    %c0_i32_1 = arith.constant 0 : i32
    return %c0_i32, %c0_i32_0 : i32, i32
  }
  func.func @transform_3(%arg0: i32) -> (i32, i32, i32) {
    %c0_i32 = arith.constant 0 : i32
    %c0_i32_0 = arith.constant 0 : i32
    %c0_i32_1 = arith.constant 0 : i32
    %c0_i32_2 = arith.constant 0 : i32
    return %c0_i32, %c0_i32_0, %c0_i32_1 : i32, i32, i32
  }
  func.func @transform_4(%arg0: i32) -> (i32, i32) {
    %c0_i32 = arith.constant 0 : i32
    %c0_i32_0 = arith.constant 0 : i32
    %c0_i32_1 = arith.constant 0 : i32
    return %c0_i32, %c0_i32_0 : i32, i32
  }
  func.func @transform_5(%arg0: i32) -> (i32, i32, i32) {
    %c0_i32 = arith.constant 0 : i32
    %c0_i32_0 = arith.constant 0 : i32
    %c0_i32_1 = arith.constant 0 : i32
    %c0_i32_2 = arith.constant 0 : i32
    return %c0_i32, %c0_i32_0, %c0_i32_1 : i32, i32, i32
  }
  func.func @transform_6(%arg0: i32) -> (i32, i32) {
    %c0_i32 = arith.constant 0 : i32
    %c0_i32_0 = arith.constant 0 : i32
    %c0_i32_1 = arith.constant 0 : i32
    return %c0_i32, %c0_i32_0 : i32, i32
  }
  func.func @transform_7(%arg0: i32) -> (i32, i32, i32) {
    %c0_i32 = arith.constant 0 : i32
    %c0_i32_0 = arith.constant 0 : i32
    %c0_i32_1 = arith.constant 0 : i32
    %c0_i32_2 = arith.constant 0 : i32
    return %c0_i32, %c0_i32_0, %c0_i32_1 : i32, i32, i32
  }
  func.func @transform_8(%arg0: i32) -> (i32, i32) {
    %c0_i32 = arith.constant 0 : i32
    %c0_i32_0 = arith.constant 0 : i32
    %c0_i32_1 = arith.constant 0 : i32
    return %c0_i32, %c0_i32_0 : i32, i32
  }
  func.func @transform_9(%arg0: i32) -> (i32, i32, i32) {
    %c0_i32 = arith.constant 0 : i32
    %c0_i32_0 = arith.constant 0 : i32
    %c0_i32_1 = arith.constant 0 : i32
    %c0_i32_2 = arith.constant 0 : i32
    return %c0_i32, %c0_i32_0, %c0_i32_1 : i32, i32, i32
  }
  func.func @transform_10(%arg0: i32) -> (i32, i32) {
    %c0_i32 = arith.constant 0 : i32
    %c0_i32_0 = arith.constant 0 : i32
    %c0_i32_1 = arith.constant 0 : i32
    return %c0_i32, %c0_i32_0 : i32, i32
  }
  func.func @transform_11(%arg0: i32) -> (i32, i32, i32) {
    %c0_i32 = arith.constant 0 : i32
    %c0_i32_0 = arith.constant 0 : i32
    %c0_i32_1 = arith.constant 0 : i32
    %c0_i32_2 = arith.constant 0 : i32
    return %c0_i32, %c0_i32_0, %c0_i32_1 : i32, i32, i32
  }
  func.func @transform_12(%arg0: i32) -> (i32, i32) {
    %c0_i32 = arith.constant 0 : i32
    %c0_i32_0 = arith.constant 0 : i32
    %c0_i32_1 = arith.constant 0 : i32
    return %c0_i32, %c0_i32_0 : i32, i32
  }
  func.func @transform_13(%arg0: i32) -> (i32, i32, i32) {
    %c0_i32 = arith.constant 0 : i32
    %c0_i32_0 = arith.constant 0 : i32
    %c0_i32_1 = arith.constant 0 : i32
    return %arg0, %c0_i32, %c0_i32_0 : i32, i32, i32
  }
}

</mosaic_0001>

<bundles_post_ra>
// kernel: patch_discriminator2_forward.1
= control target key start
LH: loop header
LB: loop body
LE: loop exit
PB: predicated region body
PF: predicated region fallthrough
CT: control target
= control target key end

     0   :  { %s13200_s25 = smov 0   ;;  %s16425_s0 = inlined_call_operand.vmem [shape: bf16[2,4480,28], index: 0, kind: input, shape index: {}]   ;;  %s16426_s1 = inlined_call_operand.vmem [shape: bf16[7,28,16], index: 1, kind: input, shape index: {}]   ;;  %s16427_s2 = inlined_call_operand.vmem [shape: f32[1,16], index: 2, kind: input, shape index: {}]   ;;  %s16428_s3 = inlined_call_operand.vmem [shape: bf16[4,64,32], index: 3, kind: input, shape index: {}]   ;;  %s16429_s4 = inlined_call_operand.vmem [shape: f32[1,32], index: 4, kind: input, shape index: {}]   ;;  %s16430_s5 = inlined_call_operand.vmem [shape: bf16[4,128,64], index: 5, kind: input, shape index: {}]   ;;  %s16431_s6 = inlined_call_operand.vmem [shape: f32[1,64], index: 6, kind: input, shape index: {}]   ;;  %s16432_s7 = inlined_call_operand.vmem [shape: bf16[4,256,64], index: 7, kind: input, shape index: {}]   ;;  %s16433_s8 = inlined_call_operand.vmem [shape: f32[1,64], index: 8, kind: input, shape index: {}]   ;;  %s16434_s9 = inlined_call_operand.vmem [shape: bf16[4,256,64], index: 9, kind: input, shape index: {}]   ;;  %s16435_s10 = inlined_call_operand.vmem [shape: f32[1,64], index: 10, kind: input, shape index: {}]   ;;  %s16436_s11 = inlined_call_operand.vmem [shape: bf16[4,256,64], index: 11, kind: input, shape index: {}]   ;;  %s16437_s12 = inlined_call_operand.vmem [shape: f32[1,64], index: 12, kind: input, shape index: {}]   ;;  %s16438_s13 = inlined_call_operand.vmem [shape: f32[2,4,64], index: 13, kind: output, shape index: {}]  }
   0x1 LB: > { %s9633_s26 = sadd.s32 4294967295, %s13089_s25   ;;  %p9637_p0 = scmp.ge.s32.totalorder %s13089_s25, 1  ;;  %s13089_s25 = sphi %s13200_s25, %s23_s25  }
   0x2   : > { %p387_p1 = scmp.lt.s32.totalorder %s13089_s25, 3 }
   0x4   : > { %p388_p2 = pnand %p9637_p0, %p387_p1 }
   0x6   : > { %391 = sbr.rel (%p388_p2) target bundleno = 4040 (0xfc8), region = 72 }
   0xd   : > { %p13210_p3 = scmp.lt.s32.totalorder %s9633_s26, 1  ;;  %vm440_vm0 = vcmask 519168   ;;  %vm449_vm1 = vsmask.f32 3328  ;;  %vm468_vm2 = vcmask 1043456   ;;  %v13111_v0 = vmov 0  }
   0xe   : > { %441 = vst.msk [vmem:[#allocation2] sm:$0xf] %vm440_vm0, %v13111_v0  ;;  %442 = vst.msk [vmem:[#allocation2 + $0x4] sm:$0xf] %vm440_vm0, %v13111_v0  ;;  %v16490_v1 = vmov 0  ;;  %vm481_vm4 = vcmask 1047556  }
   0xf   : > { %443 = vst.msk [vmem:[#allocation2 + $0x8] sm:$0xf] %vm440_vm0, %v13111_v0  ;;  %444 = vst.msk [vmem:[#allocation2 + $0xc] sm:$0xf] %vm440_vm0, %v13111_v0  ;;  %v451_v2 = vld [vmem:[#allocation2 + $0x1c] sm:$0xf] }
  0x10   : > { %445 = vst.msk [vmem:[#allocation2 + $0x10] sm:$0xf] %vm440_vm0, %v13111_v0  ;;  %446 = vst.msk [vmem:[#allocation2 + $0x14] sm:$0xf] %vm440_vm0, %v13111_v0  ;;  %v462_v3 = vld [vmem:[#allocation2 + $0x83c] sm:$0xf] }
  0x11   : > { %447 = vst.msk [vmem:[#allocation2 + $0x18] sm:$0xf] %vm440_vm0, %v13111_v0  ;;  %455 = vst.msk [vmem:[#allocation2 + $0x820] sm:$0xf] %vm440_vm0, %v13111_v0  ;;  %vm500_vm5 = vcmask 1041408   ;;  %s16659_s26 = smov (!%p13210_p3, %s9633_s26), 1 }
  0x12   : > { %456 = vst.msk [vmem:[#allocation2 + $0x824] sm:$0xf] %vm440_vm0, %v13111_v0  ;;  %457 = vst.msk [vmem:[#allocation2 + $0x828] sm:$0xf] %vm440_vm0, %v13111_v0  ;;  %v470_v7 = vld [vmem:[#allocation3 + $0xc] sm:$0xf] }
  0x13   : > { %458 = vst.msk [vmem:[#allocation2 + $0x82c] sm:$0xf] %vm440_vm0, %v13111_v0  ;;  %459 = vst.msk [vmem:[#allocation2 + $0x830] sm:$0xf] %vm440_vm0, %v13111_v0  ;;  %v485_v8 = vld [vmem:[#allocation4 + $0x8] sm:$0xff]  ;;  %v490_v11 = vld [vmem:[#allocation4 + $0x118] sm:$0xff] }
  0x14   : > { %460 = vst.msk [vmem:[#allocation2 + $0x834] sm:$0xf] %vm440_vm0, %v13111_v0  ;;  %461 = vst.msk [vmem:[#allocation2 + $0x838] sm:$0xf] %vm440_vm0, %v13111_v0  ;;  %v477_v10 = vld [vmem:[#allocation3 + $0x21c] sm:$0xf] }
  0x15   : > { %465 = vst [vmem:[#allocation3] sm:$0xf] %v13111_v0  ;;  %466 = vst [vmem:[#allocation3 + $0x4] sm:$0xf] %v13111_v0  ;;  %vm482_vm7 = vsmask.f32 7424 }
  0x16   : > { %467 = vst [vmem:[#allocation3 + $0x8] sm:$0xf] %v13111_v0  ;;  %474 = vst [vmem:[#allocation3 + $0x210] sm:$0xf] %v13111_v0  ;;  %s12521_s28 = smul.u32 2240, %s16659_s26  ;;  %s9639_s29 = sshll.u32 %s16659_s26, 2 }
  0x17   : > { %475 = vst [vmem:[#allocation3 + $0x214] sm:$0xf] %v13111_v0  ;;  %476 = vst [vmem:[#allocation3 + $0x218] sm:$0xf] %v13111_v0  ;;  %v493_v13 = vld [vmem:[#allocation5] sm:$0xff]  ;;  %v497_v14 = vld [vmem:[#allocation5 + $0x48] sm:$0xff]  ;;  %s13256_s15 = scalar_lea.vmem %s16438_s13, %s9639_s29 }
  0x18   : > { %480 = vst [vmem:[#allocation4] sm:$0xff] %v13111_v0  ;;  %489 = vst [vmem:[#allocation4 + $0x110] sm:$0xff] %v13111_v0  ;;  %vm503_vm9 = vcmask 1043458   ;;  %vm16479_vm11 = vsmask.f32 1280  ;;  %s13263_s18 = scalar_lea.vmem %s16425_s0, %s12521_s28  ;;  %s13269_s19 = smov 0  }
  0x19   : > { %vm13230_vm3 = vmand %vm440_vm0, %vm449_vm1  ;;  %v506_v15 = vld [vmem:[#allocation6] sm:$0xf]  ;;  %v510_v20 = vld [vmem:[#allocation6 + $0x14] sm:$0xf] }
  0x1a   : > { %v16491_v1 = vsel %vm13230_vm3, 4294967295, %v16490_v1  ;;  %v452_v4 = vsel %vm13230_vm3, 0, %v451_v2  ;;  %v463_v5 = vsel %vm13230_vm3, 0, %v462_v3  ;;  %vm13244_vm6 = vmand %vm468_vm2, %vm449_vm1 }
  0x1b   : > { %16492 = vst [vmem:[#allocation7_spill] sm:$0xff] %v16491_v1  ;;  %453 = vst [vmem:[#allocation2 + $0x1c] sm:$0xf] %v452_v4  ;;  %v471_v9 = vsel %vm13244_vm6, 0, %v470_v7  ;;  %v478_v12 = vsel %vm13244_vm6, 0, %v477_v10 }
  0x1c   : > { %464 = vst [vmem:[#allocation2 + $0x83c] sm:$0xf] %v463_v5  ;;  %472 = vst [vmem:[#allocation3 + $0xc] sm:$0xf] %v471_v9 }
  0x1d   : > { %vm483_vm8 = vmand %vm481_vm4, %vm482_vm7  ;;  %479 = vst [vmem:[#allocation3 + $0x21c] sm:$0xf] %v478_v12 }
  0x1e   : > { %vm484_vm10 = vmor %vm483_vm8, %vm13244_vm6 }
  0x1f   : > { %v486_v16 = vsel %vm484_vm10, 0, %v485_v8  ;;  %v491_v17 = vsel %vm484_vm10, 0, %v490_v11  ;;  %v494_v18 = vsel %vm484_vm10, 0, %v493_v13  ;;  %v498_v19 = vsel %vm484_vm10, 0, %v497_v14  ;;  %vm502_vm12 = vmand %vm500_vm5, %vm16479_vm11 }
  0x20   : > { %487 = vst [vmem:[#allocation4 + $0x8] sm:$0xff] %v486_v16  ;;  %492 = vst [vmem:[#allocation4 + $0x118] sm:$0xff] %v491_v17 }
  0x21   : > { %495 = vst [vmem:[#allocation5] sm:$0xff] %v494_v18  ;;  %499 = vst [vmem:[#allocation5 + $0x48] sm:$0xff] %v498_v19 }
  0x22   : > { %vm504_vm13 = vmand %vm503_vm9, %vm449_vm1 }
  0x23   : > { %vm505_vm14 = vmor %vm504_vm13, %vm502_vm12 }
  0x24   : > { %v507_v21 = vsel %vm505_vm14, 0, %v506_v15  ;;  %v511_v22 = vsel %vm505_vm14, 0, %v510_v20 }
  0x25   : > { %508 = vst [vmem:[#allocation6] sm:$0xf] %v507_v21  ;;  %512 = vst [vmem:[#allocation6 + $0x14] sm:$0xf] %v511_v22 }
  0x26 LB: >> { %v12589_v23 = vld [vmem:[%s16426_s1 + $0x10] sm:$0xff]   ;;  %vm744_vm15 = vcmask 1045504   ;;  %v12591_v25 = vld [vmem:[%s16426_s1 + $0x18] sm:$0x3f]   ;;  %s13295_s29 = sshll.u32 %s13093_s19, 8  ;;  %v12597_v29 = vld [vmem:[%s16426_s1 + $0x40] sm:$0xff]   ;;  %s13093_s19 = sphi %s13269_s19, %s518_s19  }
  0x27   : >> { %v13280_v24 = vld [vmem:[%s16426_s1 + $0x30] sm:$0xff]   ;;  %11790 = vmatprep.subr.bf16.mxu1 %v12589_v23  ;;  %v13289_v26 = vld [vmem:[%s16426_s1 + $0x38] sm:$0x3f]   ;;  %v746_v27 = vsel %vm744_vm15, %v12591_v25, 0  ;;  %s11133_s30 = sadd.s32 64, %s13295_s29  ;;  %v12614_v30 = vld [vmem:[%s16426_s1] sm:$0xff]  }
  0x28   : >> { %11898 = vmatprep.subr.bf16.mxu0 %v13280_v24  ;;  %11791 = vmatpush3.bf16.msra.mxu1 %v12589_v23  ;;  %v13301_v28 = vsel %vm744_vm15, %v13289_v26, 0  ;;  %s563_s21 = sshra.s32 %s11133_s30, 3  ;;  %s11137_s22 = sadd.s32 192, %s13295_s29  ;;  %vm695_vm2 = vcmask 228352   ;;  %v12606_v32 = vld [vmem:[%s16426_s1 + $0x48] sm:$0x3f]  }
  0x29   : >> { %11899 = vmatpush3.bf16.msra.mxu0 %v13280_v24  ;;  %12513 = vmatprep.subr.msk.bf16.mxu1 %vm744_vm15, %v12591_v25  ;;  %s9644_s23 = sshll.u32 %s563_s21, 2  ;;  %s1592_s24 = sshra.s32 %s11137_s22, 3  ;;  %v2151_v38 = vsel %vm744_vm15, %v12606_v32, 0  ;;  %v12616_v39 = vld [vmem:[%s16426_s1 + $0x50] sm:$0xff]   ;;  %v12629_v55 = vld [vmem:[%s16426_s1 + $0x8] sm:$0x3f]  }
  0x2a   : >> { %12516 = vmatprep.subr.msk.bf16.mxu0 %vm744_vm15, %v13289_v26  ;;  %s13313_s26 = scalar_lea.vmem %s13263_s18, %s9644_s23  ;;  %s9758_s27 = sshll.u32 %s1592_s24, 2  ;;  %v1049_v57 = vsel %vm744_vm15, %v12629_v55, 0  ;;  %v12634_v58 = vld [vmem:[%s16426_s1 + $0x58] sm:$0x3f]   ;;  %v12650_v6 = vld [vmem:[%s16426_s1 + $0x20] sm:$0xff]   ;;  %vm16476_vm6 = vcmask 1042432  }
  0x2b   : >> { %v12593_v31 = vld [vmem:[%s13313_s26] sm:$0xff]   ;;  %s13317_s28 = scalar_lea.vmem %s13263_s18, %s9758_s27  ;;  %v12595_v34 = vld [vmem:[%s13313_s26 + $0x8] sm:$0xff]   ;;  %v12598_v36 = vld [vmem:[%s13313_s26 + $0x10] sm:$0xff]   ;;  %s11139_s20 = sadd.s32 256, %s13295_s29  ;;  %v2529_v61 = vsel %vm744_vm15, %v12634_v58, 0  ;;  %vm3495_vm8 = vcmask 1046532  }
  0x2c   : >> { %11793 = vmatpush3.bf16.msra.mxu1 %v746_v27  ;;  %v12594_v33 = vld [vmem:[%s13317_s28] sm:$0xff]   ;;  %11794 = vmatprep.mubr.msk.bf16.mxu1 %vm695_vm2, %v12593_v31  ;;  %v12596_v35 = vld [vmem:[%s13317_s28 + $0x8] sm:$0xff]   ;;  %v12599_v37 = vld [vmem:[%s13317_s28 + $0x10] sm:$0xff]   ;;  %s1970_s21 = sshra.s32 %s11139_s20, 3  ;;  %s521_s24 = sshra.s32 %s13295_s29, 3  ;;  %vm3544_vm11 = vcmask 519552  }
  0x2d   : >> { %11901 = vmatpush3.bf16.msra.mxu0 %v13301_v28  ;;  %11826 = vmatprep.subr.bf16.mxu1 %v12614_v30  ;;  %v12600_v40 = vld [vmem:[%s13313_s26 + $0x18] sm:$0xff]   ;;  %v12602_v42 = vld [vmem:[%s13313_s26 + $0x20] sm:$0xff]   ;;  %s9798_s22 = sshll.u32 %s1970_s21, 2  ;;  %v12604_v44 = vld [vmem:[%s13313_s26 + $0x28] sm:$0xff]   ;;  %s9642_s27 = sshll.u32 %s521_s24, 2 }
  0x2e   : >> { %11934 = vmatprep.subr.bf16.mxu0 %v12597_v29  ;;  %11902 = vmatprep.mubr.msk.bf16.mxu0 %vm695_vm2, %v12594_v33  ;;  %v12601_v41 = vld [vmem:[%s13317_s28 + $0x18] sm:$0xff]   ;;  %v12603_v43 = vld [vmem:[%s13317_s28 + $0x20] sm:$0xff]   ;;  %v12605_v45 = vld [vmem:[%s13317_s28 + $0x28] sm:$0xff]   ;;  %s13350_s23 = scalar_lea.vmem %s13263_s18, %s9798_s22  ;;  %s13371_s30 = scalar_lea.vmem %s13263_s18, %s9642_s27 }
  0x2f   : >> { %11795 = vmatmul.mubr.msk.bf16.vlgmr.msra.gmra.mrb[0].mxu1 %vm695_vm2, %v12595_v34  ;;  %v12607_v46 = vld [vmem:[%s13313_s26 + $0x30] sm:$0xff]   ;;  %v12609_v48 = vld [vmem:[%s13313_s26 + $0x38] sm:$0xff]   ;;  %v12611_v50 = vld [vmem:[%s13313_s26 + $0x40] sm:$0xff]   ;;  %s11141_s21 = sadd.s32 320, %s13295_s29  ;;  %s11143_s17 = sadd.s32 384, %s13295_s29 }
  0x30   : >> { %11903 = vmatmul.mubr.msk.bf16.vlgmr.msra.gmra.mrb[0].mxu0 %vm695_vm2, %v12596_v35  ;;  %11827 = vmatpush3.bf16.msra.mxu1 %v12614_v30  ;;  %v12608_v47 = vld [vmem:[%s13317_s28 + $0x30] sm:$0xff]   ;;  %v12610_v49 = vld [vmem:[%s13317_s28 + $0x38] sm:$0xff]   ;;  %v12612_v51 = vld [vmem:[%s13350_s23] sm:$0xff]   ;;  %s2348_s22 = sshra.s32 %s11141_s21, 3  ;;  %s11135_s21 = sadd.s32 128, %s13295_s29 }
  0x31   : >> { %11935 = vmatpush3.bf16.msra.mxu0 %v12597_v29  ;;  %11798 = vmatprep.mubr.msk.bf16.mxu1 %vm695_vm2, %v12598_v36  ;;  %v12613_v52 = vld [vmem:[%s13313_s26 + $0x48] sm:$0xff]   ;;  %v12617_v54 = vld [vmem:[%s13313_s26 + $0x50] sm:$0xff]   ;;  %v12619_v59 = vld [vmem:[%s13313_s26 + $0x58] sm:$0xff]   ;;  %s9838_s24 = sshll.u32 %s2348_s22, 2  ;;  %s2726_s20 = sshra.s32 %s11143_s17, 3 }
  0x32   : >> { %11906 = vmatprep.mubr.msk.bf16.mxu0 %vm695_vm2, %v12599_v37  ;;  %12518 = vmatprep.subr.msk.bf16.mxu0 %vm744_vm15, %v12606_v32  ;;  %v12615_v53 = vld [vmem:[%s13350_s23 + $0x8] sm:$0xff]   ;;  %v12618_v56 = vld [vmem:[%s13350_s23 + $0x10] sm:$0xff]   ;;  %v12620_v60 = vld [vmem:[%s13350_s23 + $0x18] sm:$0xff]   ;;  %s13402_s27 = scalar_lea.vmem %s13263_s18, %s9838_s24  ;;  %s11152_s14 = sshll.u32 %s13093_s19, 7 }
  0x33   : >> { %12514 = vmatprep.subr.msk.bf16.mxu1 %vm744_vm15, %v12629_v55  ;;  %v12621_v62 = vld [vmem:[%s13313_s26 + $0x60] sm:$0xff]   ;;  %v12623_v0 = vld [vmem:[%s13313_s26 + $0x68] sm:$0xff]   ;;  %v12625_v3 = vld [vmem:[%s13313_s26 + $0x70] sm:$0xff]   ;;  %s13801_s16 = scalar_lea.vmem [#allocation2], %s11152_s14  ;;  %s518_s19 = sadd.s32 1, %s13093_s19  }
  0x34   : >> { %11829 = vmatpush3.bf16.msra.mxu1 %v1049_v57  ;;  %v12622_v63 = vld [vmem:[%s13350_s23 + $0x20] sm:$0xff]   ;;  %v12624_v2 = vld [vmem:[%s13350_s23 + $0x28] sm:$0xff]   ;;  %v12626_v4 = vld [vmem:[%s13350_s23 + $0x30] sm:$0xff]   ;;  %p515_p4 = scmp.ge.s32.totalorder %s518_s19, 16  }
  0x35   : >> { %11937 = vmatpush3.bf16.msra.mxu0 %v2151_v38  ;;  %v12627_v5 = vld [vmem:[%s13313_s26 + $0x78] sm:$0xff]   ;;  %11862 = vmatprep.subr.bf16.mxu1 %v12650_v6  ;;  %v12652_v8 = vld [vmem:[%s16426_s1 + $0x60] sm:$0xff]   ;;  %s1214_s26 = sshra.s32 %s11135_s21, 3  ;;  %v12632_v11 = vld [vmem:[%s13371_s30 + $0x8] sm:$0xff]   ;;  %s9878_s21 = sshll.u32 %s2726_s20, 2 }
  0x36   : >> { %11970 = vmatprep.subr.bf16.mxu0 %v12616_v39  ;;  %v12628_v7 = vld [vmem:[%s13350_s23 + $0x38] sm:$0xff]   ;;  %v12630_v9 = vld [vmem:[%s13371_s30] sm:$0xff]   ;;  %v12633_v12 = vld [vmem:[%s13350_s23 + $0x48] sm:$0xff]   ;;  %s9718_s22 = sshll.u32 %s1214_s26, 2  ;;  %s13458_s29 = scalar_lea.vmem %s13263_s18, %s9878_s21 }
  0x37   : >> { %11799 = vmatmul.mubr.msk.bf16.gmra.mrb[4].mxu1 %vm695_vm2, %v12600_v40  ;;  %v12631_v10 = vld [vmem:[%s13350_s23 + $0x40] sm:$0xff]   ;;  %v12635_v13 = vld [vmem:[%s13371_s30 + $0x10] sm:$0xff]   ;;  %s13429_s24 = scalar_lea.vmem %s13263_s18, %s9718_s22  ;;  %v12665_v15 = vld [vmem:[%s16426_s1 + $0x28] sm:$0x3f]   ;;  %s13113_s22 = smov 48  }
  0x38   : >> { %11907 = vmatmul.mubr.msk.bf16.gmra.mrb[4].mxu0 %vm695_vm2, %v12601_v41  ;;  %11802 = vmatprep.mubr.msk.bf16.mxu1 %vm695_vm2, %v12602_v42  ;;  %v12636_v14 = vld [vmem:[%s13350_s23 + $0x50] sm:$0xff]   ;;  %v12637_v16 = vld [vmem:[%s13371_s30 + $0x18] sm:$0xff]   ;;  %v1395_v17 = vsel %vm744_vm15, %v12665_v15, 0  ;;  %v12639_v19 = vld [vmem:[%s13371_s30 + $0x20] sm:$0xff]   ;;  %s15163_s18 = smov (%p515_p4), 0  }
  0x39   : >> { %11910 = vmatprep.mubr.msk.bf16.mxu0 %vm695_vm2, %v12603_v43  ;;  %v12638_v18 = vld [vmem:[%s13350_s23 + $0x58] sm:$0xff]   ;;  %v12640_v20 = vld [vmem:[%s13350_s23 + $0x60] sm:$0xff]   ;;  %v12641_v21 = vld [vmem:[%s13371_s30 + $0x28] sm:$0xff]  }
  0x3a   : >> { %v12642_v22 = vld [vmem:[%s13350_s23 + $0x68] sm:$0xff]   ;;  %v12643_v23 = vld [vmem:[%s13371_s30 + $0x30] sm:$0xff]   ;;  %v12645_v27 = vld [vmem:[%s13371_s30 + $0x38] sm:$0xff]  }
  0x3b   : >> { %v12644_v25 = vld [vmem:[%s13350_s23 + $0x70] sm:$0xff]   ;;  %v12646_v29 = vld [vmem:[%s13350_s23 + $0x78] sm:$0xff]   ;;  %v12647_v30 = vld [vmem:[%s13371_s30 + $0x40] sm:$0xff]  }
  0x3c   : >> { %v12648_v31 = vld [vmem:[%s13402_s27] sm:$0xff]   ;;  %v12649_v32 = vld [vmem:[%s13371_s30 + $0x48] sm:$0xff]   ;;  %v12653_v34 = vld [vmem:[%s13371_s30 + $0x50] sm:$0xff]  }
  0x3d   : >> { %v12651_v33 = vld [vmem:[%s13402_s27 + $0x8] sm:$0xff]   ;;  %v12654_v35 = vld [vmem:[%s13402_s27 + $0x10] sm:$0xff]   ;;  %v12655_v37 = vld [vmem:[%s13371_s30 + $0x58] sm:$0xff]  }
  0x3e   : >> { %v12670_v36 = vld [vmem:[%s16426_s1 + $0x68] sm:$0x3f]   ;;  %v12657_v40 = vld [vmem:[%s13371_s30 + $0x60] sm:$0xff]   ;;  %v12674_v55 = vld [vmem:[%s13402_s27 + $0x58] sm:$0xff]  }
  0x3f   : >> { %11803 = vmatmul.mubr.msk.bf16.gmra.mrb[8].mxu1 %vm695_vm2, %v12604_v44  ;;  %v2907_v38 = vsel %vm744_vm15, %v12670_v36, 0  ;;  %v12658_v41 = vld [vmem:[%s13402_s27 + $0x20] sm:$0xff]   ;;  %v12659_v42 = vld [vmem:[%s13371_s30 + $0x68] sm:$0xff]   ;;  %v12661_v44 = vld [vmem:[%s13371_s30 + $0x70] sm:$0xff]  }
  0x40   : >> { %11911 = vmatmul.mubr.msk.bf16.gmra.mrb[8].mxu0 %vm695_vm2, %v12605_v45  ;;  %11806 = vmatprep.mubr.msk.bf16.mxu1 %vm695_vm2, %v12607_v46  ;;  %v12660_v43 = vld [vmem:[%s13402_s27 + $0x28] sm:$0xff]   ;;  %v12662_v45 = vld [vmem:[%s13402_s27 + $0x30] sm:$0xff]   ;;  %v12663_v46 = vld [vmem:[%s13371_s30 + $0x78] sm:$0xff]  }
  0x41   : >> { %11914 = vmatprep.mubr.msk.bf16.mxu0 %vm695_vm2, %v12608_v47  ;;  %v12664_v47 = vld [vmem:[%s13402_s27 + $0x38] sm:$0xff]   ;;  %v12676_v57 = vld [vmem:[%s13402_s27 + $0x60] sm:$0xff]   ;;  %vm13642_vm10 = vmor %vm16476_vm6, %vm3495_vm8  ;;  %vm3416_vm8 = vsmask.f32 7440  ;;  %vm3481_vm6 = vcmask 388352  }
  0x47   : >> { %11807 = vmatmul.mubr.msk.bf16.gmra.mrb[12].mxu1 %vm695_vm2, %v12609_v48  ;;  %v12666_v48 = vld [vmem:[%s13429_s24] sm:$0xff]  }
  0x48   : >> { %11915 = vmatmul.mubr.msk.bf16.gmra.mrb[12].mxu0 %vm695_vm2, %v12610_v49  ;;  %11810 = vmatprep.mubr.msk.bf16.mxu1 %vm695_vm2, %v12611_v50  ;;  %v12667_v49 = vld [vmem:[%s13402_s27 + $0x40] sm:$0xff]   ;;  %v12668_v50 = vld [vmem:[%s13429_s24 + $0x8] sm:$0xff]  }
  0x49   : >> { %11938 = vmatprep.mubr.msk.bf16.mxu0 %vm695_vm2, %v12612_v51  ;;  %v12669_v51 = vld [vmem:[%s13402_s27 + $0x48] sm:$0xff]  }
  0x4f   : >> { %11811 = vmatmul.mubr.msk.bf16.gmra.mrb[16].mxu1 %vm695_vm2, %v12613_v52  ;;  %v12671_v52 = vld [vmem:[%s13429_s24 + $0x10] sm:$0xff]  }
  0x50   : >> { %11939 = vmatmul.mubr.msk.bf16.vlgmr.msra.gmra.mrb[0].mxu0 %vm695_vm2, %v12615_v53  ;;  %11814 = vmatprep.mubr.msk.bf16.mxu1 %vm695_vm2, %v12617_v54  ;;  %v12672_v53 = vld [vmem:[%s13402_s27 + $0x50] sm:$0xff]   ;;  %v12673_v54 = vld [vmem:[%s13429_s24 + $0x18] sm:$0xff]  }
  0x51   : >> { %11971 = vmatpush3.bf16.msra.mxu0 %v12616_v39  ;;  %11942 = vmatprep.mubr.msk.bf16.mxu0 %vm695_vm2, %v12618_v56  ;;  %v12656_v39 = vld [vmem:[%s13402_s27 + $0x18] sm:$0xff]   ;;  %v12675_v56 = vld [vmem:[%s13429_s24 + $0x20] sm:$0xff]  }
  0x52   : >> { %12519 = vmatprep.subr.msk.bf16.mxu0 %vm744_vm15, %v12634_v58  ;;  %v12679_v58 = vld [vmem:[%s13429_s24 + $0x30] sm:$0xff]  }
  0x55   : >> { %11973 = vmatpush3.bf16.msra.mxu0 %v2529_v61  ;;  %v12683_v61 = vld [vmem:[%s13429_s24 + $0x40] sm:$0xff]  }
  0x56   : >> { %12006 = vmatprep.subr.bf16.mxu0 %v12652_v8 }
  0x57   : >> { %11815 = vmatmul.mubr.msk.bf16.gmra.mrb[20].mxu1 %vm695_vm2, %v12619_v59  ;;  %v12680_v59 = vld [vmem:[%s13402_s27 + $0x70] sm:$0xff]  }
  0x58   : >> { %11943 = vmatmul.mubr.msk.bf16.gmra.mrb[4].mxu0 %vm695_vm2, %v12620_v60  ;;  %11818 = vmatprep.mubr.msk.bf16.mxu1 %vm695_vm2, %v12621_v62  ;;  %v12682_v60 = vld [vmem:[%s13402_s27 + $0x78] sm:$0xff]   ;;  %v12684_v62 = vld [vmem:[%s13458_s29] sm:$0xff]  }
  0x59   : >> { %11946 = vmatprep.mubr.msk.bf16.mxu0 %vm695_vm2, %v12622_v63  ;;  %v12685_v63 = vld [vmem:[%s13429_s24 + $0x48] sm:$0xff]  }
  0x5f   : >> { %11819 = vmatmul.mubr.msk.bf16.gmra.mrb[24].mxu1 %vm695_vm2, %v12623_v0  ;;  %v12686_v0 = vld [vmem:[%s13458_s29 + $0x8] sm:$0xff]  }
  0x60   : >> { %11947 = vmatmul.mubr.msk.bf16.gmra.mrb[8].mxu0 %vm695_vm2, %v12624_v2  ;;  %11822 = vmatprep.mubr.msk.bf16.mxu1 %vm695_vm2, %v12625_v3  ;;  %v12687_v2 = vld [vmem:[%s13429_s24 + $0x50] sm:$0xff]  }
  0x61   : >> { %11950 = vmatprep.mubr.msk.bf16.mxu0 %vm695_vm2, %v12626_v4  ;;  %v12688_v3 = vld [vmem:[%s13458_s29 + $0x10] sm:$0xff]   ;;  %v12689_v4 = vld [vmem:[%s13429_s24 + $0x58] sm:$0xff]  }
  0x67   : >> { %11823 = vmatmul.mubr.msk.bf16.gmra.mrb[28].mxu1 %vm695_vm2, %v12627_v5  ;;  %v12690_v5 = vld [vmem:[%s13458_s29 + $0x18] sm:$0xff]  }
  0x68   : >> { %11951 = vmatmul.mubr.msk.bf16.gmra.mrb[12].mxu0 %vm695_vm2, %v12628_v7  ;;  %11830 = vmatprep.mubr.msk.bf16.mxu1 %vm695_vm2, %v12630_v9  ;;  %v12692_v7 = vld [vmem:[%s13458_s29 + $0x20] sm:$0xff]   ;;  %v12694_v9 = vld [vmem:[%s13458_s29 + $0x28] sm:$0xff]  }
  0x69   : >> { %11954 = vmatprep.mubr.msk.bf16.mxu0 %vm695_vm2, %v12631_v10  ;;  %v12695_v10 = vld [vmem:[%s13429_s24 + $0x70] sm:$0xff]  }
  0x6f   : >> { %11831 = vmatmul.mubr.msk.bf16.vlgmr.msra.gmra.mrb[0].mxu1 %vm695_vm2, %v12632_v11  ;;  %v12696_v11 = vld [vmem:[%s13458_s29 + $0x30] sm:$0xff]  }
  0x70   : >> { %11955 = vmatmul.mubr.msk.bf16.gmra.mrb[16].mxu0 %vm695_vm2, %v12633_v12  ;;  %11834 = vmatprep.mubr.msk.bf16.mxu1 %vm695_vm2, %v12635_v13  ;;  %v12697_v12 = vld [vmem:[%s13429_s24 + $0x78] sm:$0xff]  }
  0x71   : >> { %11958 = vmatprep.mubr.msk.bf16.mxu0 %vm695_vm2, %v12636_v14  ;;  %11863 = vmatpush3.bf16.msra.mxu1 %v12650_v6  ;;  %v12691_v6 = vld [vmem:[%s13429_s24 + $0x60] sm:$0xff]   ;;  %v12698_v13 = vld [vmem:[%s13458_s29 + $0x38] sm:$0xff]  }
  0x72   : >> { %12515 = vmatprep.subr.msk.bf16.mxu1 %vm744_vm15, %v12665_v15  ;;  %v12699_v14 = vld [vmem:[%s13317_s28 + $0x40] sm:$0xff]  }
  0x73   : >> { %v12700_v15 = vld [vmem:[%s13458_s29 + $0x40] sm:$0xff]  }
  0x75   : >> { %11865 = vmatpush3.bf16.msra.mxu1 %v1395_v17  ;;  %v12702_v17 = vld [vmem:[%s13458_s29 + $0x48] sm:$0xff]  }
  0x76   : >> { %12273 = vmatprep.subr.bf16.mxu1 %v13280_v24 }
  0x77   : >> { %11835 = vmatmul.mubr.msk.bf16.gmra.mrb[4].mxu1 %vm695_vm2, %v12637_v16  ;;  %v12701_v16 = vld [vmem:[%s13317_s28 + $0x48] sm:$0xff]  }
  0x78   : >> { %11959 = vmatmul.mubr.msk.bf16.gmra.mrb[20].mxu0 %vm695_vm2, %v12638_v18  ;;  %11838 = vmatprep.mubr.msk.bf16.mxu1 %vm695_vm2, %v12639_v19  ;;  %v12703_v18 = vld [vmem:[%s13317_s28 + $0x50] sm:$0xff]  }
  0x79   : >> { %11962 = vmatprep.mubr.msk.bf16.mxu0 %vm695_vm2, %v12640_v20  ;;  %v12704_v19 = vld [vmem:[%s13458_s29 + $0x50] sm:$0xff]   ;;  %v12705_v20 = vld [vmem:[%s13317_s28 + $0x58] sm:$0xff]  }
  0x7f   : >> { %11839 = vmatmul.mubr.msk.bf16.gmra.mrb[8].mxu1 %vm695_vm2, %v12641_v21  ;;  %v12706_v21 = vld [vmem:[%s13458_s29 + $0x58] sm:$0xff]  }
  0x80   : >> { %11963 = vmatmul.mubr.msk.bf16.gmra.mrb[24].mxu0 %vm695_vm2, %v12642_v22  ;;  %11842 = vmatprep.mubr.msk.bf16.mxu1 %vm695_vm2, %v12643_v23  ;;  %v12707_v22 = vld [vmem:[%s13317_s28 + $0x60] sm:$0xff]  }
  0x81   : >> { %11966 = vmatprep.mubr.msk.bf16.mxu0 %vm695_vm2, %v12644_v25  ;;  %v12708_v23 = vld [vmem:[%s13458_s29 + $0x60] sm:$0xff]   ;;  %v12709_v25 = vld [vmem:[%s13317_s28 + $0x68] sm:$0xff]  }
  0x87   : >> { %11843 = vmatmul.mubr.msk.bf16.gmra.mrb[12].mxu1 %vm695_vm2, %v12645_v27  ;;  %v12710_v27 = vld [vmem:[%s13458_s29 + $0x68] sm:$0xff]  }
  0x88   : >> { %11967 = vmatmul.mubr.msk.bf16.gmra.mrb[28].mxu0 %vm695_vm2, %v12646_v29  ;;  %11846 = vmatprep.mubr.msk.bf16.mxu1 %vm695_vm2, %v12647_v30  ;;  %v12711_v29 = vld [vmem:[%s13317_s28 + $0x70] sm:$0xff]  }
  0x89   : >> { %11974 = vmatprep.mubr.msk.bf16.mxu0 %vm695_vm2, %v12648_v31  ;;  %v12712_v30 = vld [vmem:[%s13458_s29 + $0x70] sm:$0xff]   ;;  %v12713_v31 = vld [vmem:[%s13317_s28 + $0x78] sm:$0xff]  }
  0x8f   : >> { %11847 = vmatmul.mubr.msk.bf16.gmra.mrb[16].mxu1 %vm695_vm2, %v12649_v32  ;;  %v12714_v32 = vld [vmem:[%s13458_s29 + $0x78] sm:$0xff]  }
  0x90   : >> { %11975 = vmatmul.mubr.msk.bf16.vlgmr.msra.gmra.mrb[0].mxu0 %vm695_vm2, %v12651_v33  ;;  %11850 = vmatprep.mubr.msk.bf16.mxu1 %vm695_vm2, %v12653_v34 }
  0x91   : >> { %12007 = vmatpush3.bf16.msra.mxu0 %v12652_v8  ;;  %11978 = vmatprep.mubr.msk.bf16.mxu0 %vm695_vm2, %v12654_v35  ;;  %v12693_v8 = vld [vmem:[%s13429_s24 + $0x68] sm:$0xff]  }
  0x92   : >> { %12520 = vmatprep.subr.msk.bf16.mxu0 %vm744_vm15, %v12670_v36 }
  0x95   : >> { %12009 = vmatpush3.bf16.msra.mxu0 %v2907_v38 }
  0x97   : >> { %11851 = vmatmul.mubr.msk.bf16.gmra.mrb[20].mxu1 %vm695_vm2, %v12655_v37 }
  0x98   : >> { %11979 = vmatmul.mubr.msk.bf16.gmra.mrb[4].mxu0 %vm695_vm2, %v12656_v39  ;;  %11854 = vmatprep.mubr.msk.bf16.mxu1 %vm695_vm2, %v12657_v40 }
  0x99   : >> { %11982 = vmatprep.mubr.msk.bf16.mxu0 %vm695_vm2, %v12658_v41 }
  0x9f   : >> { %11855 = vmatmul.mubr.msk.bf16.gmra.mrb[24].mxu1 %vm695_vm2, %v12659_v42 }
  0xa0   : >> { %11983 = vmatmul.mubr.msk.bf16.gmra.mrb[8].mxu0 %vm695_vm2, %v12660_v43  ;;  %11858 = vmatprep.mubr.msk.bf16.mxu1 %vm695_vm2, %v12661_v44 }
  0xa1   : >> { %11986 = vmatprep.mubr.msk.bf16.mxu0 %vm695_vm2, %v12662_v45 }
  0xa7   : >> { %11859 = vmatmul.mubr.msk.bf16.gmra.mrb[28].mxu1 %vm695_vm2, %v12663_v46 }
  0xa8   : >> { %11987 = vmatmul.mubr.msk.bf16.gmra.mrb[12].mxu0 %vm695_vm2, %v12664_v47  ;;  %11866 = vmatprep.mubr.msk.bf16.mxu1 %vm695_vm2, %v12666_v48 }
  0xa9   : >> { %11990 = vmatprep.mubr.msk.bf16.mxu0 %vm695_vm2, %v12667_v49 }
  0xaf   : >> { %11867 = vmatmul.mubr.msk.bf16.vlgmr.msra.gmra.mrb[0].mxu1 %vm695_vm2, %v12668_v50  ;;  %v13620_v50 = vld [vmem:[%s16427_s2] ss:$0 sm:$0xff] }
  0xb0   : >> { %11991 = vmatmul.mubr.msk.bf16.gmra.mrb[16].mxu0 %vm695_vm2, %v12669_v51  ;;  %11870 = vmatprep.mubr.msk.bf16.mxu1 %vm695_vm2, %v12671_v52 }
  0xb1   : >> { %11994 = vmatprep.mubr.msk.bf16.mxu0 %vm695_vm2, %v12672_v53  ;;  %12275 = vmatpush3.bf16.msra.mxu1 %v13280_v24  ;;  %v12677_v24 = vld [vmem:[%s13429_s24 + $0x28] sm:$0xff]  }
  0xb2   : >> { %12517 = vmatprep.subr.msk.bf16.mxu1 %vm744_vm15, %v13289_v26  ;;  %v12678_v26 = vld [vmem:[%s13402_s27 + $0x68] sm:$0xff]   ;;  %s13112_s27 = smov 16  }
  0xb5   : >> { %12276 = vmatpush3.bf16.msra.mxu1 %v13301_v28  ;;  %v12681_v28 = vld [vmem:[%s13429_s24 + $0x38] sm:$0xff]   ;;  %s13114_s24 = smov 32  }
  0xb7   : >> { %11871 = vmatmul.mubr.msk.bf16.gmra.mrb[4].mxu1 %vm695_vm2, %v12673_v54 }
  0xb8   : >> { %11995 = vmatmul.mubr.msk.bf16.gmra.mrb[20].mxu0 %vm695_vm2, %v12674_v55  ;;  %11874 = vmatprep.mubr.msk.bf16.mxu1 %vm695_vm2, %v12675_v56 }
  0xb9   : >> { %11998 = vmatprep.mubr.msk.bf16.mxu0 %vm695_vm2, %v12676_v57 }
  0xbf   : >> { %11875 = vmatmul.mubr.msk.bf16.gmra.mrb[8].mxu1 %vm695_vm2, %v12677_v24 }
  0xc0   : >> { %11999 = vmatmul.mubr.msk.bf16.gmra.mrb[24].mxu0 %vm695_vm2, %v12678_v26  ;;  %11878 = vmatprep.mubr.msk.bf16.mxu1 %vm695_vm2, %v12679_v58 }
  0xc1   : >> { %12002 = vmatprep.mubr.msk.bf16.mxu0 %vm695_vm2, %v12680_v59 }
  0xc7   : >> { %11879 = vmatmul.mubr.msk.bf16.gmra.mrb[12].mxu1 %vm695_vm2, %v12681_v28 }
  0xc8   : >> { %12003 = vmatmul.mubr.msk.bf16.gmra.mrb[28].mxu0 %vm695_vm2, %v12682_v60  ;;  %11882 = vmatprep.mubr.msk.bf16.mxu1 %vm695_vm2, %v12683_v61 }
  0xc9   : >> { %12010 = vmatprep.mubr.msk.bf16.mxu0 %vm695_vm2, %v12684_v62 }
  0xcf   : >> { %11883 = vmatmul.mubr.msk.bf16.gmra.mrb[16].mxu1 %vm695_vm2, %v12685_v63 }
  0xd0   : >> { %12011 = vmatmul.mubr.msk.bf16.vlgmr.msra.gmra.mrb[0].mxu0 %vm695_vm2, %v12686_v0  ;;  %11886 = vmatprep.mubr.msk.bf16.mxu1 %vm695_vm2, %v12687_v2 }
  0xd1   : >> { %12014 = vmatprep.mubr.msk.bf16.mxu0 %vm695_vm2, %v12688_v3 }
  0xd7   : >> { %11887 = vmatmul.mubr.msk.bf16.gmra.mrb[20].mxu1 %vm695_vm2, %v12689_v4 }
  0xd8   : >> { %12015 = vmatmul.mubr.msk.bf16.gmra.mrb[4].mxu0 %vm695_vm2, %v12690_v5  ;;  %11890 = vmatprep.mubr.msk.bf16.mxu1 %vm695_vm2, %v12691_v6 }
  0xd9   : >> { %12018 = vmatprep.mubr.msk.bf16.mxu0 %vm695_vm2, %v12692_v7 }
  0xdf   : >> { %11891 = vmatmul.mubr.msk.bf16.gmra.mrb[24].mxu1 %vm695_vm2, %v12693_v8 }
  0xe0   : >> { %12019 = vmatmul.mubr.msk.bf16.gmra.mrb[8].mxu0 %vm695_vm2, %v12694_v9  ;;  %11894 = vmatprep.mubr.msk.bf16.mxu1 %vm695_vm2, %v12695_v10 }
  0xe1   : >> { %12022 = vmatprep.mubr.msk.bf16.mxu0 %vm695_vm2, %v12696_v11 }
  0xe7   : >> { %11895 = vmatmul.mubr.msk.bf16.gmra.mrb[28].mxu1 %vm695_vm2, %v12697_v12 }
  0xe8   : >> { %12023 = vmatmul.mubr.msk.bf16.gmra.mrb[12].mxu0 %vm695_vm2, %v12698_v13  ;;  %11918 = vmatprep.mubr.msk.bf16.mxu1 %vm695_vm2, %v12699_v14 }
  0xe9   : >> { %12026 = vmatprep.mubr.msk.bf16.mxu0 %vm695_vm2, %v12700_v15 }
  0xef   : >> { %11919 = vmatmul.mubr.msk.bf16.vlgmr.msra.gmra.mrb[16].mxu1 %vm695_vm2, %v12701_v16 }
  0xf0   : >> { %12027 = vmatmul.mubr.msk.bf16.gmra.mrb[16].mxu0 %vm695_vm2, %v12702_v17  ;;  %11922 = vmatprep.mubr.msk.bf16.mxu1 %vm695_vm2, %v12703_v18  ;;  %v16495_v17 = vmov 0 }
  0xf1   : >> { %12030 = vmatprep.mubr.msk.bf16.mxu0 %vm695_vm2, %v12704_v19  ;;  %v16496_v17 = vsel %vm13642_vm10, 4294967295, %v16495_v17 }
  0xf2   : >> { %16497 = vst [vmem:[#allocation8_spill] sm:$0xff] %v16496_v17 }
  0xf7   : >> { %11923 = vmatmul.mubr.msk.bf16.gmra.mrb[20].mxu1 %vm695_vm2, %v12705_v20 }
  0xf8   : >> { %12031 = vmatmul.mubr.msk.bf16.gmra.mrb[20].mxu0 %vm695_vm2, %v12706_v21  ;;  %11926 = vmatprep.mubr.msk.bf16.mxu1 %vm695_vm2, %v12707_v22 }
  0xf9   : >> { %12034 = vmatprep.mubr.msk.bf16.mxu0 %vm695_vm2, %v12708_v23 }
  0xff   : >> { %11927 = vmatmul.mubr.msk.bf16.gmra.mrb[24].mxu1 %vm695_vm2, %v12709_v25 }
 0x100   : >> { %12035 = vmatmul.mubr.msk.bf16.gmra.mrb[24].mxu0 %vm695_vm2, %v12710_v27  ;;  %11930 = vmatprep.mubr.msk.bf16.mxu1 %vm695_vm2, %v12711_v29 }
 0x101   : >> { %12038 = vmatprep.mubr.msk.bf16.mxu0 %vm695_vm2, %v12712_v30 }
 0x107   : >> { %11931 = vmatmul.mubr.msk.bf16.gmra.mrb[28].mxu1 %vm695_vm2, %v12713_v31 }
 0x108   : >> { %12039 = vmatmul.mubr.msk.bf16.gmra.mrb[28].mxu0 %vm695_vm2, %v12714_v32 }
 0x182   : >> { %v11868_v33 = vpop.f32.mrb[0].mxu1 }
 0x183   : >> { %v1431_v34 = vpop.f32.mrb[1].mxu1 }
 0x184   : >> { %v11869_v35 = vpop.f32.mrb[2].mxu1 }
 0x185   : >> { %v1434_v36 = vpop.f32.mrb[3].mxu1 }
 0x18a   : >> { %v11872_v37 = vpop.f32.mrb[4].mxu1 }
 0x18b   : >> { %v1447_v38 = vpop.f32.mrb[5].mxu1 }
 0x18c   : >> { %v11873_v39 = vpop.f32.mrb[6].mxu1 }
 0x18d   : >> { %v1450_v40 = vpop.f32.mrb[7].mxu1 }
 0x192   : >> { %v13601_v41 = vpop.f32.mrb[8].mxu1 }
 0x193   : >> { %v13603_v42 = vpop.f32.mrb[9].mxu1 }
 0x194   : >> { %v13605_v43 = vpop.f32.mrb[10].mxu1 }
 0x195   : >> { %v13607_v44 = vpop.f32.mrb[11].mxu1 }
 0x19a   : >> { %v13609_v45 = vpop.f32.mrb[12].mxu1 }
 0x19b   : >> { %v13611_v46 = vpop.f32.mrb[13].mxu1 }
 0x19c   : >> { %v13613_v47 = vpop.f32.mrb[14].mxu1 }
 0x19d   : >> { %v13615_v48 = vpop.f32.mrb[15].mxu1 }
 0x1a3   : >> { %v12012_v49 = vpop.f32.mrb[0].mxu0 }
 0x1a4   : >> { %v12277_v51 = vadd.f32 %v12012_v49, %v11868_v33  ;;  %v2943_v52 = vpop.f32.mrb[1].mxu0 }
 0x1a5   : >> { %v12278_v53 = vadd.f32 %v2943_v52, %v1431_v34  ;;  %v12013_v54 = vpop.f32.mrb[2].mxu0 }
 0x1a6   : >> { %v3111_v55 = vadd.f32 %v12277_v51, %v13620_v50  ;;  %v12279_v56 = vadd.f32 %v12013_v54, %v11869_v35  ;;  %v2946_v57 = vpop.f32.mrb[3].mxu0 }
 0x1a7   : >> { %v3109_v24 = vadd.f32 %v12278_v53, %v13620_v50  ;;  %v12280_v26 = vadd.f32 %v2946_v57, %v1434_v36 }
 0x1a8   : >> { %vm3143_vm4 = vcmp.gt.f32.partialorder %v3111_v55, 0.0  ;;  %v3175_v58 = vmul.f32 0.2, %v3111_v55  ;;  %v3112_v59 = vadd.f32 %v12279_v56, %v13620_v50 }
 0x1a9   : >> { %vm3141_vm5 = vcmp.gt.f32.partialorder %v3109_v24, 0.0  ;;  %v3173_v28 = vmul.f32 0.2, %v3109_v24  ;;  %v3110_v60 = vadd.f32 %v12280_v26, %v13620_v50 }
 0x1aa   : >> { %v3207_v61 = vsel %vm3143_vm4, %v3111_v55, %v3175_v58  ;;  %vm3144_vm7 = vcmp.gt.f32.partialorder %v3112_v59, 0.0  ;;  %v3176_v62 = vmul.f32 0.2, %v3112_v59 }
 0x1ab   : >> { %v13626_v63 = vpack.c.bf16 %v3207_v61, %v3207_v61  ;;  %v3205_v0 = vsel %vm3141_vm5, %v3109_v24, %v3173_v28  ;;  %vm3142_vm9 = vcmp.gt.f32.partialorder %v3110_v60, 0.0  ;;  %v3174_v2 = vmul.f32 0.2, %v3110_v60  ;;  %v12016_v3 = vpop.f32.mrb[4].mxu0 }
 0x1ac   : >> { %v13628_v4 = vpack.c.bf16 %v3205_v0, %v3205_v0  ;;  %v3208_v5 = vsel %vm3144_vm7, %v3112_v59, %v3176_v62  ;;  %v12281_v6 = vadd.f32 %v12016_v3, %v11872_v37  ;;  %v2959_v7 = vpop.f32.mrb[5].mxu0 }
 0x1ad   : >> { %v13630_v8 = vpack.c.bf16 %v3208_v5, %v3208_v5  ;;  %v3206_v9 = vsel %vm3142_vm9, %v3110_v60, %v3174_v2  ;;  %v12282_v10 = vadd.f32 %v2959_v7, %v1447_v38  ;;  %v12017_v11 = vpop.f32.mrb[6].mxu0  ;;  %3383 = vrot.lane.b32.xlu1 %v13626_v63, %s13112_s27  ;;  %v3502_v12 = vrot.slane %v13626_v63, 5 }
 0x1ae   : >> { %v13635_v13 = vpack.c.bf16 %v3206_v9, %v3206_v9  ;;  %v3115_v14 = vadd.f32 %v12281_v6, %v13620_v50  ;;  %v12283_v15 = vadd.f32 %v12017_v11, %v11873_v39  ;;  %v2962_v16 = vpop.f32.mrb[7].mxu0  ;;  %3379 = vrot.lane.b32.xlu0 %v13628_v4, %s13112_s27  ;;  %v9958_v34 = vrot.slane %v13628_v4, 9 }
 0x1af   : >> { %v3113_v18 = vadd.f32 %v12282_v10, %v13620_v50  ;;  %v12284_v19 = vadd.f32 %v2962_v16, %v1450_v40  ;;  %v3504_v20 = vrot.slane %v3502_v12, 4  ;;  %v3505_v21 = vrot.slane %v13630_v8, 5 }
 0x1b0   : >> { %v3116_v22 = vadd.f32 %v12283_v15, %v13620_v50  ;;  %v3499_v23 = vrot.slane %v13635_v13, 5  ;;  %v3179_v29 = vmul.f32 0.2, %v3115_v14  ;;  %vm3147_vm13 = vcmp.gt.f32.partialorder %v3115_v14, 0.0 }
 0x1b1   : >> { %v3114_v25 = vadd.f32 %v12284_v19, %v13620_v50  ;;  %3385 = vrot.lane.b32.xlu1 %v13630_v8, %s13112_s27  ;;  %v3506_v27 = vsel %vm13642_vm10, %v3504_v20, %v3505_v21  ;;  %vm3145_vm14 = vcmp.gt.f32.partialorder %v3113_v18, 0.0  ;;  %v3177_v32 = vmul.f32 0.2, %v3113_v18 }
 0x1b2   : >> { %vm3148_vm12 = vcmp.gt.f32.partialorder %v3116_v22, 0.0  ;;  %v3180_v30 = vmul.f32 0.2, %v3116_v22  ;;  %3381 = vrot.lane.b32.xlu0 %v13635_v13, %s13112_s27  ;;  %v3501_v31 = vrot.slane %v3499_v23, 4  ;;  %v3500_v51 = vsel %vm13642_vm10, %v9958_v34, %v3499_v23 }
 0x1b3   : >> { %v12020_v33 = vpop.f32.mrb[8].mxu0  ;;  %v3178_v36 = vmul.f32 0.2, %v3114_v25  ;;  %vm3146_vm15 = vcmp.gt.f32.partialorder %v3114_v25, 0.0  ;;  %v3211_v52 = vsel %vm3147_vm13, %v3115_v14, %v3179_v29  ;;  %v3285_v55 = vshrl.u32 %v13635_v13, 16 }
 0x1b4   : >> { %v3212_v35 = vsel %vm3148_vm12, %v3116_v22, %v3180_v30  ;;  %v12285_v37 = vadd.f32 %v12020_v33, %v13601_v41  ;;  %v2975_v38 = vpop.f32.mrb[9].mxu0  ;;  %v3503_v39 = vsel %vm13642_vm10, %v3501_v31, %v3502_v12  ;;  %v3294_v24 = vshrl.u32 %v13626_v63, 16 }
 0x1b5   : >> { %v12286_v40 = vadd.f32 %v2975_v38, %v13603_v42  ;;  %v12021_v49 = vpop.f32.mrb[10].mxu0  ;;  %3522 = vrot.lane.b32.xlu1 %v3503_v39, %s13113_s22  ;;  %v3209_v42 = vsel %vm3145_vm14, %v3113_v18, %v3177_v32  ;;  %v13673_v56 = vpack.c.bf16 %v3212_v35, %v3212_v35  ;;  %v3210_v26 = vsel %vm3146_vm15, %v3114_v25, %v3178_v36  ;;  %vm13730_vm14 = vmor %vm449_vm1, %vm3416_vm8 }
 0x1b6   : >> { %v3119_v53 = vadd.f32 %v12285_v37, %v13620_v50  ;;  %v12287_v41 = vadd.f32 %v12021_v49, %v13605_v43  ;;  %v2978_v54 = vpop.f32.mrb[11].mxu0  ;;  %3524 = vrot.lane.b32.xlu0 %v3506_v27, %s13113_s22  ;;  %v13679_v59 = vrot.slane %v3285_v55, 7  ;;  %v3288_v43 = vshll.u32 %v13635_v13, 16 }
 0x1b7   : >> { %v12288_v57 = vadd.f32 %v2978_v54, %v13607_v44  ;;  %v3117_v58 = vadd.f32 %v12286_v40, %v13620_v50  ;;  %v13691_v61 = vrot.slane %v3294_v24, 7  ;;  %v13693_v62 = vpack.c.bf16 %v3211_v52, %v3211_v52 }
 0x1b8   : >> { %v3183_v28 = vmul.f32 0.2, %v3119_v53  ;;  %v3120_v60 = vadd.f32 %v12287_v41, %v13620_v50  ;;  %vm3151_vm2 = vcmp.gt.f32.partialorder %v3119_v53, 0.0  ;;  %v13687_v44 = vor.u32 %v3288_v43, %v13679_v59 }
 0x1b9   : >> { %3393 = vrot.lane.b32.xlu1 %v13673_v56, %s13112_s27  ;;  %v13695_v0 = vpack.c.bf16 %v3209_v42, %v3209_v42  ;;  %v13697_v2 = vpack.c.bf16 %v3210_v26, %v3210_v26  ;;  %v3118_v3 = vadd.f32 %v12288_v57, %v13620_v50  ;;  %vm3149_vm4 = vcmp.gt.f32.partialorder %v3117_v58, 0.0 }
 0x1ba   : >> { %3520 = vrot.lane.b32.xlu0 %v3500_v51, %s13113_s22  ;;  %v3181_v6 = vmul.f32 0.2, %v3117_v58  ;;  %v3297_v10 = vshll.u32 %v13626_v63, 16  ;;  %v3215_v11 = vsel %vm3151_vm2, %v3119_v53, %v3183_v28  ;;  %vm3152_vm5 = vcmp.gt.f32.partialorder %v3120_v60, 0.0 }
 0x1bb   : >> { %v12024_v5 = vpop.f32.mrb[12].mxu0  ;;  %v13705_v14 = vrot.slane %v3288_v43, 5  ;;  %v3184_v15 = vmul.f32 0.2, %v3120_v60  ;;  %v3182_v20 = vmul.f32 0.2, %v3118_v3  ;;  %v13717_v27 = vpack.c.bf16 %v3215_v11, %v3215_v11 }
 0x1bc   : >> { %v12289_v7 = vadd.f32 %v12024_v5, %v13609_v45  ;;  %v2991_v9 = vpop.f32.mrb[13].mxu0  ;;  %v13712_v45 = vor.u32 %v3297_v10, %v13691_v61  ;;  %v3424_v23 = vrot.slane %v3285_v55, 4  ;;  %vm3150_vm7 = vcmp.gt.f32.partialorder %v3118_v3, 0.0 }
 0x1bd   : >> { %v12290_v12 = vadd.f32 %v2991_v9, %v13611_v46  ;;  %v12025_v13 = vpop.f32.mrb[14].mxu0  ;;  %3389 = vrot.lane.b32.xlu1 %v13697_v2, %s13112_s27  ;;  %v3216_v31 = vsel %vm3152_vm5, %v3120_v60, %v3184_v15  ;;  %v3427_v33 = vrot.slane %v3297_v10, 5  ;;  %v3508_v34 = vrot.slane %v13695_v0, 5 }
 0x1be   : >> { %v3123_v16 = vadd.f32 %v12289_v7, %v13620_v50  ;;  %v12291_v18 = vadd.f32 %v12025_v13, %v13613_v47  ;;  %v2994_v19 = vpop.f32.mrb[15].mxu0  ;;  %3391 = vrot.lane.b32.xlu0 %v13693_v62, %s13112_s27  ;;  %v3213_v47 = vsel %vm3149_vm4, %v3117_v58, %v3181_v6  ;;  %v3425_v30 = vor.u32 %v3424_v23, %v13705_v14 }
 0x1bf   : >> { %v3121_v46 = vadd.f32 %v12290_v12, %v13620_v50  ;;  %v12292_v22 = vadd.f32 %v2994_v19, %v13615_v48  ;;  %v3214_v35 = vsel %vm3150_vm7, %v3118_v3, %v3182_v20  ;;  %v3507_v39 = vrot.slane %v3505_v21, 4 }
 0x1c0   : >> { %v3124_v25 = vadd.f32 %v12291_v18, %v13620_v50  ;;  %v3187_v32 = vmul.f32 0.2, %v3123_v16  ;;  %vm3155_vm9 = vcmp.gt.f32.partialorder %v3123_v16, 0.0  ;;  %v3426_v49 = vrot.slane %v3425_v30, 4 }
 0x1c1   : >> { %v3122_v29 = vadd.f32 %v12292_v22, %v13620_v50  ;;  %v3185_v36 = vmul.f32 0.2, %v3121_v46  ;;  %vm3153_vm12 = vcmp.gt.f32.partialorder %v3121_v46, 0.0  ;;  %v3509_v21 = vsel %vm13642_vm10, %v3507_v39, %v3508_v34 }
 0x1c2   : >> { %3387 = vrot.lane.b32.xlu0 %v13695_v0, %s13112_s27  ;;  %v11920_v48 = vpop.f32.mrb[16].mxu1  ;;  %v3188_v40 = vmul.f32 0.2, %v3124_v25  ;;  %vm3156_vm13 = vcmp.gt.f32.partialorder %v3124_v25, 0.0  ;;  %v3219_v26 = vsel %vm3155_vm9, %v3123_v16, %v3187_v32  ;;  %v3428_v58 = vsel %vm13730_vm14, %v3426_v49, %v3427_v33 }
 0x1c3   : >> { %v12028_v37 = vpop.f32.mrb[16].mxu0  ;;  %v1873_v38 = vpop.f32.mrb[17].mxu1  ;;  %v3186_v41 = vmul.f32 0.2, %v3122_v29  ;;  %vm3154_vm15 = vcmp.gt.f32.partialorder %v3122_v29, 0.0  ;;  %vm3357_vm2 = vcmask 125952   ;;  %v3217_v60 = vsel %vm3153_vm12, %v3121_v46, %v3185_v36  ;;  %3459 = vrot.lane.b32.xlu1 %v3428_v58, %s13114_s24 }
 0x1c4   : >> { %v12293_v51 = vadd.f32 %v12028_v37, %v11920_v48  ;;  %v3007_v52 = vpop.f32.mrb[17].mxu0  ;;  %v11921_v53 = vpop.f32.mrb[18].mxu1  ;;  %vm3358_vm4 = vsmask.f32 7938  ;;  %v3303_v3 = vshrl.u32 %v13630_v8, 16  ;;  %v3306_v5 = vshll.u32 %v13630_v8, 16 }
 0x1c5   : >> { %v12294_v55 = vadd.f32 %v3007_v52, %v1873_v38  ;;  %v12029_v42 = vpop.f32.mrb[18].mxu0  ;;  %v1876_v57 = vpop.f32.mrb[19].mxu1  ;;  %v3429_v6 = vrot.slane %v3294_v24, 4  ;;  %v13747_v7 = vpack.c.bf16 %v3213_v47, %v3213_v47  ;;  %v3220_v9 = vsel %vm3156_vm13, %v3124_v25, %v3188_v40  ;;  %vm13795_vm8 = vmand %vm3357_vm2, %vm3358_vm4 }
 0x1c6   : >> { %v12295_v43 = vadd.f32 %v12029_v42, %v11921_v53  ;;  %v3010_v28 = vpop.f32.mrb[19].mxu0  ;;  %v3127_v10 = vadd.f32 %v12293_v51, %v13620_v50  ;;  %v13751_v12 = vpack.c.bf16 %v3216_v31, %v3216_v31  ;;  %v3218_v13 = vsel %vm3154_vm15, %v3122_v29, %v3186_v41 }
 0x1c7   : >> { %v12296_v11 = vadd.f32 %v3010_v28, %v1876_v57  ;;  %v13754_v15 = vrot.slane %v3303_v3, 7  ;;  %v3430_v16 = vor.u32 %v3429_v6, %v3427_v33  ;;  %v13757_v18 = vpack.c.bf16 %v3214_v35, %v3214_v35  ;;  %3526 = vrot.lane.b32.xlu1 %v3509_v21, %s13113_s22 }
 0x1c8   : >> { %v13759_v8 = vpack.c.bf16 %v3219_v26, %v3219_v26  ;;  %v13761_v63 = vpack.c.bf16 %v3217_v60, %v3217_v60  ;;  %v3125_v24 = vadd.f32 %v12294_v55, %v13620_v50  ;;  %v13764_v20 = vpack.c.bf16 %v3220_v9, %v3220_v9 }
 0x1c9   : >> { %v13768_v46 = vor.u32 %v3306_v5, %v13754_v15  ;;  %v3431_v22 = vrot.slane %v3430_v16, 4  ;;  %v3432_v23 = vrot.slane %v3306_v5, 5  ;;  %v13770_v29 = vpack.c.bf16 %v3218_v13, %v3218_v13 }
 0x1ca   : >> { %v11924_v19 = vpop.f32.mrb[20].mxu1  ;;  %vm3159_vm5 = vcmp.gt.f32.partialorder %v3127_v10, 0.0  ;;  %v3191_v30 = vmul.f32 0.2, %v3127_v10  ;;  %v16439_v31 = vshrl.u32 %v13695_v0, 16  ;;  %v3128_v48 = vadd.f32 %v12295_v43, %v13620_v50 }
 0x1cb   : >> { %v12032_v25 = vpop.f32.mrb[20].mxu0  ;;  %v1889_v47 = vpop.f32.mrb[21].mxu1  ;;  %v3433_v35 = vsel %vm13730_vm14, %v3431_v22, %v3432_v23  ;;  %v3315_v36 = vshll.u32 %v13695_v0, 16  ;;  %v3434_v37 = vrot.slane %v3303_v3, 4  ;;  %vm3157_vm7 = vcmp.gt.f32.partialorder %v3125_v24, 0.0 }
 0x1cc   : >> { %v3023_v32 = vpop.f32.mrb[21].mxu0  ;;  %v11925_v33 = vpop.f32.mrb[22].mxu1  ;;  %v3189_v40 = vmul.f32 0.2, %v3125_v24  ;;  %3461 = vrot.lane.b32.xlu0 %v3433_v35, %s13114_s24  ;;  %v13780_v49 = vrot.slane %v16439_v31, 7  ;;  %v3277_v51 = vshrl.u32 %v13628_v4, 16  ;;  %v12297_v42 = vadd.f32 %v12032_v25, %v11924_v19 }
 0x1cd   : >> { %v12033_v38 = vpop.f32.mrb[22].mxu0  ;;  %v1892_v39 = vpop.f32.mrb[23].mxu1  ;;  %v3435_v53 = vor.u32 %v3434_v37, %v3432_v23  ;;  %v13783_v41 = vrot.slane %v3315_v36, 5  ;;  %v3280_v55 = vshll.u32 %v13628_v4, 16  ;;  %v3126_v21 = vadd.f32 %v12296_v11, %v13620_v50  ;;  %v9928_v4 = vld [vmem:[%s13801_s16 + $0x20] sm:$0xf] }
 0x1ce   : >> { %v3026_v52 = vpop.f32.mrb[23].mxu0  ;;  %v13788_v57 = vor.u32 %v3315_v36, %v13780_v49  ;;  %v13790_v26 = vrot.slane %v3277_v51, 7  ;;  %v3418_v58 = vrot.slane %v3277_v51, 4  ;;  %v3223_v43 = vsel %vm3159_vm5, %v3127_v10, %v3191_v30 }
 0x1cf   : >> { %v3436_v28 = vrot.slane %v3435_v53, 4  ;;  %v3419_v3 = vrot.slane %v3280_v55, 5  ;;  %v3131_v5 = vadd.f32 %v12297_v42, %v13620_v50  ;;  %v12298_v9 = vadd.f32 %v3023_v32, %v1889_v47 }
 0x1d0   : >> { %16500 = vst [vmem:[#allocation9_spill] sm:$0xff] %v13788_v57  ;;  %v3282_v6 = vor.u32 %v3280_v55, %v13790_v26  ;;  %v3517_v10 = vrot.slane %v13673_v56, 5  ;;  %v12299_v11 = vadd.f32 %v12033_v38, %v11925_v33  ;;  %v3221_v16 = vsel %vm3157_vm7, %v3125_v24, %v3189_v40 }
 0x1d1   : >> { %vm3160_vm9 = vcmp.gt.f32.partialorder %v3128_v48, 0.0  ;;  %v3438_v19 = vsel %vm13730_vm14, %v3436_v28, %v13783_v41  ;;  %v3420_v22 = vor.u32 %v3419_v3, %v3418_v58  ;;  %v13811_v30 = vpack.c.bf16 %v3223_v43, %v3223_v43 }
 0x1d2   : >> { %v11928_v13 = vpop.f32.mrb[24].mxu1  ;;  %v3192_v35 = vmul.f32 0.2, %v3128_v48  ;;  %v3190_v36 = vmul.f32 0.2, %v3126_v21  ;;  %3463 = vrot.lane.b32.xlu1 %v3438_v19, %s13114_s24  ;;  %v3361_v47 = vsel %vm13795_vm8, %v3282_v6, %v9928_v4  ;;  %v3129_v37 = vadd.f32 %v12298_v9, %v13620_v50 }
 0x1d3   : >> { %v12036_v23 = vpop.f32.mrb[24].mxu0  ;;  %v1905_v25 = vpop.f32.mrb[25].mxu1  ;;  %9929 = vst [vmem:[%s13801_s16 + $0x20] sm:$0xf] %v3361_v47  ;;  %v3421_v24 = vrot.slane %v3420_v22, 4  ;;  %v3514_v38 = vrot.slane %v13693_v62, 5  ;;  %v12300_v40 = vadd.f32 %v3026_v52, %v1892_v39  ;;  %v13819_v55 = vpack.c.bf16 %v3221_v16, %v3221_v16 }
 0x1d4   : >> { %v3039_v32 = vpop.f32.mrb[25].mxu0  ;;  %v11929_v33 = vpop.f32.mrb[26].mxu1  ;;  %vm3158_vm12 = vcmp.gt.f32.partialorder %v3126_v21, 0.0  ;;  %v3195_v42 = vmul.f32 0.2, %v3131_v5  ;;  %v3519_v58 = vrot.slane %v3517_v10, 4  ;;  %v3132_v4 = vadd.f32 %v12299_v11, %v13620_v50 }
 0x1d5   : >> { %v12037_v51 = vpop.f32.mrb[26].mxu0  ;;  %v1908_v53 = vpop.f32.mrb[27].mxu1  ;;  %v3423_v28 = vsel %vm13730_vm14, %v3421_v24, %v13705_v14  ;;  %vm3163_vm13 = vcmp.gt.f32.partialorder %v3131_v5, 0.0  ;;  %v3516_v3 = vrot.slane %v3514_v38, 4  ;;  %v3224_v6 = vsel %vm3160_vm9, %v3128_v48, %v3192_v35 }
 0x1d6   : >> { %v3042_v43 = vpop.f32.mrb[27].mxu0  ;;  %3457 = vrot.lane.b32.xlu0 %v3423_v28, %s13114_s24  ;;  %3534 = vrot.lane.b32.xlu1 %v3519_v58, %s13113_s22  ;;  %v3511_v39 = vrot.slane %v13697_v2, 5  ;;  %v3510_v52 = vrot.slane %v3508_v34, 4  ;;  %v12301_v9 = vadd.f32 %v12036_v23, %v11928_v13  ;;  %v3222_v16 = vsel %vm3158_vm12, %v3126_v21, %v3190_v36 }
 0x1d7   : >> { %v3193_v19 = vmul.f32 0.2, %v3129_v37  ;;  %v3518_v14 = vsel %vm13642_vm10, %v3516_v3, %v3517_v10  ;;  %v3130_v11 = vadd.f32 %v12300_v40, %v13620_v50  ;;  %v3227_v22 = vsel %vm3163_vm13, %v3131_v5, %v3195_v42 }
 0x1d8   : >> { %vm3161_vm15 = vcmp.gt.f32.partialorder %v3129_v37, 0.0  ;;  %v3513_v48 = vrot.slane %v3511_v39, 4  ;;  %v3512_v35 = vsel %vm13642_vm10, %v3510_v52, %v3511_v39  ;;  %v3196_v24 = vmul.f32 0.2, %v3132_v4 }
 0x1d9   : >> { %v12302_v58 = vadd.f32 %v3039_v32, %v1905_v25  ;;  %v3339_v28 = vshrl.u32 %v13673_v56, 16  ;;  %v16440_v34 = vshll.u32 %v13673_v56, 16  ;;  %v3135_v5 = vadd.f32 %v12301_v9, %v13620_v50 }
 0x1da   : >> { %v11932_v47 = vpop.f32.mrb[28].mxu1  ;;  %3532 = vrot.lane.b32.xlu0 %v3518_v14, %s13113_s22  ;;  %v3515_v10 = vsel %vm13642_vm10, %v3513_v48, %v3514_v38  ;;  %v12303_v23 = vadd.f32 %v12037_v51, %v11929_v33  ;;  %v12304_v36 = vadd.f32 %v3042_v43, %v1908_v53  ;;  %v3225_v3 = vsel %vm3161_vm15, %v3129_v37, %v3193_v19 }
 0x1db   : >> { %v12040_v21 = vpop.f32.mrb[28].mxu0  ;;  %v1921_v13 = vpop.f32.mrb[29].mxu1  ;;  %vm3164_vm5 = vcmp.gt.f32.partialorder %v3132_v4, 0.0  ;;  %v3194_v25 = vmul.f32 0.2, %v3130_v11  ;;  %3530 = vrot.lane.b32.xlu1 %v3515_v10, %s13113_s22  ;;  %v3133_v32 = vadd.f32 %v12302_v58, %v13620_v50  ;;  %vm3162_vm7 = vcmp.gt.f32.partialorder %v3130_v11, 0.0 }
 0x1dc   : >> { %v3055_v40 = vpop.f32.mrb[29].mxu0  ;;  %v11933_v42 = vpop.f32.mrb[30].mxu1  ;;  %v3452_v38 = vrot.slane %v16440_v34, 5  ;;  %v3454_v14 = vrot.slane %v3339_v28, 4  ;;  %v3136_v33 = vadd.f32 %v12303_v23, %v13620_v50  ;;  %v13848_v53 = vpack.c.bf16 %v3224_v6, %v3224_v6 }
 0x1dd   : >> { %v12041_v39 = vpop.f32.mrb[30].mxu0  ;;  %v1924_v52 = vpop.f32.mrb[31].mxu1  ;;  %v13850_v43 = vpack.c.bf16 %v3222_v16, %v3222_v16  ;;  %v13852_v37 = vpack.c.bf16 %v3227_v22, %v3227_v22  ;;  %v3134_v9 = vadd.f32 %v12304_v36, %v13620_v50  ;;  %v13855_v19 = vpack.c.bf16 %v3225_v3, %v3225_v3 }
 0x1de   : >> { %v3058_v51 = vpop.f32.mrb[31].mxu0  ;;  %v3228_v48 = vsel %vm3164_vm5, %v3132_v4, %v3196_v24  ;;  %3528 = vrot.lane.b32.xlu0 %v3512_v35, %s13113_s22  ;;  %v3199_v58 = vmul.f32 0.2, %v3135_v5  ;;  %v3455_v10 = vor.u32 %v3454_v14, %v3452_v38  ;;  %v3226_v31 = vsel %vm3162_vm7, %v3130_v11, %v3194_v25 }
 0x1df   : >> { %vm3167_vm9 = vcmp.gt.f32.partialorder %v3135_v5, 0.0  ;;  %vm3165_vm12 = vcmp.gt.f32.partialorder %v3133_v32, 0.0  ;;  %v3197_v23 = vmul.f32 0.2, %v3133_v32  ;;  %v3200_v34 = vmul.f32 0.2, %v3136_v33 }
 0x1e0   : >> { %v3456_v6 = vrot.slane %v3455_v10, 4  ;;  %v3330_v16 = vshrl.u32 %v13693_v62, 16  ;;  %v3333_v22 = vshll.u32 %v13693_v62, 16  ;;  %vm3168_vm13 = vcmp.gt.f32.partialorder %v3136_v33, 0.0 }
 0x1e1   : >> { %v3198_v36 = vmul.f32 0.2, %v3134_v9  ;;  %v12305_v3 = vadd.f32 %v12040_v21, %v11932_v47  ;;  %v12306_v1 = vadd.f32 %v3055_v40, %v1921_v13  ;;  %v3231_v57 = vsel %vm3167_vm9, %v3135_v5, %v3199_v58 }
 0x1e2   : >> { %v3341_v4 = vrot.slane %v3339_v28, 7  ;;  %3471 = vrot.lane.b32.xlu1 %v3456_v6, %s13114_s24  ;;  %3679 = vrot.lane.b32.xlu0 %v13717_v27, %s13112_s27  ;;  %vm3166_vm15 = vcmp.gt.f32.partialorder %v3134_v9, 0.0  ;;  %v13864_v11 = vrot.slane %v3333_v22, 5  ;;  %v3229_v35 = vsel %vm3165_vm12, %v3133_v32, %v3197_v23 }
 0x1e3   : >> { %v3449_v24 = vrot.slane %v3330_v16, 4  ;;  %v3139_v25 = vadd.f32 %v12305_v3, %v13620_v50  ;;  %v12307_v62 = vadd.f32 %v12041_v39, %v11933_v42  ;;  %v3232_v14 = vsel %vm3168_vm13, %v3136_v33, %v3200_v34 }
 0x1e4   : >> { %v13868_v10 = vrot.slane %v3330_v16, 7  ;;  %v12308_v47 = vadd.f32 %v3058_v51, %v1924_v52  ;;  %v3321_v28 = vshrl.u32 %v13697_v2, 16  ;;  %v3230_v21 = vsel %vm3166_vm15, %v3134_v9, %v3198_v36 }
 0x1e5   : >> { %v3450_v13 = vor.u32 %v3449_v24, %v13864_v11  ;;  %v3203_v5 = vmul.f32 0.2, %v3139_v25  ;;  %v3137_v40 = vadd.f32 %v12306_v1, %v13620_v50  ;;  %v13873_v58 = vpack.c.bf16 %v3228_v48, %v3228_v48 }
 0x1e6   : >> { %v13875_v6 = vpack.c.bf16 %v3226_v31, %v3226_v31  ;;  %v13877_v32 = vpack.c.bf16 %v3231_v57, %v3231_v57  ;;  %3681 = vrot.lane.b32.xlu1 %v13751_v12, %s13112_s27  ;;  %vm3171_vm5 = vcmp.gt.f32.partialorder %v3139_v25, 0.0  ;;  %v13881_v34 = vpack.c.bf16 %v3229_v35, %v3229_v35 }
 0x1e7   : >> { %v16504_v42 = vshll.u32 %v13673_v56, 16  ;;  %v3451_v52 = vrot.slane %v3450_v13, 4  ;;  %v3324_v33 = vshll.u32 %v13697_v2, 16  ;;  %v13888_v1 = vpack.c.bf16 %v3232_v14, %v3232_v14 }
 0x1e8   : >> { %16503 = vst [vmem:[#allocation10_spill] sm:$0xff] %v13881_v34  ;;  %v13890_v51 = vpack.c.bf16 %v3230_v21, %v3230_v21  ;;  %v13893_v31 = vor.u32 %v3333_v22, %v13868_v10  ;;  %v3444_v57 = vrot.slane %v3321_v28, 4  ;;  %v3235_v23 = vsel %vm3171_vm5, %v3139_v25, %v3203_v5 }
 0x1e9   : >> { %v13885_v39 = vor.u32 %v16504_v42, %v3341_v4  ;;  %16505 = vst [vmem:[#allocation11_spill] sm:$0xff] %v13888_v1  ;;  %v3453_v48 = vsel %vm13730_vm14, %v3451_v52, %v3452_v38  ;;  %vm3169_vm7 = vcmp.gt.f32.partialorder %v3137_v40, 0.0  ;;  %v3201_v56 = vmul.f32 0.2, %v3137_v40 }
 0x1ea   : >> { %16506 = vst [vmem:[#allocation12_spill] sm:$0xff] %v13890_v51  ;;  %3469 = vrot.lane.b32.xlu0 %v3453_v48, %s13114_s24  ;;  %3677 = vrot.lane.b32.xlu1 %v13757_v18, %s13112_s27  ;;  %v3140_v16 = vadd.f32 %v12307_v62, %v13620_v50  ;;  %v3442_v22 = vrot.slane %v3324_v33, 5  ;;  %v16507_v36 = vshrl.u32 %v13695_v0, 16  ;;  %v3138_v4 = vadd.f32 %v12308_v47, %v13620_v50 }
 0x1eb   : >> { %v13907_v35 = vrot.slane %v3321_v28, 7  ;;  %v3784_v38 = vrot.slane %v13757_v18, 5  ;;  %v3787_v24 = vrot.slane %v13717_v27, 5  ;;  %v13911_v25 = vpack.c.bf16 %v3235_v23, %v3235_v23 }
 0x1ec   : >> { %v3439_v3 = vrot.slane %v16507_v36, 4  ;;  %v3445_v14 = vor.u32 %v3444_v57, %v3442_v22  ;;  %v3790_v62 = vrot.slane %v13751_v12, 5  ;;  %v10009_v0 = vrot.slane %v13747_v7, 9 }
 0x1ed   : >> { %16508 = vst [vmem:[#allocation13_spill] sm:$0xff] %v13911_v25  ;;  %v3786_v13 = vrot.slane %v3784_v38, 4  ;;  %v3789_v5 = vrot.slane %v3787_v24, 4  ;;  %v3588_v42 = vshrl.u32 %v13757_v18, 16  ;;  %v3233_v50 = vsel %vm3169_vm7, %v3137_v40, %v3201_v56 }
 0x1ee   : >> { %v3440_v21 = vor.u32 %v3439_v3, %v13783_v41  ;;  %3675 = vrot.lane.b32.xlu0 %v13747_v7, %s13112_s27  ;;  %v3446_v47 = vrot.slane %v3445_v14, 4  ;;  %v16444_v52 = vshll.u32 %v13757_v18, 16  ;;  %v3785_v48 = vsel %vm13642_vm10, %v10009_v0, %v3784_v38 }
 0x1ef   : >> { %v3788_v41 = vsel %vm13642_vm10, %v3786_v13, %v3787_v24  ;;  %v3791_v57 = vsel %vm13642_vm10, %v3789_v5, %v3790_v62  ;;  %v3597_v23 = vshrl.u32 %v13717_v27, 16  ;;  %vm3172_vm9 = vcmp.gt.f32.partialorder %v3140_v16, 0.0 }
 0x1f0   : >> { %v3441_v28 = vrot.slane %v3440_v21, 4  ;;  %v3448_v40 = vsel %vm13730_vm14, %v3446_v47, %v13864_v11  ;;  %v16443_v36 = vshll.u32 %v13717_v27, 16  ;;  %v3204_v3 = vmul.f32 0.2, %v3140_v16 }
 0x1f1   : >> { %v3202_v24 = vmul.f32 0.2, %v3138_v4  ;;  %3467 = vrot.lane.b32.xlu1 %v3448_v40, %s13114_s24  ;;  %v13937_v14 = vrot.slane %v16444_v52, 5  ;;  %v3715_v38 = vrot.slane %v3588_v42, 4  ;;  %v3792_v11 = vrot.slane %v3790_v62, 4 }
 0x1f2   : >> { %v3443_v56 = vsel %vm13730_vm14, %v3441_v28, %v3442_v22  ;;  %v13942_v21 = vrot.slane %v16443_v36, 5  ;;  %v3793_v22 = vrot.slane %v13761_v63, 5  ;;  %v16447_v13 = vshrl.u32 %v13751_v12, 16 }
 0x1f3   : >> { %3465 = vrot.lane.b32.xlu0 %v3443_v56, %s13114_s24  ;;  %vm3170_vm12 = vcmp.gt.f32.partialorder %v3138_v4, 0.0  ;;  %v3716_v5 = vor.u32 %v3715_v38, %v13937_v14  ;;  %v16446_v0 = vshll.u32 %v13751_v12, 16  ;;  %v3720_v47 = vrot.slane %v3597_v23, 4 }
 0x1f4   : >> { %v13948_v28 = vpack.c.bf16 %v3233_v50, %v3233_v50  ;;  %v13952_v40 = vsel %vm13642_vm10, %v3792_v11, %v3793_v22  ;;  %v16445_v56 = vshll.u32 %v13761_v63, 16  ;;  %v3725_v62 = vrot.slane %v16447_v13, 4 }
 0x1f5   : >> { %v3236_v9 = vsel %vm3172_vm9, %v3140_v16, %v3204_v3  ;;  %3807 = vrot.lane.b32.xlu1 %v3788_v41, %s13113_s22  ;;  %v3717_v36 = vrot.slane %v3716_v5, 4  ;;  %v3721_v38 = vor.u32 %v3720_v47, %v13942_v21  ;;  %v13962_v50 = vrot.slane %v16446_v0, 5 }
 0x1f6   : >> { %16509 = vst [vmem:[#allocation14_spill] sm:$0xff] %v13948_v28  ;;  %v3234_v52 = vsel %vm3170_vm12, %v3138_v4, %v3202_v24  ;;  %v13967_v11 = vor.u32 %v3324_v33, %v13907_v35  ;;  %v3580_v16 = vshrl.u32 %v13747_v7, 16  ;;  %v3583_v41 = vshll.u32 %v13747_v7, 16  ;;  %vm14226_vm12 = vmand %vm3357_vm2, %vm449_vm1 }
 0x1f7   : >> { %3809 = vrot.lane.b32.xlu0 %v3791_v57, %s13113_s22  ;;  %v3719_v3 = vsel %vm13730_vm14, %v3717_v36, %v13942_v21  ;;  %v13975_v5 = vrot.slane %v3721_v38, 4  ;;  %v3726_v4 = vor.u32 %v3725_v62, %v13962_v50  ;;  %v13980_v2 = vrot.slane %v16445_v56, 5  ;;  %v9979_v21 = vld [vmem:[%s13801_s16 + $0x40] sm:$0xf] }
 0x1f8   : >> { %v13982_v33 = vrot.slane %v3580_v16, 7  ;;  %v3709_v24 = vrot.slane %v3580_v16, 4  ;;  %v3710_v57 = vrot.slane %v3583_v41, 5  ;;  %v3799_v62 = vrot.slane %v13759_v8, 5 }
 0x1f9   : >> { %3689 = vrot.lane.b32.xlu1 %v13764_v20, %s13112_s27  ;;  %v13991_v36 = vrot.slane %v3726_v4, 4  ;;  %v3796_v38 = vrot.slane %v13770_v29, 5  ;;  %v13997_v16 = vrot.slane %v3588_v42, 7  ;;  %v3795_v13 = vrot.slane %v3793_v22, 4 }
 0x1fa   : >> { %16510 = vst [vmem:[#allocation15_spill] sm:$0xff] %v13982_v33  ;;  %v3585_v56 = vor.u32 %v3583_v41, %v13982_v33  ;;  %v3711_v0 = vor.u32 %v3710_v57, %v3709_v24  ;;  %v3615_v47 = vshrl.u32 %v13761_v63, 16  ;;  %v3801_v7 = vrot.slane %v3799_v62, 4 }
 0x1fb   : >> { %3805 = vrot.lane.b32.xlu0 %v3785_v48, %s13113_s22  ;;  %v3798_v25 = vrot.slane %v3796_v38, 4  ;;  %v14005_v28 = vrot.slane %v3597_v23, 7  ;;  %v14013_v41 = vsel %vm13642_vm10, %v3795_v13, %v3796_v38  ;;  %vm3374_vm13 = vcmask 122880  }
 0x1fc   : >> { %v3661_v42 = vsel %vm13795_vm8, %v3585_v56, %v9979_v21  ;;  %v14009_v48 = vrot.slane %v3711_v0, 4  ;;  %v14015_v22 = vpack.c.bf16 %v3236_v9, %v3236_v9  ;;  %v14017_v24 = vpack.c.bf16 %v3234_v52, %v3234_v52 }
 0x1fd   : >> { %16511 = vst [vmem:[#allocation16_spill] sm:$0xff] %v14005_v28  ;;  %3685 = vrot.lane.b32.xlu1 %v13770_v29, %s13112_s27  ;;  %9980 = vst [vmem:[%s13801_s16 + $0x40] sm:$0xf] %v3661_v42  ;;  %v16514_v23 = vrot.slane %v13764_v20, 5  ;;  %v14030_v0 = vsel %vm13642_vm10, %v3798_v25, %v3799_v62  ;;  %vm3273_vm15 = vsmask.f32 256 }
 0x1fe   : >> { %16512 = vst [vmem:[#allocation17_spill] sm:$0xff] %v14015_v22  ;;  %16513 = vst [vmem:[#allocation18_spill] sm:$0xff] %v14017_v24  ;;  %vm3274_vm5 = vsmask.f32 4368  ;;  %v3714_v9 = vsel %vm13730_vm14, %v14009_v48, %v13937_v14  ;;  %v3642_v52 = vshrl.u32 %v13764_v20, 16  ;;  %v3633_v13 = vshrl.u32 %v13759_v8, 16 }
 0x1ff   : >> { %v14026_v56 = vsel %vm13642_vm10, %v3801_v7, %v16514_v23  ;;  %3687 = vrot.lane.b32.xlu0 %v13759_v8, %s13112_s27  ;;  %v16451_v57 = vshll.u32 %v13759_v8, 16  ;;  %v3645_v7 = vshll.u32 %v13764_v20, 16  ;;  %v3730_v62 = vrot.slane %v3615_v47, 4  ;;  %vm14132_vm7 = vmand %vm3374_vm13, %vm3273_vm15 }
 0x200   : >> { %v16515_v38 = vshll.u32 %v13757_v18, 16  ;;  %v16517_v14 = vshll.u32 %v13717_v27, 16  ;;  %v3740_v4 = vrot.slane %v3633_v13, 4  ;;  %v16519_v25 = vshrl.u32 %v13751_v12, 16  ;;  %vm14149_vm9 = vmor %vm3273_vm15, %vm3274_vm5 }
 0x201   : >> { %v14056_v23 = vrot.slane %v16451_v57, 5  ;;  %3750 = vrot.lane.b32.xlu1 %v3719_v3, %s13114_s24  ;;  %v16521_v18 = vshll.u32 %v13770_v29, 16  ;;  %v16522_v24 = vshrl.u32 %v13770_v29, 16  ;;  %v14072_v57 = vrot.slane %v3615_v47, 7 }
 0x202   : >> { %v14047_v42 = vor.u32 %v16515_v38, %v13997_v16  ;;  %v14052_v48 = vor.u32 %v16517_v14, %v14005_v28  ;;  %v14061_v21 = vrot.slane %v16519_v25, 7  ;;  %v3731_v14 = vor.u32 %v3730_v62, %v13980_v2 }
 0x203   : >> { %v14065_v38 = vrot.slane %v16521_v18, 5  ;;  %v3735_v27 = vrot.slane %v16522_v24, 4  ;;  %3683 = vrot.lane.b32.xlu0 %v13761_v63, %s13112_s27  ;;  %16523 = vst [vmem:[#allocation22_spill] sm:$0xff] %v14072_v57  ;;  %v3644_v22 = vrot.slane %v3642_v52, 7  ;;  %v14074_v3 = vrot.slane %v3642_v52, 4 }
 0x204   : >> { %16516 = vst [vmem:[#allocation19_spill] sm:$0xff] %v14047_v42  ;;  %16518 = vst [vmem:[#allocation20_spill] sm:$0xff] %v14052_v48  ;;  %v3741_v25 = vor.u32 %v3740_v4, %v14056_v23  ;;  %v14077_v42 = vrot.slane %v3645_v7, 5  ;;  %v14080_v33 = vrot.slane %v3731_v14, 4  ;;  %v4065_v24 = vrot.slane %v13850_v43, 5 }
 0x205   : >> { %16520 = vst [vmem:[#allocation21_spill] sm:$0xff] %v14061_v21  ;;  %v3736_v18 = vor.u32 %v3735_v27, %v14065_v38  ;;  %v4068_v62 = vrot.slane %v13811_v30, 5  ;;  %v4071_v47 = vrot.slane %v13848_v53, 5  ;;  %3811 = vrot.lane.b32.xlu1 %v13952_v40, %s13113_s22  ;;  %v16456_v14 = vshll.u32 %v13811_v30, 16 }
 0x206   : >> { %v14083_v28 = vrot.slane %v3741_v25, 4  ;;  %v4067_v27 = vrot.slane %v4065_v24, 4  ;;  %v16524_v25 = vshll.u32 %v13751_v12, 16  ;;  %v16525_v40 = vsel %vm13730_vm14, %v13975_v5, %v13962_v50 }
 0x207   : >> { %v14090_v4 = vrot.slane %v3736_v18, 4  ;;  %3752 = vrot.lane.b32.xlu0 %v16525_v40, %s13114_s24  ;;  %v16526_v18 = vshll.u32 %v13761_v63, 16  ;;  %v4070_v12 = vrot.slane %v4068_v62, 4  ;;  %v14128_v63 = vrot.slane %v16456_v14, 5 }
 0x208   : >> { %v14100_v48 = vor.u32 %v16524_v25, %v14061_v21  ;;  %v14123_v50 = vsel %vm13642_vm10, %v4067_v27, %v4068_v62  ;;  %v16530_v52 = vrot.slane %v13764_v20, 5  ;;  %v16531_v27 = vshrl.u32 %v13811_v30, 16 }
 0x209   : >> { %v14111_v34 = vor.u32 %v16526_v18, %v14072_v57  ;;  %v9938_v18 = vld [vmem:[%s13801_s16 + $0x20] sm:$0x1]  ;;  %v14143_v62 = vsel %vm13642_vm10, %v4070_v12, %v4071_v47  ;;  %v16534_v20 = vsel %vm13730_vm14, %v13991_v36, %v13980_v2  ;;  %v3292_v12 = vrot.slane %v13679_v59, 4 }
 0x20a   : >> { %v3804_v25 = vrot.slane %v16530_v52, 4  ;;  %v4001_v14 = vrot.slane %v16531_v27, 4  ;;  %3754 = vrot.lane.b32.xlu1 %v16534_v20, %s13114_s24  ;;  %v10060_v52 = vrot.slane %v13819_v55, 9  ;;  %v16535_v21 = vshll.u32 %v13848_v53, 16 }
 0x20b   : >> { %16527 = vst [vmem:[#allocation23_spill] sm:$0xff] %v14111_v34  ;;  %v14139_v34 = vor.u32 %v3645_v7, %v3644_v22  ;;  %v3746_v22 = vor.u32 %v14074_v3, %v14077_v42  ;;  %v14161_v7 = vrot.slane %v3633_v13, 7  ;;  %3748 = vrot.lane.b32.xlu0 %v3714_v9, %s13114_s24  ;;  %v3377_v2 = vsel %vm14132_vm7, 0, %v9938_v18 }
 0x20c   : >> { %v4002_v27 = vor.u32 %v4001_v14, %v14128_v63  ;;  %v14169_v57 = vrot.slane %v16535_v21, 5  ;;  %v3301_v36 = vrot.slane %v13691_v61, 4  ;;  %v14176_v13 = vsel %vm13642_vm10, %v10060_v52, %v4065_v24  ;;  %9939 = vst [vmem:[%s13801_s16 + $0x20] sm:$0x1] %v3377_v2 }
 0x20d   : >> { %v3300_v59 = vsel %vm14149_vm9, %v3292_v12, %v13712_v45  ;;  %v3283_v9 = vrot.slane %v13790_v26, 4  ;;  %v16460_v21 = vshrl.u32 %v13850_v43, 16  ;;  %v16459_v24 = vshll.u32 %v13850_v43, 16 }
 0x20e   : >> { %v14184_v3 = vrot.slane %v4002_v27, 4  ;;  %9931 = vst.msk [vmem:[%s13801_s16 + $0x28] sm:$0xf] %vm3357_vm2, %v3300_v59  ;;  %v3309_v61 = vsel %vm14149_vm9, %v3301_v36, %v13768_v46  ;;  %v3861_v45 = vshrl.u32 %v13819_v55, 16  ;;  %3819 = vrot.lane.b32.xlu1 %v3804_v25, %s13113_s22  ;;  %v16536_v26 = vshrl.u32 %v13770_v29, 16 }
 0x20f   : >> { %9932 = vst.msk [vmem:[%s13801_s16 + $0x2c] sm:$0xf] %vm3357_vm2, %v3309_v61  ;;  %v3291_v18 = vsel %vm14149_vm9, %v3283_v9, %v13687_v44  ;;  %v3996_v46 = vrot.slane %v16460_v21, 4  ;;  %v3864_v20 = vshll.u32 %v13819_v55, 16  ;;  %3817 = vrot.lane.b32.xlu0 %v14026_v56, %s13113_s22  ;;  %v14216_v52 = vrot.slane %v16459_v24, 5 }
 0x210   : >> { %v14196_v14 = vrot.slane %v16536_v26, 7  ;;  %9930 = vst.msk [vmem:[%s13801_s16 + $0x24] sm:$0xf] %vm3357_vm2, %v3291_v18  ;;  %v14218_v44 = vrot.slane %v3861_v45, 7  ;;  %v3990_v12 = vrot.slane %v3861_v45, 4  ;;  %v3887_v2 = vshrl.u32 %v13848_v53, 16 }
 0x211   : >> { %v9936_v27 = vld [vmem:[%s13801_s16 + $0x3c] sm:$0xf]  ;;  %v10030_v36 = vld [vmem:[%s13801_s16 + $0x60] sm:$0xf]  ;;  %v3991_v59 = vrot.slane %v3864_v20, 5  ;;  %v4073_v56 = vrot.slane %v4071_v47, 4  ;;  %v3997_v26 = vor.u32 %v3996_v46, %v14216_v52 }
 0x212   : >> { %16537 = vst [vmem:[#allocation24_spill] sm:$0xff] %v14218_v44  ;;  %v4074_v9 = vrot.slane %v13855_v19, 5  ;;  %v3866_v18 = vor.u32 %v3864_v20, %v14218_v44  ;;  %v4080_v45 = vrot.slane %v13852_v37, 5  ;;  %v16464_v25 = vrot.slane %v13873_v58, 5  ;;  %3815 = vrot.lane.b32.xlu1 %v14030_v0, %s13113_s22 }
 0x213   : >> { %v3747_v47 = vrot.slane %v3746_v22, 4  ;;  %v3992_v24 = vor.u32 %v3991_v59, %v3990_v12  ;;  %v16540_v46 = vrot.slane %v13868_v10, 4  ;;  %3813 = vrot.lane.b32.xlu0 %v14013_v41, %s13113_s22  ;;  %v14247_v44 = vrot.slane %v3997_v26, 4 }
 0x214   : >> { %v14238_v21 = vsel %vm13642_vm10, %v4073_v56, %v4074_v9  ;;  %v3942_v0 = vsel %vm13795_vm8, %v3866_v18, %v10030_v36  ;;  %v4082_v22 = vrot.slane %v4080_v45, 4  ;;  %v16541_v59 = vshll.u32 %v13759_v8, 16 }
 0x215   : >> { %v3345_v20 = vsel %vm14149_vm9, %v16540_v46, %v13885_v39  ;;  %10031 = vst [vmem:[%s13801_s16 + $0x60] sm:$0xf] %v3942_v0  ;;  %v14260_v39 = vrot.slane %v3992_v24, 4  ;;  %v16463_v41 = vshll.u32 %v13855_v19, 16  ;;  %v3319_v26 = vrot.slane %v13780_v49, 4 }
 0x216   : >> { %v3372_v12 = vsel %vm14226_vm12, %v3345_v20, %v9936_v27  ;;  %v14256_v56 = vor.u32 %v16541_v59, %v14161_v7  ;;  %v14272_v8 = vsel %vm13642_vm10, %v4082_v22, %v16464_v25  ;;  %v4006_v27 = vrot.slane %v3887_v2, 4  ;;  %3762 = vrot.lane.b32.xlu1 %v3747_v47, %s13114_s24 }
 0x217   : >> { %9937 = vst [vmem:[%s13801_s16 + $0x3c] sm:$0xf] %v3372_v12  ;;  %v16542_v24 = vshrl.u32 %v13811_v30, 16  ;;  %v14286_v20 = vrot.slane %v16463_v41, 5  ;;  %v3328_v0 = vrot.slane %v13907_v35, 4  ;;  %3960 = vrot.lane.b32.xlu0 %v13811_v30, %s13112_s27  ;;  %v3327_v47 = vsel %vm14149_vm9, %v3319_v26, %v13967_v11 }
 0x218   : >> { %v4007_v49 = vor.u32 %v4006_v27, %v14169_v57  ;;  %v4077_v22 = vrot.slane %v13875_v6, 5  ;;  %v4076_v12 = vrot.slane %v4074_v9, 4  ;;  %v16544_v59 = vshll.u32 %v13770_v29, 16  ;;  %9934 = vst.msk [vmem:[%s13801_s16 + $0x34] sm:$0xf] %vm3357_vm2, %v3327_v47 }
 0x219   : >> { %v14278_v18 = vrot.slane %v16542_v24, 7  ;;  %16543 = vst [vmem:[#allocation25_spill] sm:$0xff] %v14286_v20  ;;  %v3896_v46 = vshrl.u32 %v13855_v19, 16  ;;  %v3336_v35 = vsel %vm14149_vm9, %v3328_v0, %v13893_v31  ;;  %v3310_v27 = vrot.slane %v13754_v15, 4  ;;  %v16549_v15 = vld [vmem:[#allocation9_spill] sm:$0xff] }
 0x21a   : >> { %v14299_v24 = vor.u32 %v16544_v59, %v14196_v14  ;;  %v14308_v11 = vrot.slane %v4007_v49, 4  ;;  %9935 = vst.msk [vmem:[%s13801_s16 + $0x38] sm:$0xf] %vm3357_vm2, %v3336_v35  ;;  %v4079_v9 = vrot.slane %v4077_v22, 4  ;;  %v14314_v29 = vsel %vm13642_vm10, %v4076_v12, %v4077_v22  ;;  %3962 = vrot.lane.b32.xlu1 %v13848_v53, %s13112_s27 }
 0x21b   : >> { %16546 = vst [vmem:[#allocation27_spill] sm:$0xff] %v14314_v29  ;;  %v3914_v26 = vshrl.u32 %v13852_v37, 16  ;;  %v16547_v47 = vshll.u32 %v13811_v30, 16  ;;  %v3318_v0 = vsel %vm14149_vm9, %v3310_v27, %v16549_v15  ;;  %v3917_v49 = vshll.u32 %v13852_v37, 16 }
 0x21c   : >> { %16545 = vst [vmem:[#allocation26_spill] sm:$0xff] %v14308_v11  ;;  %v16462_v59 = vshll.u32 %v13875_v6, 16  ;;  %v16550_v22 = vsel %vm13730_vm14, %v14083_v28, %v14077_v42  ;;  %v14341_v12 = vsel %vm13642_vm10, %v4079_v9, %v4080_v45  ;;  %9933 = vst.msk [vmem:[%s13801_s16 + $0x30] sm:$0xf] %vm3357_vm2, %v3318_v0  ;;  %v3926_v35 = vshll.u32 %v13873_v58, 16 }
 0x21d   : >> { %v14322_v31 = vor.u32 %v16547_v47, %v14278_v18  ;;  %3760 = vrot.lane.b32.xlu0 %v16550_v22, %s13114_s24  ;;  %16551 = vst [vmem:[#allocation9_spill] sm:$0xff] %v14341_v12  ;;  %v4021_v27 = vrot.slane %v3914_v26, 4  ;;  %v14346_v47 = vrot.slane %v3887_v2, 7  ;;  %vm3403_vm13 = vcmask 257152  }
 0x21e   : >> { %v14348_v28 = vrot.slane %v3917_v49, 5  ;;  %v4011_v42 = vrot.slane %v3896_v46, 4  ;;  %v3916_v15 = vrot.slane %v3914_v26, 7  ;;  %v14352_v22 = vrot.slane %v16462_v59, 5  ;;  %3958 = vrot.lane.b32.xlu1 %v13850_v43, %s13112_s27  ;;  %vm14477_vm5 = vmand %vm3403_vm13, %vm449_vm1 }
 0x21f   : >> { %16548 = vst [vmem:[#allocation28_spill] sm:$0xff] %v14322_v31  ;;  %v3905_v45 = vshrl.u32 %v13875_v6, 16  ;;  %v16467_v9 = vshrl.u32 %v13873_v58, 16  ;;  %v3384_v0 = vpop.permute.xlu1 %3383  ;;  %v4346_v36 = vrot.slane %v13890_v51, 5  ;;  %v4349_v26 = vrot.slane %v13877_v32, 5 }
 0x220   : >> { %16552 = vst [vmem:[#allocation29_spill] sm:$0xff] %v14348_v28  ;;  %16553 = vst [vmem:[#allocation30_spill] sm:$0xff] %v14352_v22  ;;  %v4022_v2 = vor.u32 %v4021_v27, %v14348_v28  ;;  %v4012_v30 = vor.u32 %v4011_v42, %v14286_v20  ;;  %v3380_v10 = vpop.permute.xlu0 %3379  ;;  %v16554_v59 = vshrl.u32 %v13850_v43, 16  ;;  %v14370_v25 = vrot.slane %v3926_v35, 5 }
 0x221   : >> { %3956 = vrot.lane.b32.xlu0 %v13819_v55, %s13112_s27  ;;  %9942 = vst.msk [vmem:[%s13801_s16 + $0x28] sm:$0xf] %vm3403_vm13, %v3384_v0  ;;  %v3925_v27 = vrot.slane %v16467_v9, 7  ;;  %v4016_v42 = vrot.slane %v3905_v45, 4  ;;  %9940 = vst.msk [vmem:[%s13801_s16 + $0x20] sm:$0xf] %vm3403_vm13, %v3380_v10  ;;  %v16555_v10 = vsel %vm13730_vm14, %v14090_v4, %v14056_v23  ;;  %v16557_v23 = vsel %vm13730_vm14, %v14080_v33, %v14065_v38 }
 0x222   : >> { %v14368_v41 = vrot.slane %v16554_v59, 7  ;;  %v14376_v29 = vrot.slane %v4022_v2, 4  ;;  %v14378_v12 = vrot.slane %v4012_v30, 4  ;;  %v4348_v55 = vrot.slane %v4346_v36, 4  ;;  %3758 = vrot.lane.b32.xlu1 %v16555_v10, %s13114_s24 }
 0x223   : >> { %v4351_v0 = vrot.slane %v4349_v26, 4  ;;  %v14380_v31 = vrot.slane %v3896_v46, 7  ;;  %v3921_v20 = vrot.slane %v3916_v15, 4  ;;  %v3928_v59 = vor.u32 %v3926_v35, %v3925_v27  ;;  %v3386_v2 = vpop.permute.xlu1 %3385 }
 0x224   : >> { %v4017_v11 = vor.u32 %v4016_v42, %v14352_v22  ;;  %v14399_v35 = vsel %vm13642_vm10, %v4348_v55, %v4349_v26  ;;  %v16468_v27 = vrot.slane %v13888_v1, 5  ;;  %v16558_v4 = vshll.u32 %v13848_v53, 16  ;;  %9943 = vst.msk [vmem:[%s13801_s16 + $0x2c] sm:$0xf] %vm3403_vm13, %v3386_v2  ;;  %v3382_v10 = vpop.permute.xlu0 %3381 }
 0x225   : >> { %16556 = vst [vmem:[#allocation31_spill] sm:$0xff] %v14399_v35  ;;  %3756 = vrot.lane.b32.xlu0 %v16557_v23, %s13114_s24  ;;  %v16559_v26 = vshll.u32 %v13850_v43, 16  ;;  %v14422_v46 = vsel %vm14149_vm9, %v3921_v20, %v3928_v59  ;;  %9941 = vst.msk [vmem:[%s13801_s16 + $0x24] sm:$0xf] %vm3403_vm13, %v3382_v10  ;;  %v16561_v53 = vrot.slane %v13873_v58, 5  ;;  %v3595_v43 = vrot.slane %v13997_v16, 4 }
 0x226   : >> { %v14411_v42 = vor.u32 %v16558_v4, %v14346_v47  ;;  %v14424_v30 = vrot.slane %v4017_v11, 4  ;;  %v14436_v38 = vsel %vm13642_vm10, %v4351_v0, %v16468_v27  ;;  %v4159_v20 = vshrl.u32 %v13877_v32, 16  ;;  %4088 = vrot.lane.b32.xlu1 %v14123_v50, %s13113_s22  ;;  %v16564_v10 = vld [vmem:[#allocation20_spill] sm:$0xff]  ;;  %v9989_v35 = vld [vmem:[%s13801_s16 + $0x40] sm:$0x1] }
 0x227   : >> { %v14418_v55 = vor.u32 %v16559_v26, %v14368_v41  ;;  %v14430_v33 = vrot.slane %v16561_v53, 4  ;;  %16562 = vst [vmem:[#allocation33_spill] sm:$0xff] %v14436_v38  ;;  %v16563_v11 = vshll.u32 %v13855_v19, 16  ;;  %v16469_v23 = vshll.u32 %v13877_v32, 16  ;;  %v14453_v16 = vpop.permute.xlu1 %3522 }
 0x228   : >> { %16560 = vst [vmem:[#allocation32_spill] sm:$0xff] %v14424_v30  ;;  %v16470_v0 = vshrl.u32 %v13888_v1, 16  ;;  %v14455_v4 = vor.u32 %v3917_v49, %v3916_v15  ;;  %v3603_v26 = vsel %vm14149_vm9, %v3595_v43, %v16564_v10  ;;  %v4282_v53 = vrot.slane %v4159_v20, 4  ;;  %v14463_v2 = vpop.permute.xlu0 %3524  ;;  %v16566_v15 = vld [vmem:[#allocation16_spill] sm:$0xff]  ;;  %v10081_v30 = vld [vmem:[%s13801_s16 + $0x80] sm:$0xf] }
 0x229   : >> { %v14443_v59 = vor.u32 %v16563_v11, %v14380_v31  ;;  %v16565_v11 = vld [vmem:[#allocation10_spill] sm:$0xff]  ;;  %4090 = vrot.lane.b32.xlu0 %v14143_v62, %s13113_s22  ;;  %v14465_v27 = vrot.slane %v3905_v45, 7  ;;  %9982 = vst.msk [vmem:[%s13801_s16 + $0x48] sm:$0xf] %vm3357_vm2, %v3603_v26  ;;  %v14472_v49 = vrot.slane %v16469_v23, 5  ;;  %v3604_v43 = vrot.slane %v16566_v15, 4 }
 0x22a   : >> { %v10111_v9 = vrot.slane %v16565_v11, 9  ;;  %v16567_v62 = vmov 0  ;;  %v14481_v45 = vrot.slane %v4159_v20, 7  ;;  %v4142_v26 = vshrl.u32 %v16565_v11, 16 }
 0x22b   : >> { %v16568_v62 = vsel %vm14477_vm5, 4294967295, %v16567_v62  ;;  %v4145_v50 = vshll.u32 %v16565_v11, 16  ;;  %v14491_v23 = vrot.slane %v16470_v0, 7  ;;  %v4283_v15 = vor.u32 %v4282_v53, %v14472_v49  ;;  %v9947_v0 = vld [vmem:[%s13801_s16 + $0x3c] sm:$0xf] }
 0x22c   : >> { %16569 = vst [vmem:[#allocation20_spill] sm:$0xff] %v16568_v62  ;;  %v14485_v10 = vsel %vm13642_vm10, %v10111_v9, %v4346_v36  ;;  %v3612_v38 = vsel %vm14149_vm9, %v3604_v43, %v14100_v48  ;;  %v4153_v20 = vshll.u32 %v13890_v51, 16  ;;  %v16571_v36 = vsel %vm13730_vm14, %v14184_v3, %v14169_v57  ;;  %v3394_v9 = vpop.permute.xlu1 %3393  ;;  %v14515_v57 = vpop.permute.xlu0 %3520 }
 0x22d   : >> { %16570 = vst [vmem:[#allocation16_spill] sm:$0xff] %v14485_v10  ;;  %4033 = vrot.lane.b32.xlu1 %v16571_v36, %s13114_s24  ;;  %9983 = vst.msk [vmem:[%s13801_s16 + $0x4c] sm:$0xf] %vm3357_vm2, %v3612_v38  ;;  %v14508_v53 = vrot.slane %v4142_v26, 7  ;;  %v4271_v10 = vrot.slane %v4142_v26, 4  ;;  %v4272_v48 = vrot.slane %v4145_v50, 5  ;;  %4086 = vrot.lane.b32.xlu0 %v14176_v13, %s13113_s22  ;;  %v3414_v28 = vsel %vm14477_vm5, %v3394_v9, %v9947_v0 }
 0x22e   : >> { %v4150_v43 = vshrl.u32 %v13890_v51, 16  ;;  %16572 = vst [vmem:[#allocation34_spill] sm:$0xff] %v14515_v57  ;;  %v14517_v3 = vrot.slane %v4283_v15, 4  ;;  %v16574_v36 = vshll.u32 %v13888_v1, 16  ;;  %v16575_v26 = vld [vmem:[#allocation15_spill] sm:$0xff]  ;;  %v14527_v13 = vrot.slane %v4153_v20, 5 }
 0x22f   : >> { %v3586_v11 = vrot.slane %v16575_v26, 4  ;;  %9948 = vst [vmem:[%s13801_s16 + $0x3c] sm:$0xf] %v3414_v28  ;;  %v4147_v51 = vor.u32 %v4145_v50, %v14508_v53  ;;  %v4273_v22 = vor.u32 %v4272_v48, %v4271_v10  ;;  %v3673_v0 = vsel %vm14132_vm7, 0, %v9989_v35  ;;  %v16577_v9 = vld [vmem:[#allocation19_spill] sm:$0xff]  ;;  %v16579_v48 = vld [vmem:[#allocation14_spill] sm:$0xff] }
 0x230   : >> { %16573 = vst [vmem:[#allocation35_spill] sm:$0xff] %v14517_v3  ;;  %v14521_v38 = vrot.slane %v16574_v36, 5  ;;  %16576 = vst [vmem:[#allocation15_spill] sm:$0xff] %v14527_v13  ;;  %v16578_v50 = vrot.slane %v13888_v1, 5  ;;  %v16481_v36 = vrot.slane %v16579_v48, 5  ;;  %v3390_v35 = vpop.permute.xlu1 %3389  ;;  %v14548_v62 = vrot.slane %v4150_v43, 7 }
 0x231   : >> { %v3594_v28 = vsel %vm14149_vm9, %v3586_v11, %v16577_v9  ;;  %9990 = vst [vmem:[%s13801_s16 + $0x40] sm:$0x1] %v3673_v0  ;;  %3970 = vrot.lane.b32.xlu1 %v13873_v58, %s13112_s27  ;;  %v4223_v26 = vsel %vm13795_vm8, %v4147_v51, %v10081_v30  ;;  %v14546_v15 = vrot.slane %v4273_v22, 4  ;;  %v16581_v11 = vld [vmem:[#allocation13_spill] sm:$0xff]  ;;  %3968 = vrot.lane.b32.xlu0 %v13852_v37, %s13112_s27  ;;  %9945 = vst.msk [vmem:[%s13801_s16 + $0x34] sm:$0xf] %vm3403_vm13, %v3390_v35 }
 0x232   : >> { %v4354_v10 = vrot.slane %v16578_v50, 4  ;;  %9981 = vst.msk [vmem:[%s13801_s16 + $0x44] sm:$0xf] %vm3357_vm2, %v3594_v28  ;;  %v4195_v0 = vshrl.u32 %v16581_v11, 16  ;;  %v9987_v9 = vld [vmem:[%s13801_s16 + $0x5c] sm:$0xf]  ;;  %v3392_v50 = vpop.permute.xlu0 %3391 }
 0x233   : >> { %16580 = vst [vmem:[#allocation19_spill] sm:$0xff] %v14546_v15  ;;  %v16582_v60 = vshll.u32 %v13875_v6, 16  ;;  %10082 = vst [vmem:[%s13801_s16 + $0x80] sm:$0xf] %v4223_v26  ;;  %v4198_v30 = vshll.u32 %v16581_v11, 16  ;;  %v4277_v37 = vrot.slane %v4150_v43, 4 }
 0x234   : >> { %v14568_v22 = vsel %vm13642_vm10, %v4354_v10, %v16481_v36  ;;  %9946 = vst.msk [vmem:[%s13801_s16 + $0x38] sm:$0xf] %vm3403_vm13, %v3392_v50  ;;  %v16584_v35 = vld [vmem:[#allocation17_spill] sm:$0xff]  ;;  %v4302_v26 = vrot.slane %v4195_v0, 4  ;;  %v16585_v3 = vrot.slane %v14161_v7, 4  ;;  %v16586_v36 = vshll.u32 %v13877_v32, 16 }
 0x235   : >> { %v14561_v51 = vor.u32 %v16582_v60, %v14465_v27  ;;  %16583 = vst [vmem:[#allocation14_spill] sm:$0xff] %v14568_v22  ;;  %v4207_v60 = vshll.u32 %v16584_v35, 16  ;;  %v14588_v50 = vrot.slane %v4198_v30, 5  ;;  %v4278_v22 = vor.u32 %v4277_v37, %v14527_v13  ;;  %3966 = vrot.lane.b32.xlu1 %v13875_v6, %s13112_s27  ;;  %3964 = vrot.lane.b32.xlu0 %v13855_v19, %s13112_s27 }
 0x236   : >> { %v3648_v10 = vsel %vm14149_vm9, %v16585_v3, %v14139_v34  ;;  %v14586_v43 = vor.u32 %v16586_v36, %v14481_v45  ;;  %v16587_v7 = vshll.u32 %v13888_v1, 16  ;;  %v14601_v3 = vor.u32 %v4153_v20, %v14548_v62  ;;  %v3388_v37 = vpop.permute.xlu0 %3387 }
 0x237   : >> { %v3670_v28 = vsel %vm14226_vm12, %v3648_v10, %v9987_v9  ;;  %v4197_v36 = vrot.slane %v4195_v0, 7  ;;  %v16484_v15 = vshrl.u32 %v16584_v35, 16  ;;  %v4303_v9 = vor.u32 %v4302_v26, %v14588_v50  ;;  %9944 = vst.msk [vmem:[%s13801_s16 + $0x30] sm:$0xf] %vm3403_vm13, %v3388_v37 }
 0x238   : >> { %v14598_v34 = vor.u32 %v16587_v7, %v14491_v23  ;;  %9988 = vst [vmem:[%s13801_s16 + $0x5c] sm:$0xf] %v3670_v28  ;;  %v14608_v10 = vrot.slane %v4278_v22, 4  ;;  %v4180_v6 = vshll.u32 %v16579_v48, 16  ;;  %v16588_v7 = vshrl.u32 %v13888_v1, 16  ;;  %v16589_v28 = vld [vmem:[#allocation22_spill] sm:$0xff] }
 0x239   : >> { %v14615_v20 = vrot.slane %v4207_v60, 5  ;;  %v4206_v0 = vrot.slane %v16484_v15, 7  ;;  %v4177_v19 = vshrl.u32 %v16579_v48, 16  ;;  %v3622_v57 = vrot.slane %v16589_v28, 4 }
 0x23a   : >> { %v4287_v13 = vrot.slane %v16588_v7, 4  ;;  %v14621_v26 = vrot.slane %v4303_v9, 4  ;;  %v14628_v37 = vrot.slane %v4180_v6, 5  ;;  %v16590_v15 = vsel %vm13730_vm14, %v14247_v44, %v14128_v63  ;;  %v10040_v63 = vld [vmem:[%s13801_s16 + $0x60] sm:$0x1] }
 0x23b   : >> { %4031 = vrot.lane.b32.xlu1 %v16590_v15, %s13114_s24  ;;  %v14636_v28 = vor.u32 %v4198_v30, %v4197_v36  ;;  %v4202_v9 = vrot.slane %v4197_v36, 4  ;;  %v4209_v1 = vor.u32 %v4207_v60, %v4206_v0  ;;  %v3630_v22 = vsel %vm14149_vm9, %v3622_v57, %v14299_v24  ;;  %v16592_v57 = vld [vmem:[#allocation18_spill] sm:$0xff]  ;;  %v3460_v30 = vpop.permute.xlu1 %3459 }
 0x23c   : >> { %v4288_v7 = vor.u32 %v4287_v13, %v14521_v38  ;;  %v16591_v13 = vsel %vm13730_vm14, %v14260_v39, %v14216_v52  ;;  %9985 = vst.msk [vmem:[%s13801_s16 + $0x54] sm:$0xf] %vm3357_vm2, %v3630_v22  ;;  %v3631_v24 = vrot.slane %v14196_v14, 4  ;;  %v4358_v15 = vrot.slane %v16592_v57, 5 }
 0x23d   : >> { %4029 = vrot.lane.b32.xlu0 %v16591_v13, %s13114_s24  ;;  %v14659_v52 = vsel %vm14149_vm9, %v4202_v9, %v4209_v1  ;;  %v14661_v39 = vrot.slane %v4177_v19, 7  ;;  %v4361_v60 = vrot.slane %v16581_v11, 5  ;;  %v16593_v36 = vrot.slane %v16579_v48, 5  ;;  %9950 = vst.msk [vmem:[%s13801_s16 + $0x24] sm:$0xf] %vm3481_vm6, %v3460_v30 }
 0x23e   : >> { %v14651_v44 = vrot.slane %v4288_v7, 4  ;;  %v3639_v1 = vsel %vm14149_vm9, %v3631_v24, %v14256_v56  ;;  %v4360_v22 = vrot.slane %v4358_v15, 4  ;;  %v16594_v7 = vld [vmem:[#allocation21_spill] sm:$0xff]  ;;  %9960 = vst.msk [vmem:[%s13801_s16 + $0x24] sm:$0xf] %vm3544_vm11, %v14453_v16  ;;  %v4189_v30 = vshll.u32 %v16592_v57, 16 }
 0x23f   : >> { %v4357_v0 = vrot.slane %v16593_v36, 4  ;;  %v3613_v9 = vrot.slane %v16594_v7, 4  ;;  %4092 = vrot.lane.b32.xlu1 %v14238_v21, %s13113_s22  ;;  %9986 = vst.msk [vmem:[%s13801_s16 + $0x58] sm:$0xf] %vm3357_vm2, %v3639_v1  ;;  %v4292_v56 = vrot.slane %v4177_v19, 4  ;;  %v4186_v24 = vshrl.u32 %v16592_v57, 16 }
 0x240   : >> { %v14693_v21 = vsel %vm13642_vm10, %v4360_v22, %v4361_v60  ;;  %v16595_v16 = vld [vmem:[#allocation23_spill] sm:$0xff]  ;;  %v16488_v1 = vrot.slane %v16584_v35, 5  ;;  %v14703_v7 = vrot.slane %v4189_v30, 5  ;;  %v14707_v22 = vor.u32 %v4180_v6, %v14661_v39 }
 0x241   : >> { %v14685_v13 = vsel %vm13642_vm10, %v4357_v0, %v4358_v15  ;;  %4098 = vrot.lane.b32.xlu0 %v14272_v8, %s13113_s22  ;;  %v3621_v36 = vsel %vm14149_vm9, %v3613_v9, %v16595_v16  ;;  %v4363_v15 = vrot.slane %v4361_v60, 4  ;;  %v10038_v0 = vld [vmem:[%s13801_s16 + $0x7c] sm:$0xf]  ;;  %v4293_v19 = vor.u32 %v4292_v56, %v14628_v37 }
 0x242   : >> { %9984 = vst.msk [vmem:[%s13801_s16 + $0x50] sm:$0xf] %vm3357_vm2, %v3621_v36  ;;  %v4188_v8 = vrot.slane %v4186_v24, 7  ;;  %v4297_v14 = vrot.slane %v4186_v24, 4  ;;  %v3876_v60 = vrot.slane %v14368_v41, 4  ;;  %v3885_v16 = vrot.slane %v14278_v18, 4 }
 0x243   : >> { %v14713_v9 = vsel %vm13642_vm10, %v4363_v15, %v16488_v1  ;;  %4100 = vrot.lane.b32.xlu1 %v14430_v33, %s13113_s22  ;;  %v14719_v56 = vrot.slane %v4293_v19, 4  ;;  %v16597_v36 = vld [vmem:[#allocation24_spill] sm:$0xff]  ;;  %v10091_v15 = vld [vmem:[%s13801_s16 + $0x80] sm:$0x1]  ;;  %v16599_v18 = vld [vmem:[#allocation25_spill] sm:$0xff]  ;;  %v3527_v33 = vpop.permute.xlu1 %3526  ;;  %v3462_v19 = vpop.permute.xlu0 %3461  ;;  %v4148_v40 = vrot.slane %v14508_v53, 4 }
 0x244   : >> { %16596 = vst [vmem:[#allocation13_spill] sm:$0xff] %v14713_v9  ;;  %v4191_v6 = vor.u32 %v4189_v30, %v4188_v8  ;;  %v4298_v24 = vor.u32 %v4297_v14, %v14703_v7  ;;  %v3867_v17 = vrot.slane %v16597_v36, 4  ;;  %v16598_v41 = vld [vmem:[#allocation26_spill] sm:$0xff]  ;;  %v16601_v9 = vld [vmem:[#allocation28_spill] sm:$0xff]  ;;  %v3893_v30 = vsel %vm14149_vm9, %v3885_v16, %v14411_v42  ;;  %9951 = vst.msk [vmem:[%s13801_s16 + $0x28] sm:$0xf] %vm3481_vm6, %v3462_v19 }
 0x245   : >> { %v16600_v1 = vsel %vm13730_vm14, %v16598_v41, %v16599_v18  ;;  %v3884_v14 = vsel %vm14149_vm9, %v3876_v60, %v16601_v9  ;;  %v3954_v36 = vsel %vm14132_vm7, 0, %v10040_v63  ;;  %v3951_v41 = vsel %vm14226_vm12, %v14422_v46, %v10038_v0  ;;  %10034 = vst.msk [vmem:[%s13801_s16 + $0x6c] sm:$0xf] %vm3357_vm2, %v3893_v30  ;;  %v16611_v30 = vld [vmem:[#allocation12_spill] sm:$0xff] }
 0x246   : >> { %4035 = vrot.lane.b32.xlu0 %v16600_v1, %s13114_s24  ;;  %v4296_v1 = vsel %vm13730_vm14, %v14719_v56, %v14703_v7  ;;  %v14747_v18 = vrot.slane %v4298_v24, 4  ;;  %10033 = vst.msk [vmem:[%s13801_s16 + $0x68] sm:$0xf] %vm3357_vm2, %v3884_v14  ;;  %v3875_v42 = vsel %vm14149_vm9, %v3867_v17, %v14418_v55  ;;  %10041 = vst [vmem:[%s13801_s16 + $0x60] sm:$0x1] %v3954_v36  ;;  %v3912_v46 = vrot.slane %v14465_v27, 4 }
 0x247   : >> { %10039 = vst [vmem:[%s13801_s16 + $0x7c] sm:$0xf] %v3951_v41  ;;  %9961 = vst.msk [vmem:[%s13801_s16 + $0x28] sm:$0xf] %vm3544_vm11, %v14463_v2  ;;  %v3903_v63 = vrot.slane %v14380_v31, 4  ;;  %v3894_v0 = vrot.slane %v14346_v47, 4  ;;  %v3464_v16 = vpop.permute.xlu1 %3463 }
 0x248   : >> { %10032 = vst.msk [vmem:[%s13801_s16 + $0x64] sm:$0xf] %vm3357_vm2, %v3875_v42  ;;  %v4157_v9 = vrot.slane %v14548_v62, 4  ;;  %v4235_v17 = vsel %vm14132_vm7, 0, %v10091_v15  ;;  %v16602_v55 = vld [vmem:[#allocation9_spill] sm:$0xff]  ;;  %v4301_v27 = vsel %vm13730_vm14, %v14747_v18, %v14588_v50  ;;  %v3920_v31 = vsel %vm14149_vm9, %v3912_v46, %v14455_v4  ;;  %v16603_v62 = vld [vmem:[#allocation27_spill] sm:$0xff] }
 0x249   : >> { %4096 = vrot.lane.b32.xlu1 %v16602_v55, %s13113_s22  ;;  %10092 = vst [vmem:[%s13801_s16 + $0x80] sm:$0x1] %v4235_v17  ;;  %v4166_v47 = vrot.slane %v14481_v45, 4  ;;  %v10089_v2 = vld [vmem:[%s13801_s16 + $0x9c] sm:$0xf]  ;;  %v3911_v60 = vsel %vm14149_vm9, %v3903_v63, %v14561_v51  ;;  %v3902_v4 = vsel %vm14149_vm9, %v3894_v0, %v14443_v59  ;;  %v4193_v53 = vrot.slane %v4188_v8, 4 }
 0x24a   : >> { %4094 = vrot.lane.b32.xlu0 %v16603_v62, %s13113_s22  ;;  %10037 = vst.msk [vmem:[%s13801_s16 + $0x78] sm:$0xf] %vm3357_vm2, %v3920_v31  ;;  %v4165_v45 = vsel %vm14149_vm9, %v4157_v9, %v14586_v43  ;;  %10036 = vst.msk [vmem:[%s13801_s16 + $0x74] sm:$0xf] %vm3357_vm2, %v3911_v60  ;;  %v4156_v59 = vsel %vm14149_vm9, %v4148_v40, %v14601_v3  ;;  %v4184_v43 = vrot.slane %v14661_v39, 4  ;;  %v4175_v8 = vrot.slane %v14491_v23, 4 }
 0x24b   : >> { %10035 = vst.msk [vmem:[%s13801_s16 + $0x70] sm:$0xf] %vm3357_vm2, %v3902_v4  ;;  %10084 = vst.msk [vmem:[%s13801_s16 + $0x88] sm:$0xf] %vm3357_vm2, %v4165_v45  ;;  %v4174_v51 = vsel %vm14149_vm9, %v4166_v47, %v14598_v34  ;;  %v16604_v24 = vshrl.u32 %v13873_v58, 16  ;;  %v4201_v34 = vsel %vm14149_vm9, %v4193_v53, %v14636_v28  ;;  %v4232_v3 = vsel %vm14226_vm12, %v14659_v52, %v10089_v2  ;;  %v3535_v52 = vpop.permute.xlu1 %3534  ;;  %v16606_v39 = vld [vmem:[#allocation30_spill] sm:$0xff] }
 0x24c   : >> { %10085 = vst.msk [vmem:[%s13801_s16 + $0x8c] sm:$0xf] %vm3357_vm2, %v4174_v51  ;;  %10083 = vst.msk [vmem:[%s13801_s16 + $0x84] sm:$0xf] %vm3357_vm2, %v4156_v59  ;;  %v16605_v58 = vsel %vm13730_vm14, %v14376_v29, %v14370_v25  ;;  %v4192_v23 = vsel %vm14149_vm9, %v4184_v43, %v4191_v6  ;;  %v4183_v61 = vsel %vm14149_vm9, %v4175_v8, %v14707_v22  ;;  %v3458_v29 = vpop.permute.xlu0 %3457  ;;  %v16609_v6 = vld [vmem:[#allocation34_spill] sm:$0xff]  ;;  %v16612_v36 = vld [vmem:[#allocation32_spill] sm:$0xff] }
 0x24d   : >> { %v4026_v15 = vrot.slane %v16604_v24, 4  ;;  %4041 = vrot.lane.b32.xlu1 %v16605_v58, %s13114_s24  ;;  %9952 = vst.msk [vmem:[%s13801_s16 + $0x2c] sm:$0xf] %vm3481_vm6, %v3464_v16  ;;  %10090 = vst [vmem:[%s13801_s16 + $0x9c] sm:$0xf] %v4232_v3  ;;  %v16607_v22 = vsel %vm13730_vm14, %v14378_v12, %v16606_v39  ;;  %v16613_v41 = vld [vmem:[#allocation29_spill] sm:$0xff]  ;;  %v16629_v58 = vsel %vm13730_vm14, %v14621_v26, %v14615_v20 }
 0x24e   : >> { %10088 = vst.msk [vmem:[%s13801_s16 + $0x98] sm:$0xf] %vm3357_vm2, %v4201_v34  ;;  %4241 = vrot.lane.b32.xlu0 %v13877_v32, %s13112_s27  ;;  %10087 = vst.msk [vmem:[%s13801_s16 + $0x94] sm:$0xf] %vm3357_vm2, %v4192_v23  ;;  %v16608_v32 = vld [vmem:[#allocation10_spill] sm:$0xff]  ;;  %v16614_v42 = vsel %vm13730_vm14, %v16612_v36, %v16613_v41  ;;  %vm3552_vm8 = vcmask 518528   ;;  %v16630_v23 = vsel %vm13730_vm14, %v14608_v10, %v14472_v49  ;;  %v16632_v49 = vsel %vm13730_vm14, %v14651_v44, %v14628_v37 }
 0x24f   : >> { %9962 = vst.msk [vmem:[%s13801_s16 + $0x2c] sm:$0xf] %vm3544_vm11, %v3527_v33  ;;  %v4027_v28 = vor.u32 %v4026_v15, %v14370_v25  ;;  %v16610_v25 = vld [vmem:[#allocation11_spill] sm:$0xff]  ;;  %v3531_v12 = vpop.permute.xlu1 %3530  ;;  %v9956_v63 = vld [vmem:[%s13801_s16 + $0x3c] sm:$0xf]  ;;  %vm3554_vm7 = vcmask 519555  }
 0x250   : >> { %10086 = vst.msk [vmem:[%s13801_s16 + $0x90] sm:$0xf] %vm3357_vm2, %v4183_v61  ;;  %v3533_v19 = vpop.permute.xlu0 %3532  ;;  %vm14872_vm2 = vmand %vm3481_vm6, %vm449_vm1  ;;  %v16617_v17 = vld [vmem:[#allocation31_spill] sm:$0xff]  ;;  %v16618_v31 = vld [vmem:[#allocation33_spill] sm:$0xff]  ;;  %v16627_v24 = vshrl.u32 %v16584_v35, 16 }
 0x251   : >> { %4037 = vrot.lane.b32.xlu1 %v16607_v22, %s13114_s24  ;;  %9949 = vst.msk [vmem:[%s13801_s16 + $0x20] sm:$0xf] %vm3481_vm6, %v3458_v29  ;;  %v4028_v33 = vrot.slane %v4027_v28, 4  ;;  %v16619_v40 = vld [vmem:[#allocation35_spill] sm:$0xff]  ;;  %v16621_v62 = vld [vmem:[#allocation16_spill] sm:$0xff]  ;;  %vm14899_vm12 = vmand %vm3554_vm7, %vm449_vm1 }
 0x252   : >> { %4237 = vrot.lane.b32.xlu0 %v16608_v32, %s13112_s27  ;;  %9959 = vst.msk [vmem:[%s13801_s16 + $0x20] sm:$0xf] %vm3544_vm11, %v16609_v6  ;;  %v16620_v2 = vsel %vm13730_vm14, %v16619_v40, %v14521_v38  ;;  %v16624_v38 = vld [vmem:[#allocation19_spill] sm:$0xff]  ;;  %v4307_v15 = vrot.slane %v16627_v24, 4  ;;  %v9998_v29 = vld [vmem:[%s13801_s16 + $0x5c] sm:$0xf] }
 0x253   : >> { %v16625_v51 = vld [vmem:[#allocation15_spill] sm:$0xff]  ;;  %v16634_v7 = vld [vmem:[#allocation13_spill] sm:$0xff] }
 0x254   : >> { %v3529_v14 = vpop.permute.xlu0 %3528  ;;  %v3472_v0 = vpop.permute.xlu1 %3471  ;;  %v16626_v59 = vsel %vm13730_vm14, %v16624_v38, %v16625_v51  ;;  %v10049_v40 = vld [vmem:[%s13801_s16 + $0x7c] sm:$0xf] }
 0x255   : >> { %4243 = vrot.lane.b32.xlu1 %v16610_v25, %s13112_s27  ;;  %v3492_v55 = vsel %vm14872_vm2, %v3472_v0, %v9956_v63 }
 0x256   : >> { %4043 = vrot.lane.b32.xlu0 %v4028_v33, %s13114_s24  ;;  %9957 = vst [vmem:[%s13801_s16 + $0x3c] sm:$0xf] %v3492_v55 }
 0x257   : >> { %9966 = vst.msk [vmem:[%s13801_s16 + $0x3c] sm:$0x7] %vm3552_vm8, %v3535_v52 }
 0x258   : >> { %v3680_v9 = vpop.permute.xlu0 %3679  ;;  %v3682_v47 = vpop.permute.xlu1 %3681 }
 0x259   : >> { %4239 = vrot.lane.b32.xlu1 %v16611_v30, %s13112_s27  ;;  %9993 = vst.msk [vmem:[%s13801_s16 + $0x48] sm:$0xf] %vm3403_vm13, %v3680_v9  ;;  %9994 = vst.msk [vmem:[%s13801_s16 + $0x4c] sm:$0xf] %vm3403_vm13, %v3682_v47 }
 0x25a   : >> { %4039 = vrot.lane.b32.xlu0 %v16614_v42, %s13114_s24 }
 0x25c   : >> { %v3470_v4 = vpop.permute.xlu0 %3469  ;;  %v3678_v45 = vpop.permute.xlu1 %3677 }
 0x25d   : >> { %4369 = vrot.lane.b32.xlu1 %v16617_v17, %s13113_s22  ;;  %v9967_v53 = vld [vmem:[%s13801_s16 + $0x3c] sm:$0x8]  ;;  %9955 = vst.msk [vmem:[%s13801_s16 + $0x38] sm:$0xf] %vm3481_vm6, %v3470_v4 }
 0x25e   : >> { %4371 = vrot.lane.b32.xlu0 %v16618_v31, %s13113_s22  ;;  %9992 = vst.msk [vmem:[%s13801_s16 + $0x44] sm:$0xf] %vm3403_vm13, %v3678_v45  ;;  %v3557_v43 = vsel %vm14899_vm12, 0, %v9967_v53 }
 0x25f   : >> { %9965 = vst.msk [vmem:[%s13801_s16 + $0x38] sm:$0xf] %vm3544_vm11, %v3533_v19  ;;  %9968 = vst [vmem:[%s13801_s16 + $0x3c] sm:$0x8] %v3557_v43 }
 0x260   : >> { %v3676_v8 = vpop.permute.xlu0 %3675 }
 0x261   : >> { %4314 = vrot.lane.b32.xlu1 %v16620_v2, %s13114_s24  ;;  %9991 = vst.msk [vmem:[%s13801_s16 + $0x40] sm:$0xf] %vm3403_vm13, %v3676_v8 }
 0x262   : >> { %4367 = vrot.lane.b32.xlu0 %v16621_v62, %s13113_s22 }
 0x263   : >> { %v3468_v16 = vpop.permute.xlu1 %3467 }
 0x264   : >> { %9954 = vst.msk [vmem:[%s13801_s16 + $0x34] sm:$0xf] %vm3481_vm6, %v3468_v16 }
 0x265   : >> { %4310 = vrot.lane.b32.xlu1 %v16626_v59, %s13114_s24  ;;  %v3466_v34 = vpop.permute.xlu0 %3465  ;;  %9964 = vst.msk [vmem:[%s13801_s16 + $0x34] sm:$0xf] %vm3544_vm11, %v3531_v12 }
 0x266   : >> { %4249 = vrot.lane.b32.xlu0 %v16581_v11, %s13112_s27  ;;  %9953 = vst.msk [vmem:[%s13801_s16 + $0x30] sm:$0xf] %vm3481_vm6, %v3466_v34  ;;  %v16628_v11 = vld [vmem:[#allocation14_spill] sm:$0xff] }
 0x267   : >> { %9963 = vst.msk [vmem:[%s13801_s16 + $0x30] sm:$0xf] %vm3544_vm11, %v3529_v14 }
 0x269   : >> { %4247 = vrot.lane.b32.xlu1 %v16592_v57, %s13112_s27  ;;  %v4308_v57 = vor.u32 %v4307_v15, %v14615_v20  ;;  %v3810_v3 = vpop.permute.xlu0 %3809 }
 0x26a   : >> { %4245 = vrot.lane.b32.xlu0 %v16579_v48, %s13112_s27  ;;  %v3808_v48 = vpop.permute.xlu1 %3807 }
 0x26b   : >> { %v4309_v28 = vrot.slane %v4308_v57, 4 }
 0x26d   : >> { %4373 = vrot.lane.b32.xlu1 %v16628_v11, %s13113_s22  ;;  %v3806_v22 = vpop.permute.xlu0 %3805 }
 0x26e   : >> { %4251 = vrot.lane.b32.xlu0 %v16584_v35, %s13112_s27  ;;  %v3690_v61 = vpop.permute.xlu1 %3689 }
 0x26f   : >> { %v3707_v39 = vsel %vm14477_vm5, %v3690_v61, %v9998_v29 }
 0x270   : >> { %9999 = vst [vmem:[%s13801_s16 + $0x5c] sm:$0xf] %v3707_v39 }
 0x271   : >> { %4322 = vrot.lane.b32.xlu1 %v16629_v58, %s13114_s24  ;;  %v3688_v20 = vpop.permute.xlu0 %3687 }
 0x272   : >> { %4312 = vrot.lane.b32.xlu0 %v16630_v23, %s13114_s24  ;;  %v3686_v10 = vpop.permute.xlu1 %3685  ;;  %9997 = vst.msk [vmem:[%s13801_s16 + $0x58] sm:$0xf] %vm3403_vm13, %v3688_v20 }
 0x273   : >> { %9996 = vst.msk [vmem:[%s13801_s16 + $0x54] sm:$0xf] %vm3403_vm13, %v3686_v10 }
 0x275   : >> { %4324 = vrot.lane.b32.xlu1 %v4309_v28, %s13114_s24  ;;  %v3684_v37 = vpop.permute.xlu0 %3683 }
 0x276   : >> { %4316 = vrot.lane.b32.xlu0 %v16632_v49, %s13114_s24  ;;  %v3751_v26 = vpop.permute.xlu1 %3750  ;;  %9995 = vst.msk [vmem:[%s13801_s16 + $0x50] sm:$0xf] %vm3403_vm13, %v3684_v37 }
 0x277   : >> { %10001 = vst.msk [vmem:[%s13801_s16 + $0x44] sm:$0xf] %vm3481_vm6, %v3751_v26  ;;  %v10007_v6 = vld [vmem:[%s13801_s16 + $0x5c] sm:$0xf] }
 0x278   : >> { %10011 = vst.msk [vmem:[%s13801_s16 + $0x44] sm:$0xf] %vm3544_vm11, %v3808_v48 }
 0x279   : >> { %4377 = vrot.lane.b32.xlu1 %v14693_v21, %s13113_s22  ;;  %v3753_v32 = vpop.permute.xlu0 %3752 }
 0x27a   : >> { %4375 = vrot.lane.b32.xlu0 %v14685_v13, %s13113_s22  ;;  %v3812_v44 = vpop.permute.xlu1 %3811  ;;  %v16633_v13 = vrot.slane %v16584_v35, 5  ;;  %10002 = vst.msk [vmem:[%s13801_s16 + $0x48] sm:$0xf] %vm3481_vm6, %v3753_v32 }
 0x27b   : >> { %10012 = vst.msk [vmem:[%s13801_s16 + $0x48] sm:$0xf] %vm3544_vm11, %v3810_v3 }
 0x27c   : >> { %v4366_v21 = vrot.slane %v16633_v13, 4 }
 0x27d   : >> { %4318 = vrot.lane.b32.xlu1 %v4296_v1, %s13114_s24  ;;  %v3749_v50 = vpop.permute.xlu0 %3748 }
 0x27e   : >> { %4320 = vrot.lane.b32.xlu0 %v4301_v27, %s13114_s24  ;;  %v3755_v56 = vpop.permute.xlu1 %3754  ;;  %10000 = vst.msk [vmem:[%s13801_s16 + $0x40] sm:$0xf] %vm3481_vm6, %v3749_v50 }
 0x27f   : >> { %10003 = vst.msk [vmem:[%s13801_s16 + $0x4c] sm:$0xf] %vm3481_vm6, %v3755_v56 }
 0x280   : >> { %10013 = vst.msk [vmem:[%s13801_s16 + $0x4c] sm:$0xf] %vm3544_vm11, %v3812_v44  ;;  %10010 = vst.msk [vmem:[%s13801_s16 + $0x40] sm:$0xf] %vm3544_vm11, %v3806_v22 }
 0x281   : >> { %4381 = vrot.lane.b32.xlu1 %v4366_v21, %s13113_s22  ;;  %v3818_v1 = vpop.permute.xlu0 %3817 }
 0x282   : >> { %4379 = vrot.lane.b32.xlu0 %v16634_v7, %s13113_s22  ;;  %v3820_v35 = vpop.permute.xlu1 %3819  ;;  %v10100_v7 = vld [vmem:[%s13801_s16 + $0x9c] sm:$0xf] }
 0x285   : >> { %v3814_v27 = vpop.permute.xlu0 %3813 }
 0x286   : >> { %v3816_v18 = vpop.permute.xlu1 %3815 }
 0x289   : >> { %v3961_v25 = vpop.permute.xlu0 %3960 }
 0x28a   : >> { %v3763_v33 = vpop.permute.xlu1 %3762  ;;  %10044 = vst.msk [vmem:[%s13801_s16 + $0x68] sm:$0xf] %vm3403_vm13, %v3961_v25 }
 0x28b   : >> { %v3780_v19 = vsel %vm14872_vm2, %v3763_v33, %v10007_v6 }
 0x28c   : >> { %10008 = vst [vmem:[%s13801_s16 + $0x5c] sm:$0xf] %v3780_v19 }
 0x28d   : >> { %10017 = vst.msk [vmem:[%s13801_s16 + $0x5c] sm:$0x7] %vm3552_vm8, %v3820_v35 }
 0x28e   : >> { %v3963_v12 = vpop.permute.xlu1 %3962 }
 0x28f   : >> { %10045 = vst.msk [vmem:[%s13801_s16 + $0x6c] sm:$0xf] %vm3403_vm13, %v3963_v12  ;;  %v3761_v14 = vpop.permute.xlu0 %3760 }
 0x290   : >> { %10006 = vst.msk [vmem:[%s13801_s16 + $0x58] sm:$0xf] %vm3481_vm6, %v3761_v14 }
 0x291   : >> { %10016 = vst.msk [vmem:[%s13801_s16 + $0x58] sm:$0xf] %vm3544_vm11, %v3818_v1 }
 0x292   : >> { %v3959_v30 = vpop.permute.xlu1 %3958 }
 0x293   : >> { %v10018_v36 = vld [vmem:[%s13801_s16 + $0x5c] sm:$0x8]  ;;  %10043 = vst.msk [vmem:[%s13801_s16 + $0x64] sm:$0xf] %vm3403_vm13, %v3959_v30  ;;  %v3957_v41 = vpop.permute.xlu0 %3956 }
 0x294   : >> { %v3838_v42 = vsel %vm14899_vm12, 0, %v10018_v36  ;;  %10042 = vst.msk [vmem:[%s13801_s16 + $0x60] sm:$0xf] %vm3403_vm13, %v3957_v41  ;;  %v4402_v36 = vlaneseq (%p515_p4) }
 0x295   : >> { %10019 = vst [vmem:[%s13801_s16 + $0x5c] sm:$0x8] %v3838_v42 }
 0x296   : >> { %v3759_v63 = vpop.permute.xlu1 %3758  ;;  %v15145_v41 = vshrl.u32 (%p515_p4), %v4402_v36, 7  ;;  %v4408_v42 = vand.u32 (%p515_p4), 127, %v4402_v36 }
 0x297   : >> { %10005 = vst.msk [vmem:[%s13801_s16 + $0x54] sm:$0xf] %vm3481_vm6, %v3759_v63  ;;  %v3757_v0 = vpop.permute.xlu0 %3756 }
 0x298   : >> { %10015 = vst.msk [vmem:[%s13801_s16 + $0x54] sm:$0xf] %vm3544_vm11, %v3816_v18  ;;  %v4404_v60 = vadd.s32 (%p515_p4), 8, %v15145_v41  ;;  %v4405_v63 = vadd.s32 (%p515_p4), 16, %v15145_v41 }
 0x299   : >> { %10004 = vst.msk [vmem:[%s13801_s16 + $0x50] sm:$0xf] %vm3481_vm6, %v3757_v0  ;;  %v4406_v0 = vadd.s32 (%p515_p4), 24, %v15145_v41 }
 0x29a   : >> { %10014 = vst.msk [vmem:[%s13801_s16 + $0x50] sm:$0xf] %vm3544_vm11, %v3814_v27  ;;  %v4089_v9 = vpop.permute.xlu1 %4088 }
 0x29b   : >> { %v4091_v17 = vpop.permute.xlu0 %4090 }
 0x29f   : >> { %v4034_v55 = vpop.permute.xlu1 %4033  ;;  %v4087_v31 = vpop.permute.xlu0 %4086 }
 0x2a0   : >> { %10053 = vst.msk [vmem:[%s13801_s16 + $0x68] sm:$0xf] %vm3481_vm6, %v4034_v55  ;;  %v4411_v55 = vmul.u32 (%p515_p4), 2, %v4405_v63 }
 0x2a1   : >> { %10063 = vst.msk [vmem:[%s13801_s16 + $0x68] sm:$0xf] %vm3544_vm11, %v4091_v17  ;;  %v4410_v17 = vmul.u32 (%p515_p4), 2, %v4404_v60 }
 0x2a3   : >> { %v3971_v47 = vpop.permute.xlu1 %3970  ;;  %v3969_v62 = vpop.permute.xlu0 %3968 }
 0x2a4   : >> { %v3988_v2 = vsel %vm14477_vm5, %v3971_v47, %v10049_v40  ;;  %10048 = vst.msk [vmem:[%s13801_s16 + $0x78] sm:$0xf] %vm3403_vm13, %v3969_v62  ;;  %v13115_v47 = vmov (%p515_p4), 0.0  }
 0x2a5   : >> { %10050 = vst [vmem:[%s13801_s16 + $0x7c] sm:$0xf] %v3988_v2 }
 0x2a7   : >> { %v3967_v4 = vpop.permute.xlu1 %3966  ;;  %v3965_v45 = vpop.permute.xlu0 %3964 }
 0x2a8   : >> { %10047 = vst.msk [vmem:[%s13801_s16 + $0x74] sm:$0xf] %vm3403_vm13, %v3967_v4  ;;  %10046 = vst.msk [vmem:[%s13801_s16 + $0x70] sm:$0xf] %vm3403_vm13, %v3965_v45 }
 0x2ac   : >> { %v10058_v3 = vld [vmem:[%s13801_s16 + $0x7c] sm:$0xf] }
 0x2ad   : >> { %v4032_v53 = vpop.permute.xlu1 %4031 }
 0x2ae   : >> { %10052 = vst.msk [vmem:[%s13801_s16 + $0x64] sm:$0xf] %vm3481_vm6, %v4032_v53 }
 0x2af   : >> { %v4030_v38 = vpop.permute.xlu0 %4029  ;;  %10062 = vst.msk [vmem:[%s13801_s16 + $0x64] sm:$0xf] %vm3544_vm11, %v4089_v9  ;;  %v4409_v9 = vmul.u32 (%p515_p4), 2, %v15145_v41 }
 0x2b0   : >> { %10051 = vst.msk [vmem:[%s13801_s16 + $0x60] sm:$0xf] %vm3481_vm6, %v4030_v38 }
 0x2b1   : >> { %10061 = vst.msk [vmem:[%s13801_s16 + $0x60] sm:$0xf] %vm3544_vm11, %v4087_v31  ;;  %v4093_v51 = vpop.permute.xlu1 %4092  ;;  %v4412_v31 = vmul.u32 (%p515_p4), 2, %v4406_v0 }
 0x2b3   : >> { %v4099_v59 = vpop.permute.xlu0 %4098 }
 0x2b5   : >> { %v4101_v43 = vpop.permute.xlu1 %4100 }
 0x2b8   : >> { %v4036_v8 = vpop.permute.xlu0 %4035 }
 0x2b9   : >> { %10054 = vst.msk [vmem:[%s13801_s16 + $0x6c] sm:$0xf] %vm3481_vm6, %v4036_v8 }
 0x2ba   : >> { %10064 = vst.msk [vmem:[%s13801_s16 + $0x6c] sm:$0xf] %vm3544_vm11, %v4093_v51 }
 0x2bb   : >> { %v4097_v16 = vpop.permute.xlu1 %4096 }
 0x2bc   : >> { %v4095_v24 = vpop.permute.xlu0 %4094 }
 0x2bf   : >> { %v4042_v15 = vpop.permute.xlu1 %4041 }
 0x2c0   : >> { %10057 = vst.msk [vmem:[%s13801_s16 + $0x78] sm:$0xf] %vm3481_vm6, %v4042_v15  ;;  %v4242_v34 = vpop.permute.xlu0 %4241 }
 0x2c1   : >> { %10067 = vst.msk [vmem:[%s13801_s16 + $0x78] sm:$0xf] %vm3544_vm11, %v4099_v59 }
 0x2c2   : >> { %10095 = vst.msk [vmem:[%s13801_s16 + $0x88] sm:$0xf] %vm3403_vm13, %v4242_v34 }
 0x2c3   : >> { %v4038_v11 = vpop.permute.xlu1 %4037 }
 0x2c4   : >> { %10055 = vst.msk [vmem:[%s13801_s16 + $0x70] sm:$0xf] %vm3481_vm6, %v4038_v11  ;;  %v4238_v48 = vpop.permute.xlu0 %4237 }
 0x2c5   : >> { %10065 = vst.msk [vmem:[%s13801_s16 + $0x70] sm:$0xf] %vm3544_vm11, %v4095_v24 }
 0x2c6   : >> { %10093 = vst.msk [vmem:[%s13801_s16 + $0x80] sm:$0xf] %vm3403_vm13, %v4238_v48 }
 0x2c7   : >> { %v4244_v57 = vpop.permute.xlu1 %4243 }
 0x2c8   : >> { %10096 = vst.msk [vmem:[%s13801_s16 + $0x8c] sm:$0xf] %vm3403_vm13, %v4244_v57  ;;  %v4044_v58 = vpop.permute.xlu0 %4043 }
 0x2c9   : >> { %v4061_v23 = vsel %vm14872_vm2, %v4044_v58, %v10058_v3 }
 0x2ca   : >> { %10059 = vst [vmem:[%s13801_s16 + $0x7c] sm:$0xf] %v4061_v23 }
 0x2cb   : >> { %10068 = vst.msk [vmem:[%s13801_s16 + $0x7c] sm:$0x7] %vm3552_vm8, %v4101_v43  ;;  %v4240_v61 = vpop.permute.xlu1 %4239 }
 0x2cc   : >> { %10094 = vst.msk [vmem:[%s13801_s16 + $0x84] sm:$0xf] %vm3403_vm13, %v4240_v61  ;;  %v4040_v29 = vpop.permute.xlu0 %4039 }
 0x2cd   : >> { %10056 = vst.msk [vmem:[%s13801_s16 + $0x74] sm:$0xf] %vm3481_vm6, %v4040_v29 }
 0x2ce   : >> { %10066 = vst.msk [vmem:[%s13801_s16 + $0x74] sm:$0xf] %vm3544_vm11, %v4097_v16 }
 0x2cf   : >> { %v4370_v28 = vpop.permute.xlu1 %4369 }
 0x2d0   : >> { %v4372_v39 = vpop.permute.xlu0 %4371 }
 0x2d1   : >> { %v10069_v22 = vld [vmem:[%s13801_s16 + $0x7c] sm:$0x8] }
 0x2d2   : >> { %v4119_v49 = vsel %vm14899_vm12, 0, %v10069_v22 }
 0x2d3   : >> { %10070 = vst [vmem:[%s13801_s16 + $0x7c] sm:$0x8] %v4119_v49  ;;  %v4315_v10 = vpop.permute.xlu1 %4314 }
 0x2d4   : >> { %10104 = vst.msk [vmem:[%s13801_s16 + $0x88] sm:$0xf] %vm3481_vm6, %v4315_v10  ;;  %v4368_v20 = vpop.permute.xlu0 %4367 }
 0x2d5   : >> { %10114 = vst.msk [vmem:[%s13801_s16 + $0x88] sm:$0xf] %vm3544_vm11, %v4372_v39 }
 0x2d7   : >> { %v4311_v26 = vpop.permute.xlu1 %4310 }
 0x2d8   : >> { %10102 = vst.msk [vmem:[%s13801_s16 + $0x80] sm:$0xf] %vm3481_vm6, %v4311_v26  ;;  %v4250_v37 = vpop.permute.xlu0 %4249 }
 0x2d9   : >> { %10112 = vst.msk [vmem:[%s13801_s16 + $0x80] sm:$0xf] %vm3544_vm11, %v4368_v20 }
 0x2da   : >> { %10099 = vst.msk [vmem:[%s13801_s16 + $0x98] sm:$0xf] %vm3403_vm13, %v4250_v37 }
 0x2db   : >> { %v4248_v44 = vpop.permute.xlu1 %4247 }
 0x2dc   : >> { %10098 = vst.msk [vmem:[%s13801_s16 + $0x94] sm:$0xf] %vm3403_vm13, %v4248_v44  ;;  %v4246_v13 = vpop.permute.xlu0 %4245 }
 0x2dd   : >> { %10097 = vst.msk [vmem:[%s13801_s16 + $0x90] sm:$0xf] %vm3403_vm13, %v4246_v13  ;;  %vm4415_vm13 = vcmp.eq.s32.totalorder (%p515_p4), %v4408_v42, %v4411_v55 }
 0x2de   : > { %v15158_v62 = vsel (%p515_p4), %vm4415_vm13, 1.0, %v13115_v47 }
 0x2df   : >> { %v4374_v21 = vpop.permute.xlu1 %4373 }
 0x2e0   : >> { %v4252_v32 = vpop.permute.xlu0 %4251 }
 0x2e1   : >> { %v4269_v56 = vsel %vm14477_vm5, %v4252_v32, %v10100_v7  ;;  %vm4416_vm5 = vcmp.eq.s32.totalorder (%p515_p4), %v4408_v42, %v4412_v31 }
 0x2e2   : >> { %10101 = vst [vmem:[%s13801_s16 + $0x9c] sm:$0xf] %v4269_v56  ;;  %v15161_v4 = vsel (%p515_p4), %vm4416_vm5, 1.0, %v13115_v47 }
 0x2e3   : >> { %v4323_v50 = vpop.permute.xlu1 %4322 }
 0x2e4   : >> { %10108 = vst.msk [vmem:[%s13801_s16 + $0x98] sm:$0xf] %vm3481_vm6, %v4323_v50  ;;  %v4313_v35 = vpop.permute.xlu0 %4312 }
 0x2e5   : >> { %10103 = vst.msk [vmem:[%s13801_s16 + $0x84] sm:$0xf] %vm3481_vm6, %v4313_v35 }
 0x2e6   : >> { %10113 = vst.msk [vmem:[%s13801_s16 + $0x84] sm:$0xf] %vm3544_vm11, %v4370_v28 }
 0x2e7   : >> { %v4325_v1 = vpop.permute.xlu1 %4324 }
 0x2e8   : >> { %v4317_v18 = vpop.permute.xlu0 %4316 }
 0x2e9   : >> { %v10109_v27 = vld [vmem:[%s13801_s16 + $0x9c] sm:$0xf]  ;;  %10105 = vst.msk [vmem:[%s13801_s16 + $0x8c] sm:$0xf] %vm3481_vm6, %v4317_v18 }
 0x2ea   : >> { %v4342_v52 = vsel %vm14872_vm2, %v4325_v1, %v10109_v27  ;;  %10115 = vst.msk [vmem:[%s13801_s16 + $0x8c] sm:$0xf] %vm3544_vm11, %v4374_v21 }
 0x2eb   : >> { %10110 = vst [vmem:[%s13801_s16 + $0x9c] sm:$0xf] %v4342_v52  ;;  %v4378_v6 = vpop.permute.xlu1 %4377 }
 0x2ec   : >> { %v4376_v33 = vpop.permute.xlu0 %4375 }
 0x2ef   : >> { %v4319_v19 = vpop.permute.xlu1 %4318  ;;  %517 = sbr.rel (!%p515_p4) target bundleno = 38 (0x26), region = 198 }
 0x2f0   : >> { %10106 = vst.msk [vmem:[%s13801_s16 + $0x90] sm:$0xf] %vm3481_vm6, %v4319_v19  ;;  %v4321_v25 = vpop.permute.xlu0 %4320 }
 0x2f1   : >> { %10116 = vst.msk [vmem:[%s13801_s16 + $0x90] sm:$0xf] %vm3544_vm11, %v4376_v33 }
 0x2f2   : >> { %10107 = vst.msk [vmem:[%s13801_s16 + $0x94] sm:$0xf] %vm3481_vm6, %v4321_v25  ;;  %v10120_v12 = vld [vmem:[%s13801_s16 + $0x9c] sm:$0x8]  ;;  %vm4414_vm6 = vcmp.eq.s32.totalorder (%p515_p4), %v4408_v42, %v4410_v17 }
 0x2f3   : >> { %10117 = vst.msk [vmem:[%s13801_s16 + $0x94] sm:$0xf] %vm3544_vm11, %v4378_v6  ;;  %v4400_v46 = vsel %vm14899_vm12, 0, %v10120_v12  ;;  %v4382_v14 = vpop.permute.xlu1 %4381  ;;  %v15155_v2 = vsel (%p515_p4), %vm4414_vm6, 1.0, %v13115_v47 }
 0x2f4   : >> { %10121 = vst [vmem:[%s13801_s16 + $0x9c] sm:$0x8] %v4400_v46  ;;  %10119 = vst.msk [vmem:[%s13801_s16 + $0x9c] sm:$0x7] %vm3552_vm8, %v4382_v14  ;;  %v4380_v30 = vpop.permute.xlu0 %4379 }
 0x2f5   : >> { %10118 = vst.msk [vmem:[%s13801_s16 + $0x98] sm:$0xf] %vm3544_vm11, %v4380_v30  ;;  %vm4413_vm11 = vcmp.eq.s32.totalorder (%p515_p4), %v4408_v42, %v4409_v9 }
 0x2f6   : > { %v15152_v40 = vsel %vm4413_vm11, 1.0, %v13115_v47 }
 0x2f7 LB: >> { %v12715_v45 = vld [vmem:[%s16428_s3 + $0x20] sm:$0xff]   ;;  %v12717_v38 = vld [vmem:[%s16428_s3 + $0x28] sm:$0xff]   ;;  %s11181_s23 = sshll.u32 %s13097_s18, 6  ;;  %v12719_v59 = vld [vmem:[%s16428_s3 + $0x30] sm:$0xff]   ;;  %vm4516_vm2 = vcmask 523264   ;;  %vm5022_vm8 = vcmask 515072   ;;  %s13097_s18 = sphi %s15163_s18, %s4430_s18  }
 0x2f8   : >> { %v12716_v53 = vld [vmem:[%s16428_s3 + $0x40] sm:$0xff]   ;;  %12042 = vmatprep.subr.bf16.mxu1 %v12715_v45  ;;  %v12718_v51 = vld [vmem:[%s16428_s3 + $0x48] sm:$0xff]   ;;  %v12720_v43 = vld [vmem:[%s16428_s3 + $0x50] sm:$0xff]   ;;  %s15193_s21 = scalar_lea.vmem [#allocation2], %s11181_s23  ;;  %vm5035_vm7 = vcmask 1046528   ;;  %vm13116_vm12 = vmmov 1  }
 0x2f9   : >> { %12074 = vmatprep.subr.bf16.mxu0 %v12716_v53  ;;  %12043 = vmatpush3.bf16.msra.mxu1 %v12715_v45  ;;  %v12721_v8 = vld [vmem:[%s16428_s3 + $0x38] sm:$0xff]   ;;  %v12726_v11 = vld [vmem:[%s16428_s3] sm:$0xff]   ;;  %v12729_v3 = vld [vmem:[%s16428_s3 + $0x8] sm:$0xff]   ;;  %s13117_s30 = smov 32   ;;  %s10241_s27 = sshll.u32 %s13097_s18, 4 }
 0x2fa   : >> { %12075 = vmatpush3.bf16.msra.mxu0 %v12716_v53  ;;  %12044 = vmatprep.subr.bf16.mxu1 %v12717_v38  ;;  %v12722_v16 = vld [vmem:[%s16428_s3 + $0x58] sm:$0xff]   ;;  %v12728_v48 = vld [vmem:[%s16428_s3 + $0x60] sm:$0xff]   ;;  %v12730_v58 = vld [vmem:[%s16428_s3 + $0x68] sm:$0xff]   ;;  %s15294_s22 = scalar_lea.vmem [#allocation3], %s10241_s27  ;;  %s13118_s24 = smov 64  }
 0x2fb   : >> { %12076 = vmatprep.subr.bf16.mxu0 %v12718_v51  ;;  %v12734_v28 = vld [vmem:[%s16428_s3 + $0x10] sm:$0xff]   ;;  %v12737_v49 = vld [vmem:[%s16428_s3 + $0x18] sm:$0xff]   ;;  %vm15256_vm11 = vmpackc.low %vm5035_vm7, %vm13116_vm12  ;;  %s13119_s14 = smov 96   ;;  %s4430_s18 = sadd.s32 1, %s13097_s18  }
 0x2fc   : >> { %v12723_v24 = vld [vmem:[%s15193_s21 + $0x20] sm:$0xff]   ;;  %v12725_v34 = vld [vmem:[%s15193_s21 + $0x28] sm:$0xff]   ;;  %v12731_v23 = vld [vmem:[%s15193_s21 + $0x30] sm:$0xff]   ;;  %p4427_p5 = scmp.ge.s32.totalorder %s4430_s18, 32  }
 0x2fd   : >> { %12045 = vmatpush3.bf16.msra.mxu1 %v12717_v38  ;;  %v12724_v15 = vld [vmem:[%s15193_s21 + $0x40] sm:$0xff]   ;;  %12050 = vmatprep.mubr.msk.bf16.mxu1 %vm4516_vm2, %v12723_v24  ;;  %v12727_v57 = vld [vmem:[%s15193_s21 + $0x48] sm:$0xff]   ;;  %v12732_v61 = vld [vmem:[%s15193_s21 + $0x50] sm:$0xff]   ;;  %s15370_s16 = smov (%p4427_p5), 0  }
 0x2fe   : >> { %12077 = vmatpush3.bf16.msra.mxu0 %v12718_v51  ;;  %12046 = vmatprep.subr.bf16.mxu1 %v12719_v59  ;;  %v12733_v29 = vld [vmem:[%s15193_s21 + $0x38] sm:$0xff]   ;;  %v12736_v39 = vld [vmem:[%s16428_s3 + $0x70] sm:$0xff]   ;;  %v12739_v20 = vld [vmem:[%s15193_s21] sm:$0xff]  }
 0x2ff   : >> { %12078 = vmatprep.subr.bf16.mxu0 %v12720_v43  ;;  %12082 = vmatprep.mubr.msk.bf16.mxu0 %vm4516_vm2, %v12724_v15  ;;  %v12735_v22 = vld [vmem:[%s15193_s21 + $0x58] sm:$0xff]   ;;  %v12740_v26 = vld [vmem:[%s15193_s21 + $0x60] sm:$0xff]   ;;  %v12741_v37 = vld [vmem:[%s15193_s21 + $0x8] sm:$0xff]  }
 0x300   : >> { %v12738_v10 = vld [vmem:[%s16428_s3 + $0x78] sm:$0xff]   ;;  %v12742_v44 = vld [vmem:[%s15193_s21 + $0x68] sm:$0xff]   ;;  %v12743_v13 = vld [vmem:[%s15193_s21 + $0x10] sm:$0xff]  }
 0x301   : >> { %12047 = vmatpush3.bf16.msra.mxu1 %v12719_v59  ;;  %v12744_v21 = vld [vmem:[%s15193_s21 + $0x70] sm:$0xff]   ;;  %v12745_v32 = vld [vmem:[%s15193_s21 + $0x18] sm:$0xff]  }
 0x302   : >> { %12079 = vmatpush3.bf16.msra.mxu0 %v12720_v43  ;;  %12048 = vmatprep.subr.bf16.mxu1 %v12721_v8  ;;  %v12746_v7 = vld [vmem:[%s15193_s21 + $0x78] sm:$0xff]   ;;  %v10231_v43 = vld [vmem:[%s16429_s4] ss:$0 sm:$0xff] }
 0x303   : >> { %12080 = vmatprep.subr.bf16.mxu0 %v12722_v16 }
 0x305   : >> { %12049 = vmatpush3.bf16.msra.mxu1 %v12721_v8 }
 0x306   : >> { %12081 = vmatpush3.bf16.msra.mxu0 %v12722_v16  ;;  %12058 = vmatprep.subr.bf16.mxu1 %v12726_v11 }
 0x307   : >> { %12090 = vmatprep.subr.bf16.mxu0 %v12728_v48 }
 0x308   : >> { %12051 = vmatmul.mubr.msk.bf16.vlgmr.msra.gmra.mrb[0].mxu1 %vm4516_vm2, %v12725_v34 }
 0x309   : >> { %12083 = vmatmul.mubr.msk.bf16.vlgmr.msra.gmra.mrb[0].mxu0 %vm4516_vm2, %v12727_v57  ;;  %12059 = vmatpush3.bf16.msra.mxu1 %v12726_v11 }
 0x30a   : >> { %12091 = vmatpush3.bf16.msra.mxu0 %v12728_v48  ;;  %12060 = vmatprep.subr.bf16.mxu1 %v12729_v3 }
 0x30b   : >> { %12092 = vmatprep.subr.bf16.mxu0 %v12730_v58  ;;  %12054 = vmatprep.mubr.msk.bf16.mxu1 %vm4516_vm2, %v12731_v23 }
 0x30c   : >> { %12086 = vmatprep.mubr.msk.bf16.mxu0 %vm4516_vm2, %v12732_v61 }
 0x30d   : >> { %12061 = vmatpush3.bf16.msra.mxu1 %v12729_v3 }
 0x30e   : >> { %12093 = vmatpush3.bf16.msra.mxu0 %v12730_v58  ;;  %12062 = vmatprep.subr.bf16.mxu1 %v12734_v28 }
 0x30f   : >> { %12094 = vmatprep.subr.bf16.mxu0 %v12736_v39 }
 0x310   : >> { %12055 = vmatmul.mubr.msk.bf16.gmra.mrb[4].mxu1 %vm4516_vm2, %v12733_v29 }
 0x311   : >> { %12087 = vmatmul.mubr.msk.bf16.gmra.mrb[4].mxu0 %vm4516_vm2, %v12735_v22  ;;  %12063 = vmatpush3.bf16.msra.mxu1 %v12734_v28 }
 0x312   : >> { %12095 = vmatpush3.bf16.msra.mxu0 %v12736_v39  ;;  %12064 = vmatprep.subr.bf16.mxu1 %v12737_v49 }
 0x313   : >> { %12096 = vmatprep.subr.bf16.mxu0 %v12738_v10  ;;  %12066 = vmatprep.mubr.msk.bf16.mxu1 %vm4516_vm2, %v12739_v20 }
 0x314   : >> { %12098 = vmatprep.mubr.msk.bf16.mxu0 %vm4516_vm2, %v12740_v26 }
 0x315   : >> { %12065 = vmatpush3.bf16.msra.mxu1 %v12737_v49 }
 0x316   : >> { %12097 = vmatpush3.bf16.msra.mxu0 %v12738_v10 }
 0x318   : >> { %12067 = vmatmul.mubr.msk.bf16.vlgmr.msra.gmra.mrb[0].mxu1 %vm4516_vm2, %v12741_v37 }
 0x319   : >> { %12099 = vmatmul.mubr.msk.bf16.vlgmr.msra.gmra.mrb[0].mxu0 %vm4516_vm2, %v12742_v44  ;;  %12070 = vmatprep.mubr.msk.bf16.mxu1 %vm4516_vm2, %v12743_v13 }
 0x31a   : >> { %12102 = vmatprep.mubr.msk.bf16.mxu0 %vm4516_vm2, %v12744_v21 }
 0x320   : >> { %12071 = vmatmul.mubr.msk.bf16.gmra.mrb[4].mxu1 %vm4516_vm2, %v12745_v32 }
 0x321   : >> { %12103 = vmatmul.mubr.msk.bf16.gmra.mrb[4].mxu0 %vm4516_vm2, %v12746_v7  ;;  %12125 = vmatprep.mubr.msk.f32.mxu1 %vm5022_vm8, %v15158_v62 }
 0x322   : >> { %12122 = vmatprep.mubr.msk.f32.mxu0 %vm5022_vm8, %v15152_v40 }
 0x3eb   : >> { %v12068_v56 = vpop.f32.mrb[0].mxu1 }
 0x3ec   : >> { %v12100_v50 = vpop.f32.mrb[0].mxu0  ;;  %v4684_v35 = vpop.f32.mrb[1].mxu1 }
 0x3ed   : >> { %v12477_v1 = vadd.f32 %v12100_v50, %v12068_v56  ;;  %v4976_v18 = vpop.f32.mrb[1].mxu0  ;;  %v12069_v27 = vpop.f32.mrb[2].mxu1 }
 0x3ee   : >> { %v12478_v52 = vadd.f32 %v4976_v18, %v4684_v35  ;;  %v12101_v6 = vpop.f32.mrb[2].mxu0  ;;  %v4687_v33 = vpop.f32.mrb[3].mxu1 }
 0x3ef   : >> { %v12479_v19 = vadd.f32 %v12101_v6, %v12069_v27  ;;  %v4979_v25 = vpop.f32.mrb[3].mxu0 }
 0x3f0   : >> { %v12480_v12 = vadd.f32 %v4979_v25, %v4687_v33 }
 0x3f1   : >> { %v12245_v46 = vpack.c.bf16 %v12479_v19, %v12477_v1 }
 0x3f2   : >> { %v12241_v14 = vpack.c.bf16 %v12480_v12, %v12478_v52 }
 0x3f3   : >> { %v12072_v30 = vpop.f32.mrb[4].mxu1 }
 0x3f4   : >> { %v12104_v36 = vpop.f32.mrb[4].mxu0  ;;  %12242 = vmatprep.subr.bf16.mxu0 %v12241_v14  ;;  %12469 = vmatprep.subr.bf16.mxu1 %v12241_v14  ;;  %v4700_v42 = vpop.f32.mrb[5].mxu1 }
 0x3f5   : >> { %v12481_v60 = vadd.f32 %v12104_v36, %v12072_v30  ;;  %v4992_v63 = vpop.f32.mrb[5].mxu0  ;;  %12244 = vmatpush3.bf16.msra.mxu0 %v12241_v14  ;;  %12473 = vmatpush3.bf16.msra.mxu1 %v12241_v14  ;;  %v12073_v0 = vpop.f32.mrb[6].mxu1 }
 0x3f6   : >> { %v12482_v9 = vadd.f32 %v4992_v63, %v4700_v42  ;;  %v12105_v17 = vpop.f32.mrb[6].mxu0  ;;  %12246 = vmatprep.subr.bf16.mxu0 %v12245_v46  ;;  %12470 = vmatprep.subr.bf16.mxu1 %v12245_v46  ;;  %v4703_v55 = vpop.f32.mrb[7].mxu1 }
 0x3f7   : >> { %v12483_v31 = vadd.f32 %v12105_v17, %v12073_v0  ;;  %v4995_v45 = vpop.f32.mrb[7].mxu0  ;;  %v10242_v17 = vld [vmem:[%s15294_s22 + $0x10] sm:$0xf] }
 0x3f8   : >> { %v12484_v53 = vadd.f32 %v4995_v45, %v4703_v55 }
 0x3f9   : >> { %v12253_v38 = vpack.c.bf16 %v12483_v31, %v12481_v60  ;;  %12248 = vmatpush3.bf16.msra.mxu0 %v12245_v46  ;;  %12474 = vmatpush3.bf16.msra.mxu1 %v12245_v46 }
 0x3fa   : >> { %v12249_v51 = vpack.c.bf16 %v12484_v53, %v12482_v9 }
 0x3fc   : >> { %12250 = vmatprep.subr.bf16.mxu0 %v12249_v51  ;;  %12471 = vmatprep.subr.bf16.mxu1 %v12249_v51 }
 0x3fd   : >> { %12252 = vmatpush3.bf16.msra.mxu0 %v12249_v51  ;;  %12475 = vmatpush3.bf16.msra.mxu1 %v12249_v51 }
 0x3fe   : >> { %12255 = vmatprep.subr.msk.bf16.mxu0 %vm15256_vm11, %v12253_v38  ;;  %12472 = vmatprep.subr.msk.bf16.mxu1 %vm15256_vm11, %v12253_v38 }
 0x401   : >> { %12258 = vmatpush3.bf16.msk.msra.mxu0 %vm15256_vm11, %v12253_v38  ;;  %12476 = vmatpush3.bf16.msk.msra.mxu1 %vm15256_vm11, %v12253_v38 }
 0x404   : >> { %12123 = vmatmul.mubr.msk.f32.vlgmr.msra.gmra.mrb[8].mxu0 %vm5022_vm8, %v15155_v2  ;;  %12126 = vmatmul.mubr.msk.f32.vlgmr.msra.gmra.mrb[8].mxu1 %vm5022_vm8, %v15161_v4  ;;  %vm5193_vm8 = vcmask 257024  }
 0x405   : >> { %vm15290_vm12 = vmand %vm5193_vm8, %vm3358_vm4 }
 0x4d7   : >> { %v12124_v8 = vpop.f32.mrb[8].mxu0  ;;  %v12127_v16 = vpop.f32.mrb[8].mxu1 }
 0x4d8   : >> { %v5111_v24 = vadd.f32 %v12124_v8, %v10231_v43  ;;  %v5121_v15 = vadd.f32 %v12127_v16, %v10231_v43  ;;  %v5105_v34 = vpop.f32.mrb[9].mxu0  ;;  %v5115_v11 = vpop.f32.mrb[9].mxu1 }
 0x4d9   : >> { %v5106_v48 = vadd.f32 %v10231_v43, %v5105_v34  ;;  %v5116_v57 = vadd.f32 %v10231_v43, %v5115_v11 }
 0x4da   : >> { %vm5125_vm6 = vcmp.gt.f32.partialorder %v5111_v24, 0.0  ;;  %v5129_v3 = vmul.f32 0.2, %v5111_v24  ;;  %vm5127_vm13 = vcmp.gt.f32.partialorder %v5121_v15, 0.0  ;;  %v5131_v58 = vmul.f32 0.2, %v5121_v15 }
 0x4db   : >> { %vm5124_vm5 = vcmp.gt.f32.partialorder %v5106_v48, 0.0  ;;  %v5128_v23 = vmul.f32 0.2, %v5106_v48  ;;  %vm5126_vm2 = vcmp.gt.f32.partialorder %v5116_v57, 0.0  ;;  %v5130_v61 = vmul.f32 0.2, %v5116_v57 }
 0x4dc   : >> { %v5133_v29 = vsel %vm5125_vm6, %v5111_v24, %v5129_v3  ;;  %v5135_v28 = vsel %vm5127_vm13, %v5121_v15, %v5131_v58  ;;  %vm15304_vm6 = vmand %vm5193_vm8, %vm449_vm1  ;;  %v10246_v3 = vld [vmem:[%s15294_s22 + $0x1c] sm:$0xf]  ;;  %vm5206_vm13 = vcmask 253952  }
 0x4dd   : >> { %v11186_v39 = vpack.c.bf16 %v5133_v29, %v5133_v29  ;;  %v15275_v22 = vpack.c.bf16 %v5135_v28, %v5135_v28  ;;  %v5132_v49 = vsel %vm5124_vm5, %v5106_v48, %v5128_v23  ;;  %v5134_v10 = vsel %vm5126_vm2, %v5116_v57, %v5130_v61  ;;  %vm5207_vm5 = vmand %vm5206_vm13, %vm3273_vm15 }
 0x4de   : >> { %v11185_v20 = vpack.c.bf16 %v5132_v49, %v5132_v49  ;;  %v11187_v26 = vpack.c.bf16 %v5134_v10, %v5134_v10  ;;  %vm5223_vm2 = vcmask 519424   ;;  %vm5300_vm13 = vcmask 1044224  }
 0x4df   : >> { %5217 = vrot.lane.b32.xlu0 %v15275_v22, %s13117_s30  ;;  %5213 = vrot.lane.b32.xlu1 %v11186_v39, %s13117_s30  ;;  %v5179_v37 = vshrl.u32 %v15275_v22, 16  ;;  %v5182_v44 = vshll.u32 %v15275_v22, 16  ;;  %v5279_v13 = vrot.slane %v11186_v39, 5  ;;  %v5161_v21 = vshrl.u32 %v11186_v39, 16 }
 0x4e0   : >> { %v5282_v32 = vrot.slane %v11187_v26, 5  ;;  %v10260_v7 = vrot.slane %v11185_v20, 9  ;;  %v5153_v56 = vshrl.u32 %v11185_v20, 16  ;;  %v5156_v50 = vshll.u32 %v11185_v20, 16 }
 0x4e1   : >> { %v5181_v35 = vrot.slane %v5179_v37, 7  ;;  %v15281_v1 = vrot.slane %v5182_v44, 5  ;;  %v5250_v18 = vrot.slane %v5179_v37, 4  ;;  %v5281_v27 = vrot.slane %v5279_v13, 4 }
 0x4e2   : >> { %v5280_v6 = vsel %vm13642_vm10, %v10260_v7, %v5279_v13  ;;  %v5163_v33 = vrot.slane %v5161_v21, 7  ;;  %v5164_v19 = vshll.u32 %v11186_v39, 16  ;;  %v5234_v25 = vrot.slane %v5153_v56, 4 }
 0x4e3   : >> { %5215 = vrot.lane.b32.xlu0 %v11187_v26, %s13117_s30  ;;  %5211 = vrot.lane.b32.xlu1 %v11185_v20, %s13117_s30  ;;  %v5184_v12 = vor.u32 %v5182_v44, %v5181_v35  ;;  %v5251_v46 = vor.u32 %v5250_v18, %v15281_v1  ;;  %v5283_v14 = vsel %vm13642_vm10, %v5281_v27, %v5282_v32  ;;  %v5235_v30 = vrot.slane %v5156_v50, 5 }
 0x4e4   : >> { %v5166_v36 = vor.u32 %v5164_v19, %v5163_v33  ;;  %v5238_v42 = vrot.slane %v5164_v19, 5  ;;  %v5155_v60 = vrot.slane %v5153_v56, 7  ;;  %v5170_v63 = vshrl.u32 %v11187_v26, 16 }
 0x4e5   : >> { %v5252_v0 = vrot.slane %v5251_v46, 4  ;;  %v5236_v55 = vor.u32 %v5235_v30, %v5234_v25  ;;  %v5173_v31 = vshll.u32 %v11187_v26, 16  ;;  %v5240_v45 = vrot.slane %v5161_v21, 4 }
 0x4e6   : >> { %v5158_v53 = vor.u32 %v5156_v50, %v5155_v60  ;;  %v5172_v38 = vrot.slane %v5170_v63, 7  ;;  %v5245_v51 = vrot.slane %v5170_v63, 4  ;;  %v5284_v43 = vrot.slane %v5282_v32, 4 }
 0x4e7   : >> { %5259 = vrot.lane.b32.xlu0 %v5252_v0, %s13118_s24  ;;  %5290 = vrot.lane.b32.xlu1 %v5283_v14, %s13119_s14  ;;  %v5237_v8 = vrot.slane %v5236_v55, 4  ;;  %v5241_v16 = vor.u32 %v5240_v45, %v5238_v42  ;;  %v5243_v24 = vrot.slane %v5173_v31, 5  ;;  %v5285_v15 = vrot.slane %v15275_v22, 5 }
 0x4e8   : >> { %v5197_v34 = vsel %vm15290_vm12, %v5158_v53, %v10242_v17  ;;  %v5175_v11 = vor.u32 %v5173_v31, %v5172_v38  ;;  %v5177_v48 = vrot.slane %v5172_v38, 4  ;;  %v5159_v58 = vrot.slane %v5155_v60, 4 }
 0x4e9   : >> { %v5239_v23 = vsel %vm13730_vm14, %v5237_v8, %v5238_v42  ;;  %10243 = vst [vmem:[%s15294_s22 + $0x10] sm:$0xf] %v5197_v34  ;;  %v5242_v61 = vrot.slane %v5241_v16, 4  ;;  %v5246_v29 = vor.u32 %v5245_v51, %v5243_v24  ;;  %v5286_v28 = vsel %vm13642_vm10, %v5284_v43, %v5285_v15 }
 0x4ea   : >> { %v5185_v39 = vsel %vm14149_vm9, %v5177_v48, %v5184_v12  ;;  %v5167_v22 = vsel %vm14149_vm9, %v5159_v58, %v5166_v36  ;;  %v5168_v49 = vrot.slane %v5163_v33, 4  ;;  %v5287_v21 = vrot.slane %v5285_v15, 4 }
 0x4eb   : >> { %5288 = vrot.lane.b32.xlu0 %v5280_v6, %s13119_s14  ;;  %5253 = vrot.lane.b32.xlu1 %v5239_v23, %s13118_s24  ;;  %v5204_v10 = vsel %vm15304_vm6, %v5185_v39, %v10246_v3  ;;  %v5244_v20 = vsel %vm13730_vm14, %v5242_v61, %v5243_v24  ;;  %v5247_v26 = vrot.slane %v5246_v29, 4  ;;  %10244 = vst.msk [vmem:[%s15294_s22 + $0x14] sm:$0xf] %vm5193_vm8, %v5167_v22  ;;  %vm5265_vm12 = vcmask 781824  }
 0x4ec   : >> { %10247 = vst [vmem:[%s15294_s22 + $0x1c] sm:$0xf] %v5204_v10  ;;  %v5176_v37 = vsel %vm14149_vm9, %v5168_v49, %v5175_v11  ;;  %vm5270_vm6 = vmand %vm5265_vm12, %vm449_vm1 }
 0x4ed   : >> { %v5249_v44 = vsel %vm13730_vm14, %v5247_v26, %v15281_v1  ;;  %10245 = vst.msk [vmem:[%s15294_s22 + $0x18] sm:$0xf] %vm5193_vm8, %v5176_v37  ;;  %vm5228_vm8 = vmand %vm5223_vm2, %vm449_vm1 }
 0x4ef   : >> { %5255 = vrot.lane.b32.xlu0 %v5244_v20, %s13118_s24  ;;  %5257 = vrot.lane.b32.xlu1 %v5249_v44, %s13118_s24 }
 0x4f0   : >> { %v10248_v13 = vld [vmem:[%s15294_s22 + $0x10] sm:$0x1] }
 0x4f1   : >> { %v5209_v32 = vsel %vm5207_vm5, 0, %v10248_v13  ;;  %vm5306_vm5 = vcmask 1044227  }
 0x4f2   : >> { %10249 = vst [vmem:[%s15294_s22 + $0x10] sm:$0x1] %v5209_v32 }
 0x4f3   : >> { %5292 = vrot.lane.b32.xlu0 %v5286_v28, %s13119_s14  ;;  %5294 = vrot.lane.b32.xlu1 %v5287_v21, %s13119_s14  ;;  %v10253_v56 = vld [vmem:[%s15294_s22 + $0x1c] sm:$0xf] }
 0x551   : >> { %v5218_v7 = vpop.permute.xlu0 %5217  ;;  %v5214_v50 = vpop.permute.xlu1 %5213 }
 0x552   : >> { %v5230_v35 = vsel %vm5228_vm8, %v5218_v7, %v10253_v56  ;;  %10251 = vst.msk [vmem:[%s15294_s22 + $0x14] sm:$0xf] %vm5223_vm2, %v5214_v50  ;;  %vm5304_vm8 = vcmask 1043200  }
 0x553   : >> { %10254 = vst [vmem:[%s15294_s22 + $0x1c] sm:$0xf] %v5230_v35 }
 0x555   : >> { %v5216_v1 = vpop.permute.xlu0 %5215  ;;  %v5212_v18 = vpop.permute.xlu1 %5211 }
 0x556   : >> { %10252 = vst.msk [vmem:[%s15294_s22 + $0x18] sm:$0xf] %vm5223_vm2, %v5216_v1  ;;  %10250 = vst.msk [vmem:[%s15294_s22 + $0x10] sm:$0xf] %vm5223_vm2, %v5212_v18 }
 0x557   : >> { %vm5307_vm2 = vmand %vm5306_vm5, %vm449_vm1 }
 0x559   : >> { %v5260_v27 = vpop.permute.xlu0 %5259  ;;  %v5291_v52 = vpop.permute.xlu1 %5290 }
 0x55a   : >> { %v10258_v6 = vld [vmem:[%s15294_s22 + $0x1c] sm:$0xf] }
 0x55b   : >> { %v5272_v33 = vsel %vm5270_vm6, %v5260_v27, %v10258_v6 }
 0x55c   : >> { %10259 = vst [vmem:[%s15294_s22 + $0x1c] sm:$0xf] %v5272_v33 }
 0x55d   : >> { %v5289_v19 = vpop.permute.xlu0 %5288  ;;  %v5254_v25 = vpop.permute.xlu1 %5253 }
 0x55e   : >> { %10255 = vst.msk [vmem:[%s15294_s22 + $0x10] sm:$0xf] %vm5265_vm12, %v5254_v25 }
 0x55f   : >> { %10261 = vst.msk [vmem:[%s15294_s22 + $0x10] sm:$0xf] %vm5300_vm13, %v5289_v19 }
 0x561   : >> { %v5256_v12 = vpop.permute.xlu0 %5255  ;;  %v5258_v46 = vpop.permute.xlu1 %5257  ;;  %4429 = sbr.rel (!%p4427_p5) target bundleno = 759 (0x2f7), region = 209 }
 0x562   : >> { %10256 = vst.msk [vmem:[%s15294_s22 + $0x14] sm:$0xf] %vm5265_vm12, %v5256_v12  ;;  %10257 = vst.msk [vmem:[%s15294_s22 + $0x18] sm:$0xf] %vm5265_vm12, %v5258_v46 }
 0x563   : >> { %v10265_v14 = vld [vmem:[%s15294_s22 + $0x1c] sm:$0x8]  ;;  %10262 = vst.msk [vmem:[%s15294_s22 + $0x14] sm:$0xf] %vm5300_vm13, %v5291_v52 }
 0x564   : >> { %v5309_v30 = vsel %vm5307_vm2, 0, %v10265_v14 }
 0x565   : >> { %10266 = vst [vmem:[%s15294_s22 + $0x1c] sm:$0x8] %v5309_v30  ;;  %v5293_v36 = vpop.permute.xlu0 %5292  ;;  %v5295_v42 = vpop.permute.xlu1 %5294 }
 0x566   : >> { %10263 = vst.msk [vmem:[%s15294_s22 + $0x18] sm:$0xf] %vm5300_vm13, %v5293_v36 }
 0x567   : >> { %10264 = vst.msk [vmem:[%s15294_s22 + $0x1c] sm:$0x7] %vm5304_vm8, %v5295_v42 }
 0x568 LB: >> { %v12747_v60 = vld [vmem:[%s16430_s5 + $0x40] sm:$0xff]   ;;  %v12749_v62 = vld [vmem:[%s16430_s5 + $0x48] sm:$0xff]   ;;  %v12751_v0 = vld [vmem:[%s16430_s5 + $0x50] sm:$0xff]   ;;  %s11190_s20 = sshll.u32 %s13101_s16, 5  ;;  %vm5867_vm12 = vcmask 252928   ;;  %s10382_s19 = sshll.u32 %s13101_s16, 4  ;;  %s13101_s16 = sphi %s15370_s16, %s5316_s16  }
 0x569   : >> { %v12748_v63 = vld [vmem:[%s16430_s5 + $0x80] sm:$0xff]   ;;  %12128 = vmatprep.subr.bf16.mxu1 %v12747_v60  ;;  %v12750_v4 = vld [vmem:[%s16430_s5 + $0x88] sm:$0xff]   ;;  %v12752_v9 = vld [vmem:[%s16430_s5 + $0x90] sm:$0xff]   ;;  %s15409_s30 = scalar_lea.vmem [#allocation3], %s11190_s20  ;;  %s13120_s17 = smov 64   ;;  %vm5998_vm2 = vcmask 516096  }
 0x56a   : >> { %12168 = vmatprep.subr.bf16.mxu0 %v12748_v63  ;;  %12129 = vmatpush3.bf16.msra.mxu1 %v12747_v60  ;;  %v12753_v17 = vld [vmem:[%s16430_s5 + $0x58] sm:$0xff]   ;;  %v12755_v31 = vld [vmem:[%s16430_s5 + $0x60] sm:$0xff]   ;;  %v12757_v53 = vld [vmem:[%s16430_s5 + $0x68] sm:$0xff]   ;;  %s15503_s20 = scalar_lea.vmem [#allocation4], %s10382_s19  ;;  %vm6050_vm8 = vcmask 1043971   ;;  %s5316_s16 = sadd.s32 1, %s13101_s16  }
 0x56b   : >> { %12169 = vmatpush3.bf16.msra.mxu0 %v12748_v63  ;;  %12130 = vmatprep.subr.bf16.mxu1 %v12749_v62  ;;  %v12754_v55 = vld [vmem:[%s16430_s5 + $0x98] sm:$0xff]   ;;  %v12756_v45 = vld [vmem:[%s16430_s5 + $0xa0] sm:$0xff]   ;;  %v12758_v51 = vld [vmem:[%s16430_s5 + $0xa8] sm:$0xff]   ;;  %p5313_p6 = scmp.ge.s32.totalorder %s5316_s16, 16  }
 0x56c   : >> { %12170 = vmatprep.subr.bf16.mxu0 %v12750_v4  ;;  %v12759_v8 = vld [vmem:[%s16430_s5 + $0x70] sm:$0xff]   ;;  %v12761_v24 = vld [vmem:[%s16430_s5 + $0x78] sm:$0xff]   ;;  %v12764_v34 = vld [vmem:[%s16430_s5] sm:$0xff]   ;;  %s15560_s29 = smov (%p5313_p6), 0  }
 0x56d   : >> { %v12760_v16 = vld [vmem:[%s16430_s5 + $0xb0] sm:$0xff]   ;;  %v12762_v15 = vld [vmem:[%s16430_s5 + $0xb8] sm:$0xff]   ;;  %v12766_v11 = vld [vmem:[%s16430_s5 + $0xc0] sm:$0xff]  }
 0x56e   : >> { %12131 = vmatpush3.bf16.msra.mxu1 %v12749_v62  ;;  %v12763_v38 = vld [vmem:[%s15409_s30 + $0x10] sm:$0xff]   ;;  %v12765_v43 = vld [vmem:[%s15409_s30 + $0x20] sm:$0xff]   ;;  %v12767_v48 = vld [vmem:[%s15409_s30 + $0x18] sm:$0xff]  }
 0x56f   : >> { %12171 = vmatpush3.bf16.msra.mxu0 %v12750_v4  ;;  %12132 = vmatprep.subr.bf16.mxu1 %v12751_v0  ;;  %v12768_v57 = vld [vmem:[%s15409_s30 + $0x28] sm:$0xff]   ;;  %v12771_v23 = vld [vmem:[%s16430_s5 + $0x10] sm:$0xff]   ;;  %v12783_v29 = vld [vmem:[%s15409_s30] sm:$0xff]  }
 0x570   : >> { %12172 = vmatprep.subr.bf16.mxu0 %v12752_v9  ;;  %12144 = vmatprep.mubr.bf16.mxu1 %v12763_v38  ;;  %v12769_v3 = vld [vmem:[%s16430_s5 + $0x8] sm:$0xff]   ;;  %v12772_v61 = vld [vmem:[%s16430_s5 + $0xd0] sm:$0xff]   ;;  %v12773_v39 = vld [vmem:[%s16430_s5 + $0x18] sm:$0xff]  }
 0x571   : >> { %12184 = vmatprep.mubr.bf16.mxu0 %v12765_v43  ;;  %v12770_v58 = vld [vmem:[%s16430_s5 + $0xc8] sm:$0xff]   ;;  %v12784_v28 = vld [vmem:[%s15409_s30 + $0x30] sm:$0xff]   ;;  %v12774_v22 = vld [vmem:[%s16430_s5 + $0xd8] sm:$0xff]  }
 0x572   : >> { %12133 = vmatpush3.bf16.msra.mxu1 %v12751_v0  ;;  %v12775_v49 = vld [vmem:[%s16430_s5 + $0x20] sm:$0xff]   ;;  %v12777_v20 = vld [vmem:[%s16430_s5 + $0x28] sm:$0xff]   ;;  %v12779_v37 = vld [vmem:[%s16430_s5 + $0x30] sm:$0xff]  }
 0x573   : >> { %12173 = vmatpush3.bf16.msra.mxu0 %v12752_v9  ;;  %12134 = vmatprep.subr.bf16.mxu1 %v12753_v17  ;;  %v12776_v10 = vld [vmem:[%s16430_s5 + $0xe0] sm:$0xff]   ;;  %v12778_v26 = vld [vmem:[%s16430_s5 + $0xe8] sm:$0xff]   ;;  %v12780_v44 = vld [vmem:[%s16430_s5 + $0xf0] sm:$0xff]  }
 0x574   : >> { %12174 = vmatprep.subr.bf16.mxu0 %v12754_v55  ;;  %v12781_v13 = vld [vmem:[%s16430_s5 + $0x38] sm:$0xff]   ;;  %v12785_v32 = vld [vmem:[%s15409_s30 + $0x8] sm:$0xff]   ;;  %v10376_v30 = vld [vmem:[%s16431_s6] ss:$0 sm:$0xff] }
 0x575   : >> { %v12782_v21 = vld [vmem:[%s16430_s5 + $0xf8] sm:$0xff]   ;;  %vm15499_vm5 = vmand %vm440_vm0, %vm3358_vm4 }
 0x576   : >> { %12135 = vmatpush3.bf16.msra.mxu1 %v12753_v17  ;;  %v12786_v7 = vld [vmem:[%s15409_s30 + $0x38] sm:$0xff]  }
 0x577   : >> { %12175 = vmatpush3.bf16.msra.mxu0 %v12754_v55  ;;  %12136 = vmatprep.subr.bf16.mxu1 %v12755_v31 }
 0x578   : >> { %12176 = vmatprep.subr.bf16.mxu0 %v12756_v45 }
 0x57a   : >> { %12137 = vmatpush3.bf16.msra.mxu1 %v12755_v31 }
 0x57b   : >> { %12177 = vmatpush3.bf16.msra.mxu0 %v12756_v45  ;;  %12138 = vmatprep.subr.bf16.mxu1 %v12757_v53 }
 0x57c   : >> { %12178 = vmatprep.subr.bf16.mxu0 %v12758_v51 }
 0x57e   : >> { %12139 = vmatpush3.bf16.msra.mxu1 %v12757_v53 }
 0x57f   : >> { %12179 = vmatpush3.bf16.msra.mxu0 %v12758_v51  ;;  %12140 = vmatprep.subr.bf16.mxu1 %v12759_v8 }
 0x580   : >> { %12180 = vmatprep.subr.bf16.mxu0 %v12760_v16 }
 0x582   : >> { %12141 = vmatpush3.bf16.msra.mxu1 %v12759_v8 }
 0x583   : >> { %12181 = vmatpush3.bf16.msra.mxu0 %v12760_v16  ;;  %12142 = vmatprep.subr.bf16.mxu1 %v12761_v24 }
 0x584   : >> { %12182 = vmatprep.subr.bf16.mxu0 %v12762_v15 }
 0x586   : >> { %12143 = vmatpush3.bf16.msra.mxu1 %v12761_v24 }
 0x587   : >> { %12183 = vmatpush3.bf16.msra.mxu0 %v12762_v15  ;;  %12148 = vmatprep.subr.bf16.mxu1 %v12764_v34 }
 0x588   : >> { %12188 = vmatprep.subr.bf16.mxu0 %v12766_v11 }
 0x589   : >> { %12145 = vmatmul.mubr.bf16.vlgmr.msra.gmra.mrb[0].mxu1 %v12767_v48 }
 0x58a   : >> { %12149 = vmatpush3.bf16.msra.mxu1 %v12764_v34  ;;  %12185 = vmatmul.mubr.bf16.vlgmr.msra.gmra.mrb[0].mxu0 %v12768_v57 }
 0x58b   : >> { %12189 = vmatpush3.bf16.msra.mxu0 %v12766_v11  ;;  %12150 = vmatprep.subr.bf16.mxu1 %v12769_v3 }
 0x58c   : >> { %12190 = vmatprep.subr.bf16.mxu0 %v12770_v58  ;;  %12164 = vmatprep.mubr.bf16.mxu1 %v12783_v29 }
 0x58d   : >> { %12204 = vmatprep.mubr.bf16.mxu0 %v12784_v28 }
 0x58e   : >> { %12151 = vmatpush3.bf16.msra.mxu1 %v12769_v3 }
 0x58f   : >> { %12191 = vmatpush3.bf16.msra.mxu0 %v12770_v58  ;;  %12152 = vmatprep.subr.bf16.mxu1 %v12771_v23 }
 0x590   : >> { %12192 = vmatprep.subr.bf16.mxu0 %v12772_v61 }
 0x592   : >> { %12153 = vmatpush3.bf16.msra.mxu1 %v12771_v23  ;;  %v10383_v23 = vld [vmem:[%s15503_s20 + $0x10] sm:$0xf] }
 0x593   : >> { %12193 = vmatpush3.bf16.msra.mxu0 %v12772_v61  ;;  %12154 = vmatprep.subr.bf16.mxu1 %v12773_v39 }
 0x594   : >> { %12194 = vmatprep.subr.bf16.mxu0 %v12774_v22 }
 0x596   : >> { %12155 = vmatpush3.bf16.msra.mxu1 %v12773_v39  ;;  %v10385_v39 = vld [vmem:[%s15503_s20 + $0x18] sm:$0xf] }
 0x597   : >> { %12195 = vmatpush3.bf16.msra.mxu0 %v12774_v22  ;;  %12156 = vmatprep.subr.bf16.mxu1 %v12775_v49 }
 0x598   : >> { %12196 = vmatprep.subr.bf16.mxu0 %v12776_v10 }
 0x59a   : >> { %12157 = vmatpush3.bf16.msra.mxu1 %v12775_v49  ;;  %v10393_v49 = vld [vmem:[%s15503_s20 + $0x1c] sm:$0xf] }
 0x59b   : >> { %12197 = vmatpush3.bf16.msra.mxu0 %v12776_v10  ;;  %12158 = vmatprep.subr.bf16.mxu1 %v12777_v20 }
 0x59c   : >> { %12198 = vmatprep.subr.bf16.mxu0 %v12778_v26 }
 0x59e   : >> { %12159 = vmatpush3.bf16.msra.mxu1 %v12777_v20 }
 0x59f   : >> { %12199 = vmatpush3.bf16.msra.mxu0 %v12778_v26  ;;  %12160 = vmatprep.subr.bf16.mxu1 %v12779_v37 }
 0x5a0   : >> { %12200 = vmatprep.subr.bf16.mxu0 %v12780_v44 }
 0x5a2   : >> { %12161 = vmatpush3.bf16.msra.mxu1 %v12779_v37 }
 0x5a3   : >> { %12201 = vmatpush3.bf16.msra.mxu0 %v12780_v44  ;;  %12162 = vmatprep.subr.bf16.mxu1 %v12781_v13 }
 0x5a4   : >> { %12202 = vmatprep.subr.bf16.mxu0 %v12782_v21 }
 0x5a6   : >> { %12163 = vmatpush3.bf16.msra.mxu1 %v12781_v13 }
 0x5a7   : >> { %12203 = vmatpush3.bf16.msra.mxu0 %v12782_v21 }
 0x5a9   : >> { %12165 = vmatmul.mubr.bf16.vlgmr.msra.gmra.mrb[0].mxu1 %v12785_v32 }
 0x5aa   : >> { %12205 = vmatmul.mubr.bf16.vlgmr.msra.gmra.mrb[0].mxu0 %v12786_v7  ;;  %12216 = vmatprep.mubr.msk.f32.mxu1 %vm5867_vm12, %v15152_v40 }
 0x67c   : >> { %v12166_v56 = vpop.f32.mrb[0].mxu1 }
 0x67d   : >> { %v12206_v50 = vpop.f32.mrb[0].mxu0  ;;  %v5569_v35 = vpop.f32.mrb[1].mxu1 }
 0x67e   : >> { %v12501_v1 = vadd.f32 %v12206_v50, %v12166_v56  ;;  %v5841_v18 = vpop.f32.mrb[1].mxu0  ;;  %v12167_v27 = vpop.f32.mrb[2].mxu1 }
 0x67f   : >> { %v12502_v52 = vadd.f32 %v5841_v18, %v5569_v35  ;;  %v12207_v6 = vpop.f32.mrb[2].mxu0  ;;  %v5572_v33 = vpop.f32.mrb[3].mxu1 }
 0x680   : >> { %v12503_v19 = vadd.f32 %v12207_v6, %v12167_v27  ;;  %v5844_v25 = vpop.f32.mrb[3].mxu0 }
 0x681   : >> { %v12504_v12 = vadd.f32 %v5844_v25, %v5572_v33 }
 0x682   : >> { %v12263_v46 = vpack.c.bf16 %v12503_v19, %v12501_v1 }
 0x683   : >> { %v12259_v14 = vpack.c.bf16 %v12504_v12, %v12502_v52 }
 0x685   : >> { %12260 = vmatprep.subr.bf16.mxu1 %v12259_v14 }
 0x686   : >> { %12262 = vmatpush3.bf16.msra.mxu1 %v12259_v14 }
 0x687   : >> { %12265 = vmatprep.subr.msk.bf16.mxu1 %vm15256_vm11, %v12263_v46 }
 0x68a   : >> { %12268 = vmatpush3.bf16.msk.msra.mxu1 %vm15256_vm11, %v12263_v46 }
 0x68d   : >> { %12217 = vmatmul.mubr.msk.f32.vlgmr.msra.gmra.mrb[4].mxu1 %vm5867_vm12, %v15155_v2  ;;  %vm15527_vm12 = vmand %vm5998_vm2, %vm3273_vm15  ;;  %vm6048_vm2 = vcmask 1042944  }
 0x760   : >> { %v12218_v36 = vpop.f32.mrb[4].mxu1 }
 0x761   : >> { %v5950_v42 = vadd.f32 %v12218_v36, %v10376_v30  ;;  %v5944_v60 = vpop.f32.mrb[5].mxu1 }
 0x762   : >> { %v5945_v63 = vadd.f32 %v10376_v30, %v5944_v60 }
 0x763   : >> { %vm5954_vm6 = vcmp.gt.f32.partialorder %v5950_v42, 0.0  ;;  %v5956_v62 = vmul.f32 0.2, %v5950_v42 }
 0x764   : >> { %vm5953_vm13 = vcmp.gt.f32.partialorder %v5945_v63, 0.0  ;;  %v5955_v4 = vmul.f32 0.2, %v5945_v63 }
 0x765   : >> { %v5958_v0 = vsel %vm5954_vm6, %v5950_v42, %v5956_v62  ;;  %vm15532_vm6 = vmand %vm6050_vm8, %vm449_vm1 }
 0x766   : >> { %v11195_v9 = vpack.c.bf16 %v5958_v0, %v5958_v0  ;;  %v5957_v17 = vsel %vm5953_vm13, %v5945_v63, %v5955_v4  ;;  %vm6009_vm13 = vcmask 1043968  }
 0x767   : >> { %v11194_v55 = vpack.c.bf16 %v5957_v17, %v5957_v17 }
 0x768   : >> { %v5978_v31 = vshrl.u32 %v11195_v9, 16  ;;  %v5981_v45 = vshll.u32 %v11195_v9, 16  ;;  %6005 = vrot.lane.b32.xlu0 %v11195_v9, %s13120_s17  ;;  %v6038_v53 = vrot.slane %v11195_v9, 5 }
 0x769   : >> { %v5970_v38 = vshrl.u32 %v11194_v55, 16  ;;  %v5973_v51 = vshll.u32 %v11194_v55, 16  ;;  %v10395_v43 = vrot.slane %v11194_v55, 9 }
 0x76a   : >> { %v5980_v8 = vrot.slane %v5978_v31, 7  ;;  %v6022_v16 = vrot.slane %v5981_v45, 5  ;;  %v6024_v24 = vrot.slane %v5978_v31, 4  ;;  %v6040_v10 = vrot.slane %v6038_v53, 4 }
 0x76b   : >> { %v5972_v15 = vrot.slane %v5970_v38, 7  ;;  %v6039_v11 = vsel %vm13642_vm10, %v10395_v43, %v6038_v53  ;;  %v6018_v48 = vrot.slane %v5970_v38, 4  ;;  %v6019_v57 = vrot.slane %v5973_v51, 5 }
 0x76c   : >> { %v5983_v3 = vor.u32 %v5981_v45, %v5980_v8  ;;  %6003 = vrot.lane.b32.xlu0 %v11194_v55, %s13120_s17  ;;  %6041 = vrot.lane.b32.xlu1 %v6039_v11, %s13120_s17  ;;  %v6025_v61 = vor.u32 %v6024_v24, %v6022_v16 }
 0x76d   : >> { %v5975_v29 = vor.u32 %v5973_v51, %v5972_v15  ;;  %v5976_v28 = vrot.slane %v5972_v15, 4  ;;  %v6020_v22 = vor.u32 %v6019_v57, %v6018_v48 }
 0x76e   : >> { %v6026_v20 = vrot.slane %v6025_v61, 4 }
 0x76f   : >> { %v5993_v26 = vsel %vm15499_vm5, %v5975_v29, %v10383_v23  ;;  %v5984_v37 = vsel %vm14149_vm9, %v5976_v28, %v5983_v3  ;;  %v6021_v44 = vrot.slane %v6020_v22, 4  ;;  %vm15545_vm5 = vmand %vm6009_vm13, %vm449_vm1 }
 0x770   : >> { %10384 = vst [vmem:[%s15503_s20 + $0x10] sm:$0xf] %v5993_v26  ;;  %6043 = vrot.lane.b32.xlu1 %v6040_v10, %s13120_s17  ;;  %v5996_v21 = vsel %vm13230_vm3, %v5984_v37, %v10385_v39  ;;  %v6031_v32 = vsel %vm13230_vm3, %v6026_v20, %v10393_v49 }
 0x771   : >> { %10386 = vst [vmem:[%s15503_s20 + $0x18] sm:$0xf] %v5996_v21  ;;  %v6023_v7 = vsel %vm13730_vm14, %v6021_v44, %v6022_v16  ;;  %10394 = vst [vmem:[%s15503_s20 + $0x1c] sm:$0xf] %v6031_v32 }
 0x772   : >> { %10392 = vst.msk [vmem:[%s15503_s20 + $0x14] sm:$0xf] %vm440_vm0, %v6023_v7 }
 0x777   : >> { %v10387_v35 = vld [vmem:[%s15503_s20 + $0x10] sm:$0x1] }
 0x778   : >> { %v6001_v1 = vsel %vm15527_vm12, 0, %v10387_v35  ;;  %v10398_v18 = vld [vmem:[%s15503_s20 + $0x1c] sm:$0x8]  ;;  %v10390_v33 = vld [vmem:[%s15503_s20 + $0x18] sm:$0xf] }
 0x779   : >> { %10388 = vst [vmem:[%s15503_s20 + $0x10] sm:$0x1] %v6001_v1  ;;  %v6053_v27 = vsel %vm15532_vm6, 0, %v10398_v18 }
 0x77a   : >> { %10399 = vst [vmem:[%s15503_s20 + $0x1c] sm:$0x8] %v6053_v27 }
 0x7da   : >> { %v6006_v6 = vpop.permute.xlu0 %6005 }
 0x7db   : >> { %v6014_v19 = vsel %vm15545_vm5, %v6006_v6, %v10390_v33 }
 0x7dc   : >> { %10391 = vst [vmem:[%s15503_s20 + $0x18] sm:$0xf] %v6014_v19 }
 0x7dd   : > { %5315 = sbr.rel (!%p5313_p6) target bundleno = 1384 (0x568), region = 220 }
 0x7de   : >> { %v6004_v25 = vpop.permute.xlu0 %6003  ;;  %v6042_v12 = vpop.permute.xlu1 %6041 }
 0x7df   : >> { %10389 = vst.msk [vmem:[%s15503_s20 + $0x10] sm:$0xf] %vm6009_vm13, %v6004_v25  ;;  %10396 = vst.msk [vmem:[%s15503_s20 + $0x14] sm:$0xf] %vm6009_vm13, %v6042_v12 }
 0x7e2   : >> { %v6044_v46 = vpop.permute.xlu1 %6043 }
 0x7e3   : >> { %10397 = vst.msk [vmem:[%s15503_s20 + $0x1c] sm:$0x7] %vm6048_vm2, %v6044_v46 }
 0x7e4 LB: >> { %v12787_v14 = vld [vmem:[%s16432_s7 + $0xc0] sm:$0xff]   ;;  %v12791_v5 = vld [vmem:[%s16432_s7 + $0xc8] sm:$0xff]   ;;  %v12795_v63 = vld [vmem:[%s16432_s7 + $0xd0] sm:$0xff]   ;;  %s11197_s17 = sshll.u32 %s13105_s29, 5  ;;  %vm13122_vm1 = vmmov 0   ;;  %vm6815_vm10 = vcmask 121856   ;;  %s13105_s29 = sphi %s15560_s29, %s6060_s29  }
 0x7e5   : >> { %v12788_v30 = vld [vmem:[%s16432_s7 + $0x40] sm:$0xff]   ;;  %11429 = vmatprep.subr.bf16.mxu0 %v12787_v14  ;;  %v12792_v2 = vld [vmem:[%s16432_s7 + $0x48] sm:$0xff]   ;;  %v12796_v62 = vld [vmem:[%s16432_s7 + $0x50] sm:$0xff]   ;;  %s15662_s30 = scalar_lea.vmem [#allocation4], %s11197_s17  ;;  %s10587_s14 = sshll.u32 %s13105_s29, 3 }
 0x7e6   : >> { %v12789_v36 = vld [vmem:[%s16432_s7 + $0x80] sm:$0xff]   ;;  %11451 = vmatprep.subr.bf16.mxu1 %v12788_v30  ;;  %v12793_v42 = vld [vmem:[%s16432_s7 + $0x88] sm:$0xff]   ;;  %v12797_v4 = vld [vmem:[%s16432_s7 + $0x90] sm:$0xff]   ;;  %vm6912_vm4 = vsmask.f32 3330  ;;  %s13124_s19 = smov 64  }
 0x7e7   : >> { %v12790_v54 = vld [vmem:[%s16432_s7] sm:$0xff]   ;;  %11430 = vmatpush3.bf16.msra.mxu0 %v12789_v36  ;;  %v12794_v60 = vld [vmem:[%s16432_s7 + $0x8] sm:$0xff]   ;;  %v12798_v0 = vld [vmem:[%s16432_s7 + $0x10] sm:$0xff]   ;;  %s9565_s20 = scalar_lea.vmem [#allocation5], %s10587_s14  ;;  %s6060_s29 = sadd.s32 1, %s13105_s29  }
 0x7e8   : >> { %11452 = vmatpush3.bf16.msra.mxu1 %v12790_v54  ;;  %11431 = vmatprep.subr.bf16.mxu0 %v12791_v5  ;;  %v12799_v9 = vld [vmem:[%s16432_s7 + $0xd8] sm:$0xff]   ;;  %v12803_v45 = vld [vmem:[%s16432_s7 + $0xe0] sm:$0xff]   ;;  %v12807_v43 = vld [vmem:[%s16432_s7 + $0xe8] sm:$0xff]   ;;  %p6057_p7 = scmp.ge.s32.totalorder %s6060_s29, 8  }
 0x7e9   : >> { %11453 = vmatprep.subr.bf16.mxu1 %v12792_v2  ;;  %v12800_v17 = vld [vmem:[%s16432_s7 + $0x58] sm:$0xff]   ;;  %v12804_v53 = vld [vmem:[%s16432_s7 + $0x60] sm:$0xff]   ;;  %v12808_v8 = vld [vmem:[%s16432_s7 + $0x68] sm:$0xff]   ;;  %s15788_s26 = smov (%p6057_p7), 0  }
 0x7ea   : >> { %v12801_v55 = vld [vmem:[%s16432_s7 + $0x98] sm:$0xff]   ;;  %v12805_v38 = vld [vmem:[%s16432_s7 + $0xa0] sm:$0xff]   ;;  %v12809_v16 = vld [vmem:[%s16432_s7 + $0xa8] sm:$0xff]  }
 0x7eb   : >> { %11432 = vmatpush3.bf16.msra.mxu0 %v12793_v42  ;;  %v12802_v31 = vld [vmem:[%s16432_s7 + $0x18] sm:$0xff]   ;;  %v12806_v51 = vld [vmem:[%s16432_s7 + $0x20] sm:$0xff]   ;;  %v12810_v24 = vld [vmem:[%s16432_s7 + $0x28] sm:$0xff]  }
 0x7ec   : >> { %11454 = vmatpush3.bf16.msra.mxu1 %v12794_v60  ;;  %11433 = vmatprep.subr.bf16.mxu0 %v12795_v63  ;;  %v12811_v15 = vld [vmem:[%s16432_s7 + $0xf0] sm:$0xff]   ;;  %v12815_v57 = vld [vmem:[%s16432_s7 + $0xf8] sm:$0xff]   ;;  %v12822_v28 = vld [vmem:[%s15662_s30] ss:$8 sps:$4 sm:$0xff]  }
 0x7ed   : >> { %11455 = vmatprep.subr.bf16.mxu1 %v12796_v62  ;;  %v12812_v34 = vld [vmem:[%s16432_s7 + $0x70] sm:$0xff]   ;;  %v12816_v3 = vld [vmem:[%s16432_s7 + $0x78] sm:$0xff]   ;;  %v12824_v39 = vld [vmem:[%s15662_s30 + $0x4] ss:$8 sps:$4 sm:$0xff]  }
 0x7ee   : >> { %v12813_v11 = vld [vmem:[%s16432_s7 + $0xb0] sm:$0xff]   ;;  %v12817_v58 = vld [vmem:[%s16432_s7 + $0xb8] sm:$0xff]   ;;  %v12825_v22 = vld [vmem:[%s16432_s7 + $0x140] sm:$0xff]   ;;  %6423 = vmatprep.mubr.bf16.mxu1 %v12824_v39 }
 0x7ef   : >> { %11434 = vmatpush3.bf16.msra.mxu0 %v12797_v4  ;;  %v12814_v48 = vld [vmem:[%s16432_s7 + $0x30] sm:$0xff]   ;;  %v12818_v23 = vld [vmem:[%s16432_s7 + $0x38] sm:$0xff]   ;;  %v12826_v49 = vld [vmem:[%s16432_s7 + $0x1c0] sm:$0xff]  }
 0x7f0   : >> { %11456 = vmatpush3.bf16.msra.mxu1 %v12798_v0  ;;  %11435 = vmatprep.subr.bf16.mxu0 %v12799_v9  ;;  %v12819_v61 = vld [vmem:[%s15662_s30 + $0x10] ss:$8 sps:$4 sm:$0xff]   ;;  %v12821_v29 = vld [vmem:[%s15662_s30 + $0x14] ss:$8 sps:$4 sm:$0xff]   ;;  %v12827_v10 = vld [vmem:[%s16432_s7 + $0x100] sm:$0xff]  }
 0x7f1   : >> { %11457 = vmatprep.subr.bf16.mxu1 %v12800_v17  ;;  %6276 = vmatprep.mubr.bf16.mxu0 %v12821_v29  ;;  %v12828_v20 = vld [vmem:[%s16432_s7 + $0x180] sm:$0xff]   ;;  %v12829_v26 = vld [vmem:[%s16432_s7 + $0x148] sm:$0xff]   ;;  %v12833_v21 = vld [vmem:[%s16432_s7 + $0x150] sm:$0xff]  }
 0x7f2   : >> { %v12830_v37 = vld [vmem:[%s16432_s7 + $0x1c8] sm:$0xff]   ;;  %v12834_v32 = vld [vmem:[%s16432_s7 + $0x1d0] sm:$0xff]   ;;  %v12837_v1 = vld [vmem:[%s16432_s7 + $0x158] sm:$0xff]  }
 0x7f3   : >> { %11436 = vmatpush3.bf16.msra.mxu0 %v12801_v55  ;;  %v12831_v44 = vld [vmem:[%s16432_s7 + $0x108] sm:$0xff]   ;;  %v12835_v7 = vld [vmem:[%s16432_s7 + $0x110] sm:$0xff]   ;;  %v12838_v18 = vld [vmem:[%s16432_s7 + $0x1d8] sm:$0xff]  }
 0x7f4   : >> { %11458 = vmatpush3.bf16.msra.mxu1 %v12802_v31  ;;  %11437 = vmatprep.subr.bf16.mxu0 %v12803_v45  ;;  %v12832_v13 = vld [vmem:[%s16432_s7 + $0x188] sm:$0xff]   ;;  %v12836_v35 = vld [vmem:[%s16432_s7 + $0x190] sm:$0xff]   ;;  %v12839_v27 = vld [vmem:[%s16432_s7 + $0x118] sm:$0xff]   ;;  %v13121_v31 = vmov 0.0|0.0   ;;  %v13123_v45 = vmov 0.0  }
 0x7f5   : >> { %11459 = vmatprep.subr.bf16.mxu1 %v12804_v53  ;;  %v12840_v6 = vld [vmem:[%s16432_s7 + $0x198] sm:$0xff]   ;;  %v12841_v33 = vld [vmem:[%s16432_s7 + $0x160] sm:$0xff]   ;;  %v12845_v46 = vld [vmem:[%s16432_s7 + $0x168] sm:$0xff]  }
 0x7f6   : >> { %v12842_v19 = vld [vmem:[%s16432_s7 + $0x1e0] sm:$0xff]   ;;  %v12846_v14 = vld [vmem:[%s16432_s7 + $0x1e8] sm:$0xff]   ;;  %v12849_v54 = vld [vmem:[%s16432_s7 + $0x170] sm:$0xff]  }
 0x7f7   : >> { %11438 = vmatpush3.bf16.msra.mxu0 %v12805_v38  ;;  %v12843_v25 = vld [vmem:[%s16432_s7 + $0x120] sm:$0xff]   ;;  %v12847_v30 = vld [vmem:[%s16432_s7 + $0x128] sm:$0xff]   ;;  %v12850_v5 = vld [vmem:[%s16432_s7 + $0x1f0] sm:$0xff]  }
 0x7f8   : >> { %11460 = vmatpush3.bf16.msra.mxu1 %v12806_v51  ;;  %11439 = vmatprep.subr.bf16.mxu0 %v12807_v43  ;;  %v12844_v12 = vld [vmem:[%s16432_s7 + $0x1a0] sm:$0xff]   ;;  %v12848_v36 = vld [vmem:[%s16432_s7 + $0x1a8] sm:$0xff]   ;;  %v12851_v2 = vld [vmem:[%s16432_s7 + $0x130] sm:$0xff]  }
 0x7f9   : >> { %11461 = vmatprep.subr.bf16.mxu1 %v12808_v8  ;;  %v12852_v42 = vld [vmem:[%s16432_s7 + $0x1b0] sm:$0xff]   ;;  %v12853_v60 = vld [vmem:[%s16432_s7 + $0x178] sm:$0xff]   ;;  %v12857_v0 = vld [vmem:[%s15662_s30 + $0x20] ss:$8 sps:$4 sm:$0xff]  }
 0x7fa   : >> { %v12854_v63 = vld [vmem:[%s16432_s7 + $0x1f8] sm:$0xff]   ;;  %v12859_v9 = vld [vmem:[%s15662_s30 + $0x24] ss:$8 sps:$4 sm:$0xff]   ;;  %vm6913_vm15 = vmand %vm440_vm0, %vm6912_vm4 }
 0x7fb   : >> { %11440 = vmatpush3.bf16.msra.mxu0 %v12809_v16  ;;  %v12855_v62 = vld [vmem:[%s16432_s7 + $0x138] sm:$0xff]  }
 0x7fc   : >> { %11462 = vmatpush3.bf16.msra.mxu1 %v12810_v24  ;;  %11441 = vmatprep.subr.bf16.mxu0 %v12811_v15  ;;  %v12856_v4 = vld [vmem:[%s16432_s7 + $0x1b8] sm:$0xff]  }
 0x7fd   : >> { %11463 = vmatprep.subr.bf16.mxu1 %v12812_v34  ;;  %v12860_v17 = vld [vmem:[%s15662_s30 + $0x30] ss:$8 sps:$4 sm:$0xff]   ;;  %v12862_v55 = vld [vmem:[%s15662_s30 + $0x34] ss:$8 sps:$4 sm:$0xff]  }
 0x7ff   : >> { %11442 = vmatpush3.bf16.msra.mxu0 %v12813_v11 }
 0x800   : >> { %11464 = vmatpush3.bf16.msra.mxu1 %v12814_v48  ;;  %11443 = vmatprep.subr.bf16.mxu0 %v12815_v57 }
 0x801   : >> { %11465 = vmatprep.subr.bf16.mxu1 %v12816_v3 }
 0x803   : >> { %11444 = vmatpush3.bf16.msra.mxu0 %v12817_v58 }
 0x804   : >> { %11466 = vmatpush3.bf16.msra.mxu1 %v12818_v23  ;;  %11473 = vmatprep.subr.bf16.mxu0 %v12825_v22 }
 0x805   : >> { %11495 = vmatprep.subr.bf16.mxu1 %v12826_v49 }
 0x806   : >> { %6277 = vmatmul.mubr.bf16.vlgmr.msra.gmra.mrb[0].mxu0 %v12819_v61 }
 0x807   : >> { %6424 = vmatmul.mubr.bf16.vlgmr.msra.gmra.mrb[0].mxu1 %v12822_v28  ;;  %11474 = vmatpush3.bf16.msra.mxu0 %v12827_v10 }
 0x808   : >> { %11496 = vmatpush3.bf16.msra.mxu1 %v12828_v20  ;;  %11475 = vmatprep.subr.bf16.mxu0 %v12829_v26 }
 0x809   : >> { %11497 = vmatprep.subr.bf16.mxu1 %v12830_v37  ;;  %6609 = vmatprep.mubr.bf16.mxu0 %v12859_v9 }
 0x80a   : >> { %6797 = vmatprep.mubr.bf16.mxu1 %v12862_v55 }
 0x80b   : >> { %11476 = vmatpush3.bf16.msra.mxu0 %v12831_v44 }
 0x80c   : >> { %11498 = vmatpush3.bf16.msra.mxu1 %v12832_v13  ;;  %11477 = vmatprep.subr.bf16.mxu0 %v12833_v21 }
 0x80d   : >> { %11499 = vmatprep.subr.bf16.mxu1 %v12834_v32 }
 0x80f   : >> { %11478 = vmatpush3.bf16.msra.mxu0 %v12835_v7 }
 0x810   : >> { %11500 = vmatpush3.bf16.msra.mxu1 %v12836_v35  ;;  %11479 = vmatprep.subr.bf16.mxu0 %v12837_v1  ;;  %v10583_v1 = vld [vmem:[%s16433_s8] ss:$0 sm:$0xff] }
 0x811   : >> { %11501 = vmatprep.subr.bf16.mxu1 %v12838_v18 }
 0x813   : >> { %11480 = vmatpush3.bf16.msra.mxu0 %v12839_v27 }
 0x814   : >> { %11502 = vmatpush3.bf16.msra.mxu1 %v12840_v6  ;;  %11481 = vmatprep.subr.bf16.mxu0 %v12841_v33 }
 0x815   : >> { %11503 = vmatprep.subr.bf16.mxu1 %v12842_v19 }
 0x817   : >> { %11482 = vmatpush3.bf16.msra.mxu0 %v12843_v25 }
 0x818   : >> { %11504 = vmatpush3.bf16.msra.mxu1 %v12844_v12  ;;  %11483 = vmatprep.subr.bf16.mxu0 %v12845_v46 }
 0x819   : >> { %11505 = vmatprep.subr.bf16.mxu1 %v12846_v14 }
 0x81b   : >> { %11484 = vmatpush3.bf16.msra.mxu0 %v12847_v30 }
 0x81c   : >> { %11506 = vmatpush3.bf16.msra.mxu1 %v12848_v36  ;;  %11485 = vmatprep.subr.bf16.mxu0 %v12849_v54 }
 0x81d   : >> { %11507 = vmatprep.subr.bf16.mxu1 %v12850_v5  ;;  %v10588_v5 = vld [vmem:[%s9565_s20 + $0x8] sm:$0xf] }
 0x81f   : >> { %11486 = vmatpush3.bf16.msra.mxu0 %v12851_v2 }
 0x820   : >> { %11508 = vmatpush3.bf16.msra.mxu1 %v12852_v42  ;;  %11487 = vmatprep.subr.bf16.mxu0 %v12853_v60  ;;  %v10594_v60 = vld [vmem:[%s9565_s20 + $0xc] sm:$0xf] }
 0x821   : >> { %11509 = vmatprep.subr.bf16.mxu1 %v12854_v63 }
 0x823   : >> { %11488 = vmatpush3.bf16.msra.mxu0 %v12855_v62 }
 0x824   : >> { %11510 = vmatpush3.bf16.msra.mxu1 %v12856_v4  ;;  %12269 = vmatprep.subr.bf16.mxu0 %v13121_v31 }
 0x826   : >> { %6610 = vmatmul.mubr.bf16.vlgmr.msra.gmra.mrb[4].mxu0 %v12857_v0 }
 0x827   : >> { %6798 = vmatmul.mubr.bf16.vlgmr.msra.gmra.mrb[4].mxu1 %v12860_v17  ;;  %12223 = vmatprep.mubr.msk.f32.mxu0 %vm13122_vm1, %v13123_v45 }
 0x8d9   : >> { %v11445_v53 = vpop.f32.mrb[0].mxu0 }
 0x8da   : >> { %v11467_v38 = vpop.f32.mrb[0].mxu1  ;;  %v11446_v51 = vpop.f32.mrb[1].mxu0 }
 0x8db   : >> { %v11447_v43 = vadd.f32 %v11446_v51, %v11445_v53  ;;  %v11468_v8 = vpop.f32.mrb[1].mxu1  ;;  %v11448_v16 = vpop.f32.mrb[2].mxu0 }
 0x8dc   : >> { %v11469_v24 = vadd.f32 %v11468_v8, %v11467_v38  ;;  %v11470_v15 = vpop.f32.mrb[2].mxu1  ;;  %v11449_v34 = vpop.f32.mrb[3].mxu0 }
 0x8dd   : >> { %v11450_v11 = vadd.f32 %v11449_v34, %v11448_v16  ;;  %v11471_v48 = vpop.f32.mrb[3].mxu1 }
 0x8de   : >> { %v6426_v57 = vadd.f32 %v11469_v24, %v11447_v43  ;;  %v11472_v3 = vadd.f32 %v11471_v48, %v11470_v15 }
 0x8e0   : >> { %v6429_v58 = vadd.f32 %v11472_v3, %v11450_v11 }
 0x8f9   : >> { %v11489_v23 = vpop.f32.mrb[4].mxu0 }
 0x8fa   : >> { %v11490_v61 = vpop.f32.mrb[5].mxu0  ;;  %v11511_v29 = vpop.f32.mrb[4].mxu1 }
 0x8fb   : >> { %v11491_v28 = vadd.f32 %v11490_v61, %v11489_v23  ;;  %v11492_v39 = vpop.f32.mrb[6].mxu0  ;;  %v11512_v22 = vpop.f32.mrb[5].mxu1 }
 0x8fc   : >> { %v11493_v49 = vpop.f32.mrb[7].mxu0  ;;  %v11513_v20 = vadd.f32 %v11512_v22, %v11511_v29  ;;  %v11514_v26 = vpop.f32.mrb[6].mxu1 }
 0x8fd   : >> { %v6618_v10 = vadd.f32 %v11491_v28, %v6426_v57  ;;  %v11494_v37 = vadd.f32 %v11493_v49, %v11492_v39  ;;  %v11515_v44 = vpop.f32.mrb[7].mxu1 }
 0x8fe   : >> { %v11516_v32 = vadd.f32 %v11515_v44, %v11514_v26 }
 0x8ff   : >> { %v6806_v13 = vadd.f32 %v11513_v20, %v6618_v10  ;;  %v6619_v21 = vadd.f32 %v11494_v37, %v6429_v58 }
 0x901   : >> { %v6807_v7 = vadd.f32 %v11516_v32, %v6619_v21 }
 0x903   : >> { %v12270_v35 = vpack.c.bf16 %v6807_v7, %v6806_v13 }
 0x905   : >> { %12272 = vmatpush3.bf16.msk.msra.mxu0 %vm15256_vm11, %v12270_v35 }
 0x908   : >> { %12224 = vmatmul.mubr.msk.f32.vlgmr.msra.gmra.mrb[8].mxu0 %vm6815_vm10, %v15152_v40 }
 0x9db   : >> { %v6889_v18 = vpop.f32.mrb[8].mxu0 }
 0x9dc   : >> { %v6890_v27 = vadd.f32 %v10583_v1, %v6889_v18  ;;  %v12225_v6 = vpop.f32.mrb[9].mxu0 }
 0x9de   : >> { %vm6893_vm14 = vcmp.gt.f32.partialorder %v6890_v27, 0.0  ;;  %v6894_v33 = vmul.f32 0.2, %v6890_v27 }
 0x9e0   : >> { %v6895_v19 = vsel %vm6893_vm14, %v6890_v27, %v6894_v33 }
 0x9e1   : >> { %v11201_v25 = vpack.c.bf16 %v6895_v19, %v6895_v19 }
 0x9e3   : >> { %v6902_v12 = vshrl.u32 %v11201_v25, 16  ;;  %v6905_v46 = vshll.u32 %v11201_v25, 16  ;;  %6923 = vrot.lane.b32.xlu0 %v11201_v25, %s13124_s19  ;;  %v10596_v30 = vrot.slane %v11201_v25, 9 }
 0x9e5   : >> { %v6904_v14 = vrot.slane %v6902_v12, 7  ;;  %v6931_v36 = vrot.slane %v6902_v12, 4  ;;  %v6932_v54 = vrot.slane %v6905_v46, 5 }
 0x9e7   : >> { %v6907_v2 = vor.u32 %v6905_v46, %v6904_v14  ;;  %6941 = vrot.lane.b32.xlu0 %v10596_v30, %s13124_s19  ;;  %v6933_v42 = vor.u32 %v6932_v54, %v6931_v36 }
 0x9e9   : >> { %v6915_v63 = vsel %vm6913_vm15, %v6907_v2, %v10588_v5  ;;  %v6934_v62 = vrot.slane %v6933_v42, 4 }
 0x9ea   : >> { %10589 = vst [vmem:[%s9565_s20 + $0x8] sm:$0xf] %v6915_v63 }
 0x9eb   : >> { %v6937_v0 = vsel %vm13230_vm3, %v6934_v62, %v10594_v60 }
 0x9ec   : >> { %10595 = vst [vmem:[%s9565_s20 + $0xc] sm:$0xf] %v6937_v0 }
 0x9f1   : >> { %v10590_v9 = vld [vmem:[%s9565_s20 + $0x8] sm:$0x1] }
 0x9f2   : >> { %v6921_v17 = vsel %vm15527_vm12, 0, %v10590_v9 }
 0x9f3   : >> { %10591 = vst [vmem:[%s9565_s20 + $0x8] sm:$0x1] %v6921_v17  ;;  %v10598_v55 = vld [vmem:[%s9565_s20 + $0xc] sm:$0x8] }
 0x9f4   : >> { %v6949_v31 = vsel %vm15532_vm6, 0, %v10598_v55 }
 0x9f5   : >> { %10599 = vst [vmem:[%s9565_s20 + $0xc] sm:$0x8] %v6949_v31 }
 0x9fa   : >> { %v10592_v53 = vld [vmem:[%s9565_s20 + $0x8] sm:$0xf] }
 0xa54   : > { %6059 = sbr.rel (!%p6057_p7) target bundleno = 2020 (0x7e4), region = 231 }
 0xa55   : >> { %v6924_v45 = vpop.permute.xlu0 %6923 }
 0xa56   : >> { %v6929_v38 = vsel %vm15545_vm5, %v6924_v45, %v10592_v53 }
 0xa57   : >> { %10593 = vst [vmem:[%s9565_s20 + $0x8] sm:$0xf] %v6929_v38 }
 0xa59   : >> { %v6942_v51 = vpop.permute.xlu0 %6941 }
 0xa5a   : >> { %10597 = vst.msk [vmem:[%s9565_s20 + $0xc] sm:$0x7] %vm6048_vm2, %v6942_v51 }
 0xa5b LB: >> { %v12863_v43 = vld [vmem:[%s16434_s9 + $0xc0] sm:$0xff]   ;;  %v12867_v50 = vld [vmem:[%s16434_s9 + $0xc8] sm:$0xff]   ;;  %v12871_v34 = vld [vmem:[%s16434_s9 + $0xd0] sm:$0xff]   ;;  %s11203_s19 = sshll.u32 %s13109_s26, 4  ;;  %vm13126_vm0 = vmmov 0   ;;  %vm7689_vm3 = vcmask 56320   ;;  %s13109_s26 = sphi %s15788_s26, %s6956_s26  }
 0xa5c   : >> { %v12864_v8 = vld [vmem:[%s16434_s9 + $0x40] sm:$0xff]   ;;  %11520 = vmatprep.subr.bf16.mxu0 %v12863_v43  ;;  %v12868_v52 = vld [vmem:[%s16434_s9 + $0x48] sm:$0xff]   ;;  %v12872_v11 = vld [vmem:[%s16434_s9 + $0x50] sm:$0xff]   ;;  %s15890_s30 = scalar_lea.vmem [#allocation5], %s11203_s19  ;;  %s10783_s24 = sshll.u32 %s13109_s26, 2  ;;  %vm7791_vm11 = vcmask 517120  }
 0xa5d   : >> { %v12865_v16 = vld [vmem:[%s16434_s9 + $0x80] sm:$0xff]   ;;  %11542 = vmatprep.subr.bf16.mxu1 %v12864_v8  ;;  %v12869_v24 = vld [vmem:[%s16434_s9 + $0x88] sm:$0xff]   ;;  %v12873_v48 = vld [vmem:[%s16434_s9 + $0x90] sm:$0xff]   ;;  %vm7792_vm8 = vsmask.f32 1282  ;;  %s13128_s14 = smov 64  }
 0xa5e   : >> { %v12866_v59 = vld [vmem:[%s16434_s9] sm:$0xff]   ;;  %11521 = vmatpush3.bf16.msra.mxu0 %v12865_v16  ;;  %v12870_v15 = vld [vmem:[%s16434_s9 + $0x8] sm:$0xff]   ;;  %v12874_v57 = vld [vmem:[%s16434_s9 + $0x10] sm:$0xff]   ;;  %s9582_s20 = scalar_lea.vmem [#allocation6], %s10783_s24  ;;  %vm16653_vm13 = vsmask.f32 1280 }
 0xa5f   : >> { %11543 = vmatpush3.bf16.msra.mxu1 %v12866_v59  ;;  %11522 = vmatprep.subr.bf16.mxu0 %v12867_v50  ;;  %v12875_v3 = vld [vmem:[%s16434_s9 + $0xd8] sm:$0xff]   ;;  %v12879_v29 = vld [vmem:[%s16434_s9 + $0xe0] sm:$0xff]   ;;  %v12883_v49 = vld [vmem:[%s16434_s9 + $0xe8] sm:$0xff]   ;;  %vm7827_vm2 = vcmask 1041921   ;;  %vm7806_vm14 = vcmask 1041920   ;;  %s6956_s26 = sadd.s32 1, %s13109_s26  }
 0xa60   : >> { %11544 = vmatprep.subr.bf16.mxu1 %v12868_v52  ;;  %v12876_v58 = vld [vmem:[%s16434_s9 + $0x58] sm:$0xff]   ;;  %v12880_v28 = vld [vmem:[%s16434_s9 + $0x60] sm:$0xff]   ;;  %v12884_v10 = vld [vmem:[%s16434_s9 + $0x68] sm:$0xff]   ;;  %p6953_p8 = scmp.ge.s32.totalorder %s6956_s26, 4  }
 0xa61   : >> { %v12877_v23 = vld [vmem:[%s16434_s9 + $0x98] sm:$0xff]   ;;  %v12881_v39 = vld [vmem:[%s16434_s9 + $0xa0] sm:$0xff]   ;;  %v12885_v20 = vld [vmem:[%s16434_s9 + $0xa8] sm:$0xff]  }
 0xa62   : >> { %11523 = vmatpush3.bf16.msra.mxu0 %v12869_v24  ;;  %v12878_v61 = vld [vmem:[%s16434_s9 + $0x18] sm:$0xff]   ;;  %v12882_v22 = vld [vmem:[%s16434_s9 + $0x20] sm:$0xff]   ;;  %v12886_v26 = vld [vmem:[%s16434_s9 + $0x28] sm:$0xff]  }
 0xa63   : >> { %11545 = vmatpush3.bf16.msra.mxu1 %v12870_v15  ;;  %11524 = vmatprep.subr.bf16.mxu0 %v12871_v34  ;;  %v12887_v37 = vld [vmem:[%s16434_s9 + $0xf0] sm:$0xff]   ;;  %v12891_v32 = vld [vmem:[%s16434_s9 + $0xf8] sm:$0xff]   ;;  %v10605_v18 = vld [vmem:[%s15890_s30 + $0x8] sm:$0xff] }
 0xa64   : >> { %11546 = vmatprep.subr.bf16.mxu1 %v12872_v11  ;;  %v12888_v44 = vld [vmem:[%s16434_s9 + $0x70] sm:$0xff]   ;;  %v12892_v7 = vld [vmem:[%s16434_s9 + $0x78] sm:$0xff]   ;;  %v6961_v27 = vld [vmem:[%s15890_s30] sm:$0xff]  ;;  %v10638_v6 = vcombine.low %v10605_v18, %v10605_v18  ;;  %v10639_v33 = vcombine.high %v10605_v18, %v10605_v18 }
 0xa65   : >> { %v12889_v13 = vld [vmem:[%s16434_s9 + $0xb0] sm:$0xff]   ;;  %v12893_v35 = vld [vmem:[%s16434_s9 + $0xb8] sm:$0xff]   ;;  %v10656_v19 = vcombine.low %v6961_v27, %v6961_v27  ;;  %v10657_v25 = vcombine.high %v6961_v27, %v6961_v27  ;;  %v12899_v12 = vld [vmem:[%s16434_s9 + $0x140] sm:$0xff]  }
 0xa66   : >> { %11525 = vmatpush3.bf16.msra.mxu0 %v12873_v48  ;;  %v12890_v21 = vld [vmem:[%s16434_s9 + $0x30] sm:$0xff]   ;;  %v12894_v1 = vld [vmem:[%s16434_s9 + $0x38] sm:$0xff]   ;;  %v12900_v46 = vld [vmem:[%s16434_s9 + $0x1c0] sm:$0xff]   ;;  %7167 = vmatprep.mubr.bf16.mxu0 %v10639_v33 }
 0xa67   : >> { %11547 = vmatpush3.bf16.msra.mxu1 %v12874_v57  ;;  %11526 = vmatprep.subr.bf16.mxu0 %v12875_v3  ;;  %v12901_v14 = vld [vmem:[%s16434_s9 + $0x100] sm:$0xff]   ;;  %v12903_v36 = vld [vmem:[%s16434_s9 + $0x148] sm:$0xff]   ;;  %v12907_v42 = vld [vmem:[%s16434_s9 + $0x150] sm:$0xff]  }
 0xa68   : >> { %11548 = vmatprep.subr.bf16.mxu1 %v12876_v58  ;;  %7310 = vmatprep.mubr.bf16.mxu1 %v10657_v25  ;;  %v12902_v30 = vld [vmem:[%s16434_s9 + $0x180] sm:$0xff]   ;;  %v12904_v54 = vld [vmem:[%s16434_s9 + $0x1c8] sm:$0xff]   ;;  %v12908_v60 = vld [vmem:[%s16434_s9 + $0x1d0] sm:$0xff]  }
 0xa69   : >> { %v12905_v5 = vld [vmem:[%s16434_s9 + $0x108] sm:$0xff]   ;;  %v12909_v63 = vld [vmem:[%s16434_s9 + $0x110] sm:$0xff]   ;;  %v12911_v4 = vld [vmem:[%s16434_s9 + $0x158] sm:$0xff]  }
 0xa6a   : >> { %11527 = vmatpush3.bf16.msra.mxu0 %v12877_v23  ;;  %v12906_v2 = vld [vmem:[%s16434_s9 + $0x188] sm:$0xff]   ;;  %v12910_v62 = vld [vmem:[%s16434_s9 + $0x190] sm:$0xff]   ;;  %v12912_v0 = vld [vmem:[%s16434_s9 + $0x1d8] sm:$0xff]  }
 0xa6b   : >> { %11549 = vmatpush3.bf16.msra.mxu1 %v12878_v61  ;;  %11528 = vmatprep.subr.bf16.mxu0 %v12879_v29  ;;  %v12913_v9 = vld [vmem:[%s16434_s9 + $0x118] sm:$0xff]   ;;  %v12915_v55 = vld [vmem:[%s16434_s9 + $0x160] sm:$0xff]   ;;  %v12919_v38 = vld [vmem:[%s16434_s9 + $0x168] sm:$0xff]   ;;  %v13125_v29 = vmov 0.0  }
 0xa6c   : >> { %11550 = vmatprep.subr.bf16.mxu1 %v12880_v28  ;;  %v12914_v17 = vld [vmem:[%s16434_s9 + $0x198] sm:$0xff]   ;;  %v12916_v31 = vld [vmem:[%s16434_s9 + $0x1e0] sm:$0xff]   ;;  %v12920_v51 = vld [vmem:[%s16434_s9 + $0x1e8] sm:$0xff]  }
 0xa6d   : >> { %v12917_v45 = vld [vmem:[%s16434_s9 + $0x120] sm:$0xff]   ;;  %v12921_v43 = vld [vmem:[%s16434_s9 + $0x128] sm:$0xff]   ;;  %v12923_v16 = vld [vmem:[%s16434_s9 + $0x170] sm:$0xff]  }
 0xa6e   : >> { %11529 = vmatpush3.bf16.msra.mxu0 %v12881_v39  ;;  %v12918_v53 = vld [vmem:[%s16434_s9 + $0x1a0] sm:$0xff]   ;;  %v12922_v8 = vld [vmem:[%s16434_s9 + $0x1a8] sm:$0xff]   ;;  %v12924_v59 = vld [vmem:[%s16434_s9 + $0x1f0] sm:$0xff]  }
 0xa6f   : >> { %11551 = vmatpush3.bf16.msra.mxu1 %v12882_v22  ;;  %11530 = vmatprep.subr.bf16.mxu0 %v12883_v49  ;;  %v12925_v50 = vld [vmem:[%s16434_s9 + $0x130] sm:$0xff]   ;;  %v12927_v24 = vld [vmem:[%s16434_s9 + $0x178] sm:$0xff]   ;;  %vm7793_vm6 = vmand %vm7791_vm11, %vm7792_vm8 }
 0xa70   : >> { %11552 = vmatprep.subr.bf16.mxu1 %v12884_v10  ;;  %v12926_v52 = vld [vmem:[%s16434_s9 + $0x1b0] sm:$0xff]   ;;  %v12928_v15 = vld [vmem:[%s16434_s9 + $0x1f8] sm:$0xff]   ;;  %vm7816_vm5 = vmand %vm7791_vm11, %vm16653_vm13 }
 0xa71   : >> { %v12929_v34 = vld [vmem:[%s16434_s9 + $0x138] sm:$0xff]   ;;  %v10676_v48 = vld [vmem:[%s15890_s30 + $0x10] sm:$0xff]  ;;  %vm16654_vm1 = vmmov %vm16653_vm13 }
 0xa72   : >> { %11531 = vmatpush3.bf16.msra.mxu0 %v12885_v20  ;;  %v12930_v11 = vld [vmem:[%s16434_s9 + $0x1b8] sm:$0xff]   ;;  %v10709_v57 = vcombine.low %v10676_v48, %v10676_v48  ;;  %v10710_v3 = vcombine.high %v10676_v48, %v10676_v48  ;;  %vm7828_vm10 = vmand %vm7827_vm2, %vm16654_vm1  ;;  %v12940_v56 = vld [vmem:[%s16436_s11 + $0x48] sm:$0xff] (%p6953_p8)  }
 0xa73   : >> { %11553 = vmatpush3.bf16.msra.mxu1 %v12886_v26  ;;  %11532 = vmatprep.subr.bf16.mxu0 %v12887_v37  ;;  %v10729_v58 = vld [vmem:[%s15890_s30 + $0x18] sm:$0xff]  ;;  %vm16655_vm4 = vmmov %vm16654_vm1 }
 0xa74   : >> { %11554 = vmatprep.subr.bf16.mxu1 %v12888_v44  ;;  %v10762_v23 = vcombine.low %v10729_v58, %v10729_v58  ;;  %v10763_v61 = vcombine.high %v10729_v58, %v10729_v58  ;;  %vm7807_vm15 = vmand %vm7806_vm14, %vm16655_vm4  ;;  %v12935_v58 = vld [vmem:[%s16436_s11 + $0xc0] sm:$0xff] (%p6953_p8)  }
 0xa76   : >> { %11533 = vmatpush3.bf16.msra.mxu0 %v12889_v13 }
 0xa77   : >> { %11555 = vmatpush3.bf16.msra.mxu1 %v12890_v21  ;;  %11534 = vmatprep.subr.bf16.mxu0 %v12891_v32 }
 0xa78   : >> { %11556 = vmatprep.subr.bf16.mxu1 %v12892_v7 }
 0xa7a   : >> { %11535 = vmatpush3.bf16.msra.mxu0 %v12893_v35 }
 0xa7b   : >> { %11557 = vmatpush3.bf16.msra.mxu1 %v12894_v1  ;;  %11564 = vmatprep.subr.bf16.mxu0 %v12899_v12 }
 0xa7c   : >> { %11586 = vmatprep.subr.bf16.mxu1 %v12900_v46 }
 0xa7d   : >> { %7168 = vmatmul.mubr.bf16.vlgmr.msra.gmra.mrb[0].mxu0 %v10638_v6 }
 0xa7e   : >> { %7311 = vmatmul.mubr.bf16.vlgmr.msra.gmra.mrb[0].mxu1 %v10656_v19  ;;  %11565 = vmatpush3.bf16.msra.mxu0 %v12901_v14  ;;  %v13127_v14 = vmov 1983009808  }
 0xa7f   : >> { %11587 = vmatpush3.bf16.msra.mxu1 %v12902_v30  ;;  %11566 = vmatprep.subr.bf16.mxu0 %v12903_v36  ;;  %v7774_v30 = vunpack.c.l.s4 %v13127_v14  ;;  %v10780_v36 = vld [vmem:[%s16435_s10] ss:$0 sm:$0xff]  ;;  %v12964_v14 = vld [vmem:[%s16436_s11 + $0x78] sm:$0xff] (%p6953_p8)  }
 0xa80   : >> { %11588 = vmatprep.subr.bf16.mxu1 %v12904_v54  ;;  %7491 = vmatprep.mubr.bf16.mxu0 %v10710_v3 }
 0xa81   : >> { %7673 = vmatprep.mubr.bf16.mxu1 %v10763_v61  ;;  %v12937_v61 = vld [vmem:[%s16436_s11 + $0x80] sm:$0xff] (%p6953_p8)  }
 0xa82   : >> { %11567 = vmatpush3.bf16.msra.mxu0 %v12905_v5  ;;  %v7775_v5 = vunpack.c.0.s8 %v7774_v30  ;;  %v12965_v30 = vld [vmem:[%s16436_s11 + $0xb8] sm:$0xff] (%p6953_p8)  }
 0xa83   : >> { %11589 = vmatpush3.bf16.msra.mxu1 %v12906_v2  ;;  %11568 = vmatprep.subr.bf16.mxu0 %v12907_v42 }
 0xa84   : >> { %11590 = vmatprep.subr.bf16.mxu1 %v12908_v60 }
 0xa86   : >> { %11569 = vmatpush3.bf16.msra.mxu0 %v12909_v63  ;;  %v7778_v63 = vsub.s32 %v7775_v5, %v15145_v41  ;;  %v12939_v41 = vld [vmem:[%s16436_s11 + $0xc8] sm:$0xff] (%p6953_p8)  }
 0xa87   : >> { %11591 = vmatpush3.bf16.msra.mxu1 %v12910_v62  ;;  %11570 = vmatprep.subr.bf16.mxu0 %v12911_v4 }
 0xa88   : >> { %11592 = vmatprep.subr.bf16.mxu1 %v12912_v0 }
 0xa8a   : >> { %11571 = vmatpush3.bf16.msra.mxu0 %v12913_v9 }
 0xa8b   : >> { %11593 = vmatpush3.bf16.msra.mxu1 %v12914_v17  ;;  %11572 = vmatprep.subr.bf16.mxu0 %v12915_v55 }
 0xa8c   : >> { %11594 = vmatprep.subr.bf16.mxu1 %v12916_v31 }
 0xa8e   : >> { %11573 = vmatpush3.bf16.msra.mxu0 %v12917_v45 }
 0xa8f   : >> { %11595 = vmatpush3.bf16.msra.mxu1 %v12918_v53  ;;  %11574 = vmatprep.subr.bf16.mxu0 %v12919_v38  ;;  %v10784_v38 = vld [vmem:[%s9582_s20 + $0x4] sm:$0x3] }
 0xa90   : >> { %11596 = vmatprep.subr.bf16.mxu1 %v12920_v51 }
 0xa92   : >> { %11575 = vmatpush3.bf16.msra.mxu0 %v12921_v43 }
 0xa93   : >> { %11597 = vmatpush3.bf16.msra.mxu1 %v12922_v8  ;;  %11576 = vmatprep.subr.bf16.mxu0 %v12923_v16  ;;  %v10790_v8 = vld [vmem:[%s9582_s20 + $0x6] sm:$0x3] }
 0xa94   : >> { %11598 = vmatprep.subr.bf16.mxu1 %v12924_v59 }
 0xa96   : >> { %11577 = vmatpush3.bf16.msra.mxu0 %v12925_v50 }
 0xa97   : >> { %11599 = vmatpush3.bf16.msra.mxu1 %v12926_v52  ;;  %11578 = vmatprep.subr.bf16.mxu0 %v12927_v24 }
 0xa98   : >> { %11600 = vmatprep.subr.bf16.mxu1 %v12928_v15 }
 0xa9a   : >> { %11579 = vmatpush3.bf16.msra.mxu0 %v12929_v34 }
 0xa9b   : >> { %11601 = vmatpush3.bf16.msra.mxu1 %v12930_v11  ;;  %12226 = vmatprep.subr.mxu0 %v13125_v29 }
 0xa9d   : >> { %7492 = vmatmul.mubr.bf16.vlgmr.msra.gmra.mrb[4].mxu0 %v10709_v57 }
 0xa9e   : >> { %7674 = vmatmul.mubr.bf16.vlgmr.msra.gmra.mrb[4].mxu1 %v10762_v23  ;;  %12228 = vmatprep.mubr.msk.f32.mxu0 %vm13126_vm0, %v13125_v29  ;;  %vm7825_vm0 = vcmask 1040896   ;;  %v12936_v23 = vld [vmem:[%s16436_s11 + $0x40] sm:$0xff] (%p6953_p8)  }
 0xa9f   : > { %11632 = vmatprep.subr.bf16.mxu1 (%p6953_p8), %v12936_v23  ;;  %v12938_v29 = vld [vmem:[%s16436_s11] sm:$0xff] (%p6953_p8)   ;;  %v12994_v23 = vld [vmem:[%s16436_s11 + $0x1b0] sm:$0xff] (%p6953_p8)  }
 0xaa0   : > { %11633 = vmatpush3.bf16.msra.mxu1 (%p6953_p8), %v12938_v29  ;;  %v12996_v29 = vld [vmem:[%s16436_s11 + $0x1f8] sm:$0xff] (%p6953_p8)  }
 0xaa1   : > { %11634 = vmatprep.subr.bf16.mxu1 (%p6953_p8), %v12940_v56  ;;  %v12998_v56 = vld [vmem:[%s16436_s11 + $0x1b8] sm:$0xff] (%p6953_p8)  }
 0xb50   : >> { %v11536_v28 = vpop.f32.mrb[0].mxu0 }
 0xb51   : >> { %v11558_v39 = vpop.f32.mrb[0].mxu1  ;;  %v11537_v22 = vpop.f32.mrb[1].mxu0 }
 0xb52   : >> { %v11559_v49 = vpop.f32.mrb[1].mxu1  ;;  %v11538_v10 = vadd.f32 %v11537_v22, %v11536_v28  ;;  %v11539_v26 = vpop.f32.mrb[2].mxu0  ;;  %v12941_v28 = vld [vmem:[%s16436_s11 + $0x88] sm:$0xff] (%p6953_p8)   ;;  %v12943_v22 = vld [vmem:[%s16436_s11 + $0xd0] sm:$0xff] (%p6953_p8)  }
 0xb53   : >> { %v11560_v20 = vadd.f32 %v11559_v49, %v11558_v39  ;;  %v11561_v37 = vpop.f32.mrb[2].mxu1  ;;  %v11540_v44 = vpop.f32.mrb[3].mxu0  ;;  %v12942_v39 = vld [vmem:[%s16436_s11 + $0x8] sm:$0xff] (%p6953_p8)   ;;  %v12944_v49 = vld [vmem:[%s16436_s11 + $0x50] sm:$0xff] (%p6953_p8)   ;;  %v12947_v26 = vld [vmem:[%s16436_s11 + $0xd8] sm:$0xff] (%p6953_p8)  }
 0xb54   : >> { %v11562_v13 = vpop.f32.mrb[3].mxu1  ;;  %11635 = vmatpush3.bf16.msra.mxu1 (%p6953_p8), %v12942_v39  ;;  %v12948_v37 = vld [vmem:[%s16436_s11 + $0x58] sm:$0xff] (%p6953_p8)  }
 0xb55   : >> { %v7313_v21 = vadd.f32 %v11560_v20, %v11538_v10  ;;  %v12945_v10 = vld [vmem:[%s16436_s11 + $0x90] sm:$0xff] (%p6953_p8)   ;;  %11636 = vmatprep.subr.bf16.mxu1 (%p6953_p8), %v12944_v49  ;;  %v12949_v44 = vld [vmem:[%s16436_s11 + $0x98] sm:$0xff] (%p6953_p8)  }
 0xb56   : > { %v12946_v20 = vld [vmem:[%s16436_s11 + $0x10] sm:$0xff] (%p6953_p8)   ;;  %v12950_v13 = vld [vmem:[%s16436_s11 + $0x18] sm:$0xff] (%p6953_p8)  }
 0xb58   : > { %11637 = vmatpush3.bf16.msra.mxu1 (%p6953_p8), %v12946_v20  ;;  %v13000_v20 = vld [vmem:[%s16436_s11 + $0x80] sm:$0xff] (%p6953_p8)  }
 0xb59   : > { %11638 = vmatprep.subr.bf16.mxu1 (%p6953_p8), %v12948_v37  ;;  %v13002_v37 = vld [vmem:[%s16436_s11 + $0x88] sm:$0xff] (%p6953_p8)  }
 0xb5c   : > { %11639 = vmatpush3.bf16.msra.mxu1 (%p6953_p8), %v12950_v13  ;;  %v13004_v13 = vld [vmem:[%s16436_s11 + $0x90] sm:$0xff] (%p6953_p8)  }
 0xb70   : >> { %v11580_v32 = vpop.f32.mrb[4].mxu0 }
 0xb71   : >> { %v11602_v7 = vpop.f32.mrb[4].mxu1  ;;  %v11581_v35 = vpop.f32.mrb[5].mxu0 }
 0xb72   : >> { %v11603_v1 = vpop.f32.mrb[5].mxu1  ;;  %v11582_v18 = vadd.f32 %v11581_v35, %v11580_v32  ;;  %v11583_v6 = vpop.f32.mrb[6].mxu0  ;;  %v12952_v32 = vld [vmem:[%s16436_s11 + $0x60] sm:$0xff] (%p6953_p8)  }
 0xb73   : >> { %v11604_v27 = vadd.f32 %v11603_v1, %v11602_v7  ;;  %v11605_v33 = vpop.f32.mrb[6].mxu1  ;;  %v11584_v19 = vpop.f32.mrb[7].mxu0  ;;  %v12953_v7 = vld [vmem:[%s16436_s11 + $0xa0] sm:$0xff] (%p6953_p8)   ;;  %11640 = vmatprep.subr.bf16.mxu1 (%p6953_p8), %v12952_v32  ;;  %v12955_v1 = vld [vmem:[%s16436_s11 + $0xe8] sm:$0xff] (%p6953_p8)   ;;  %v13006_v32 = vld [vmem:[%s16436_s11 + $0x98] sm:$0xff] (%p6953_p8)  }
 0xb74   : >> { %v11606_v25 = vpop.f32.mrb[7].mxu1  ;;  %v7499_v12 = vadd.f32 %v11582_v18, %v7313_v21  ;;  %v12951_v21 = vld [vmem:[%s16436_s11 + $0xe0] sm:$0xff] (%p6953_p8)   ;;  %v12956_v18 = vld [vmem:[%s16436_s11 + $0x68] sm:$0xff] (%p6953_p8)   ;;  %v12959_v33 = vld [vmem:[%s16436_s11 + $0xf0] sm:$0xff] (%p6953_p8)  }
 0xb75   : > { %v12954_v35 = vld [vmem:[%s16436_s11 + $0x20] sm:$0xff] (%p6953_p8)   ;;  %v12958_v6 = vld [vmem:[%s16436_s11 + $0x28] sm:$0xff] (%p6953_p8)   ;;  %v12960_v19 = vld [vmem:[%s16436_s11 + $0x70] sm:$0xff] (%p6953_p8)  }
 0xb76   : >> { %v7681_v46 = vadd.f32 %v11604_v27, %v7499_v12  ;;  %11641 = vmatpush3.bf16.msra.mxu1 (%p6953_p8), %v12954_v35  ;;  %v12957_v27 = vld [vmem:[%s16436_s11 + $0xa8] sm:$0xff] (%p6953_p8)   ;;  %v12961_v25 = vld [vmem:[%s16436_s11 + $0xb0] sm:$0xff] (%p6953_p8)   ;;  %v13008_v35 = vld [vmem:[%s16436_s11 + $0xa0] sm:$0xff] (%p6953_p8)  }
 0xb77   : > { %11642 = vmatprep.subr.bf16.mxu1 (%p6953_p8), %v12956_v18  ;;  %v12962_v12 = vld [vmem:[%s16436_s11 + $0x30] sm:$0xff] (%p6953_p8)   ;;  %v13010_v18 = vld [vmem:[%s16436_s11 + $0xa8] sm:$0xff] (%p6953_p8)  }
 0xb78   : >> { %12227 = vmatpush3.msk.msra.mxu0 %vm5035_vm7, %v7681_v46  ;;  %v12963_v46 = vld [vmem:[%s16436_s11 + $0xf8] sm:$0xff] (%p6953_p8)   ;;  %vm13129_vm7 = vmmov (%p6953_p8), 0  }
 0xb79   : >> { %12229 = vmatmul.mubr.msk.f32.vlgmr.msra.gmra.mrb[8].mxu0 %vm7689_vm3, %v15152_v40  ;;  %11610 = vmatprep.subr.bf16.mxu0 (%p6953_p8), %v12935_v58  ;;  %v12993_v58 = vld [vmem:[%s16436_s11 + $0x130] sm:$0xff] (%p6953_p8)   ;;  %vm16656_vm3 = vcmask (%p6953_p8), 1042432  }
 0xb7a   : > { %11611 = vmatpush3.bf16.msra.mxu0 (%p6953_p8), %v12937_v61  ;;  %11643 = vmatpush3.bf16.msra.mxu1 (%p6953_p8), %v12958_v6  ;;  %v12995_v61 = vld [vmem:[%s16436_s11 + $0x178] sm:$0xff] (%p6953_p8)   ;;  %v13012_v6 = vld [vmem:[%s16436_s11 + $0xb0] sm:$0xff] (%p6953_p8)   ;;  %vm16657_vm8 = vmmov (%p6953_p8), %vm16656_vm3 }
 0xb7b   : > { %11612 = vmatprep.subr.bf16.mxu0 (%p6953_p8), %v12939_v41  ;;  %11644 = vmatprep.subr.bf16.mxu1 (%p6953_p8), %v12960_v19  ;;  %v12997_v41 = vld [vmem:[%s16436_s11 + $0x138] sm:$0xff] (%p6953_p8)  }
 0xb7c   : > { %v13014_v19 = vld [vmem:[%s16436_s11 + $0xb8] sm:$0xff] (%p6953_p8)  }
 0xb7e   : > { %11613 = vmatpush3.bf16.msra.mxu0 (%p6953_p8), %v12941_v28  ;;  %11645 = vmatpush3.bf16.msra.mxu1 (%p6953_p8), %v12962_v12  ;;  %v13018_v12 = vld [vmem:[%s16436_s11 + $0x100] sm:$0xff] (%p6953_p8)  }
 0xb7f   : > { %11614 = vmatprep.subr.bf16.mxu0 (%p6953_p8), %v12943_v22  ;;  %11646 = vmatprep.subr.bf16.mxu1 (%p6953_p8), %v12964_v14  ;;  %v13022_v14 = vld [vmem:[%s16436_s11 + $0x108] sm:$0xff] (%p6953_p8)  }
 0xb82   : > { %11615 = vmatpush3.bf16.msra.mxu0 (%p6953_p8), %v12945_v10  ;;  %v12999_v10 = vld [vmem:[%s16436_s11 + $0xc0] sm:$0xff] (%p6953_p8)  }
 0xb83   : > { %11616 = vmatprep.subr.bf16.mxu0 (%p6953_p8), %v12947_v26  ;;  %v13001_v26 = vld [vmem:[%s16436_s11 + $0xc8] sm:$0xff] (%p6953_p8)  }
 0xb86   : > { %11617 = vmatpush3.bf16.msra.mxu0 (%p6953_p8), %v12949_v44  ;;  %v13003_v44 = vld [vmem:[%s16436_s11 + $0xd0] sm:$0xff] (%p6953_p8)  }
 0xb87   : > { %11618 = vmatprep.subr.bf16.mxu0 (%p6953_p8), %v12951_v21  ;;  %v13005_v21 = vld [vmem:[%s16436_s11 + $0xd8] sm:$0xff] (%p6953_p8)  }
 0xb8a   : > { %11619 = vmatpush3.bf16.msra.mxu0 (%p6953_p8), %v12953_v7  ;;  %v13007_v7 = vld [vmem:[%s16436_s11 + $0xe0] sm:$0xff] (%p6953_p8)  }
 0xb8b   : > { %11620 = vmatprep.subr.bf16.mxu0 (%p6953_p8), %v12955_v1  ;;  %v13009_v1 = vld [vmem:[%s16436_s11 + $0xe8] sm:$0xff] (%p6953_p8)  }
 0xb8e   : > { %11621 = vmatpush3.bf16.msra.mxu0 (%p6953_p8), %v12957_v27  ;;  %v13011_v27 = vld [vmem:[%s16436_s11 + $0xf0] sm:$0xff] (%p6953_p8)  }
 0xb8f   : > { %11622 = vmatprep.subr.bf16.mxu0 (%p6953_p8), %v12959_v33  ;;  %v13013_v33 = vld [vmem:[%s16436_s11 + $0xf8] sm:$0xff] (%p6953_p8)  }
 0xb92   : > { %11623 = vmatpush3.bf16.msra.mxu0 (%p6953_p8), %v12961_v25  ;;  %v13017_v25 = vld [vmem:[%s16436_s11 + $0x140] sm:$0xff] (%p6953_p8)  }
 0xb93   : > { %11624 = vmatprep.subr.bf16.mxu0 (%p6953_p8), %v12963_v46  ;;  %v13021_v46 = vld [vmem:[%s16436_s11 + $0x148] sm:$0xff] (%p6953_p8)  }
 0xb96   : > { %11625 = vmatpush3.bf16.msra.mxu0 (%p6953_p8), %v12965_v30  ;;  %v13025_v30 = vld [vmem:[%s16436_s11 + $0x150] sm:$0xff] (%p6953_p8)  }
 0xc4c   : >> { %v7763_v54 = vpop.f32.mrb[8].mxu0 }
 0xc4d   : >> { %v7764_v2 = vadd.f32 %v10780_v36, %v7763_v54  ;;  %v12230_v42 = vpop.f32.mrb[9].mxu0  ;;  %v12966_v36 = vld [vmem:[%s16436_s11 + $0x38] sm:$0xff] (%p6953_p8)  }
 0xc4e   : > { %11647 = vmatpush3.bf16.msra.mxu1 (%p6953_p8), %v12966_v36  ;;  %v13026_v36 = vld [vmem:[%s16436_s11 + $0x110] sm:$0xff] (%p6953_p8)  }
 0xc4f   : >> { %vm7767_vm9 = vcmp.gt.f32.partialorder %v7764_v2, 0.0  ;;  %v7768_v60 = vmul.f32 0.2, %v7764_v2 }
 0xc51   : >> { %v7769_v62 = vsel %vm7767_vm9, %v7764_v2, %v7768_v60  ;;  %v12967_v60 = vld [vmem:[%s16436_s11 + $0x140] sm:$0xff] (%p6953_p8)  }
 0xc52   : >> { %v7771_v4 = vpack.c.bf16 %v7769_v62, %v7769_v62  ;;  %v12969_v62 = vld [vmem:[%s16436_s11 + $0x100] sm:$0xff] (%p6953_p8)   ;;  %11654 = vmatprep.subr.bf16.mxu0 (%p6953_p8), %v12967_v60  ;;  %v13037_v60 = vld [vmem:[%s16436_s11 + $0x168] sm:$0xff] (%p6953_p8)  }
 0xc54   : >> { %v7779_v0 = vrot.slane %v7771_v4, %v7778_v63  ;;  %v12968_v63 = vld [vmem:[%s16436_s11 + $0x1c0] sm:$0xff] (%p6953_p8)  }
 0xc55   : > { %v12970_v4 = vld [vmem:[%s16436_s11 + $0x180] sm:$0xff] (%p6953_p8)   ;;  %11676 = vmatprep.subr.bf16.mxu1 (%p6953_p8), %v12968_v63  ;;  %v13038_v63 = vld [vmem:[%s16436_s11 + $0x128] sm:$0xff] (%p6953_p8)  }
 0xc56   : >> { %v7781_v9 = vshrl.u32 %v7779_v0, 16  ;;  %v7784_v17 = vshll.u32 %v7779_v0, 16  ;;  %7803 = vrot.lane.b32.xlu0 %v7779_v0, %s13128_s14  ;;  %v10792_v53 = vrot.slane %v7779_v0, 9  ;;  %v12971_v0 = vld [vmem:[%s16436_s11 + $0x148] sm:$0xff] (%p6953_p8)  }
 0xc58   : >> { %v7783_v55 = vrot.slane %v7781_v9, 7  ;;  %v7811_v31 = vrot.slane %v7781_v9, 6  ;;  %v7812_v45 = vrot.slane %v7784_v17, 7  ;;  %v12972_v9 = vld [vmem:[%s16436_s11 + $0x1c8] sm:$0xff] (%p6953_p8)  }
 0xc5a   : >> { %v7786_v51 = vor.u32 %v7784_v17, %v7783_v55  ;;  %7822 = vrot.lane.b32.xlu0 %v10792_v53, %s13128_s14  ;;  %v7813_v43 = vor.u32 %v7812_v45, %v7811_v31  ;;  %v12973_v17 = vld [vmem:[%s16436_s11 + $0x108] sm:$0xff] (%p6953_p8)   ;;  %v12975_v31 = vld [vmem:[%s16436_s11 + $0x150] sm:$0xff] (%p6953_p8)  }
 0xc5b   : > { %v12974_v55 = vld [vmem:[%s16436_s11 + $0x188] sm:$0xff] (%p6953_p8)   ;;  %v12976_v45 = vld [vmem:[%s16436_s11 + $0x1d0] sm:$0xff] (%p6953_p8)  }
 0xc5c   : >> { %v7795_v16 = vsel %vm7793_vm6, %v7786_v51, %v10784_v38  ;;  %v7814_v59 = vrot.slane %v7813_v43, 2  ;;  %v12977_v53 = vld [vmem:[%s16436_s11 + $0x110] sm:$0xff] (%p6953_p8)   ;;  %v12979_v51 = vld [vmem:[%s16436_s11 + $0x158] sm:$0xff] (%p6953_p8)  }
 0xc5d   : >> { %10785 = vst [vmem:[%s9582_s20 + $0x4] sm:$0x3] %v7795_v16  ;;  %v12978_v38 = vld [vmem:[%s16436_s11 + $0x190] sm:$0xff] (%p6953_p8)   ;;  %v12980_v43 = vld [vmem:[%s16436_s11 + $0x1d8] sm:$0xff] (%p6953_p8)  }
 0xc5e   : >> { %v7818_v50 = vsel %vm7816_vm5, %v7814_v59, %v10790_v8  ;;  %v12981_v8 = vld [vmem:[%s16436_s11 + $0x118] sm:$0xff] (%p6953_p8)   ;;  %v12983_v59 = vld [vmem:[%s16436_s11 + $0x160] sm:$0xff] (%p6953_p8)  }
 0xc5f   : >> { %10791 = vst [vmem:[%s9582_s20 + $0x6] sm:$0x3] %v7818_v50  ;;  %v12982_v16 = vld [vmem:[%s16436_s11 + $0x198] sm:$0xff] (%p6953_p8)   ;;  %v12984_v50 = vld [vmem:[%s16436_s11 + $0x1e0] sm:$0xff] (%p6953_p8)  }
 0xc64   : >> { %v10786_v52 = vld [vmem:[%s9582_s20 + $0x4] sm:$0x1] }
 0xc65   : >> { %v7801_v24 = vsel %vm15527_vm12, 0, %v10786_v52  ;;  %v12985_v52 = vld [vmem:[%s16436_s11 + $0x120] sm:$0xff] (%p6953_p8)   ;;  %vm8567_vm12 = vcmask (%p6953_p8), 23552  }
 0xc66   : >> { %10787 = vst [vmem:[%s9582_s20 + $0x4] sm:$0x1] %v7801_v24  ;;  %v10794_v15 = vld [vmem:[%s9582_s20 + $0x6] sm:$0x2] }
 0xc67   : >> { %v7830_v34 = vsel %vm7828_vm10, 0, %v10794_v15  ;;  %v12986_v24 = vld [vmem:[%s16436_s11 + $0x1a0] sm:$0xff] (%p6953_p8)   ;;  %v12987_v15 = vld [vmem:[%s16436_s11 + $0x168] sm:$0xff] (%p6953_p8)  }
 0xc68   : >> { %10795 = vst [vmem:[%s9582_s20 + $0x6] sm:$0x2] %v7830_v34  ;;  %v12988_v34 = vld [vmem:[%s16436_s11 + $0x1e8] sm:$0xff] (%p6953_p8)  }
 0xc6d   : >> { %v10788_v48 = vld [vmem:[%s9582_s20 + $0x4] sm:$0x3] }
 0xcc7   : > { %6955 = sbr.rel (!%p6953_p8) target bundleno = 2651 (0xa5b), region = 242 }
 0xcc8   : >> { %v7804_v11 = vpop.permute.xlu0 %7803 }
 0xcc9   : >> { %v7809_v57 = vsel %vm7807_vm15, %v7804_v11, %v10788_v48  ;;  %v12989_v11 = vld [vmem:[%s16436_s11 + $0x128] sm:$0xff] (%p6953_p8)  }
 0xcca   : >> { %10789 = vst [vmem:[%s9582_s20 + $0x4] sm:$0x3] %v7809_v57  ;;  %v12990_v48 = vld [vmem:[%s16436_s11 + $0x1a8] sm:$0xff] (%p6953_p8)   ;;  %v12991_v57 = vld [vmem:[%s16436_s11 + $0x170] sm:$0xff] (%p6953_p8)  }
 0xccc   : >> { %v7823_v3 = vpop.permute.xlu0 %7822 }
 0xccd   : >> { %10793 = vst.msk [vmem:[%s9582_s20 + $0x6] sm:$0x1] %vm7825_vm0, %v7823_v3  ;;  %v12992_v3 = vld [vmem:[%s16436_s11 + $0x1f0] sm:$0xff] (%p6953_p8)  }
 0xcd4   : > { %v10828_v54 = vld.sshfl [vmem:[#allocation6 + $0x4] sm:$0x33 pattern:$0x76325410] }
 0xcd5   : > { %v7908_v5 = vcombine.high %v10828_v54, %v10828_v54  ;;  %v10845_v2 = vld.sshfl [vmem:[#allocation6] sm:$0x33 pattern:$0x76325410] }
 0xcd6   : > { %v8055_v42 = vcombine.high %v10845_v2, %v10845_v2  ;;  %v16201_v28 = vld.sshfl [vmem:[#allocation6 + $0x8] sm:$0x33 pattern:$0x76325410] }
 0xcd7   : > { %8039 = vmatprep.mubr.bf16.mxu0 %v7908_v5  ;;  %v16205_v39 = vcombine.high %v16201_v28, %v16201_v28  ;;  %v10943_v22 = vld.sshfl [vmem:[#allocation6 + $0xc] sm:$0x33 pattern:$0x76325410] }
 0xcd8   : > { %8186 = vmatprep.mubr.bf16.mxu1 %v8055_v42  ;;  %8040 = vmatmul.mubr.bf16.vlgmr.msra.gmra.mrb[0].mxu0 %v10828_v54  ;;  %v8420_v49 = vcombine.high %v10943_v22, %v10943_v22  ;;  %v13029_v54 = vld [vmem:[%s16436_s11 + $0x158] sm:$0xff]   ;;  %v13034_v42 = vld [vmem:[%s16436_s11 + $0x120] sm:$0xff]  }
 0xcd9   : > { %8187 = vmatmul.mubr.bf16.vlgmr.msra.gmra.mrb[0].mxu1 %v10845_v2  ;;  %11655 = vmatpush3.bf16.msra.mxu0 %v12969_v62  ;;  %v13030_v5 = vld [vmem:[%s16436_s11 + $0x118] sm:$0xff]   ;;  %v13033_v2 = vld [vmem:[%s16436_s11 + $0x160] sm:$0xff]   ;;  %v13041_v62 = vld [vmem:[%s16436_s11 + $0x170] sm:$0xff]  }
 0xcda   : > { %11677 = vmatpush3.bf16.msra.mxu1 %v12970_v4  ;;  %11656 = vmatprep.subr.bf16.mxu0 %v12971_v0  ;;  %v13042_v4 = vld [vmem:[%s16436_s11 + $0x130] sm:$0xff]   ;;  %v13045_v0 = vld [vmem:[%s16436_s11 + $0x178] sm:$0xff]  }
 0xcdb   : > { %11678 = vmatprep.subr.bf16.mxu1 %v12972_v9  ;;  %8368 = vmatprep.mubr.bf16.mxu0 %v16205_v39  ;;  %v13046_v9 = vld [vmem:[%s16436_s11 + $0x138] sm:$0xff]  }
 0xcdc   : > { %8551 = vmatprep.mubr.bf16.mxu1 %v8420_v49 }
 0xcdd   : > { %11657 = vmatpush3.bf16.msra.mxu0 %v12973_v17  ;;  %v11061_v17 = vld.sshfl [vmem:[#allocation6 + $0x10] sm:$0x33 pattern:$0x76325410] }
 0xcde   : > { %11679 = vmatpush3.bf16.msra.mxu1 %v12974_v55  ;;  %11658 = vmatprep.subr.bf16.mxu0 %v12975_v31  ;;  %v9052_v55 = vcombine.high %v11061_v17, %v11061_v17 }
 0xcdf   : > { %11680 = vmatprep.subr.bf16.mxu1 %v12976_v45 }
 0xce1   : > { %11659 = vmatpush3.bf16.msra.mxu0 %v12977_v53 }
 0xce2   : > { %11681 = vmatpush3.bf16.msra.mxu1 %v12978_v38  ;;  %11660 = vmatprep.subr.bf16.mxu0 %v12979_v51 }
 0xce3   : > { %11682 = vmatprep.subr.bf16.mxu1 %v12980_v43 }
 0xce5   : > { %11661 = vmatpush3.bf16.msra.mxu0 %v12981_v8 }
 0xce6   : > { %11683 = vmatpush3.bf16.msra.mxu1 %v12982_v16  ;;  %11662 = vmatprep.subr.bf16.mxu0 %v12983_v59 }
 0xce7   : > { %11684 = vmatprep.subr.bf16.mxu1 %v12984_v50 }
 0xce9   : > { %11663 = vmatpush3.bf16.msra.mxu0 %v12985_v52 }
 0xcea   : > { %11685 = vmatpush3.bf16.msra.mxu1 %v12986_v24  ;;  %11664 = vmatprep.subr.bf16.mxu0 %v12987_v15 }
 0xceb   : > { %11686 = vmatprep.subr.bf16.mxu1 %v12988_v34 }
 0xced   : > { %11665 = vmatpush3.bf16.msra.mxu0 %v12989_v11 }
 0xcee   : > { %11687 = vmatpush3.bf16.msra.mxu1 %v12990_v48  ;;  %11666 = vmatprep.subr.bf16.mxu0 %v12991_v57 }
 0xcef   : > { %11688 = vmatprep.subr.bf16.mxu1 %v12992_v3 }
 0xcf1   : > { %11667 = vmatpush3.bf16.msra.mxu0 %v12993_v58 }
 0xcf2   : > { %11689 = vmatpush3.bf16.msra.mxu1 %v12994_v23  ;;  %11668 = vmatprep.subr.bf16.mxu0 %v12995_v61 }
 0xcf3   : > { %11690 = vmatprep.subr.bf16.mxu1 %v12996_v29  ;;  %v13015_v29 = vld [vmem:[%s16436_s11 + $0x40] sm:$0xff]  }
 0xcf5   : > { %11669 = vmatpush3.bf16.msra.mxu0 %v12997_v41 }
 0xcf6   : > { %11691 = vmatpush3.bf16.msra.mxu1 %v12998_v56  ;;  %12231 = vmatprep.subr.mxu0 %v13115_v47  ;;  %v13016_v56 = vld [vmem:[%s16436_s11] sm:$0xff]  }
 0xcf7   : > { %11700 = vmatprep.subr.bf16.mxu1 %v12999_v10  ;;  %v13023_v10 = vld [vmem:[%s16436_s11 + $0x50] sm:$0xff]  }
 0xcf8   : > { %8369 = vmatmul.mubr.bf16.vlgmr.msra.gmra.mrb[4].mxu0 %v16201_v28 }
 0xcf9   : > { %8552 = vmatmul.mubr.bf16.vlgmr.msra.gmra.mrb[4].mxu1 %v10943_v22  ;;  %12233 = vmatprep.mubr.msk.f32.mxu0 %vm13129_vm7, %v13115_v47 }
 0xcfa   : > { %8855 = vmatprep.mubr.bf16.mxu1 %v8420_v49  ;;  %11701 = vmatpush3.bf16.msra.mxu1 %v13000_v20  ;;  %v13020_v49 = vld [vmem:[%s16436_s11 + $0x8] sm:$0xff]   ;;  %v13024_v20 = vld [vmem:[%s16436_s11 + $0x10] sm:$0xff]  }
 0xcfb   : > { %11702 = vmatprep.subr.bf16.mxu1 %v13001_v26  ;;  %v13027_v26 = vld [vmem:[%s16436_s11 + $0x58] sm:$0xff]  }
 0xcfe   : > { %11703 = vmatpush3.bf16.msra.mxu1 %v13002_v37  ;;  %v13031_v37 = vld [vmem:[%s16436_s11 + $0x60] sm:$0xff]  }
 0xcff   : > { %11704 = vmatprep.subr.bf16.mxu1 %v13003_v44  ;;  %v13032_v44 = vld [vmem:[%s16436_s11 + $0x20] sm:$0xff]  }
 0xd02   : > { %11705 = vmatpush3.bf16.msra.mxu1 %v13004_v13  ;;  %v13035_v13 = vld [vmem:[%s16436_s11 + $0x68] sm:$0xff]  }
 0xd03   : > { %11706 = vmatprep.subr.bf16.mxu1 %v13005_v21  ;;  %v13036_v21 = vld [vmem:[%s16436_s11 + $0x28] sm:$0xff]  }
 0xd06   : > { %11707 = vmatpush3.bf16.msra.mxu1 %v13006_v32  ;;  %v13039_v32 = vld [vmem:[%s16436_s11 + $0x70] sm:$0xff]  }
 0xd07   : > { %11708 = vmatprep.subr.bf16.mxu1 %v13007_v7  ;;  %v13040_v7 = vld [vmem:[%s16436_s11 + $0x30] sm:$0xff]  }
 0xd0a   : > { %11709 = vmatpush3.bf16.msra.mxu1 %v13008_v35  ;;  %v13043_v35 = vld [vmem:[%s16436_s11 + $0x78] sm:$0xff]  }
 0xd0b   : > { %11710 = vmatprep.subr.bf16.mxu1 %v13009_v1  ;;  %v13044_v1 = vld [vmem:[%s16436_s11 + $0x38] sm:$0xff]  }
 0xd0e   : > { %11711 = vmatpush3.bf16.msra.mxu1 %v13010_v18  ;;  %v13047_v18 = vld [vmem:[%s16436_s11 + $0x1c0] sm:$0xff]  }
 0xd0f   : > { %11712 = vmatprep.subr.bf16.mxu1 %v13011_v27  ;;  %v11110_v27 = vld.sshfl [vmem:[#allocation6 + $0x14] sm:$0x33 pattern:$0x76325410] }
 0xd12   : > { %11713 = vmatpush3.bf16.msra.mxu1 %v13012_v6  ;;  %v13048_v6 = vld [vmem:[%s16436_s11 + $0x180] sm:$0xff]  }
 0xd13   : > { %11714 = vmatprep.subr.bf16.mxu1 %v13013_v33  ;;  %v9233_v33 = vcombine.high %v11110_v27, %v11110_v27 }
 0xd16   : > { %11715 = vmatpush3.bf16.msra.mxu1 %v13014_v19  ;;  %v13049_v19 = vld [vmem:[%s16436_s11 + $0x1c8] sm:$0xff]  }
 0xd17   : > { %11744 = vmatprep.subr.bf16.mxu1 %v13017_v25  ;;  %v13050_v25 = vld [vmem:[%s16436_s11 + $0x188] sm:$0xff]  }
 0xd19   : > { %8856 = vmatmul.mubr.bf16.vlgmr.msra.gmra.mrb[8].mxu1 %v10943_v22  ;;  %v13019_v22 = vld [vmem:[%s16436_s11 + $0x48] sm:$0xff]  }
 0xd1a   : > { %11745 = vmatpush3.bf16.msra.mxu1 %v13018_v12  ;;  %9183 = vmatprep.mubr.bf16.mxu1 %v9052_v55  ;;  %v13051_v12 = vld [vmem:[%s16436_s11 + $0x1d0] sm:$0xff]  }
 0xd1b   : > { %11746 = vmatprep.subr.bf16.mxu1 %v13021_v46  ;;  %v13052_v46 = vld [vmem:[%s16436_s11 + $0x190] sm:$0xff]  }
 0xd1e   : > { %11747 = vmatpush3.bf16.msra.mxu1 %v13022_v14  ;;  %v13054_v14 = vld [vmem:[%s16436_s11 + $0x198] sm:$0xff]  }
 0xd1f   : > { %11748 = vmatprep.subr.bf16.mxu1 %v13025_v30  ;;  %v13055_v30 = vld [vmem:[%s16436_s11 + $0x1e0] sm:$0xff]  }
 0xd22   : > { %11749 = vmatpush3.bf16.msra.mxu1 %v13026_v36  ;;  %v13056_v36 = vld [vmem:[%s16436_s11 + $0x1a0] sm:$0xff]  }
 0xd23   : > { %11750 = vmatprep.subr.bf16.mxu1 %v13029_v54  ;;  %v13057_v54 = vld [vmem:[%s16436_s11 + $0x1e8] sm:$0xff]  }
 0xd26   : > { %11751 = vmatpush3.bf16.msra.mxu1 %v13030_v5  ;;  %v13058_v5 = vld [vmem:[%s16436_s11 + $0x1a8] sm:$0xff]  }
 0xd27   : > { %11752 = vmatprep.subr.bf16.mxu1 %v13033_v2  ;;  %v13059_v2 = vld [vmem:[%s16436_s11 + $0x1f0] sm:$0xff]  }
 0xd2a   : > { %11753 = vmatpush3.bf16.msra.mxu1 %v13034_v42  ;;  %v13060_v42 = vld [vmem:[%s16436_s11 + $0x1b0] sm:$0xff]  }
 0xd2b   : > { %11754 = vmatprep.subr.bf16.mxu1 %v13037_v60  ;;  %v13061_v60 = vld [vmem:[%s16436_s11 + $0x1f8] sm:$0xff]  }
 0xd2e   : > { %11755 = vmatpush3.bf16.msra.mxu1 %v13038_v63  ;;  %v13062_v63 = vld [vmem:[%s16436_s11 + $0x1b8] sm:$0xff]  }
 0xd2f   : > { %11756 = vmatprep.subr.bf16.mxu1 %v13041_v62 }
 0xd32   : > { %11757 = vmatpush3.bf16.msra.mxu1 %v13042_v4 }
 0xd33   : > { %11758 = vmatprep.subr.bf16.mxu1 %v13045_v0 }
 0xd36   : > { %11759 = vmatpush3.bf16.msra.mxu1 %v13046_v9 }
 0xd37   : > { %12236 = vmatprep.subr.mxu1 %v13115_v47 }
 0xd39   : > { %9184 = vmatmul.mubr.bf16.vlgmr.msra.gmra.mrb[12].mxu1 %v11061_v17 }
 0xd3a   : > { %12238 = vmatprep.mubr.msk.f32.mxu1 %vm13129_vm7, %v13115_v47 }
 0xdab   : > { %v11626_v31 = vpop.f32.mrb[0].mxu0 }
 0xdac   : > { %v11648_v45 = vpop.f32.mrb[0].mxu1  ;;  %v11627_v53 = vpop.f32.mrb[1].mxu0 }
 0xdad   : > { %v11628_v38 = vadd.f32 %v11627_v53, %v11626_v31  ;;  %v11649_v51 = vpop.f32.mrb[1].mxu1  ;;  %v11629_v43 = vpop.f32.mrb[2].mxu0 }
 0xdae   : > { %v11650_v8 = vadd.f32 %v11649_v51, %v11648_v45  ;;  %v11651_v16 = vpop.f32.mrb[2].mxu1  ;;  %v11630_v59 = vpop.f32.mrb[3].mxu0  ;;  %v10960_v51 = vld [vmem:[%s16437_s12] ss:$0 sm:$0xff] }
 0xdaf   : > { %v11652_v50 = vpop.f32.mrb[3].mxu1 }
 0xdb0   : > { %v8189_v52 = vadd.f32 %v11650_v8, %v11628_v38 }
 0xdcb   : > { %v11670_v24 = vpop.f32.mrb[4].mxu0 }
 0xdcc   : > { %v11692_v15 = vpop.f32.mrb[4].mxu1  ;;  %v11671_v34 = vpop.f32.mrb[5].mxu0 }
 0xdcd   : > { %v11672_v11 = vadd.f32 %v11671_v34, %v11670_v24  ;;  %v11693_v48 = vpop.f32.mrb[5].mxu1  ;;  %v11673_v57 = vpop.f32.mrb[6].mxu0 }
 0xdce   : > { %v11694_v3 = vadd.f32 %v11693_v48, %v11692_v15  ;;  %v11695_v58 = vpop.f32.mrb[6].mxu1  ;;  %v11674_v47 = vpop.f32.mrb[7].mxu0 }
 0xdcf   : > { %v8376_v23 = vadd.f32 %v11672_v11, %v8189_v52  ;;  %v11696_v61 = vpop.f32.mrb[7].mxu1 }
 0xdd1   : > { %v8559_v41 = vadd.f32 %v11694_v3, %v8376_v23 }
 0xdd3   : > { %12232 = vmatpush3.msk.msra.mxu0 %vm16656_vm3, %v8559_v41 }
 0xdd4   : > { %12234 = vmatmul.mubr.msk.f32.vlgmr.msra.gmra.mrb[8].mxu0 %vm8567_vm12, %v15152_v40  ;;  %11722 = vmatprep.subr.bf16.mxu0 %v13015_v29 }
 0xdd5   : > { %11723 = vmatpush3.bf16.msra.mxu0 %v13016_v56  ;;  %9002 = vmatprep.mubr.bf16.mxu0 %v16205_v39  ;;  %v13028_v39 = vld [vmem:[%s16436_s11 + $0x18] sm:$0xff]  }
 0xdd6   : > { %11724 = vmatprep.subr.bf16.mxu0 %v13019_v22 }
 0xdd9   : > { %11725 = vmatpush3.bf16.msra.mxu0 %v13020_v49 }
 0xdda   : > { %11726 = vmatprep.subr.bf16.mxu0 %v13023_v10 }
 0xddd   : > { %11727 = vmatpush3.bf16.msra.mxu0 %v13024_v20 }
 0xdde   : > { %11728 = vmatprep.subr.bf16.mxu0 %v13027_v26 }
 0xde1   : > { %11729 = vmatpush3.bf16.msra.mxu0 %v13028_v39 }
 0xde2   : > { %11730 = vmatprep.subr.bf16.mxu0 %v13031_v37 }
 0xde5   : > { %11731 = vmatpush3.bf16.msra.mxu0 %v13032_v44 }
 0xde6   : > { %11732 = vmatprep.subr.bf16.mxu0 %v13035_v13 }
 0xde9   : > { %11733 = vmatpush3.bf16.msra.mxu0 %v13036_v21 }
 0xdea   : > { %11734 = vmatprep.subr.bf16.mxu0 %v13039_v32 }
 0xdec   : > { %v11716_v62 = vpop.f32.mrb[8].mxu1 }
 0xded   : > { %11735 = vmatpush3.bf16.msra.mxu0 %v13040_v7  ;;  %v11717_v4 = vpop.f32.mrb[9].mxu1 }
 0xdee   : > { %11736 = vmatprep.subr.bf16.mxu0 %v13043_v35  ;;  %v11718_v0 = vadd.f32 %v11717_v4, %v11716_v62  ;;  %v11719_v9 = vpop.f32.mrb[10].mxu1 }
 0xdef   : > { %v11720_v17 = vpop.f32.mrb[11].mxu1 }
 0xdf1   : > { %11737 = vmatpush3.bf16.msra.mxu0 %v13044_v1 }
 0xdf2   : > { %11766 = vmatprep.subr.bf16.mxu0 %v13047_v18 }
 0xdf4   : > { %9003 = vmatmul.mubr.bf16.vlgmr.msra.gmra.mrb[12].mxu0 %v16201_v28  ;;  %v13053_v28 = vld [vmem:[%s16436_s11 + $0x1d8] sm:$0xff]  }
 0xdf5   : > { %11767 = vmatpush3.bf16.msra.mxu0 %v13048_v6  ;;  %9364 = vmatprep.mubr.bf16.mxu0 %v9233_v33 }
 0xdf6   : > { %11768 = vmatprep.subr.bf16.mxu0 %v13049_v19 }
 0xdf9   : > { %11769 = vmatpush3.bf16.msra.mxu0 %v13050_v25 }
 0xdfa   : > { %11770 = vmatprep.subr.bf16.mxu0 %v13051_v12 }
 0xdfd   : > { %11771 = vmatpush3.bf16.msra.mxu0 %v13052_v46 }
 0xdfe   : > { %11772 = vmatprep.subr.bf16.mxu0 %v13053_v28 }
 0xe01   : > { %11773 = vmatpush3.bf16.msra.mxu0 %v13054_v14 }
 0xe02   : > { %11774 = vmatprep.subr.bf16.mxu0 %v13055_v30 }
 0xe05   : > { %11775 = vmatpush3.bf16.msra.mxu0 %v13056_v36 }
 0xe06   : > { %11776 = vmatprep.subr.bf16.mxu0 %v13057_v54 }
 0xe09   : > { %11777 = vmatpush3.bf16.msra.mxu0 %v13058_v5 }
 0xe0a   : > { %11778 = vmatprep.subr.bf16.mxu0 %v13059_v2 }
 0xe0c   : > { %v11760_v55 = vpop.f32.mrb[12].mxu1 }
 0xe0d   : > { %11779 = vmatpush3.bf16.msra.mxu0 %v13060_v42  ;;  %v11761_v31 = vpop.f32.mrb[13].mxu1 }
 0xe0e   : > { %11780 = vmatprep.subr.bf16.mxu0 %v13061_v60  ;;  %v11762_v45 = vadd.f32 %v11761_v31, %v11760_v55  ;;  %v11763_v53 = vpop.f32.mrb[14].mxu1 }
 0xe0f   : > { %v11764_v38 = vpop.f32.mrb[15].mxu1 }
 0xe11   : > { %11781 = vmatpush3.bf16.msra.mxu0 %v13062_v63 }
 0xe14   : > { %9365 = vmatmul.mubr.bf16.vlgmr.msra.gmra.mrb[16].mxu0 %v11110_v27 }
 0xea7   : > { %v8641_v43 = vpop.f32.mrb[8].mxu0 }
 0xea8   : > { %v8642_v8 = vadd.f32 %v10960_v51, %v8641_v43  ;;  %v12235_v16 = vpop.f32.mrb[9].mxu0 }
 0xeaa   : > { %vm8645_vm9 = vcmp.gt.f32.partialorder %v8642_v8, 0.0  ;;  %v8646_v59 = vmul.f32 0.2, %v8642_v8 }
 0xeac   : > { %v8647_v50 = vsel %vm8645_vm9, %v8642_v8, %v8646_v59 }
 0xead   : > { %8649 = vst.msk [vmem:[%s13256_s15] sm:$0x3] %vm7791_vm11, %v8647_v50 }
 0xec7   : > { %v11738_v52 = vpop.f32.mrb[12].mxu0 }
 0xec8   : > { %v11739_v24 = vpop.f32.mrb[13].mxu0 }
 0xec9   : > { %v11740_v15 = vadd.f32 %v11739_v24, %v11738_v52  ;;  %v11741_v34 = vpop.f32.mrb[14].mxu0 }
 0xeca   : > { %v11742_v11 = vpop.f32.mrb[15].mxu0 }
 0xecb   : > { %v9005_v48 = vadd.f32 %v11740_v15, %v11718_v0 }
 0xecd   : > { %v9191_v57 = vadd.f32 %v11762_v45, %v9005_v48 }
 0xee7   : > { %v11782_v3 = vpop.f32.mrb[16].mxu0 }
 0xee8   : > { %v11783_v58 = vpop.f32.mrb[17].mxu0 }
 0xee9   : > { %v11784_v47 = vadd.f32 %v11783_v58, %v11782_v3  ;;  %v11785_v23 = vpop.f32.mrb[18].mxu0 }
 0xeea   : > { %v11786_v61 = vpop.f32.mrb[19].mxu0 }
 0xeeb   : > { %v9372_v29 = vadd.f32 %v11784_v47, %v9191_v57 }
 0xeed   : > { %12237 = vmatpush3.msk.msra.mxu1 %vm16657_vm8, %v9372_v29 }
 0xeee   : > { %12239 = vmatmul.mubr.msk.f32.vlgmr.msra.gmra.mrb[16].mxu1 %vm8567_vm12, %v15152_v40 }
 0xfc1   : > { %v9449_v41 = vpop.f32.mrb[16].mxu1 }
 0xfc2   : > { %v9450_v56 = vadd.f32 %v10960_v51, %v9449_v41  ;;  %v12240_v22 = vpop.f32.mrb[17].mxu1 }
 0xfc4   : > { %vm9453_vm6 = vcmp.gt.f32.partialorder %v9450_v56, 0.0  ;;  %v9454_v49 = vmul.f32 0.2, %v9450_v56 }
 0xfc6   : > { %v9455_v10 = vsel %vm9453_vm6, %v9450_v56, %v9454_v49 }
 0xfc7   : > { %9456 = vst.msk [vmem:[%s13256_s15 + $0x2] sm:$0x3] %vm7791_vm11, %v9455_v10 }
 0xfc8 PF: > { %s23_s25 = sadd.s32 1, %s13089_s25  }
 0xfc9   : > { %p20_p9 = scmp.ge.s32.totalorder %s23_s25, 4  }
 0xfcb   :  { %22 = sbr.rel (!%p20_p9) target bundleno = 1 (0x1), region = 253 }

</bundles_post_ra>
